<compile_context>
chip_gen: v5e
topology: v5e:2x2
jax: 0.10.0
libtpu: 0.0.40
codegen_flags: <defaults>
</compile_context>

<pallas_src>
import functools

import jax
import jax.numpy as jnp
from jax.experimental import pallas as pl
from jax.experimental.pallas import tpu as pltpu

_BN_EPS = 1e-5  # nn.BatchNorm2d default


# ---------------------------------------------------------------------------
# Pallas kernels
# ---------------------------------------------------------------------------
def _conv3x3_bias_relu_kernel(x_ref, w_ref, b_ref, o_ref, *,
                              sh, h_out, w_out, kww, pad_out):
    """Fused 3x3 conv (pad=1) + bias + ReLU for one whole batch element.

    x_ref: (1, HQ, sh, WQ, CW)  stride-folded, zero-padded input
                                (input row r = q*sh + phase; CW = sw*Cin with the
                                 W-stride phase folded into channels)
    w_ref: (3, kww*CW, Cout)    per-kh weight with kw taps stacked along K
    b_ref: (1, Cout)            fused bias (f32)
    o_ref: (1, h_out[+2], w_out[+2], Cout)
    """
    cw = x_ref.shape[4]
    cout = w_ref.shape[2]
    m = h_out * w_out

    acc = jnp.zeros((m, cout), jnp.float32)
    for kh in range(3):                             # static unroll -> 3 deep-K dots
        jh, ph = kh // sh, kh % sh
        rows = x_ref[0, jh:jh + h_out, ph]          # (h_out, WQ, CW) contiguous load
        taps = [rows[:, jw:jw + w_out, :] for jw in range(kww)]
        patch = taps[0] if kww == 1 else jnp.concatenate(taps, axis=-1)
        acc = acc + jnp.dot(patch.reshape(m, kww * cw), w_ref[kh],
                            preferred_element_type=jnp.float32)

    res = jnp.maximum(acc + b_ref[...], 0.0).reshape(h_out, w_out, cout)
    if pad_out:
        # Emit the +1 zero halo the next conv needs (built in-registers, single
        # aligned full-block store) -> no XLA pad / HBM round trip between layers.
        zc = jnp.zeros((h_out, 1, cout), jnp.float32)
        zr = jnp.zeros((1, w_out + 2, cout), jnp.float32)
        res = jnp.concatenate(
            [zr, jnp.concatenate([zc, res, zc], axis=1), zr], axis=0)
    o_ref[0] = res.astype(o_ref.dtype)


def _maxpool2x2_kernel(x_ref, o_ref):
    """MaxPool2d(kernel=2, stride=2, pad=0) over a whole batch element.

    x_ref: (1, H//2, 2, W//2, 2*C)  (row phase split out; col phase folded into
                                     channels by a free wrapper reshape)
    o_ref: (1, H//2, W//2, C)
    """
    c = o_ref.shape[3]
    x = x_ref[0]
    a = jnp.maximum(x[:, 0], x[:, 1])                    # max over the row pair
    o_ref[0] = jnp.maximum(a[:, :, :c], a[:, :, c:])     # max over the col pair


# ---------------------------------------------------------------------------
# Wrappers around pallas_call
# ---------------------------------------------------------------------------
def conv3x3_bias_relu(x_pad, w_eff, b, sh, sw, pad_out):
    """x_pad: (N, H+2, W+2, Cin) NHWC, already carrying the +1 zero halo."""
    n, h_pad, w_pad, cin = x_pad.shape
    h, w = h_pad - 2, w_pad - 2
    h_out = (h - 1) // sh + 1
    w_out = (w - 1) // sw + 1
    cout = w_eff.shape[-1]
    kww = (3 - 1) // sw + 1                 # number of W taps after folding the W stride
    cw = sw * cin
    assert w_eff.shape == (3, kww * cw, cout)

    # Pad (no-op for this config) so the stride folds divide evenly.
    eh, ew = (-h_pad) % sh, (-w_pad) % sw
    if eh or ew:
        x_pad = jnp.pad(x_pad, ((0, 0), (0, eh), (0, ew), (0, 0)))
        h_pad, w_pad = h_pad + eh, w_pad + ew
    hq, wq = h_pad // sh, w_pad // sw

    # Free reshapes: fold W stride into channels, H stride into a phase dim.
    xf = x_pad.reshape(n, hq, sh, wq, cw)

    out_h = h_out + 2 if pad_out else h_out
    out_w = w_out + 2 if pad_out else w_out

    kernel = functools.partial(_conv3x3_bias_relu_kernel, sh=sh, h_out=h_out,
                               w_out=w_out, kww=kww, pad_out=pad_out)
    flops = 2 * n * h_out * w_out * (3 * kww * cw) * cout
    bytes_accessed = (n * hq * sh * wq * cw + 3 * kww * cw * cout
                      + n * out_h * out_w * cout) * 2 + cout * 4

    return pl.pallas_call(
        kernel,
        out_shape=jax.ShapeDtypeStruct((n, out_h, out_w, cout), x_pad.dtype),
        grid_spec=pltpu.PrefetchScalarGridSpec(
            num_scalar_prefetch=0,
            grid=(n,),  # one whole image per step; batch axis shards across cores
            in_specs=[
                pl.BlockSpec((1, hq, sh, wq, cw), lambda i: (i, 0, 0, 0, 0)),
                pl.BlockSpec((3, kww * cw, cout), lambda i: (0, 0, 0)),
                pl.BlockSpec((1, cout), lambda i: (0, 0)),
            ],
            out_specs=pl.BlockSpec((1, out_h, out_w, cout),
                                   lambda i: (i, 0, 0, 0)),
        ),
        compiler_params=pltpu.CompilerParams(
            dimension_semantics=("parallel",),
            vmem_limit_bytes=48 * 1024 * 1024),
        cost_estimate=pl.CostEstimate(flops=int(flops), transcendentals=0,
                                      bytes_accessed=int(bytes_accessed)),
    )(xf, w_eff, b)


def maxpool2x2(x_nhwc):
    n, h, w, c = x_nhwc.shape
    h_out, w_out = h // 2, w // 2
    x = x_nhwc[:, :2 * h_out, :2 * w_out, :]       # MaxPool2d(2,2) truncates odd edges
    xf = x.reshape(n, h_out, 2, w_out, 2 * c)      # free reshape
    return pl.pallas_call(
        _maxpool2x2_kernel,
        out_shape=jax.ShapeDtypeStruct((n, h_out, w_out, c), x_nhwc.dtype),
        grid_spec=pltpu.PrefetchScalarGridSpec(
            num_scalar_prefetch=0,
            grid=(n,),
            in_specs=[pl.BlockSpec((1, h_out, 2, w_out, 2 * c),
                                   lambda i: (i, 0, 0, 0, 0))],
            out_specs=pl.BlockSpec((1, h_out, w_out, c), lambda i: (i, 0, 0, 0)),
        ),
        compiler_params=pltpu.CompilerParams(
            dimension_semantics=("parallel",),
            vmem_limit_bytes=48 * 1024 * 1024),
    )(xf)


# ---------------------------------------------------------------------------
# Deterministic synthetic parameters + RepVGGBlock reparameterization (glue)
# ---------------------------------------------------------------------------
def _init_bn(key, c):
    k1, k2, k3, k4 = jax.random.split(key, 4)
    gamma = jax.random.uniform(k1, (c,), jnp.float32, 0.5, 1.5)
    beta = 0.1 * jax.random.normal(k2, (c,), jnp.float32)
    mean = 0.1 * jax.random.normal(k3, (c,), jnp.float32)
    var = jax.random.uniform(k4, (c,), jnp.float32, 0.5, 1.5)
    return gamma, beta, mean, var


def _fuse_conv_bn(w_oihw, bn):
    gamma, beta, mean, var = bn
    t = gamma / jnp.sqrt(var + _BN_EPS)
    return w_oihw * t[:, None, None, None], beta - mean * t


def _prep_weight(w_hwio, sw):
    """(3,3,Cin,Cout) -> (3, kww*sw*Cin, Cout) with kw taps stacked along K in the
    exact order produced by the kernel's lane-concat (jw major, W-phase p, then Cin)."""
    _, _, cin, cout = w_hwio.shape
    kww = (3 - 1) // sw + 1
    cw = sw * cin
    wef = jnp.zeros((3, kww * cw, cout), jnp.float32)
    for kw in range(3):
        jw, p = kw // sw, kw % sw
        r0 = jw * cw + p * cin
        wef = wef.at[:, r0:r0 + cin, :].set(w_hwio[:, kw])
    return wef


def _make_block_params(key, cin, cout, stride_hw, has_identity):
    """RepVGGBlock (deploy=False, groups=1, use_se=False), BN in eval mode,
    reparameterized exactly into a single fused 3x3 conv + bias."""
    k3, kb3, k1, kb1, kid = jax.random.split(key, 5)
    w3 = 0.1 * jax.random.normal(k3, (cout, cin, 3, 3), jnp.float32)
    w1 = 0.1 * jax.random.normal(k1, (cout, cin, 1, 1), jnp.float32)

    w3f, b3f = _fuse_conv_bn(w3, _init_bn(kb3, cout))
    w1f, b1f = _fuse_conv_bn(w1, _init_bn(kb1, cout))
    w = w3f + jnp.pad(w1f, ((0, 0), (0, 0), (1, 1), (1, 1)))
    b = b3f + b1f

    if has_identity:
        wid = jnp.zeros((cout, cin, 3, 3), jnp.float32)
        wid = wid.at[jnp.arange(cout), jnp.arange(cin), 1, 1].set(1.0)
        widf, bidf = _fuse_conv_bn(wid, _init_bn(kid, cout))
        w = w + widf
        b = b + bidf

    sh, sw = stride_hw
    w_hwio = jnp.transpose(w, (2, 3, 1, 0))                    # OIHW -> HWIO
    w_eff = _prep_weight(w_hwio, sw).astype(jnp.bfloat16)      # bf16 on the MXU
    return w_eff, b.reshape(1, cout).astype(jnp.float32), sh, sw


def build_repvgg_params(key, num_blocks, in_channels=3, width_multiplier=None):
    assert len(width_multiplier) == 4
    stage_strides = [1, 2, 2, 2]
    in_planes = min(64, int(64 * width_multiplier[0]))
    keys = iter(jax.random.split(key, 1 + sum(num_blocks)))

    blocks = []
    # stage0: 3x3, stride 2, in_channels -> in_planes (no identity: channels differ).
    blocks.append(_make_block_params(next(keys), in_channels, in_planes, (2, 2), False))

    planes_list = [int(64 * width_multiplier[0]), int(128 * width_multiplier[1]),
                   int(256 * width_multiplier[2]), int(512 * width_multiplier[3])]
    for si in range(4):
        planes = planes_list[si]
        strides = [(stage_strides[si], 1)] + [1] * (num_blocks[si] - 1)
        for s in strides:
            # Matches the PyTorch spec exactly: _make_stage passes the TUPLE stride
            # (stage_stride, 1) to the first block of each stage, and RepVGGBlock adds
            # the identity-BN branch only when out_channels == in_channels and
            # stride == 1 (False for tuples, including (1, 1)).
            has_id = (planes == in_planes) and (s == 1)
            s_hw = (s, s) if isinstance(s, int) else tuple(s)
            blocks.append(_make_block_params(next(keys), in_planes, planes, s_hw, has_id))
            in_planes = planes
    return blocks


def repvgg_forward(x_nchw, blocks):
    x = jnp.transpose(x_nchw, (0, 2, 3, 1)).astype(jnp.bfloat16)   # NCHW -> NHWC
    x = jnp.pad(x, ((0, 0), (1, 1), (1, 1), (0, 0)))               # only input is padded here
    for idx, (w_eff, b, sh, sw) in enumerate(blocks):
        pad_out = idx + 1 < len(blocks)   # every conv but the last emits the next halo
        x = conv3x3_bias_relu(x, w_eff, b, sh, sw, pad_out)
    x = maxpool2x2(x)
    return jnp.transpose(x, (0, 3, 1, 2)).astype(jnp.float32)      # NHWC -> NCHW


if __name__ == "__main__":
    key = jax.random.PRNGKey(0)
    kx, kp = jax.random.split(key)

    # Small config: num_blocks=[1,2,1,1], width_multiplier=[0.25]*4, in_channels=3
    x = jax.random.normal(kx, (2, 3, 32, 32), jnp.float32)  # NCHW, like PyTorch
    blocks = build_repvgg_params(kp, num_blocks=[1, 2, 1, 1], in_channels=3,
                                 width_multiplier=[0.25, 0.25, 0.25, 0.25])

    fwd = jax.jit(lambda inp: repvgg_forward(inp, blocks))
    out = jax.block_until_ready(fwd(x))
    # 32x32 -s(2,2)-> 16x16 -s(1,1)-> 16x16 -s(2,1)-> 8x16 -s1-> 8x16
    # -s(2,1)-> 4x16 -s(2,1)-> 2x16 -maxpool-> 1x8, C=128
    assert out.shape == (2, 128, 1, 8), out.shape
    assert bool(jnp.all(jnp.isfinite(out)))
    print("KERNEL_OK")
</pallas_src>

<mosaic_0001>
module attributes {stable_mosaic.version = 11 : i64} {
  func.func @_conv3x3_bias_relu_kernel(%arg0: i32, %arg1: memref<1x17x2x17x6xbf16, #tpu.memory_space<vmem>>, %arg2: memref<3x12x16xbf16, #tpu.memory_space<vmem>>, %arg3: memref<1x16xf32, #tpu.memory_space<vmem>>, %arg4: memref<1x18x18x16xbf16, #tpu.memory_space<vmem>>) attributes {dimension_semantics = [#tpu.dimension_semantics<parallel>], iteration_bounds = array<i64: 2>, scalar_prefetch = 0 : i64, scratch_operands = 0 : i64, tpu.core_type = #tpu.core_type<tc>, window_params = [{transform_indices = @transform_0, window_bounds = array<i64: 1, 17, 2, 17, 6>}, {pipeline_mode = #tpu.pipeline_mode<synchronous>, transform_indices = @transform_1, window_bounds = array<i64: 3, 12, 16>}, {pipeline_mode = #tpu.pipeline_mode<synchronous>, transform_indices = @transform_2, window_bounds = array<i64: 1, 16>}, {transform_indices = @transform_3, window_bounds = array<i64: 1, 18, 18, 16>}]} {
    %cst = arith.constant 0.000000e+00 : f32
    %0 = vector.broadcast %cst : f32 to vector<256x16xf32>
    %c0 = arith.constant 0 : index
    %c0_0 = arith.constant 0 : index
    %c0_1 = arith.constant 0 : index
    %c0_2 = arith.constant 0 : index
    %c0_3 = arith.constant 0 : index
    %1 = vector.load %arg1[%c0, %c0_0, %c0_1, %c0_2, %c0_3] : memref<1x17x2x17x6xbf16, #tpu.memory_space<vmem>>, vector<1x16x1x17x6xbf16>
    %2 = vector.shape_cast %1 : vector<1x16x1x17x6xbf16> to vector<16x17x6xbf16>
    %3 = vector.extract_strided_slice %2 {offsets = [0, 0, 0], sizes = [16, 16, 6], strides = [1, 1, 1]} : vector<16x17x6xbf16> to vector<16x16x6xbf16>
    %4 = vector.extract_strided_slice %2 {offsets = [0, 1, 0], sizes = [16, 16, 6], strides = [1, 1, 1]} : vector<16x17x6xbf16> to vector<16x16x6xbf16>
    %5 = tpu.concatenate %3, %4 in 2 : vector<16x16x6xbf16>, vector<16x16x6xbf16> -> vector<16x16x12xbf16>
    %6 = vector.shape_cast %5 : vector<16x16x12xbf16> to vector<256x12xbf16>
    %c0_4 = arith.constant 0 : index
    %c0_5 = arith.constant 0 : index
    %c0_6 = arith.constant 0 : index
    %7 = vector.load %arg2[%c0_4, %c0_5, %c0_6] : memref<3x12x16xbf16, #tpu.memory_space<vmem>>, vector<1x12x16xbf16>
    %8 = vector.shape_cast %7 : vector<1x12x16xbf16> to vector<12x16xbf16>
    %cst_7 = arith.constant dense<0.000000e+00> : vector<256x16xf32>
    %9 = tpu.matmul %6, %8, %cst_7 {dimension_numbers = #tpu.dot_dimension_numbers<[1], [0], [0], [1], [0, 0, 1, 1], [], []>} : vector<256x12xbf16>, vector<12x16xbf16>, vector<256x16xf32> -> vector<256x16xf32>
    %10 = arith.addf %0, %9 : vector<256x16xf32>
    %c0_8 = arith.constant 0 : index
    %c0_9 = arith.constant 0 : index
    %c1 = arith.constant 1 : index
    %c0_10 = arith.constant 0 : index
    %c0_11 = arith.constant 0 : index
    %11 = vector.load %arg1[%c0_8, %c0_9, %c1, %c0_10, %c0_11] : memref<1x17x2x17x6xbf16, #tpu.memory_space<vmem>>, vector<1x16x1x17x6xbf16>
    %12 = vector.shape_cast %11 : vector<1x16x1x17x6xbf16> to vector<16x17x6xbf16>
    %13 = vector.extract_strided_slice %12 {offsets = [0, 0, 0], sizes = [16, 16, 6], strides = [1, 1, 1]} : vector<16x17x6xbf16> to vector<16x16x6xbf16>
    %14 = vector.extract_strided_slice %12 {offsets = [0, 1, 0], sizes = [16, 16, 6], strides = [1, 1, 1]} : vector<16x17x6xbf16> to vector<16x16x6xbf16>
    %15 = tpu.concatenate %13, %14 in 2 : vector<16x16x6xbf16>, vector<16x16x6xbf16> -> vector<16x16x12xbf16>
    %16 = vector.shape_cast %15 : vector<16x16x12xbf16> to vector<256x12xbf16>
    %c1_12 = arith.constant 1 : index
    %c0_13 = arith.constant 0 : index
    %c0_14 = arith.constant 0 : index
    %17 = vector.load %arg2[%c1_12, %c0_13, %c0_14] : memref<3x12x16xbf16, #tpu.memory_space<vmem>>, vector<1x12x16xbf16>
    %18 = vector.shape_cast %17 : vector<1x12x16xbf16> to vector<12x16xbf16>
    %cst_15 = arith.constant dense<0.000000e+00> : vector<256x16xf32>
    %19 = tpu.matmul %16, %18, %cst_15 {dimension_numbers = #tpu.dot_dimension_numbers<[1], [0], [0], [1], [0, 0, 1, 1], [], []>} : vector<256x12xbf16>, vector<12x16xbf16>, vector<256x16xf32> -> vector<256x16xf32>
    %20 = arith.addf %10, %19 : vector<256x16xf32>
    %c0_16 = arith.constant 0 : index
    %c1_17 = arith.constant 1 : index
    %c0_18 = arith.constant 0 : index
    %c0_19 = arith.constant 0 : index
    %c0_20 = arith.constant 0 : index
    %21 = vector.load %arg1[%c0_16, %c1_17, %c0_18, %c0_19, %c0_20] : memref<1x17x2x17x6xbf16, #tpu.memory_space<vmem>>, vector<1x16x1x17x6xbf16>
    %22 = vector.shape_cast %21 : vector<1x16x1x17x6xbf16> to vector<16x17x6xbf16>
    %23 = vector.extract_strided_slice %22 {offsets = [0, 0, 0], sizes = [16, 16, 6], strides = [1, 1, 1]} : vector<16x17x6xbf16> to vector<16x16x6xbf16>
    %24 = vector.extract_strided_slice %22 {offsets = [0, 1, 0], sizes = [16, 16, 6], strides = [1, 1, 1]} : vector<16x17x6xbf16> to vector<16x16x6xbf16>
    %25 = tpu.concatenate %23, %24 in 2 : vector<16x16x6xbf16>, vector<16x16x6xbf16> -> vector<16x16x12xbf16>
    %26 = vector.shape_cast %25 : vector<16x16x12xbf16> to vector<256x12xbf16>
    %c2 = arith.constant 2 : index
    %c0_21 = arith.constant 0 : index
    %c0_22 = arith.constant 0 : index
    %27 = vector.load %arg2[%c2, %c0_21, %c0_22] : memref<3x12x16xbf16, #tpu.memory_space<vmem>>, vector<1x12x16xbf16>
    %28 = vector.shape_cast %27 : vector<1x12x16xbf16> to vector<12x16xbf16>
    %cst_23 = arith.constant dense<0.000000e+00> : vector<256x16xf32>
    %29 = tpu.matmul %26, %28, %cst_23 {dimension_numbers = #tpu.dot_dimension_numbers<[1], [0], [0], [1], [0, 0, 1, 1], [], []>} : vector<256x12xbf16>, vector<12x16xbf16>, vector<256x16xf32> -> vector<256x16xf32>
    %30 = arith.addf %20, %29 : vector<256x16xf32>
    %c0_24 = arith.constant 0 : index
    %c0_25 = arith.constant 0 : index
    %31 = vector.load %arg3[%c0_24, %c0_25] : memref<1x16xf32, #tpu.memory_space<vmem>>, vector<1x16xf32>
    %32 = vector.broadcast %31 : vector<1x16xf32> to vector<256x16xf32>
    %33 = arith.addf %30, %32 : vector<256x16xf32>
    %cst_26 = arith.constant 0.000000e+00 : f32
    %34 = vector.broadcast %cst_26 : f32 to vector<256x16xf32>
    %35 = arith.maximumf %33, %34 : vector<256x16xf32>
    %36 = vector.shape_cast %35 : vector<256x16xf32> to vector<16x16x16xf32>
    %cst_27 = arith.constant 0.000000e+00 : f32
    %37 = vector.broadcast %cst_27 : f32 to vector<16x1x16xf32>
    %cst_28 = arith.constant 0.000000e+00 : f32
    %38 = vector.broadcast %cst_28 : f32 to vector<1x18x16xf32>
    %39 = tpu.concatenate %37, %36, %37 in 1 : vector<16x1x16xf32>, vector<16x16x16xf32>, vector<16x1x16xf32> -> vector<16x18x16xf32>
    %40 = tpu.concatenate %38, %39, %38 in 0 : vector<1x18x16xf32>, vector<16x18x16xf32>, vector<1x18x16xf32> -> vector<18x18x16xf32>
    %41 = arith.truncf %40 : vector<18x18x16xf32> to vector<18x18x16xbf16>
    %c0_29 = arith.constant 0 : index
    %c0_30 = arith.constant 0 : index
    %c0_31 = arith.constant 0 : index
    %c0_32 = arith.constant 0 : index
    %42 = vector.load %arg4[%c0_29, %c0_30, %c0_31, %c0_32] : memref<1x18x18x16xbf16, #tpu.memory_space<vmem>>, vector<1x18x18x16xbf16>
    %43 = vector.shape_cast %42 : vector<1x18x18x16xbf16> to vector<18x18x16xbf16>
    %44 = vector.shape_cast %41 : vector<18x18x16xbf16> to vector<1x18x18x16xbf16>
    tpu.vector_store %arg4[%c0_29, %c0_30, %c0_31, %c0_32], %44 {strides = array<i32>} : memref<1x18x18x16xbf16, #tpu.memory_space<vmem>>, vector<1x18x18x16xbf16>,
    return
  }
  func.func @transform_0(%arg0: i32) -> (i32, i32, i32, i32, i32) {
    %c0_i32 = arith.constant 0 : i32
    %c0_i32_0 = arith.constant 0 : i32
    %c0_i32_1 = arith.constant 0 : i32
    %c0_i32_2 = arith.constant 0 : i32
    %c0_i32_3 = arith.constant 0 : i32
    return %arg0, %c0_i32, %c0_i32_0, %c0_i32_1, %c0_i32_2 : i32, i32, i32, i32, i32
  }
  func.func @transform_1(%arg0: i32) -> (i32, i32, i32) {
    %c0_i32 = arith.constant 0 : i32
    %c0_i32_0 = arith.constant 0 : i32
    %c0_i32_1 = arith.constant 0 : i32
    %c0_i32_2 = arith.constant 0 : i32
    return %c0_i32, %c0_i32_0, %c0_i32_1 : i32, i32, i32
  }
  func.func @transform_2(%arg0: i32) -> (i32, i32) {
    %c0_i32 = arith.constant 0 : i32
    %c0_i32_0 = arith.constant 0 : i32
    %c0_i32_1 = arith.constant 0 : i32
    return %c0_i32, %c0_i32_0 : i32, i32
  }
  func.func @transform_3(%arg0: i32) -> (i32, i32, i32, i32) {
    %c0_i32 = arith.constant 0 : i32
    %c0_i32_0 = arith.constant 0 : i32
    %c0_i32_1 = arith.constant 0 : i32
    %c0_i32_2 = arith.constant 0 : i32
    return %arg0, %c0_i32, %c0_i32_0, %c0_i32_1 : i32, i32, i32, i32
  }
}

module attributes {stable_mosaic.version = 11 : i64} {
  func.func @_conv3x3_bias_relu_kernel(%arg0: i32, %arg1: memref<1x18x1x18x16xbf16, #tpu.memory_space<vmem>>, %arg2: memref<3x48x16xbf16, #tpu.memory_space<vmem>>, %arg3: memref<1x16xf32, #tpu.memory_space<vmem>>, %arg4: memref<1x18x18x16xbf16, #tpu.memory_space<vmem>>) attributes {dimension_semantics = [#tpu.dimension_semantics<parallel>], iteration_bounds = array<i64: 2>, scalar_prefetch = 0 : i64, scratch_operands = 0 : i64, tpu.core_type = #tpu.core_type<tc>, window_params = [{transform_indices = @transform_0, window_bounds = array<i64: 1, 18, 1, 18, 16>}, {pipeline_mode = #tpu.pipeline_mode<synchronous>, transform_indices = @transform_1, window_bounds = array<i64: 3, 48, 16>}, {pipeline_mode = #tpu.pipeline_mode<synchronous>, transform_indices = @transform_2, window_bounds = array<i64: 1, 16>}, {transform_indices = @transform_3, window_bounds = array<i64: 1, 18, 18, 16>}]} {
    %cst = arith.constant 0.000000e+00 : f32
    %0 = vector.broadcast %cst : f32 to vector<256x16xf32>
    %c0 = arith.constant 0 : index
    %c0_0 = arith.constant 0 : index
    %c0_1 = arith.constant 0 : index
    %c0_2 = arith.constant 0 : index
    %c0_3 = arith.constant 0 : index
    %1 = vector.load %arg1[%c0, %c0_0, %c0_1, %c0_2, %c0_3] : memref<1x18x1x18x16xbf16, #tpu.memory_space<vmem>>, vector<1x16x1x18x16xbf16>
    %2 = vector.shape_cast %1 : vector<1x16x1x18x16xbf16> to vector<16x18x16xbf16>
    %3 = vector.extract_strided_slice %2 {offsets = [0, 0, 0], sizes = [16, 16, 16], strides = [1, 1, 1]} : vector<16x18x16xbf16> to vector<16x16x16xbf16>
    %4 = vector.extract_strided_slice %2 {offsets = [0, 1, 0], sizes = [16, 16, 16], strides = [1, 1, 1]} : vector<16x18x16xbf16> to vector<16x16x16xbf16>
    %5 = vector.extract_strided_slice %2 {offsets = [0, 2, 0], sizes = [16, 16, 16], strides = [1, 1, 1]} : vector<16x18x16xbf16> to vector<16x16x16xbf16>
    %6 = tpu.concatenate %3, %4, %5 in 2 : vector<16x16x16xbf16>, vector<16x16x16xbf16>, vector<16x16x16xbf16> -> vector<16x16x48xbf16>
    %7 = vector.shape_cast %6 : vector<16x16x48xbf16> to vector<256x48xbf16>
    %c0_4 = arith.constant 0 : index
    %c0_5 = arith.constant 0 : index
    %c0_6 = arith.constant 0 : index
    %8 = vector.load %arg2[%c0_4, %c0_5, %c0_6] : memref<3x48x16xbf16, #tpu.memory_space<vmem>>, vector<1x48x16xbf16>
    %9 = vector.shape_cast %8 : vector<1x48x16xbf16> to vector<48x16xbf16>
    %cst_7 = arith.constant dense<0.000000e+00> : vector<256x16xf32>
    %10 = tpu.matmul %7, %9, %cst_7 {dimension_numbers = #tpu.dot_dimension_numbers<[1], [0], [0], [1], [0, 0, 1, 1], [], []>} : vector<256x48xbf16>, vector<48x16xbf16>, vector<256x16xf32> -> vector<256x16xf32>
    %11 = arith.addf %0, %10 : vector<256x16xf32>
    %c0_8 = arith.constant 0 : index
    %c1 = arith.constant 1 : index
    %c0_9 = arith.constant 0 : index
    %c0_10 = arith.constant 0 : index
    %c0_11 = arith.constant 0 : index
    %12 = vector.load %arg1[%c0_8, %c1, %c0_9, %c0_10, %c0_11] : memref<1x18x1x18x16xbf16, #tpu.memory_space<vmem>>, vector<1x16x1x18x16xbf16>
    %13 = vector.shape_cast %12 : vector<1x16x1x18x16xbf16> to vector<16x18x16xbf16>
    %14 = vector.extract_strided_slice %13 {offsets = [0, 0, 0], sizes = [16, 16, 16], strides = [1, 1, 1]} : vector<16x18x16xbf16> to vector<16x16x16xbf16>
    %15 = vector.extract_strided_slice %13 {offsets = [0, 1, 0], sizes = [16, 16, 16], strides = [1, 1, 1]} : vector<16x18x16xbf16> to vector<16x16x16xbf16>
    %16 = vector.extract_strided_slice %13 {offsets = [0, 2, 0], sizes = [16, 16, 16], strides = [1, 1, 1]} : vector<16x18x16xbf16> to vector<16x16x16xbf16>
    %17 = tpu.concatenate %14, %15, %16 in 2 : vector<16x16x16xbf16>, vector<16x16x16xbf16>, vector<16x16x16xbf16> -> vector<16x16x48xbf16>
    %18 = vector.shape_cast %17 : vector<16x16x48xbf16> to vector<256x48xbf16>
    %c1_12 = arith.constant 1 : index
    %c0_13 = arith.constant 0 : index
    %c0_14 = arith.constant 0 : index
    %19 = vector.load %arg2[%c1_12, %c0_13, %c0_14] : memref<3x48x16xbf16, #tpu.memory_space<vmem>>, vector<1x48x16xbf16>
    %20 = vector.shape_cast %19 : vector<1x48x16xbf16> to vector<48x16xbf16>
    %cst_15 = arith.constant dense<0.000000e+00> : vector<256x16xf32>
    %21 = tpu.matmul %18, %20, %cst_15 {dimension_numbers = #tpu.dot_dimension_numbers<[1], [0], [0], [1], [0, 0, 1, 1], [], []>} : vector<256x48xbf16>, vector<48x16xbf16>, vector<256x16xf32> -> vector<256x16xf32>
    %22 = arith.addf %11, %21 : vector<256x16xf32>
    %c0_16 = arith.constant 0 : index
    %c2 = arith.constant 2 : index
    %c0_17 = arith.constant 0 : index
    %c0_18 = arith.constant 0 : index
    %c0_19 = arith.constant 0 : index
    %23 = vector.load %arg1[%c0_16, %c2, %c0_17, %c0_18, %c0_19] : memref<1x18x1x18x16xbf16, #tpu.memory_space<vmem>>, vector<1x16x1x18x16xbf16>
    %24 = vector.shape_cast %23 : vector<1x16x1x18x16xbf16> to vector<16x18x16xbf16>
    %25 = vector.extract_strided_slice %24 {offsets = [0, 0, 0], sizes = [16, 16, 16], strides = [1, 1, 1]} : vector<16x18x16xbf16> to vector<16x16x16xbf16>
    %26 = vector.extract_strided_slice %24 {offsets = [0, 1, 0], sizes = [16, 16, 16], strides = [1, 1, 1]} : vector<16x18x16xbf16> to vector<16x16x16xbf16>
    %27 = vector.extract_strided_slice %24 {offsets = [0, 2, 0], sizes = [16, 16, 16], strides = [1, 1, 1]} : vector<16x18x16xbf16> to vector<16x16x16xbf16>
    %28 = tpu.concatenate %25, %26, %27 in 2 : vector<16x16x16xbf16>, vector<16x16x16xbf16>, vector<16x16x16xbf16> -> vector<16x16x48xbf16>
    %29 = vector.shape_cast %28 : vector<16x16x48xbf16> to vector<256x48xbf16>
    %c2_20 = arith.constant 2 : index
    %c0_21 = arith.constant 0 : index
    %c0_22 = arith.constant 0 : index
    %30 = vector.load %arg2[%c2_20, %c0_21, %c0_22] : memref<3x48x16xbf16, #tpu.memory_space<vmem>>, vector<1x48x16xbf16>
    %31 = vector.shape_cast %30 : vector<1x48x16xbf16> to vector<48x16xbf16>
    %cst_23 = arith.constant dense<0.000000e+00> : vector<256x16xf32>
    %32 = tpu.matmul %29, %31, %cst_23 {dimension_numbers = #tpu.dot_dimension_numbers<[1], [0], [0], [1], [0, 0, 1, 1], [], []>} : vector<256x48xbf16>, vector<48x16xbf16>, vector<256x16xf32> -> vector<256x16xf32>
    %33 = arith.addf %22, %32 : vector<256x16xf32>
    %c0_24 = arith.constant 0 : index
    %c0_25 = arith.constant 0 : index
    %34 = vector.load %arg3[%c0_24, %c0_25] : memref<1x16xf32, #tpu.memory_space<vmem>>, vector<1x16xf32>
    %35 = vector.broadcast %34 : vector<1x16xf32> to vector<256x16xf32>
    %36 = arith.addf %33, %35 : vector<256x16xf32>
    %cst_26 = arith.constant 0.000000e+00 : f32
    %37 = vector.broadcast %cst_26 : f32 to vector<256x16xf32>
    %38 = arith.maximumf %36, %37 : vector<256x16xf32>
    %39 = vector.shape_cast %38 : vector<256x16xf32> to vector<16x16x16xf32>
    %cst_27 = arith.constant 0.000000e+00 : f32
    %40 = vector.broadcast %cst_27 : f32 to vector<16x1x16xf32>
    %cst_28 = arith.constant 0.000000e+00 : f32
    %41 = vector.broadcast %cst_28 : f32 to vector<1x18x16xf32>
    %42 = tpu.concatenate %40, %39, %40 in 1 : vector<16x1x16xf32>, vector<16x16x16xf32>, vector<16x1x16xf32> -> vector<16x18x16xf32>
    %43 = tpu.concatenate %41, %42, %41 in 0 : vector<1x18x16xf32>, vector<16x18x16xf32>, vector<1x18x16xf32> -> vector<18x18x16xf32>
    %44 = arith.truncf %43 : vector<18x18x16xf32> to vector<18x18x16xbf16>
    %c0_29 = arith.constant 0 : index
    %c0_30 = arith.constant 0 : index
    %c0_31 = arith.constant 0 : index
    %c0_32 = arith.constant 0 : index
    %45 = vector.load %arg4[%c0_29, %c0_30, %c0_31, %c0_32] : memref<1x18x18x16xbf16, #tpu.memory_space<vmem>>, vector<1x18x18x16xbf16>
    %46 = vector.shape_cast %45 : vector<1x18x18x16xbf16> to vector<18x18x16xbf16>
    %47 = vector.shape_cast %44 : vector<18x18x16xbf16> to vector<1x18x18x16xbf16>
    tpu.vector_store %arg4[%c0_29, %c0_30, %c0_31, %c0_32], %47 {strides = array<i32>} : memref<1x18x18x16xbf16, #tpu.memory_space<vmem>>, vector<1x18x18x16xbf16>,
    return
  }
  func.func @transform_0(%arg0: i32) -> (i32, i32, i32, i32, i32) {
    %c0_i32 = arith.constant 0 : i32
    %c0_i32_0 = arith.constant 0 : i32
    %c0_i32_1 = arith.constant 0 : i32
    %c0_i32_2 = arith.constant 0 : i32
    %c0_i32_3 = arith.constant 0 : i32
    return %arg0, %c0_i32, %c0_i32_0, %c0_i32_1, %c0_i32_2 : i32, i32, i32, i32, i32
  }
  func.func @transform_1(%arg0: i32) -> (i32, i32, i32) {
    %c0_i32 = arith.constant 0 : i32
    %c0_i32_0 = arith.constant 0 : i32
    %c0_i32_1 = arith.constant 0 : i32
    %c0_i32_2 = arith.constant 0 : i32
    return %c0_i32, %c0_i32_0, %c0_i32_1 : i32, i32, i32
  }
  func.func @transform_2(%arg0: i32) -> (i32, i32) {
    %c0_i32 = arith.constant 0 : i32
    %c0_i32_0 = arith.constant 0 : i32
    %c0_i32_1 = arith.constant 0 : i32
    return %c0_i32, %c0_i32_0 : i32, i32
  }
  func.func @transform_3(%arg0: i32) -> (i32, i32, i32, i32) {
    %c0_i32 = arith.constant 0 : i32
    %c0_i32_0 = arith.constant 0 : i32
    %c0_i32_1 = arith.constant 0 : i32
    %c0_i32_2 = arith.constant 0 : i32
    return %arg0, %c0_i32, %c0_i32_0, %c0_i32_1 : i32, i32, i32, i32
  }
}

module attributes {stable_mosaic.version = 11 : i64} {
  func.func @_conv3x3_bias_relu_kernel(%arg0: i32, %arg1: memref<1x9x2x18x16xbf16, #tpu.memory_space<vmem>>, %arg2: memref<3x48x32xbf16, #tpu.memory_space<vmem>>, %arg3: memref<1x32xf32, #tpu.memory_space<vmem>>, %arg4: memref<1x10x18x32xbf16, #tpu.memory_space<vmem>>) attributes {dimension_semantics = [#tpu.dimension_semantics<parallel>], iteration_bounds = array<i64: 2>, scalar_prefetch = 0 : i64, scratch_operands = 0 : i64, tpu.core_type = #tpu.core_type<tc>, window_params = [{transform_indices = @transform_0, window_bounds = array<i64: 1, 9, 2, 18, 16>}, {pipeline_mode = #tpu.pipeline_mode<synchronous>, transform_indices = @transform_1, window_bounds = array<i64: 3, 48, 32>}, {pipeline_mode = #tpu.pipeline_mode<synchronous>, transform_indices = @transform_2, window_bounds = array<i64: 1, 32>}, {transform_indices = @transform_3, window_bounds = array<i64: 1, 10, 18, 32>}]} {
    %cst = arith.constant 0.000000e+00 : f32
    %0 = vector.broadcast %cst : f32 to vector<128x32xf32>
    %c0 = arith.constant 0 : index
    %c0_0 = arith.constant 0 : index
    %c0_1 = arith.constant 0 : index
    %c0_2 = arith.constant 0 : index
    %c0_3 = arith.constant 0 : index
    %1 = vector.load %arg1[%c0, %c0_0, %c0_1, %c0_2, %c0_3] : memref<1x9x2x18x16xbf16, #tpu.memory_space<vmem>>, vector<1x8x1x18x16xbf16>
    %2 = vector.shape_cast %1 : vector<1x8x1x18x16xbf16> to vector<8x18x16xbf16>
    %3 = vector.extract_strided_slice %2 {offsets = [0, 0, 0], sizes = [8, 16, 16], strides = [1, 1, 1]} : vector<8x18x16xbf16> to vector<8x16x16xbf16>
    %4 = vector.extract_strided_slice %2 {offsets = [0, 1, 0], sizes = [8, 16, 16], strides = [1, 1, 1]} : vector<8x18x16xbf16> to vector<8x16x16xbf16>
    %5 = vector.extract_strided_slice %2 {offsets = [0, 2, 0], sizes = [8, 16, 16], strides = [1, 1, 1]} : vector<8x18x16xbf16> to vector<8x16x16xbf16>
    %6 = tpu.concatenate %3, %4, %5 in 2 : vector<8x16x16xbf16>, vector<8x16x16xbf16>, vector<8x16x16xbf16> -> vector<8x16x48xbf16>
    %7 = vector.shape_cast %6 : vector<8x16x48xbf16> to vector<128x48xbf16>
    %c0_4 = arith.constant 0 : index
    %c0_5 = arith.constant 0 : index
    %c0_6 = arith.constant 0 : index
    %8 = vector.load %arg2[%c0_4, %c0_5, %c0_6] : memref<3x48x32xbf16, #tpu.memory_space<vmem>>, vector<1x48x32xbf16>
    %9 = vector.shape_cast %8 : vector<1x48x32xbf16> to vector<48x32xbf16>
    %cst_7 = arith.constant dense<0.000000e+00> : vector<128x32xf32>
    %10 = tpu.matmul %7, %9, %cst_7 {dimension_numbers = #tpu.dot_dimension_numbers<[1], [0], [0], [1], [0, 0, 1, 1], [], []>} : vector<128x48xbf16>, vector<48x32xbf16>, vector<128x32xf32> -> vector<128x32xf32>
    %11 = arith.addf %0, %10 : vector<128x32xf32>
    %c0_8 = arith.constant 0 : index
    %c0_9 = arith.constant 0 : index
    %c1 = arith.constant 1 : index
    %c0_10 = arith.constant 0 : index
    %c0_11 = arith.constant 0 : index
    %12 = vector.load %arg1[%c0_8, %c0_9, %c1, %c0_10, %c0_11] : memref<1x9x2x18x16xbf16, #tpu.memory_space<vmem>>, vector<1x8x1x18x16xbf16>
    %13 = vector.shape_cast %12 : vector<1x8x1x18x16xbf16> to vector<8x18x16xbf16>
    %14 = vector.extract_strided_slice %13 {offsets = [0, 0, 0], sizes = [8, 16, 16], strides = [1, 1, 1]} : vector<8x18x16xbf16> to vector<8x16x16xbf16>
    %15 = vector.extract_strided_slice %13 {offsets = [0, 1, 0], sizes = [8, 16, 16], strides = [1, 1, 1]} : vector<8x18x16xbf16> to vector<8x16x16xbf16>
    %16 = vector.extract_strided_slice %13 {offsets = [0, 2, 0], sizes = [8, 16, 16], strides = [1, 1, 1]} : vector<8x18x16xbf16> to vector<8x16x16xbf16>
    %17 = tpu.concatenate %14, %15, %16 in 2 : vector<8x16x16xbf16>, vector<8x16x16xbf16>, vector<8x16x16xbf16> -> vector<8x16x48xbf16>
    %18 = vector.shape_cast %17 : vector<8x16x48xbf16> to vector<128x48xbf16>
    %c1_12 = arith.constant 1 : index
    %c0_13 = arith.constant 0 : index
    %c0_14 = arith.constant 0 : index
    %19 = vector.load %arg2[%c1_12, %c0_13, %c0_14] : memref<3x48x32xbf16, #tpu.memory_space<vmem>>, vector<1x48x32xbf16>
    %20 = vector.shape_cast %19 : vector<1x48x32xbf16> to vector<48x32xbf16>
    %cst_15 = arith.constant dense<0.000000e+00> : vector<128x32xf32>
    %21 = tpu.matmul %18, %20, %cst_15 {dimension_numbers = #tpu.dot_dimension_numbers<[1], [0], [0], [1], [0, 0, 1, 1], [], []>} : vector<128x48xbf16>, vector<48x32xbf16>, vector<128x32xf32> -> vector<128x32xf32>
    %22 = arith.addf %11, %21 : vector<128x32xf32>
    %c0_16 = arith.constant 0 : index
    %c1_17 = arith.constant 1 : index
    %c0_18 = arith.constant 0 : index
    %c0_19 = arith.constant 0 : index
    %c0_20 = arith.constant 0 : index
    %23 = vector.load %arg1[%c0_16, %c1_17, %c0_18, %c0_19, %c0_20] : memref<1x9x2x18x16xbf16, #tpu.memory_space<vmem>>, vector<1x8x1x18x16xbf16>
    %24 = vector.shape_cast %23 : vector<1x8x1x18x16xbf16> to vector<8x18x16xbf16>
    %25 = vector.extract_strided_slice %24 {offsets = [0, 0, 0], sizes = [8, 16, 16], strides = [1, 1, 1]} : vector<8x18x16xbf16> to vector<8x16x16xbf16>
    %26 = vector.extract_strided_slice %24 {offsets = [0, 1, 0], sizes = [8, 16, 16], strides = [1, 1, 1]} : vector<8x18x16xbf16> to vector<8x16x16xbf16>
    %27 = vector.extract_strided_slice %24 {offsets = [0, 2, 0], sizes = [8, 16, 16], strides = [1, 1, 1]} : vector<8x18x16xbf16> to vector<8x16x16xbf16>
    %28 = tpu.concatenate %25, %26, %27 in 2 : vector<8x16x16xbf16>, vector<8x16x16xbf16>, vector<8x16x16xbf16> -> vector<8x16x48xbf16>
    %29 = vector.shape_cast %28 : vector<8x16x48xbf16> to vector<128x48xbf16>
    %c2 = arith.constant 2 : index
    %c0_21 = arith.constant 0 : index
    %c0_22 = arith.constant 0 : index
    %30 = vector.load %arg2[%c2, %c0_21, %c0_22] : memref<3x48x32xbf16, #tpu.memory_space<vmem>>, vector<1x48x32xbf16>
    %31 = vector.shape_cast %30 : vector<1x48x32xbf16> to vector<48x32xbf16>
    %cst_23 = arith.constant dense<0.000000e+00> : vector<128x32xf32>
    %32 = tpu.matmul %29, %31, %cst_23 {dimension_numbers = #tpu.dot_dimension_numbers<[1], [0], [0], [1], [0, 0, 1, 1], [], []>} : vector<128x48xbf16>, vector<48x32xbf16>, vector<128x32xf32> -> vector<128x32xf32>
    %33 = arith.addf %22, %32 : vector<128x32xf32>
    %c0_24 = arith.constant 0 : index
    %c0_25 = arith.constant 0 : index
    %34 = vector.load %arg3[%c0_24, %c0_25] : memref<1x32xf32, #tpu.memory_space<vmem>>, vector<1x32xf32>
    %35 = vector.broadcast %34 : vector<1x32xf32> to vector<128x32xf32>
    %36 = arith.addf %33, %35 : vector<128x32xf32>
    %cst_26 = arith.constant 0.000000e+00 : f32
    %37 = vector.broadcast %cst_26 : f32 to vector<128x32xf32>
    %38 = arith.maximumf %36, %37 : vector<128x32xf32>
    %39 = vector.shape_cast %38 : vector<128x32xf32> to vector<8x16x32xf32>
    %cst_27 = arith.constant 0.000000e+00 : f32
    %40 = vector.broadcast %cst_27 : f32 to vector<8x1x32xf32>
    %cst_28 = arith.constant 0.000000e+00 : f32
    %41 = vector.broadcast %cst_28 : f32 to vector<1x18x32xf32>
    %42 = tpu.concatenate %40, %39, %40 in 1 : vector<8x1x32xf32>, vector<8x16x32xf32>, vector<8x1x32xf32> -> vector<8x18x32xf32>
    %43 = tpu.concatenate %41, %42, %41 in 0 : vector<1x18x32xf32>, vector<8x18x32xf32>, vector<1x18x32xf32> -> vector<10x18x32xf32>
    %44 = arith.truncf %43 : vector<10x18x32xf32> to vector<10x18x32xbf16>
    %c0_29 = arith.constant 0 : index
    %c0_30 = arith.constant 0 : index
    %c0_31 = arith.constant 0 : index
    %c0_32 = arith.constant 0 : index
    %45 = vector.load %arg4[%c0_29, %c0_30, %c0_31, %c0_32] : memref<1x10x18x32xbf16, #tpu.memory_space<vmem>>, vector<1x10x18x32xbf16>
    %46 = vector.shape_cast %45 : vector<1x10x18x32xbf16> to vector<10x18x32xbf16>
    %47 = vector.shape_cast %44 : vector<10x18x32xbf16> to vector<1x10x18x32xbf16>
    tpu.vector_store %arg4[%c0_29, %c0_30, %c0_31, %c0_32], %47 {strides = array<i32>} : memref<1x10x18x32xbf16, #tpu.memory_space<vmem>>, vector<1x10x18x32xbf16>,
    return
  }
  func.func @transform_0(%arg0: i32) -> (i32, i32, i32, i32, i32) {
    %c0_i32 = arith.constant 0 : i32
    %c0_i32_0 = arith.constant 0 : i32
    %c0_i32_1 = arith.constant 0 : i32
    %c0_i32_2 = arith.constant 0 : i32
    %c0_i32_3 = arith.constant 0 : i32
    return %arg0, %c0_i32, %c0_i32_0, %c0_i32_1, %c0_i32_2 : i32, i32, i32, i32, i32
  }
  func.func @transform_1(%arg0: i32) -> (i32, i32, i32) {
    %c0_i32 = arith.constant 0 : i32
    %c0_i32_0 = arith.constant 0 : i32
    %c0_i32_1 = arith.constant 0 : i32
    %c0_i32_2 = arith.constant 0 : i32
    return %c0_i32, %c0_i32_0, %c0_i32_1 : i32, i32, i32
  }
  func.func @transform_2(%arg0: i32) -> (i32, i32) {
    %c0_i32 = arith.constant 0 : i32
    %c0_i32_0 = arith.constant 0 : i32
    %c0_i32_1 = arith.constant 0 : i32
    return %c0_i32, %c0_i32_0 : i32, i32
  }
  func.func @transform_3(%arg0: i32) -> (i32, i32, i32, i32) {
    %c0_i32 = arith.constant 0 : i32
    %c0_i32_0 = arith.constant 0 : i32
    %c0_i32_1 = arith.constant 0 : i32
    %c0_i32_2 = arith.constant 0 : i32
    return %arg0, %c0_i32, %c0_i32_0, %c0_i32_1 : i32, i32, i32, i32
  }
}

module attributes {stable_mosaic.version = 11 : i64} {
  func.func @_conv3x3_bias_relu_kernel(%arg0: i32, %arg1: memref<1x10x1x18x32xbf16, #tpu.memory_space<vmem>>, %arg2: memref<3x96x32xbf16, #tpu.memory_space<vmem>>, %arg3: memref<1x32xf32, #tpu.memory_space<vmem>>, %arg4: memref<1x10x18x32xbf16, #tpu.memory_space<vmem>>) attributes {dimension_semantics = [#tpu.dimension_semantics<parallel>], iteration_bounds = array<i64: 2>, scalar_prefetch = 0 : i64, scratch_operands = 0 : i64, tpu.core_type = #tpu.core_type<tc>, window_params = [{transform_indices = @transform_0, window_bounds = array<i64: 1, 10, 1, 18, 32>}, {pipeline_mode = #tpu.pipeline_mode<synchronous>, transform_indices = @transform_1, window_bounds = array<i64: 3, 96, 32>}, {pipeline_mode = #tpu.pipeline_mode<synchronous>, transform_indices = @transform_2, window_bounds = array<i64: 1, 32>}, {transform_indices = @transform_3, window_bounds = array<i64: 1, 10, 18, 32>}]} {
    %cst = arith.constant 0.000000e+00 : f32
    %0 = vector.broadcast %cst : f32 to vector<128x32xf32>
    %c0 = arith.constant 0 : index
    %c0_0 = arith.constant 0 : index
    %c0_1 = arith.constant 0 : index
    %c0_2 = arith.constant 0 : index
    %c0_3 = arith.constant 0 : index
    %1 = vector.load %arg1[%c0, %c0_0, %c0_1, %c0_2, %c0_3] : memref<1x10x1x18x32xbf16, #tpu.memory_space<vmem>>, vector<1x8x1x18x32xbf16>
    %2 = vector.shape_cast %1 : vector<1x8x1x18x32xbf16> to vector<8x18x32xbf16>
    %3 = vector.extract_strided_slice %2 {offsets = [0, 0, 0], sizes = [8, 16, 32], strides = [1, 1, 1]} : vector<8x18x32xbf16> to vector<8x16x32xbf16>
    %4 = vector.extract_strided_slice %2 {offsets = [0, 1, 0], sizes = [8, 16, 32], strides = [1, 1, 1]} : vector<8x18x32xbf16> to vector<8x16x32xbf16>
    %5 = vector.extract_strided_slice %2 {offsets = [0, 2, 0], sizes = [8, 16, 32], strides = [1, 1, 1]} : vector<8x18x32xbf16> to vector<8x16x32xbf16>
    %6 = tpu.concatenate %3, %4, %5 in 2 : vector<8x16x32xbf16>, vector<8x16x32xbf16>, vector<8x16x32xbf16> -> vector<8x16x96xbf16>
    %7 = vector.shape_cast %6 : vector<8x16x96xbf16> to vector<128x96xbf16>
    %c0_4 = arith.constant 0 : index
    %c0_5 = arith.constant 0 : index
    %c0_6 = arith.constant 0 : index
    %8 = vector.load %arg2[%c0_4, %c0_5, %c0_6] : memref<3x96x32xbf16, #tpu.memory_space<vmem>>, vector<1x96x32xbf16>
    %9 = vector.shape_cast %8 : vector<1x96x32xbf16> to vector<96x32xbf16>
    %cst_7 = arith.constant dense<0.000000e+00> : vector<128x32xf32>
    %10 = tpu.matmul %7, %9, %cst_7 {dimension_numbers = #tpu.dot_dimension_numbers<[1], [0], [0], [1], [0, 0, 1, 1], [], []>} : vector<128x96xbf16>, vector<96x32xbf16>, vector<128x32xf32> -> vector<128x32xf32>
    %11 = arith.addf %0, %10 : vector<128x32xf32>
    %c0_8 = arith.constant 0 : index
    %c1 = arith.constant 1 : index
    %c0_9 = arith.constant 0 : index
    %c0_10 = arith.constant 0 : index
    %c0_11 = arith.constant 0 : index
    %12 = vector.load %arg1[%c0_8, %c1, %c0_9, %c0_10, %c0_11] : memref<1x10x1x18x32xbf16, #tpu.memory_space<vmem>>, vector<1x8x1x18x32xbf16>
    %13 = vector.shape_cast %12 : vector<1x8x1x18x32xbf16> to vector<8x18x32xbf16>
    %14 = vector.extract_strided_slice %13 {offsets = [0, 0, 0], sizes = [8, 16, 32], strides = [1, 1, 1]} : vector<8x18x32xbf16> to vector<8x16x32xbf16>
    %15 = vector.extract_strided_slice %13 {offsets = [0, 1, 0], sizes = [8, 16, 32], strides = [1, 1, 1]} : vector<8x18x32xbf16> to vector<8x16x32xbf16>
    %16 = vector.extract_strided_slice %13 {offsets = [0, 2, 0], sizes = [8, 16, 32], strides = [1, 1, 1]} : vector<8x18x32xbf16> to vector<8x16x32xbf16>
    %17 = tpu.concatenate %14, %15, %16 in 2 : vector<8x16x32xbf16>, vector<8x16x32xbf16>, vector<8x16x32xbf16> -> vector<8x16x96xbf16>
    %18 = vector.shape_cast %17 : vector<8x16x96xbf16> to vector<128x96xbf16>
    %c1_12 = arith.constant 1 : index
    %c0_13 = arith.constant 0 : index
    %c0_14 = arith.constant 0 : index
    %19 = vector.load %arg2[%c1_12, %c0_13, %c0_14] : memref<3x96x32xbf16, #tpu.memory_space<vmem>>, vector<1x96x32xbf16>
    %20 = vector.shape_cast %19 : vector<1x96x32xbf16> to vector<96x32xbf16>
    %cst_15 = arith.constant dense<0.000000e+00> : vector<128x32xf32>
    %21 = tpu.matmul %18, %20, %cst_15 {dimension_numbers = #tpu.dot_dimension_numbers<[1], [0], [0], [1], [0, 0, 1, 1], [], []>} : vector<128x96xbf16>, vector<96x32xbf16>, vector<128x32xf32> -> vector<128x32xf32>
    %22 = arith.addf %11, %21 : vector<128x32xf32>
    %c0_16 = arith.constant 0 : index
    %c2 = arith.constant 2 : index
    %c0_17 = arith.constant 0 : index
    %c0_18 = arith.constant 0 : index
    %c0_19 = arith.constant 0 : index
    %23 = vector.load %arg1[%c0_16, %c2, %c0_17, %c0_18, %c0_19] : memref<1x10x1x18x32xbf16, #tpu.memory_space<vmem>>, vector<1x8x1x18x32xbf16>
    %24 = vector.shape_cast %23 : vector<1x8x1x18x32xbf16> to vector<8x18x32xbf16>
    %25 = vector.extract_strided_slice %24 {offsets = [0, 0, 0], sizes = [8, 16, 32], strides = [1, 1, 1]} : vector<8x18x32xbf16> to vector<8x16x32xbf16>
    %26 = vector.extract_strided_slice %24 {offsets = [0, 1, 0], sizes = [8, 16, 32], strides = [1, 1, 1]} : vector<8x18x32xbf16> to vector<8x16x32xbf16>
    %27 = vector.extract_strided_slice %24 {offsets = [0, 2, 0], sizes = [8, 16, 32], strides = [1, 1, 1]} : vector<8x18x32xbf16> to vector<8x16x32xbf16>
    %28 = tpu.concatenate %25, %26, %27 in 2 : vector<8x16x32xbf16>, vector<8x16x32xbf16>, vector<8x16x32xbf16> -> vector<8x16x96xbf16>
    %29 = vector.shape_cast %28 : vector<8x16x96xbf16> to vector<128x96xbf16>
    %c2_20 = arith.constant 2 : index
    %c0_21 = arith.constant 0 : index
    %c0_22 = arith.constant 0 : index
    %30 = vector.load %arg2[%c2_20, %c0_21, %c0_22] : memref<3x96x32xbf16, #tpu.memory_space<vmem>>, vector<1x96x32xbf16>
    %31 = vector.shape_cast %30 : vector<1x96x32xbf16> to vector<96x32xbf16>
    %cst_23 = arith.constant dense<0.000000e+00> : vector<128x32xf32>
    %32 = tpu.matmul %29, %31, %cst_23 {dimension_numbers = #tpu.dot_dimension_numbers<[1], [0], [0], [1], [0, 0, 1, 1], [], []>} : vector<128x96xbf16>, vector<96x32xbf16>, vector<128x32xf32> -> vector<128x32xf32>
    %33 = arith.addf %22, %32 : vector<128x32xf32>
    %c0_24 = arith.constant 0 : index
    %c0_25 = arith.constant 0 : index
    %34 = vector.load %arg3[%c0_24, %c0_25] : memref<1x32xf32, #tpu.memory_space<vmem>>, vector<1x32xf32>
    %35 = vector.broadcast %34 : vector<1x32xf32> to vector<128x32xf32>
    %36 = arith.addf %33, %35 : vector<128x32xf32>
    %cst_26 = arith.constant 0.000000e+00 : f32
    %37 = vector.broadcast %cst_26 : f32 to vector<128x32xf32>
    %38 = arith.maximumf %36, %37 : vector<128x32xf32>
    %39 = vector.shape_cast %38 : vector<128x32xf32> to vector<8x16x32xf32>
    %cst_27 = arith.constant 0.000000e+00 : f32
    %40 = vector.broadcast %cst_27 : f32 to vector<8x1x32xf32>
    %cst_28 = arith.constant 0.000000e+00 : f32
    %41 = vector.broadcast %cst_28 : f32 to vector<1x18x32xf32>
    %42 = tpu.concatenate %40, %39, %40 in 1 : vector<8x1x32xf32>, vector<8x16x32xf32>, vector<8x1x32xf32> -> vector<8x18x32xf32>
    %43 = tpu.concatenate %41, %42, %41 in 0 : vector<1x18x32xf32>, vector<8x18x32xf32>, vector<1x18x32xf32> -> vector<10x18x32xf32>
    %44 = arith.truncf %43 : vector<10x18x32xf32> to vector<10x18x32xbf16>
    %c0_29 = arith.constant 0 : index
    %c0_30 = arith.constant 0 : index
    %c0_31 = arith.constant 0 : index
    %c0_32 = arith.constant 0 : index
    %45 = vector.load %arg4[%c0_29, %c0_30, %c0_31, %c0_32] : memref<1x10x18x32xbf16, #tpu.memory_space<vmem>>, vector<1x10x18x32xbf16>
    %46 = vector.shape_cast %45 : vector<1x10x18x32xbf16> to vector<10x18x32xbf16>
    %47 = vector.shape_cast %44 : vector<10x18x32xbf16> to vector<1x10x18x32xbf16>
    tpu.vector_store %arg4[%c0_29, %c0_30, %c0_31, %c0_32], %47 {strides = array<i32>} : memref<1x10x18x32xbf16, #tpu.memory_space<vmem>>, vector<1x10x18x32xbf16>,
    return
  }
  func.func @transform_0(%arg0: i32) -> (i32, i32, i32, i32, i32) {
    %c0_i32 = arith.constant 0 : i32
    %c0_i32_0 = arith.constant 0 : i32
    %c0_i32_1 = arith.constant 0 : i32
    %c0_i32_2 = arith.constant 0 : i32
    %c0_i32_3 = arith.constant 0 : i32
    return %arg0, %c0_i32, %c0_i32_0, %c0_i32_1, %c0_i32_2 : i32, i32, i32, i32, i32
  }
  func.func @transform_1(%arg0: i32) -> (i32, i32, i32) {
    %c0_i32 = arith.constant 0 : i32
    %c0_i32_0 = arith.constant 0 : i32
    %c0_i32_1 = arith.constant 0 : i32
    %c0_i32_2 = arith.constant 0 : i32
    return %c0_i32, %c0_i32_0, %c0_i32_1 : i32, i32, i32
  }
  func.func @transform_2(%arg0: i32) -> (i32, i32) {
    %c0_i32 = arith.constant 0 : i32
    %c0_i32_0 = arith.constant 0 : i32
    %c0_i32_1 = arith.constant 0 : i32
    return %c0_i32, %c0_i32_0 : i32, i32
  }
  func.func @transform_3(%arg0: i32) -> (i32, i32, i32, i32) {
    %c0_i32 = arith.constant 0 : i32
    %c0_i32_0 = arith.constant 0 : i32
    %c0_i32_1 = arith.constant 0 : i32
    %c0_i32_2 = arith.constant 0 : i32
    return %arg0, %c0_i32, %c0_i32_0, %c0_i32_1 : i32, i32, i32, i32
  }
}

module attributes {stable_mosaic.version = 11 : i64} {
  func.func @_conv3x3_bias_relu_kernel(%arg0: i32, %arg1: memref<1x5x2x18x32xbf16, #tpu.memory_space<vmem>>, %arg2: memref<3x96x64xbf16, #tpu.memory_space<vmem>>, %arg3: memref<1x64xf32, #tpu.memory_space<vmem>>, %arg4: memref<1x6x18x64xbf16, #tpu.memory_space<vmem>>) attributes {dimension_semantics = [#tpu.dimension_semantics<parallel>], iteration_bounds = array<i64: 2>, scalar_prefetch = 0 : i64, scratch_operands = 0 : i64, tpu.core_type = #tpu.core_type<tc>, window_params = [{transform_indices = @transform_0, window_bounds = array<i64: 1, 5, 2, 18, 32>}, {pipeline_mode = #tpu.pipeline_mode<synchronous>, transform_indices = @transform_1, window_bounds = array<i64: 3, 96, 64>}, {pipeline_mode = #tpu.pipeline_mode<synchronous>, transform_indices = @transform_2, window_bounds = array<i64: 1, 64>}, {transform_indices = @transform_3, window_bounds = array<i64: 1, 6, 18, 64>}]} {
    %cst = arith.constant 0.000000e+00 : f32
    %0 = vector.broadcast %cst : f32 to vector<64x64xf32>
    %c0 = arith.constant 0 : index
    %c0_0 = arith.constant 0 : index
    %c0_1 = arith.constant 0 : index
    %c0_2 = arith.constant 0 : index
    %c0_3 = arith.constant 0 : index
    %1 = vector.load %arg1[%c0, %c0_0, %c0_1, %c0_2, %c0_3] : memref<1x5x2x18x32xbf16, #tpu.memory_space<vmem>>, vector<1x4x1x18x32xbf16>
    %2 = vector.shape_cast %1 : vector<1x4x1x18x32xbf16> to vector<4x18x32xbf16>
    %3 = vector.extract_strided_slice %2 {offsets = [0, 0, 0], sizes = [4, 16, 32], strides = [1, 1, 1]} : vector<4x18x32xbf16> to vector<4x16x32xbf16>
    %4 = vector.extract_strided_slice %2 {offsets = [0, 1, 0], sizes = [4, 16, 32], strides = [1, 1, 1]} : vector<4x18x32xbf16> to vector<4x16x32xbf16>
    %5 = vector.extract_strided_slice %2 {offsets = [0, 2, 0], sizes = [4, 16, 32], strides = [1, 1, 1]} : vector<4x18x32xbf16> to vector<4x16x32xbf16>
    %6 = tpu.concatenate %3, %4, %5 in 2 : vector<4x16x32xbf16>, vector<4x16x32xbf16>, vector<4x16x32xbf16> -> vector<4x16x96xbf16>
    %7 = vector.shape_cast %6 : vector<4x16x96xbf16> to vector<64x96xbf16>
    %c0_4 = arith.constant 0 : index
    %c0_5 = arith.constant 0 : index
    %c0_6 = arith.constant 0 : index
    %8 = vector.load %arg2[%c0_4, %c0_5, %c0_6] : memref<3x96x64xbf16, #tpu.memory_space<vmem>>, vector<1x96x64xbf16>
    %9 = vector.shape_cast %8 : vector<1x96x64xbf16> to vector<96x64xbf16>
    %cst_7 = arith.constant dense<0.000000e+00> : vector<64x64xf32>
    %10 = tpu.matmul %7, %9, %cst_7 {dimension_numbers = #tpu.dot_dimension_numbers<[1], [0], [0], [1], [0, 0, 1, 1], [], []>} : vector<64x96xbf16>, vector<96x64xbf16>, vector<64x64xf32> -> vector<64x64xf32>
    %11 = arith.addf %0, %10 : vector<64x64xf32>
    %c0_8 = arith.constant 0 : index
    %c0_9 = arith.constant 0 : index
    %c1 = arith.constant 1 : index
    %c0_10 = arith.constant 0 : index
    %c0_11 = arith.constant 0 : index
    %12 = vector.load %arg1[%c0_8, %c0_9, %c1, %c0_10, %c0_11] : memref<1x5x2x18x32xbf16, #tpu.memory_space<vmem>>, vector<1x4x1x18x32xbf16>
    %13 = vector.shape_cast %12 : vector<1x4x1x18x32xbf16> to vector<4x18x32xbf16>
    %14 = vector.extract_strided_slice %13 {offsets = [0, 0, 0], sizes = [4, 16, 32], strides = [1, 1, 1]} : vector<4x18x32xbf16> to vector<4x16x32xbf16>
    %15 = vector.extract_strided_slice %13 {offsets = [0, 1, 0], sizes = [4, 16, 32], strides = [1, 1, 1]} : vector<4x18x32xbf16> to vector<4x16x32xbf16>
    %16 = vector.extract_strided_slice %13 {offsets = [0, 2, 0], sizes = [4, 16, 32], strides = [1, 1, 1]} : vector<4x18x32xbf16> to vector<4x16x32xbf16>
    %17 = tpu.concatenate %14, %15, %16 in 2 : vector<4x16x32xbf16>, vector<4x16x32xbf16>, vector<4x16x32xbf16> -> vector<4x16x96xbf16>
    %18 = vector.shape_cast %17 : vector<4x16x96xbf16> to vector<64x96xbf16>
    %c1_12 = arith.constant 1 : index
    %c0_13 = arith.constant 0 : index
    %c0_14 = arith.constant 0 : index
    %19 = vector.load %arg2[%c1_12, %c0_13, %c0_14] : memref<3x96x64xbf16, #tpu.memory_space<vmem>>, vector<1x96x64xbf16>
    %20 = vector.shape_cast %19 : vector<1x96x64xbf16> to vector<96x64xbf16>
    %cst_15 = arith.constant dense<0.000000e+00> : vector<64x64xf32>
    %21 = tpu.matmul %18, %20, %cst_15 {dimension_numbers = #tpu.dot_dimension_numbers<[1], [0], [0], [1], [0, 0, 1, 1], [], []>} : vector<64x96xbf16>, vector<96x64xbf16>, vector<64x64xf32> -> vector<64x64xf32>
    %22 = arith.addf %11, %21 : vector<64x64xf32>
    %c0_16 = arith.constant 0 : index
    %c1_17 = arith.constant 1 : index
    %c0_18 = arith.constant 0 : index
    %c0_19 = arith.constant 0 : index
    %c0_20 = arith.constant 0 : index
    %23 = vector.load %arg1[%c0_16, %c1_17, %c0_18, %c0_19, %c0_20] : memref<1x5x2x18x32xbf16, #tpu.memory_space<vmem>>, vector<1x4x1x18x32xbf16>
    %24 = vector.shape_cast %23 : vector<1x4x1x18x32xbf16> to vector<4x18x32xbf16>
    %25 = vector.extract_strided_slice %24 {offsets = [0, 0, 0], sizes = [4, 16, 32], strides = [1, 1, 1]} : vector<4x18x32xbf16> to vector<4x16x32xbf16>
    %26 = vector.extract_strided_slice %24 {offsets = [0, 1, 0], sizes = [4, 16, 32], strides = [1, 1, 1]} : vector<4x18x32xbf16> to vector<4x16x32xbf16>
    %27 = vector.extract_strided_slice %24 {offsets = [0, 2, 0], sizes = [4, 16, 32], strides = [1, 1, 1]} : vector<4x18x32xbf16> to vector<4x16x32xbf16>
    %28 = tpu.concatenate %25, %26, %27 in 2 : vector<4x16x32xbf16>, vector<4x16x32xbf16>, vector<4x16x32xbf16> -> vector<4x16x96xbf16>
    %29 = vector.shape_cast %28 : vector<4x16x96xbf16> to vector<64x96xbf16>
    %c2 = arith.constant 2 : index
    %c0_21 = arith.constant 0 : index
    %c0_22 = arith.constant 0 : index
    %30 = vector.load %arg2[%c2, %c0_21, %c0_22] : memref<3x96x64xbf16, #tpu.memory_space<vmem>>, vector<1x96x64xbf16>
    %31 = vector.shape_cast %30 : vector<1x96x64xbf16> to vector<96x64xbf16>
    %cst_23 = arith.constant dense<0.000000e+00> : vector<64x64xf32>
    %32 = tpu.matmul %29, %31, %cst_23 {dimension_numbers = #tpu.dot_dimension_numbers<[1], [0], [0], [1], [0, 0, 1, 1], [], []>} : vector<64x96xbf16>, vector<96x64xbf16>, vector<64x64xf32> -> vector<64x64xf32>
    %33 = arith.addf %22, %32 : vector<64x64xf32>
    %c0_24 = arith.constant 0 : index
    %c0_25 = arith.constant 0 : index
    %34 = vector.load %arg3[%c0_24, %c0_25] : memref<1x64xf32, #tpu.memory_space<vmem>>, vector<1x64xf32>
    %35 = vector.broadcast %34 : vector<1x64xf32> to vector<64x64xf32>
    %36 = arith.addf %33, %35 : vector<64x64xf32>
    %cst_26 = arith.constant 0.000000e+00 : f32
    %37 = vector.broadcast %cst_26 : f32 to vector<64x64xf32>
    %38 = arith.maximumf %36, %37 : vector<64x64xf32>
    %39 = vector.shape_cast %38 : vector<64x64xf32> to vector<4x16x64xf32>
    %cst_27 = arith.constant 0.000000e+00 : f32
    %40 = vector.broadcast %cst_27 : f32 to vector<4x1x64xf32>
    %cst_28 = arith.constant 0.000000e+00 : f32
    %41 = vector.broadcast %cst_28 : f32 to vector<1x18x64xf32>
    %42 = tpu.concatenate %40, %39, %40 in 1 : vector<4x1x64xf32>, vector<4x16x64xf32>, vector<4x1x64xf32> -> vector<4x18x64xf32>
    %43 = tpu.concatenate %41, %42, %41 in 0 : vector<1x18x64xf32>, vector<4x18x64xf32>, vector<1x18x64xf32> -> vector<6x18x64xf32>
    %44 = arith.truncf %43 : vector<6x18x64xf32> to vector<6x18x64xbf16>
    %c0_29 = arith.constant 0 : index
    %c0_30 = arith.constant 0 : index
    %c0_31 = arith.constant 0 : index
    %c0_32 = arith.constant 0 : index
    %45 = vector.load %arg4[%c0_29, %c0_30, %c0_31, %c0_32] : memref<1x6x18x64xbf16, #tpu.memory_space<vmem>>, vector<1x6x18x64xbf16>
    %46 = vector.shape_cast %45 : vector<1x6x18x64xbf16> to vector<6x18x64xbf16>
    %47 = vector.shape_cast %44 : vector<6x18x64xbf16> to vector<1x6x18x64xbf16>
    tpu.vector_store %arg4[%c0_29, %c0_30, %c0_31, %c0_32], %47 {strides = array<i32>} : memref<1x6x18x64xbf16, #tpu.memory_space<vmem>>, vector<1x6x18x64xbf16>,
    return
  }
  func.func @transform_0(%arg0: i32) -> (i32, i32, i32, i32, i32) {
    %c0_i32 = arith.constant 0 : i32
    %c0_i32_0 = arith.constant 0 : i32
    %c0_i32_1 = arith.constant 0 : i32
    %c0_i32_2 = arith.constant 0 : i32
    %c0_i32_3 = arith.constant 0 : i32
    return %arg0, %c0_i32, %c0_i32_0, %c0_i32_1, %c0_i32_2 : i32, i32, i32, i32, i32
  }
  func.func @transform_1(%arg0: i32) -> (i32, i32, i32) {
    %c0_i32 = arith.constant 0 : i32
    %c0_i32_0 = arith.constant 0 : i32
    %c0_i32_1 = arith.constant 0 : i32
    %c0_i32_2 = arith.constant 0 : i32
    return %c0_i32, %c0_i32_0, %c0_i32_1 : i32, i32, i32
  }
  func.func @transform_2(%arg0: i32) -> (i32, i32) {
    %c0_i32 = arith.constant 0 : i32
    %c0_i32_0 = arith.constant 0 : i32
    %c0_i32_1 = arith.constant 0 : i32
    return %c0_i32, %c0_i32_0 : i32, i32
  }
  func.func @transform_3(%arg0: i32) -> (i32, i32, i32, i32) {
    %c0_i32 = arith.constant 0 : i32
    %c0_i32_0 = arith.constant 0 : i32
    %c0_i32_1 = arith.constant 0 : i32
    %c0_i32_2 = arith.constant 0 : i32
    return %arg0, %c0_i32, %c0_i32_0, %c0_i32_1 : i32, i32, i32, i32
  }
}

module attributes {stable_mosaic.version = 11 : i64} {
  func.func @_conv3x3_bias_relu_kernel(%arg0: i32, %arg1: memref<1x3x2x18x64xbf16, #tpu.memory_space<vmem>>, %arg2: memref<3x192x128xbf16, #tpu.memory_space<vmem>>, %arg3: memref<1x128xf32, #tpu.memory_space<vmem>>, %arg4: memref<1x2x16x128xbf16, #tpu.memory_space<vmem>>) attributes {dimension_semantics = [#tpu.dimension_semantics<parallel>], iteration_bounds = array<i64: 2>, scalar_prefetch = 0 : i64, scratch_operands = 0 : i64, tpu.core_type = #tpu.core_type<tc>, window_params = [{transform_indices = @transform_0, window_bounds = array<i64: 1, 3, 2, 18, 64>}, {pipeline_mode = #tpu.pipeline_mode<synchronous>, transform_indices = @transform_1, window_bounds = array<i64: 3, 192, 128>}, {pipeline_mode = #tpu.pipeline_mode<synchronous>, transform_indices = @transform_2, window_bounds = array<i64: 1, 128>}, {transform_indices = @transform_3, window_bounds = array<i64: 1, 2, 16, 128>}]} {
    %cst = arith.constant 0.000000e+00 : f32
    %0 = vector.broadcast %cst : f32 to vector<32x128xf32>
    %c0 = arith.constant 0 : index
    %c0_0 = arith.constant 0 : index
    %c0_1 = arith.constant 0 : index
    %c0_2 = arith.constant 0 : index
    %c0_3 = arith.constant 0 : index
    %1 = vector.load %arg1[%c0, %c0_0, %c0_1, %c0_2, %c0_3] : memref<1x3x2x18x64xbf16, #tpu.memory_space<vmem>>, vector<1x2x1x18x64xbf16>
    %2 = vector.shape_cast %1 : vector<1x2x1x18x64xbf16> to vector<2x18x64xbf16>
    %3 = vector.extract_strided_slice %2 {offsets = [0, 0, 0], sizes = [2, 16, 64], strides = [1, 1, 1]} : vector<2x18x64xbf16> to vector<2x16x64xbf16>
    %4 = vector.extract_strided_slice %2 {offsets = [0, 1, 0], sizes = [2, 16, 64], strides = [1, 1, 1]} : vector<2x18x64xbf16> to vector<2x16x64xbf16>
    %5 = vector.extract_strided_slice %2 {offsets = [0, 2, 0], sizes = [2, 16, 64], strides = [1, 1, 1]} : vector<2x18x64xbf16> to vector<2x16x64xbf16>
    %6 = tpu.concatenate %3, %4, %5 in 2 : vector<2x16x64xbf16>, vector<2x16x64xbf16>, vector<2x16x64xbf16> -> vector<2x16x192xbf16>
    %7 = vector.shape_cast %6 : vector<2x16x192xbf16> to vector<32x192xbf16>
    %c0_4 = arith.constant 0 : index
    %c0_5 = arith.constant 0 : index
    %c0_6 = arith.constant 0 : index
    %8 = vector.load %arg2[%c0_4, %c0_5, %c0_6] : memref<3x192x128xbf16, #tpu.memory_space<vmem>>, vector<1x192x128xbf16>
    %9 = vector.shape_cast %8 : vector<1x192x128xbf16> to vector<192x128xbf16>
    %cst_7 = arith.constant dense<0.000000e+00> : vector<32x128xf32>
    %10 = tpu.matmul %7, %9, %cst_7 {dimension_numbers = #tpu.dot_dimension_numbers<[1], [0], [0], [1], [0, 0, 1, 1], [], []>} : vector<32x192xbf16>, vector<192x128xbf16>, vector<32x128xf32> -> vector<32x128xf32>
    %11 = arith.addf %0, %10 : vector<32x128xf32>
    %c0_8 = arith.constant 0 : index
    %c0_9 = arith.constant 0 : index
    %c1 = arith.constant 1 : index
    %c0_10 = arith.constant 0 : index
    %c0_11 = arith.constant 0 : index
    %12 = vector.load %arg1[%c0_8, %c0_9, %c1, %c0_10, %c0_11] : memref<1x3x2x18x64xbf16, #tpu.memory_space<vmem>>, vector<1x2x1x18x64xbf16>
    %13 = vector.shape_cast %12 : vector<1x2x1x18x64xbf16> to vector<2x18x64xbf16>
    %14 = vector.extract_strided_slice %13 {offsets = [0, 0, 0], sizes = [2, 16, 64], strides = [1, 1, 1]} : vector<2x18x64xbf16> to vector<2x16x64xbf16>
    %15 = vector.extract_strided_slice %13 {offsets = [0, 1, 0], sizes = [2, 16, 64], strides = [1, 1, 1]} : vector<2x18x64xbf16> to vector<2x16x64xbf16>
    %16 = vector.extract_strided_slice %13 {offsets = [0, 2, 0], sizes = [2, 16, 64], strides = [1, 1, 1]} : vector<2x18x64xbf16> to vector<2x16x64xbf16>
    %17 = tpu.concatenate %14, %15, %16 in 2 : vector<2x16x64xbf16>, vector<2x16x64xbf16>, vector<2x16x64xbf16> -> vector<2x16x192xbf16>
    %18 = vector.shape_cast %17 : vector<2x16x192xbf16> to vector<32x192xbf16>
    %c1_12 = arith.constant 1 : index
    %c0_13 = arith.constant 0 : index
    %c0_14 = arith.constant 0 : index
    %19 = vector.load %arg2[%c1_12, %c0_13, %c0_14] : memref<3x192x128xbf16, #tpu.memory_space<vmem>>, vector<1x192x128xbf16>
    %20 = vector.shape_cast %19 : vector<1x192x128xbf16> to vector<192x128xbf16>
    %cst_15 = arith.constant dense<0.000000e+00> : vector<32x128xf32>
    %21 = tpu.matmul %18, %20, %cst_15 {dimension_numbers = #tpu.dot_dimension_numbers<[1], [0], [0], [1], [0, 0, 1, 1], [], []>} : vector<32x192xbf16>, vector<192x128xbf16>, vector<32x128xf32> -> vector<32x128xf32>
    %22 = arith.addf %11, %21 : vector<32x128xf32>
    %c0_16 = arith.constant 0 : index
    %c1_17 = arith.constant 1 : index
    %c0_18 = arith.constant 0 : index
    %c0_19 = arith.constant 0 : index
    %c0_20 = arith.constant 0 : index
    %23 = vector.load %arg1[%c0_16, %c1_17, %c0_18, %c0_19, %c0_20] : memref<1x3x2x18x64xbf16, #tpu.memory_space<vmem>>, vector<1x2x1x18x64xbf16>
    %24 = vector.shape_cast %23 : vector<1x2x1x18x64xbf16> to vector<2x18x64xbf16>
    %25 = vector.extract_strided_slice %24 {offsets = [0, 0, 0], sizes = [2, 16, 64], strides = [1, 1, 1]} : vector<2x18x64xbf16> to vector<2x16x64xbf16>
    %26 = vector.extract_strided_slice %24 {offsets = [0, 1, 0], sizes = [2, 16, 64], strides = [1, 1, 1]} : vector<2x18x64xbf16> to vector<2x16x64xbf16>
    %27 = vector.extract_strided_slice %24 {offsets = [0, 2, 0], sizes = [2, 16, 64], strides = [1, 1, 1]} : vector<2x18x64xbf16> to vector<2x16x64xbf16>
    %28 = tpu.concatenate %25, %26, %27 in 2 : vector<2x16x64xbf16>, vector<2x16x64xbf16>, vector<2x16x64xbf16> -> vector<2x16x192xbf16>
    %29 = vector.shape_cast %28 : vector<2x16x192xbf16> to vector<32x192xbf16>
    %c2 = arith.constant 2 : index
    %c0_21 = arith.constant 0 : index
    %c0_22 = arith.constant 0 : index
    %30 = vector.load %arg2[%c2, %c0_21, %c0_22] : memref<3x192x128xbf16, #tpu.memory_space<vmem>>, vector<1x192x128xbf16>
    %31 = vector.shape_cast %30 : vector<1x192x128xbf16> to vector<192x128xbf16>
    %cst_23 = arith.constant dense<0.000000e+00> : vector<32x128xf32>
    %32 = tpu.matmul %29, %31, %cst_23 {dimension_numbers = #tpu.dot_dimension_numbers<[1], [0], [0], [1], [0, 0, 1, 1], [], []>} : vector<32x192xbf16>, vector<192x128xbf16>, vector<32x128xf32> -> vector<32x128xf32>
    %33 = arith.addf %22, %32 : vector<32x128xf32>
    %c0_24 = arith.constant 0 : index
    %c0_25 = arith.constant 0 : index
    %34 = vector.load %arg3[%c0_24, %c0_25] : memref<1x128xf32, #tpu.memory_space<vmem>>, vector<1x128xf32>
    %35 = vector.broadcast %34 : vector<1x128xf32> to vector<32x128xf32>
    %36 = arith.addf %33, %35 : vector<32x128xf32>
    %cst_26 = arith.constant 0.000000e+00 : f32
    %37 = vector.broadcast %cst_26 : f32 to vector<32x128xf32>
    %38 = arith.maximumf %36, %37 : vector<32x128xf32>
    %39 = vector.shape_cast %38 : vector<32x128xf32> to vector<2x16x128xf32>
    %40 = arith.truncf %39 : vector<2x16x128xf32> to vector<2x16x128xbf16>
    %c0_27 = arith.constant 0 : index
    %c0_28 = arith.constant 0 : index
    %c0_29 = arith.constant 0 : index
    %c0_30 = arith.constant 0 : index
    %41 = vector.load %arg4[%c0_27, %c0_28, %c0_29, %c0_30] : memref<1x2x16x128xbf16, #tpu.memory_space<vmem>>, vector<1x2x16x128xbf16>
    %42 = vector.shape_cast %41 : vector<1x2x16x128xbf16> to vector<2x16x128xbf16>
    %43 = vector.shape_cast %40 : vector<2x16x128xbf16> to vector<1x2x16x128xbf16>
    tpu.vector_store %arg4[%c0_27, %c0_28, %c0_29, %c0_30], %43 {strides = array<i32>} : memref<1x2x16x128xbf16, #tpu.memory_space<vmem>>, vector<1x2x16x128xbf16>,
    return
  }
  func.func @transform_0(%arg0: i32) -> (i32, i32, i32, i32, i32) {
    %c0_i32 = arith.constant 0 : i32
    %c0_i32_0 = arith.constant 0 : i32
    %c0_i32_1 = arith.constant 0 : i32
    %c0_i32_2 = arith.constant 0 : i32
    %c0_i32_3 = arith.constant 0 : i32
    return %arg0, %c0_i32, %c0_i32_0, %c0_i32_1, %c0_i32_2 : i32, i32, i32, i32, i32
  }
  func.func @transform_1(%arg0: i32) -> (i32, i32, i32) {
    %c0_i32 = arith.constant 0 : i32
    %c0_i32_0 = arith.constant 0 : i32
    %c0_i32_1 = arith.constant 0 : i32
    %c0_i32_2 = arith.constant 0 : i32
    return %c0_i32, %c0_i32_0, %c0_i32_1 : i32, i32, i32
  }
  func.func @transform_2(%arg0: i32) -> (i32, i32) {
    %c0_i32 = arith.constant 0 : i32
    %c0_i32_0 = arith.constant 0 : i32
    %c0_i32_1 = arith.constant 0 : i32
    return %c0_i32, %c0_i32_0 : i32, i32
  }
  func.func @transform_3(%arg0: i32) -> (i32, i32, i32, i32) {
    %c0_i32 = arith.constant 0 : i32
    %c0_i32_0 = arith.constant 0 : i32
    %c0_i32_1 = arith.constant 0 : i32
    %c0_i32_2 = arith.constant 0 : i32
    return %arg0, %c0_i32, %c0_i32_0, %c0_i32_1 : i32, i32, i32, i32
  }
}

module attributes {stable_mosaic.version = 11 : i64} {
  func.func @_maxpool2x2_kernel(%arg0: i32, %arg1: memref<1x1x2x8x256xbf16, #tpu.memory_space<vmem>>, %arg2: memref<1x1x8x128xbf16, #tpu.memory_space<vmem>>) attributes {dimension_semantics = [#tpu.dimension_semantics<parallel>], iteration_bounds = array<i64: 2>, scalar_prefetch = 0 : i64, scratch_operands = 0 : i64, tpu.core_type = #tpu.core_type<tc>, window_params = [{transform_indices = @transform_0, window_bounds = array<i64: 1, 1, 2, 8, 256>}, {transform_indices = @transform_1, window_bounds = array<i64: 1, 1, 8, 128>}]} {
    %c0 = arith.constant 0 : index
    %c0_0 = arith.constant 0 : index
    %c0_1 = arith.constant 0 : index
    %c0_2 = arith.constant 0 : index
    %c0_3 = arith.constant 0 : index
    %0 = vector.load %arg1[%c0, %c0_0, %c0_1, %c0_2, %c0_3] : memref<1x1x2x8x256xbf16, #tpu.memory_space<vmem>>, vector<1x1x2x8x256xbf16>
    %1 = vector.shape_cast %0 : vector<1x1x2x8x256xbf16> to vector<1x2x8x256xbf16>
    %2 = vector.extract_strided_slice %1 {offsets = [0, 0, 0, 0], sizes = [1, 1, 8, 256], strides = [1, 1, 1, 1]} : vector<1x2x8x256xbf16> to vector<1x1x8x256xbf16>
    %3 = vector.shape_cast %2 : vector<1x1x8x256xbf16> to vector<1x8x256xbf16>
    %4 = vector.extract_strided_slice %1 {offsets = [0, 1, 0, 0], sizes = [1, 1, 8, 256], strides = [1, 1, 1, 1]} : vector<1x2x8x256xbf16> to vector<1x1x8x256xbf16>
    %5 = vector.shape_cast %4 : vector<1x1x8x256xbf16> to vector<1x8x256xbf16>
    %6 = arith.maximumf %3, %5 : vector<1x8x256xbf16>
    %7 = vector.extract_strided_slice %6 {offsets = [0, 0, 0], sizes = [1, 8, 128], strides = [1, 1, 1]} : vector<1x8x256xbf16> to vector<1x8x128xbf16>
    %8 = vector.extract_strided_slice %6 {offsets = [0, 0, 128], sizes = [1, 8, 128], strides = [1, 1, 1]} : vector<1x8x256xbf16> to vector<1x8x128xbf16>
    %9 = arith.maximumf %7, %8 : vector<1x8x128xbf16>
    %c0_4 = arith.constant 0 : index
    %c0_5 = arith.constant 0 : index
    %c0_6 = arith.constant 0 : index
    %c0_7 = arith.constant 0 : index
    %10 = vector.load %arg2[%c0_4, %c0_5, %c0_6, %c0_7] : memref<1x1x8x128xbf16, #tpu.memory_space<vmem>>, vector<1x1x8x128xbf16>
    %11 = vector.shape_cast %10 : vector<1x1x8x128xbf16> to vector<1x8x128xbf16>
    %12 = vector.shape_cast %9 : vector<1x8x128xbf16> to vector<1x1x8x128xbf16>
    tpu.vector_store %arg2[%c0_4, %c0_5, %c0_6, %c0_7], %12 {strides = array<i32>} : memref<1x1x8x128xbf16, #tpu.memory_space<vmem>>, vector<1x1x8x128xbf16>,
    return
  }
  func.func @transform_0(%arg0: i32) -> (i32, i32, i32, i32, i32) {
    %c0_i32 = arith.constant 0 : i32
    %c0_i32_0 = arith.constant 0 : i32
    %c0_i32_1 = arith.constant 0 : i32
    %c0_i32_2 = arith.constant 0 : i32
    %c0_i32_3 = arith.constant 0 : i32
    return %arg0, %c0_i32, %c0_i32_0, %c0_i32_1, %c0_i32_2 : i32, i32, i32, i32, i32
  }
  func.func @transform_1(%arg0: i32) -> (i32, i32, i32, i32) {
    %c0_i32 = arith.constant 0 : i32
    %c0_i32_0 = arith.constant 0 : i32
    %c0_i32_1 = arith.constant 0 : i32
    %c0_i32_2 = arith.constant 0 : i32
    return %arg0, %c0_i32, %c0_i32_0, %c0_i32_1 : i32, i32, i32, i32
  }
}

</mosaic_0001>

<bundles_post_ra>
// kernel: _lambda_.7
= control target key start
LH: loop header
LB: loop body
LE: loop exit
PB: predicated region body
PF: predicated region fallthrough
CT: control target
= control target key end

     0   :  { %s2752_s12 = smov 0   ;;  %s3559_s0 = inlined_call_operand.vmem [shape: bf16[2,17,2,17,6], index: 0, kind: input, shape index: {}]   ;;  %s3560_s1 = inlined_call_operand.vmem [shape: bf16[3,12,16], index: 1, kind: input, shape index: {}]   ;;  %s3561_s2 = inlined_call_operand.vmem [shape: f32[1,16], index: 2, kind: input, shape index: {}]   ;;  %s3562_s3 = inlined_call_operand.vmem [shape: bf16[2,18,18,16], index: 3, kind: output, shape index: {}]  }
   0x1 LB: > { %s2290_s13 = sadd.s32 4294967295, %s2728_s12   ;;  %p2294_p0 = scmp.ge.s32.totalorder %s2728_s12, 1  ;;  %s2728_s12 = sphi %s2752_s12, %s13_s12  }
   0x2   : > { %p137_p1 = scmp.lt.s32.totalorder %s2728_s12, 3 }
   0x4   : > { %p138_p2 = pnand %p2294_p0, %p137_p1 }
   0x5   : > { %p161_p3 = scmp.lt.s32.totalorder (!%p138_p2), %s2290_s13, 1  ;;  %s2730_s18 = smov (!%p138_p2), 6  }
   0x6   : > { %141 = sbr.rel (%p138_p2) target bundleno = 478 (0x1de), region = 32 }
   0xb   : > { %s3564_s13 = smov (!%p161_p3, %s2290_s13), 1  ;;  %vm348_vm0 = vsmask.f32 7424  ;;  %vm1082_vm1 = vcmask 1045504   ;;  %vm573_vm2 = vcmask 48128   ;;  %vm1049_vm3 = vcmask 97280  }
   0xc   : > { %s2705_s14 = smul.u32 408, %s3564_s13  ;;  %vm2179_vm4 = vcmask 125952   ;;  %vm2182_vm5 = vcmask 122880   ;;  %vm2001_vm6 = vcmask 1040384  }
   0xd   : > { %s2706_s4 = smul.u32 216, %s3564_s13 }
   0xe   : > { %s2766_s17 = scalar_lea.vmem %s3559_s0, %s2705_s14 }
   0xf   : > { %v2769_v0 = vld [vmem:[%s2766_s17 + $0x12c] sm:$0xff]  ;;  %v2399_v1 = vld [vmem:[%s2766_s17 + $0x134] sm:$0x1]  ;;  %v2773_v2 = vld [vmem:[%s2766_s17] sm:$0xff]  ;;  %s3267_s7 = scalar_lea.vmem %s3562_s3, %s2706_s4 }
  0x10   : > { %v765_v3 = vunpack.c.l.b16 %v2399_v1  ;;  %v174_v4 = vld [vmem:[%s2766_s17 + $0x8] sm:$0x1]  ;;  %v2777_v5 = vld [vmem:[%s2766_s17 + $0x18] sm:$0xff]  ;;  %v2517_v6 = vld [vmem:[%s2766_s17 + $0x20] sm:$0x1]  ;;  %v930_v7 = vshrl.u32 %v2769_v0, 16 }
  0x11   : > { %v932_v8 = vshll.u32 %v2769_v0, 16  ;;  %v316_v9 = vunpack.c.l.b16 %v174_v4  ;;  %v350_v10 = vshrl.u32 %v2773_v2, 16  ;;  %v2363_v11 = vld [vmem:[%s2766_s17 + $0x14] sm:$0x1]  ;;  %v352_v13 = vshll.u32 %v2773_v2, 16  ;;  %v2787_v16 = vld [vmem:[%s2766_s17 + $0xc] sm:$0xff] }
  0x12   : > { %v781_v12 = vpack.c.b16 %v765_v3, %v765_v3  ;;  %v1449_v14 = vunpack.c.l.b16 %v2517_v6  ;;  %v1482_v15 = vshrl.u32 %v2777_v5, 16  ;;  %v1484_v19 = vshll.u32 %v2777_v5, 16  ;;  %v177_v25 = vld [vmem:[%s2766_s17 + $0x20] sm:$0x1]  ;;  %v2793_v30 = vld [vmem:[%s2766_s17 + $0x18] sm:$0xff]  ;;  %v2669_v38 = vld [vmem:[%s2766_s17 + $0x24] sm:$0xff] }
  0x13   : > { %v934_v17 = vrot.slane %v932_v8, 1  ;;  %v332_v18 = vpack.c.b16 %v316_v9, %v316_v9  ;;  %v753_v20 = vunpack.c.l.b16 %v2363_v11  ;;  %v354_v22 = vrot.slane %v352_v13, 1  ;;  %v2366_v39 = vld [vmem:[%s2766_s17 + $0x2c] sm:$0x1]  ;;  %v2805_v51 = vld [vmem:[%s2766_s17 + $0x30] sm:$0xff]  ;;  %v2809_v56 = vld [vmem:[%s2766_s17 + $0x144] sm:$0xff] }
  0x14   : > { %v937_v21 = vshll.u32 %v781_v12, 16  ;;  %v1465_v23 = vpack.c.b16 %v1449_v14, %v1449_v14  ;;  %v786_v24 = vshrl.u32 %v2787_v16, 16  ;;  %v1486_v28 = vrot.slane %v1484_v19, 1  ;;  %v180_v52 = vld [vmem:[%s2766_s17 + $0x38] sm:$0x1]  ;;  %v2687_v63 = vld [vmem:[%s2766_s17 + $0x48] sm:$0xff] }
  0x15   : > { %v935_v26 = vor.u32 %v934_v17, %v930_v7  ;;  %v357_v27 = vshll.u32 %v332_v18, 16  ;;  %v769_v29 = vpack.c.b16 %v753_v20, %v753_v20  ;;  %v355_v32 = vor.u32 %v354_v22, %v350_v10  ;;  %v2402_v57 = vld [vmem:[%s2766_s17 + $0x14c] sm:$0x1]  ;;  %v2523_v1 = vld [vmem:[%s2766_s17 + $0x50] sm:$0x1] }
  0x16   : > { %v939_v31 = vrot.slane %v937_v21, 1  ;;  %v1489_v33 = vshll.u32 %v1465_v23, 16  ;;  %v788_v34 = vshll.u32 %v2787_v16, 16  ;;  %v317_v37 = vunpack.c.l.b16 %v177_v25  ;;  %v2520_v12 = vld [vmem:[%s2766_s17 + $0x38] sm:$0x1] }
  0x17   : > { %v359_v35 = vrot.slane %v357_v27, 1  ;;  %v793_v36 = vshll.u32 %v769_v29, 16  ;;  %v1487_v41 = vor.u32 %v1486_v28, %v1482_v15  ;;  %v364_v47 = vshll.u32 %v2793_v30, 16  ;;  %v2821_v15 = vld [vmem:[%s2766_s17 + $0x30] sm:$0xff]  ;;  %v2408_v25 = vld [vmem:[%s2766_s17 + $0x17c] sm:$0x1] }
  0x18   : > { %v940_v40 = vsel %vm348_vm0, %v935_v26, %v939_v31  ;;  %v1491_v42 = vrot.slane %v1489_v33, 1  ;;  %v790_v43 = vrot.slane %v788_v34, 1  ;;  %v333_v46 = vpack.c.b16 %v317_v37, %v317_v37 }
  0x19   : > { %1001 = vrot.lane.b32.xlu0 %v940_v40, %s2730_s18  ;;  %v360_v44 = vsel %vm348_vm0, %v355_v32, %v359_v35  ;;  %v795_v45 = vrot.slane %v793_v36, 1  ;;  %v362_v49 = vshrl.u32 %v2793_v30, 16  ;;  %v754_v50 = vunpack.c.l.b16 %v2366_v39  ;;  %v2831_v35 = vld [vmem:[%s2766_s17 + $0x15c] sm:$0xff]  ;;  %v2405_v36 = vld [vmem:[%s2766_s17 + $0x164] sm:$0x1]  ;;  %v2835_v40 = vld [vmem:[%s2766_s17 + $0x174] sm:$0xff] }
  0x1a   : > { %541 = vrot.lane.b32.xlu1 %v360_v44, %s2730_s18  ;;  %v791_v48 = vor.u32 %v790_v43, %v786_v24  ;;  %v366_v53 = vrot.slane %v364_v47, 1  ;;  %v369_v54 = vshll.u32 %v333_v46, 16  ;;  %v800_v55 = vshll.u32 %v2669_v38, 16 }
  0x1b   : > { %v770_v58 = vpack.c.b16 %v754_v50, %v754_v50  ;;  %v1492_v59 = vsel %vm348_vm0, %v1487_v41, %v1491_v42  ;;  %v798_v61 = vshrl.u32 %v2669_v38, 16  ;;  %v318_v62 = vunpack.c.l.b16 %v180_v52  ;;  %v2526_v52 = vld [vmem:[%s2766_s17 + $0x68] sm:$0x1] }
  0x1c   : > { %v796_v60 = vsel %vm348_vm0, %v791_v48, %v795_v45  ;;  %v367_v3 = vor.u32 %v366_v53, %v362_v49  ;;  %v371_v4 = vrot.slane %v369_v54, 1  ;;  %v376_v6 = vshll.u32 %v2805_v51, 16 }
  0x1d   : > { %v766_v7 = vunpack.c.l.b16 %v2402_v57  ;;  %v802_v8 = vrot.slane %v800_v55, 1  ;;  %v805_v9 = vshll.u32 %v770_v58, 16  ;;  %v942_v10 = vshrl.u32 %v2809_v56, 16 }
  0x1e   : > { %v944_v11 = vshll.u32 %v2809_v56, 16  ;;  %v1451_v14 = vunpack.c.l.b16 %v2523_v1  ;;  %v334_v17 = vpack.c.b16 %v318_v62, %v318_v62  ;;  %v374_v18 = vshrl.u32 %v2805_v51, 16  ;;  %v2688_v51 = vld [vmem:[%s2766_s17 + $0x60] sm:$0xff] }
  0x1f   : > { %v782_v13 = vpack.c.b16 %v766_v7, %v766_v7  ;;  %v1508_v20 = vshll.u32 %v2687_v63, 16  ;;  %v378_v21 = vrot.slane %v376_v6, 1  ;;  %v1450_v24 = vunpack.c.l.b16 %v2520_v12  ;;  %v2855_v12 = vld [vmem:[%s2766_s17 + $0x54] sm:$0xff] }
  0x20   : > { %v946_v19 = vrot.slane %v944_v11, 1  ;;  %v1467_v23 = vpack.c.b16 %v1451_v14, %v1451_v14  ;;  %v372_v26 = vsel %vm348_vm0, %v367_v3, %v371_v4  ;;  %v803_v27 = vor.u32 %v802_v8, %v798_v61  ;;  %v2372_v61 = vld [vmem:[%s2766_s17 + $0x5c] sm:$0x1]  ;;  %v2369_v3 = vld [vmem:[%s2766_s17 + $0x44] sm:$0x1] }
  0x21   : > { %1673 = vrot.lane.b32.xlu0 %v1492_v59, %s2730_s18  ;;  %v949_v22 = vshll.u32 %v782_v13, 16  ;;  %v807_v28 = vrot.slane %v805_v9, 1  ;;  %v1466_v32 = vpack.c.b16 %v1450_v24, %v1450_v24  ;;  %v1494_v33 = vshrl.u32 %v2821_v15, 16  ;;  %v2852_v9 = vld [vmem:[%s2766_s17 + $0x3c] sm:$0xff] }
  0x22   : > { %977 = vrot.lane.b32.xlu1 %v796_v60, %s2730_s18  ;;  %v947_v29 = vor.u32 %v946_v19, %v942_v10  ;;  %v1496_v34 = vshll.u32 %v2821_v15, 16  ;;  %v381_v37 = vshll.u32 %v334_v17, 16  ;;  %v1506_v38 = vshrl.u32 %v2687_v63, 16  ;;  %v210_v17 = vld [vmem:[%s2766_s17 + $0x128] sm:$0x1] }
  0x23   : > { %v951_v31 = vrot.slane %v949_v22, 1  ;;  %v1510_v39 = vrot.slane %v1508_v20, 1  ;;  %v768_v41 = vunpack.c.l.b16 %v2408_v25  ;;  %v1513_v43 = vshll.u32 %v1467_v23, 16 }
  0x24   : > { %v1498_v44 = vrot.slane %v1496_v34, 1  ;;  %v1501_v45 = vshll.u32 %v1466_v32, 16  ;;  %v808_v46 = vsel %vm348_vm0, %v803_v27, %v807_v28  ;;  %v767_v47 = vunpack.c.l.b16 %v2405_v36 }
  0x25   : > { %v952_v42 = vsel %vm348_vm0, %v947_v29, %v951_v31  ;;  %v956_v50 = vshll.u32 %v2831_v35, 16  ;;  %v784_v53 = vpack.c.b16 %v768_v41, %v768_v41  ;;  %v968_v54 = vshll.u32 %v2835_v40, 16 }
  0x26   : > { %1003 = vrot.lane.b32.xlu2 %v952_v42, %s2730_s18  ;;  %v1499_v48 = vor.u32 %v1498_v44, %v1494_v33  ;;  %v1503_v49 = vrot.slane %v1501_v45, 1  ;;  %v783_v55 = vpack.c.b16 %v767_v47, %v767_v47  ;;  %v379_v57 = vor.u32 %v378_v21, %v374_v18  ;;  %v2861_v21 = vld [vmem:[%s2766_s17 + $0x120] sm:$0xff]  ;;  %v2375_v44 = vld [vmem:[%s2766_s17 + $0x74] sm:$0x1] }
  0x27   : > { %v383_v58 = vrot.slane %v381_v37, 1  ;;  %v1511_v59 = vor.u32 %v1510_v39, %v1506_v38  ;;  %v1515_v60 = vrot.slane %v1513_v43, 1  ;;  %v954_v62 = vshrl.u32 %v2831_v35, 16  ;;  %v186_v38 = vld [vmem:[%s2766_s17 + $0x68] sm:$0x1]  ;;  %v2872_v43 = vld [vmem:[%s2766_s17 + $0x60] sm:$0xff] }
  0x28   : > { %v958_v63 = vrot.slane %v956_v50, 1  ;;  %v1452_v1 = vunpack.c.l.b16 %v2526_v52  ;;  %v1504_v4 = vsel %vm348_vm0, %v1499_v48, %v1503_v49  ;;  %v966_v6 = vshrl.u32 %v2835_v40, 16  ;;  %v2878_v49 = vld [vmem:[%s2766_s17 + $0x48] sm:$0xff]  ;;  %v183_v50 = vld [vmem:[%s2766_s17 + $0x50] sm:$0x1] }
  0x29   : > { %543 = vrot.lane.b32.xlu0 %v372_v26, %s2730_s18  ;;  %v961_v7 = vshll.u32 %v783_v55, 16  ;;  %v1520_v8 = vshll.u32 %v2688_v51, 16  ;;  %v970_v10 = vrot.slane %v968_v54, 1  ;;  %v973_v11 = vshll.u32 %v784_v53, 16  ;;  %v2883_v55 = vld [vmem:[%s2766_s17 + $0x6c] sm:$0xff] }
  0x2a   : > { %979 = vrot.lane.b32.xlu1 %v808_v46, %s2730_s18  ;;  %v756_v13 = vunpack.c.l.b16 %v2372_v61  ;;  %v1468_v14 = vpack.c.b16 %v1452_v1, %v1452_v1  ;;  %v384_v18 = vsel %vm348_vm0, %v379_v57, %v383_v58  ;;  %v1516_v19 = vsel %vm348_vm0, %v1511_v59, %v1515_v60 }
  0x2b   : > { %v755_v20 = vunpack.c.l.b16 %v2369_v3  ;;  %v959_v22 = vor.u32 %v958_v63, %v954_v62  ;;  %v1518_v23 = vshrl.u32 %v2688_v51, 16  ;;  %v1522_v24 = vrot.slane %v1520_v8, 1 }
  0x2c   : > { %v1525_v25 = vshll.u32 %v1468_v14, 16  ;;  %v963_v26 = vrot.slane %v961_v7, 1  ;;  %v812_v28 = vshll.u32 %v2852_v9, 16  ;;  %v328_v29 = vunpack.c.l.b16 %v210_v17 }
  0x2d   : > { %v771_v27 = vpack.c.b16 %v755_v20, %v755_v20  ;;  %v971_v31 = vor.u32 %v970_v10, %v966_v6  ;;  %v975_v32 = vrot.slane %v973_v11, 1  ;;  %v772_v33 = vpack.c.b16 %v756_v13, %v756_v13  ;;  %v189_v6 = vld [vmem:[%s2766_s17 + $0x80] sm:$0x1]  ;;  %v2532_v13 = vld [vmem:[%s2766_s17 + $0x98] sm:$0x1] }
  0x2e   : > { %1675 = vrot.lane.b32.xlu2 %v1504_v4, %s2730_s18  ;;  %v824_v34 = vshll.u32 %v2855_v12, 16  ;;  %v344_v36 = vpack.c.b16 %v328_v29, %v328_v29  ;;  %v496_v37 = vshll.u32 %v2861_v21, 16  ;;  %v822_v39 = vshrl.u32 %v2855_v12, 16  ;;  %v2896_v20 = vld [vmem:[%s2766_s17 + $0x78] sm:$0xff] }
  0x2f   : > { %v1523_v41 = vor.u32 %v1522_v24, %v1518_v23  ;;  %v1527_v42 = vrot.slane %v1525_v25, 1  ;;  %v964_v45 = vsel %vm348_vm0, %v959_v22, %v963_v26  ;;  %v810_v46 = vshrl.u32 %v2852_v9, 16  ;;  %v2529_v22 = vld [vmem:[%s2766_s17 + $0x80] sm:$0x1] }
  0x30   : > { %v814_v47 = vrot.slane %v812_v28, 1  ;;  %v817_v48 = vshll.u32 %v771_v27, 16  ;;  %v976_v51 = vsel %vm348_vm0, %v971_v31, %v975_v32  ;;  %v826_v52 = vrot.slane %v824_v34, 1  ;;  %v2901_v27 = vld [vmem:[%s2766_s17 + $0x90] sm:$0xff] }
  0x31   : > { %1677 = vrot.lane.b32.xlu0 %v1516_v19, %s2730_s18  ;;  %v829_v53 = vshll.u32 %v772_v33, 16  ;;  %v320_v54 = vunpack.c.l.b16 %v186_v38  ;;  %v494_v57 = vshrl.u32 %v2861_v21, 16  ;;  %v498_v58 = vrot.slane %v496_v37, 1  ;;  %v2906_v33 = vld [vmem:[%s2766_s17 + $0x78] sm:$0xff] }
  0x32   : > { %545 = vrot.lane.b32.xlu1 %v384_v18, %s2730_s18  ;;  %v501_v59 = vshll.u32 %v344_v36, 16  ;;  %v757_v60 = vunpack.c.l.b16 %v2375_v44  ;;  %v1528_v61 = vsel %vm348_vm0, %v1523_v41, %v1527_v42  ;;  %v319_v62 = vunpack.c.l.b16 %v183_v50 }
  0x33   : > { %v815_v63 = vor.u32 %v814_v47, %v810_v46  ;;  %v819_v1 = vrot.slane %v817_v48, 1  ;;  %v400_v3 = vshll.u32 %v2872_v43, 16  ;;  %v388_v4 = vshll.u32 %v2878_v49, 16 }
  0x34   : > { %v827_v7 = vor.u32 %v826_v52, %v822_v39  ;;  %v336_v8 = vpack.c.b16 %v320_v54, %v320_v54  ;;  %v836_v10 = vshll.u32 %v2883_v55, 16  ;;  %v335_v11 = vpack.c.b16 %v319_v62, %v319_v62 }
  0x35   : > { %v831_v14 = vrot.slane %v829_v53, 1  ;;  %v499_v17 = vor.u32 %v498_v58, %v494_v57  ;;  %v503_v18 = vrot.slane %v501_v59, 1  ;;  %v773_v19 = vpack.c.b16 %v757_v60, %v757_v60  ;;  %v216_v58 = vld [vmem:[%s2766_s17 + $0x158] sm:$0x1]  ;;  %v213_v59 = vld [vmem:[%s2766_s17 + $0x140] sm:$0x1] }
  0x36   : > { %1005 = vrot.lane.b32.xlu2 %v964_v45, %s2730_s18  ;;  %v386_v23 = vshrl.u32 %v2878_v49, 16  ;;  %v390_v24 = vrot.slane %v388_v4, 1  ;;  %v393_v25 = vshll.u32 %v335_v11, 16  ;;  %v321_v26 = vunpack.c.l.b16 %v189_v6 }
  0x37   : > { %v820_v28 = vsel %vm348_vm0, %v815_v63, %v819_v1  ;;  %v398_v29 = vshrl.u32 %v2872_v43, 16  ;;  %v402_v31 = vrot.slane %v400_v3, 1  ;;  %v1454_v32 = vunpack.c.l.b16 %v2532_v13  ;;  %v2922_v1 = vld [vmem:[%s2766_s17 + $0x138] sm:$0xff] }
  0x38   : > { %v405_v34 = vshll.u32 %v336_v8, 16  ;;  %v834_v36 = vshrl.u32 %v2883_v55, 16  ;;  %v838_v37 = vrot.slane %v836_v10, 1  ;;  %v1453_v38 = vunpack.c.l.b16 %v2529_v22 }
  0x39   : > { %1007 = vrot.lane.b32.xlu0 %v976_v51, %s2730_s18  ;;  %v832_v39 = vsel %vm348_vm0, %v827_v7, %v831_v14  ;;  %v504_v41 = vsel %vm348_vm0, %v499_v17, %v503_v18  ;;  %v841_v42 = vshll.u32 %v773_v19, 16  ;;  %v412_v44 = vshll.u32 %v2896_v20, 16  ;;  %v2535_v14 = vld [vmem:[%s2766_s17 + $0xb0] sm:$0x1] }
  0x3a   : > { %1679 = vrot.lane.b32.xlu1 %v1528_v61, %s2730_s18  ;;  %v391_v45 = vor.u32 %v390_v24, %v386_v23  ;;  %v395_v46 = vrot.slane %v393_v25, 1  ;;  %v337_v47 = vpack.c.b16 %v321_v26, %v321_v26  ;;  %v1544_v48 = vshll.u32 %v2901_v27, 16  ;;  %v2928_v17 = vld [vmem:[%s2766_s17 + $0x150] sm:$0xff] }
  0x3b   : > { %v1470_v50 = vpack.c.b16 %v1454_v32, %v1454_v32  ;;  %v1469_v51 = vpack.c.b16 %v1453_v38, %v1453_v38  ;;  %v1532_v52 = vshll.u32 %v2906_v33, 16  ;;  %v403_v53 = vor.u32 %v402_v31, %v398_v29 }
  0x3c   : > { %v407_v54 = vrot.slane %v405_v34, 1  ;;  %v839_v57 = vor.u32 %v838_v37, %v834_v36  ;;  %v843_v60 = vrot.slane %v841_v42, 1  ;;  %v410_v61 = vshrl.u32 %v2896_v20, 16 }
  0x3d   : > { %v414_v62 = vrot.slane %v412_v44, 1  ;;  %v1542_v63 = vshrl.u32 %v2901_v27, 16  ;;  %v396_v3 = vsel %vm348_vm0, %v391_v45, %v395_v46  ;;  %v417_v4 = vshll.u32 %v337_v47, 16  ;;  %v2477_v45 = vld [vmem:[%s3560_s1 + $0x8] sm:$0xf] }
  0x3e   : > { %981 = vrot.lane.b32.xlu2 %v820_v28, %s2730_s18  ;;  %v1546_v6 = vrot.slane %v1544_v48, 1  ;;  %v1530_v7 = vshrl.u32 %v2906_v33, 16  ;;  %v1549_v8 = vshll.u32 %v1470_v50, 16  ;;  %v1534_v10 = vrot.slane %v1532_v52, 1  ;;  %v2935_v28 = vld [vmem:[%s2766_s17 + $0xa8] sm:$0xff] }
  0x3f   : > { %v1537_v11 = vshll.u32 %v1469_v51, 16  ;;  %v329_v13 = vunpack.c.l.b16 %v213_v59  ;;  %v330_v18 = vunpack.c.l.b16 %v216_v58  ;;  %v408_v19 = vsel %vm348_vm0, %v403_v53, %v407_v54  ;;  %v2684_v46 = vld [vmem:[%s3560_s1 + $0x8] sm:$0x30]  ;;  %v2497_v52 = vld [vmem:[%s3560_s1] sm:$0xf]  ;;  %v2961_v59 = vld [vmem:[%s2766_s17 + $0x84] sm:$0xff] }
  0x40   : > { %v844_v22 = vsel %vm348_vm0, %v839_v57, %v843_v60  ;;  %v508_v23 = vshll.u32 %v2922_v1, 16  ;;  %v415_v24 = vor.u32 %v414_v62, %v410_v61  ;;  %v419_v25 = vrot.slane %v417_v4, 1  ;;  %v2667_v53 = vld [vmem:[%s3560_s1] sm:$0x30]  ;;  %v219_v61 = vld [vmem:[%s2766_s17 + $0x170] sm:$0x1] }
  0x41   : > { %983 = vrot.lane.b32.xlu0 %v832_v39, %s2730_s18  ;;  %v1547_v26 = vor.u32 %v1546_v6, %v1542_v63  ;;  %v1455_v29 = vunpack.c.l.b16 %v2535_v14  ;;  %v1551_v31 = vrot.slane %v1549_v8, 1  ;;  %v1535_v32 = vor.u32 %v1534_v10, %v1530_v7  ;;  %v2381_v39 = vld [vmem:[%s2766_s17 + $0xa4] sm:$0x1]  ;;  %v2965_v6 = vld [vmem:[%s2766_s17 + $0x9c] sm:$0xff]  ;;  %v2970_v14 = vld [vmem:[%s2766_s17 + $0x168] sm:$0xff] }
  0x42   : > { %565 = vrot.lane.b32.xlu1 %v504_v41, %s2730_s18  ;;  %v1539_v34 = vrot.slane %v1537_v11, 1  ;;  %v345_v36 = vpack.c.b16 %v329_v13, %v329_v13  ;;  %v346_v37 = vpack.c.b16 %v330_v18, %v330_v18  ;;  %v520_v38 = vshll.u32 %v2928_v17, 16  ;;  %v2378_v41 = vld [vmem:[%s2766_s17 + $0x8c] sm:$0x1] }
  0x43   : > { %v506_v42 = vshrl.u32 %v2922_v1, 16  ;;  %v510_v44 = vrot.slane %v508_v23, 1  ;;  %v420_v47 = vsel %vm348_vm0, %v415_v24, %v419_v25  ;;  %v518_v48 = vshrl.u32 %v2928_v17, 16 }
  0x44   : > { %v1471_v50 = vpack.c.b16 %v1455_v29, %v1455_v29  ;;  %v1556_v51 = vshll.u32 %v2935_v28, 16  ;;  %v1552_v54 = vsel %vm348_vm0, %v1547_v26, %v1551_v31  ;;  %v1540_v57 = vsel %vm348_vm0, %v1535_v32, %v1539_v34 }
  0x45   : > { %v513_v58 = vshll.u32 %v345_v36, 16  ;;  %v758_v60 = vunpack.c.l.b16 %v2378_v41  ;;  %v522_v62 = vrot.slane %v520_v38, 1  ;;  %v525_v63 = vshll.u32 %v346_v37, 16 }
  0x46   : > { %547 = vrot.lane.b32.xlu2 %v396_v3, %s2730_s18  ;;  %v2478_v3 = vor.u32 %v2684_v46, %v2477_v45  ;;  %v511_v4 = vor.u32 %v510_v44, %v506_v42  ;;  %v759_v7 = vunpack.c.l.b16 %v2381_v39  ;;  %v1554_v8 = vshrl.u32 %v2935_v28, 16 }
  0x47   : > { %v2498_v10 = vor.u32 %v2667_v53, %v2497_v52  ;;  %v1558_v11 = vrot.slane %v1556_v51, 1  ;;  %v1561_v13 = vshll.u32 %v1471_v50, 16  ;;  %v331_v18 = vunpack.c.l.b16 %v219_v61 }
  0x48   : > { %v774_v23 = vpack.c.b16 %v758_v60, %v758_v60  ;;  %v848_v24 = vshll.u32 %v2961_v59, 16  ;;  %v523_v26 = vor.u32 %v522_v62, %v518_v48  ;;  %v527_v29 = vrot.slane %v525_v63, 1 }
  0x49   : > { %549 = vrot.lane.b32.xlu0 %v408_v19, %s2730_s18  ;;  %v1084_v19 = vsel %vm1082_vm1, %v2478_v3, 0  ;;  %v1213_v25 = vsel %vm1082_vm1, %v2498_v10, 0  ;;  %v775_v31 = vpack.c.b16 %v759_v7, %v759_v7  ;;  %v860_v32 = vshll.u32 %v2965_v6, 16  ;;  %v195_v7 = vld [vmem:[%s2766_s17 + $0xb0] sm:$0x1] }
  0x4a   : > { %985 = vrot.lane.b32.xlu1 %v844_v22, %s2730_s18  ;;  %v515_v22 = vrot.slane %v513_v58, 1  ;;  %2702 = vmatpush.bf16.msra.mxu3 %v1084_v19  ;;  %v1559_v34 = vor.u32 %v1558_v11, %v1554_v8  ;;  %v1563_v36 = vrot.slane %v1561_v13, 1  ;;  %v347_v37 = vpack.c.b16 %v331_v18, %v331_v18  ;;  %v2996_v8 = vld [vmem:[%s2766_s17 + $0xa8] sm:$0xff]  ;;  %v2384_v18 = vld [vmem:[%s2766_s17 + $0xbc] sm:$0x1] }
  0x4b   : > { %1093 = vmatpush.bf16.msra.mxu0 %v1084_v19  ;;  %1222 = vmatpush.bf16.msra.mxu1 %v1213_v25  ;;  %v532_v38 = vshll.u32 %v2970_v14, 16  ;;  %v846_v41 = vshrl.u32 %v2961_v59, 16  ;;  %v850_v42 = vrot.slane %v848_v24, 1  ;;  %v853_v44 = vshll.u32 %v774_v23, 16  ;;  %v3002_v24 = vld [vmem:[%s2766_s17 + $0xb4] sm:$0xff] }
  0x4c   : > { %v516_v39 = vsel %vm348_vm0, %v511_v4, %v515_v22  ;;  %v528_v45 = vsel %vm348_vm0, %v523_v26, %v527_v29  ;;  %v858_v46 = vshrl.u32 %v2965_v6, 16  ;;  %v865_v48 = vshll.u32 %v775_v31, 16 }
  0x4d   : > { %v1564_v50 = vsel %vm348_vm0, %v1559_v34, %v1563_v36  ;;  %v530_v51 = vshrl.u32 %v2970_v14, 16  ;;  %v534_v52 = vrot.slane %v532_v38, 1  ;;  %v537_v53 = vshll.u32 %v347_v37, 16  ;;  %v192_v34 = vld [vmem:[%s2766_s17 + $0x98] sm:$0x1] }
  0x4e   : > { %1681 = vrot.lane.b32.xlu2 %v1540_v57, %s2730_s18  ;;  %2703 = vmatpush.bf16.msrb.mxu3 %v1213_v25  ;;  %v855_v57 = vrot.slane %v853_v44, 1  ;;  %v867_v60 = vrot.slane %v865_v48, 1  ;;  %v323_v10 = vunpack.c.l.b16 %v195_v7  ;;  %v436_v13 = vshll.u32 %v2996_v8, 16  ;;  %v2701_v44 = vld [vmem:[%s3560_s1 + $0x10] sm:$0x30] }
  0x4f   : > { %v535_v61 = vor.u32 %v534_v52, %v530_v51  ;;  %v539_v62 = vrot.slane %v537_v53, 1  ;;  %v434_v19 = vshrl.u32 %v2996_v8, 16  ;;  %v760_v25 = vunpack.c.l.b16 %v2384_v18  ;;  %v2553_v52 = vld [vmem:[%s2766_s17 + $0x140] sm:$0x1] }
  0x50   : > { %v339_v11 = vpack.c.b16 %v323_v10, %v323_v10  ;;  %v438_v22 = vrot.slane %v436_v13, 1  ;;  %v870_v37 = vshrl.u32 %v3002_v24, 16  ;;  %v198_v10 = vld [vmem:[%s2766_s17 + $0xc8] sm:$0x1]  ;;  %v3034_v18 = vld [vmem:[%s2766_s17 + $0xc0] sm:$0xff] }
  0x51   : > { %1683 = vrot.lane.b32.xlu0 %v1552_v54, %s2730_s18  ;;  %v851_v54 = vor.u32 %v850_v42, %v846_v41  ;;  %v540_v4 = vsel %vm348_vm0, %v535_v61, %v539_v62  ;;  %v776_v31 = vpack.c.b16 %v760_v25, %v760_v25  ;;  %v3009_v41 = vld [vmem:[%s2766_s17 + $0x90] sm:$0xff]  ;;  %v1461_v62 = vunpack.c.l.b16 %v2553_v52 }
  0x52   : > { %551 = vrot.lane.b32.xlu1 %v420_v47, %s2730_s18  ;;  %v862_v47 = vrot.slane %v860_v32, 1  ;;  %v441_v23 = vshll.u32 %v339_v11, 16  ;;  %v439_v26 = vor.u32 %v438_v22, %v434_v19  ;;  %v872_v32 = vshll.u32 %v3002_v24, 16  ;;  %v2631_v42 = vld [vmem:[%s3560_s1 + $0x10] sm:$0xf] }
  0x53   : > { %v856_v63 = vsel %vm348_vm0, %v851_v54, %v855_v57  ;;  %v2632_v48 = vor.u32 %v2701_v44, %v2631_v42  ;;  %v422_v57 = vshrl.u32 %v3009_v41, 16  ;;  %v1477_v7 = vpack.c.b16 %v1461_v62, %v1461_v62  ;;  %v2538_v44 = vld [vmem:[%s2766_s17 + $0xc8] sm:$0x1]  ;;  %v3054_v52 = vld [vmem:[%s2766_s17 + $0x150] sm:$0xff] }
  0x54   : > { %v863_v58 = vor.u32 %v862_v47, %v858_v46  ;;  %v443_v29 = vrot.slane %v441_v23, 1  ;;  %v874_v38 = vrot.slane %v872_v32, 1  ;;  %v324_v19 = vunpack.c.l.b16 %v198_v10 }
  0x55   : > { %v3022_v54 = vsel %vm1082_vm1, %v2632_v48, 0  ;;  %v1633_v23 = vshll.u32 %v1477_v7, 16  ;;  %v446_v32 = vshrl.u32 %v3034_v18, 16  ;;  %v1456_v48 = vunpack.c.l.b16 %v2538_v44 }
  0x56   : > { %567 = vrot.lane.b32.xlu2 %v516_v39, %s2730_s18  ;;  %v868_v3 = vsel %vm348_vm0, %v863_v58, %v867_v60  ;;  %v444_v36 = vsel %vm348_vm0, %v439_v26, %v443_v29  ;;  %v877_v39 = vshll.u32 %v776_v31, 16  ;;  %v875_v46 = vor.u32 %v874_v38, %v870_v37  ;;  %v3026_v60 = vld [vmem:[%s2766_s17 + $0x138] sm:$0xff]  ;;  %1787 = vmatpush.bf16.msra.mxu2 %v3022_v54 }
  0x57   : > { %v1626_v11 = vshrl.u32 %v3026_v60, 16  ;;  %v340_v26 = vpack.c.b16 %v324_v19, %v324_v19  ;;  %v448_v29 = vshll.u32 %v3034_v18, 16  ;;  %v1635_v31 = vrot.slane %v1633_v23, 1 }
  0x58   : > { %v879_v47 = vrot.slane %v877_v39, 1 }
  0x59   : > { %569 = vrot.lane.b32.xlu0 %v528_v45, %s2730_s18  ;;  %v322_v45 = vunpack.c.l.b16 %v192_v34  ;;  %v450_v34 = vrot.slane %v448_v29, 1 }
  0x5a   : > { %1685 = vrot.lane.b32.xlu1 %v1564_v50, %s2730_s18  ;;  %v424_v50 = vshll.u32 %v3009_v41, 16  ;;  %v880_v53 = vsel %vm348_vm0, %v875_v46, %v879_v47  ;;  %v2556_v46 = vld [vmem:[%s2766_s17 + $0x158] sm:$0x1]  ;;  %v3048_v47 = vld [vmem:[%s2766_s17 + $0xc0] sm:$0xff] }
  0x5b   : > { %v338_v51 = vpack.c.b16 %v322_v45, %v322_v45  ;;  %v451_v38 = vor.u32 %v450_v34, %v446_v32  ;;  %v2544_v45 = vld [vmem:[%s2766_s17 + $0xf8] sm:$0x1] }
  0x5c   : > { %v426_v58 = vrot.slane %v424_v50, 1  ;;  %v3051_v50 = vld [vmem:[%s2766_s17 + $0xf0] sm:$0xff] }
  0x5d   : > { %v429_v61 = vshll.u32 %v338_v51, 16  ;;  %v1458_v51 = vunpack.c.l.b16 %v2544_v45  ;;  %v1592_v62 = vshll.u32 %v3051_v50, 16  ;;  %v3069_v45 = vld [vmem:[%s2766_s17 + $0xe4] sm:$0xff] }
  0x5e   : > { %987 = vrot.lane.b32.xlu2 %v856_v63, %s2730_s18  ;;  %v427_v63 = vor.u32 %v426_v58, %v422_v57  ;;  %v1472_v57 = vpack.c.b16 %v1456_v48, %v1456_v48  ;;  %v1568_v58 = vshll.u32 %v3048_v47, 16 }
  0x60   : > { %v1570_v7 = vrot.slane %v1568_v58, 1  ;;  %v1573_v10 = vshll.u32 %v1472_v57, 16 }
  0x61   : > { %989 = vrot.lane.b32.xlu0 %v868_v3, %s2730_s18  ;;  %v1628_v3 = vshll.u32 %v3026_v60, 16 }
  0x62   : > { %571 = vrot.lane.b32.xlu1 %v540_v4, %s2730_s18  ;;  %v431_v4 = vrot.slane %v429_v61, 1  ;;  %v1474_v61 = vpack.c.b16 %v1458_v51, %v1458_v51 }
  0x63   : > { %v1630_v13 = vrot.slane %v1628_v3, 1  ;;  %v1640_v3 = vshll.u32 %v3054_v52, 16 }
  0x64   : > { %v432_v22 = vsel %vm348_vm0, %v427_v63, %v431_v4  ;;  %v1566_v4 = vshrl.u32 %v3048_v47, 16  ;;  %v1597_v19 = vshll.u32 %v1474_v61, 16 }
  0x65   : > { %v1631_v25 = vor.u32 %v1630_v13, %v1626_v11  ;;  %v1590_v11 = vshrl.u32 %v3051_v50, 16  ;;  %v1594_v13 = vrot.slane %v1592_v62, 1  ;;  %v1642_v23 = vrot.slane %v1640_v3, 1 }
  0x66   : > { %553 = vrot.lane.b32.xlu2 %v432_v22, %s2730_s18  ;;  %v1638_v22 = vshrl.u32 %v3054_v52, 16  ;;  %v1599_v32 = vrot.slane %v1597_v19, 1  ;;  %v896_v3 = vshll.u32 %v3069_v45, 16 }
  0x67   : > { %v1636_v37 = vsel %vm348_vm0, %v1631_v25, %v1635_v31  ;;  %v1571_v25 = vor.u32 %v1570_v7, %v1566_v4  ;;  %v1595_v31 = vor.u32 %v1594_v13, %v1590_v11 }
  0x68   : > { %v1643_v34 = vor.u32 %v1642_v23, %v1638_v22  ;;  %v898_v13 = vrot.slane %v896_v3, 1 }
  0x69   : > { %555 = vrot.lane.b32.xlu0 %v444_v36, %s2730_s18  ;;  %v453_v36 = vshll.u32 %v340_v26, 16  ;;  %v1575_v26 = vrot.slane %v1573_v10, 1  ;;  %v1600_v48 = vsel %vm348_vm0, %v1595_v31, %v1599_v32  ;;  %v3091_v32 = vld [vmem:[%s2766_s17 + $0xcc] sm:$0xff] }
  0x6a   : > { %991 = vrot.lane.b32.xlu1 %v880_v53, %s2730_s18  ;;  %v1462_v53 = vunpack.c.l.b16 %v2556_v46 }
  0x6b   : > { %v455_v39 = vrot.slane %v453_v36, 1  ;;  %v2541_v36 = vld [vmem:[%s2766_s17 + $0xe0] sm:$0x1] }
  0x6c   : > { %v1478_v63 = vpack.c.b16 %v1462_v53, %v1462_v53  ;;  %v1457_v44 = vunpack.c.l.b16 %v2541_v36  ;;  %v3094_v36 = vld [vmem:[%s2766_s17 + $0x108] sm:$0xff] }
  0x6d   : > { %v456_v42 = vsel %vm348_vm0, %v451_v38, %v455_v39  ;;  %v1576_v38 = vsel %vm348_vm0, %v1571_v25, %v1575_v26 }
  0x6e   : > { %v1645_v29 = vshll.u32 %v1478_v63, 16  ;;  %1687 = vrot.lane.b32.xlu2 %v1576_v38, %s2730_s18  ;;  %v1473_v57 = vpack.c.b16 %v1457_v44, %v1457_v44 }
  0x70   : > { %v1647_v39 = vrot.slane %v1645_v29, 1  ;;  %v1585_v11 = vshll.u32 %v1473_v57, 16  ;;  %v2387_v29 = vld [vmem:[%s2766_s17 + $0xd4] sm:$0x1] }
  0x71   : > { %1697 = vrot.lane.b32.xlu0 %v1636_v37, %s2730_s18  ;;  %v2390_v37 = vld [vmem:[%s2766_s17 + $0xec] sm:$0x1] }
  0x72   : > { %557 = vrot.lane.b32.xlu1 %v456_v42, %s2730_s18  ;;  %v3066_v42 = vld [vmem:[%s2766_s17 + $0xd8] sm:$0xff]  ;;  %v762_v46 = vunpack.c.l.b16 %v2390_v37  ;;  %v1648_v53 = vsel %vm348_vm0, %v1643_v34, %v1647_v39  ;;  %v1587_v23 = vrot.slane %v1585_v11, 1  ;;  %v761_v34 = vunpack.c.l.b16 %v2387_v29 }
  0x73   : > { %v1580_v58 = vshll.u32 %v3066_v42, 16  ;;  %v1578_v7 = vshrl.u32 %v3066_v42, 16 }
  0x74   : > { %v778_v61 = vpack.c.b16 %v762_v46, %v762_v46  ;;  %v777_v44 = vpack.c.b16 %v761_v34, %v761_v34  ;;  %v884_v46 = vshll.u32 %v3091_v32, 16 }
  0x75   : > { %v1582_v10 = vrot.slane %v1580_v58, 1  ;;  %v204_v58 = vld [vmem:[%s2766_s17 + $0xf8] sm:$0x1] }
  0x76   : > { %v901_v19 = vshll.u32 %v778_v61, 16  ;;  %v889_v3 = vshll.u32 %v777_v44, 16  ;;  %v326_v11 = vunpack.c.l.b16 %v204_v58 }
  0x77   : > { %v1583_v22 = vor.u32 %v1582_v10, %v1578_v7  ;;  %v1602_v7 = vshrl.u32 %v3094_v36, 16 }
  0x78   : > { %v903_v26 = vrot.slane %v901_v19, 1 }
  0x79   : > { %1691 = vrot.lane.b32.xlu0 %v1600_v48, %s2730_s18  ;;  %v1588_v31 = vsel %vm348_vm0, %v1583_v22, %v1587_v23 }
  0x7a   : > { %1699 = vrot.lane.b32.xlu1 %v1648_v53, %s2730_s18  ;;  %1689 = vrot.lane.b32.xlu2 %v1588_v31, %s2730_s18  ;;  %v3118_v31 = vld [vmem:[%s2766_s17 + $0xfc] sm:$0xff] }
  0x80   : > { %v1004_v38 = vpop.permute.xlu2 %1003 }
  0x8b   : > { %v1002_v51 = vpop.permute.xlu0 %1001 }
  0x8c   : > { %v542_v62 = vpop.permute.xlu1 %541  ;;  %v1034_v63 = vsel %vm573_vm2, %v2769_v0, %v1002_v51  ;;  %v894_v0 = vshrl.u32 %v3069_v45, 16  ;;  %v1604_v51 = vshll.u32 %v3094_v36, 16 }
  0x8d   : > { %2491 = vmatmul.msk.bf16.vlgmr.msra.gmra.mxu3 %vm1049_vm3, %v1034_v63  ;;  %v575_v4 = vsel %vm573_vm2, %v2773_v2, %v542_v62  ;;  %v2547_v2 = vld [vmem:[%s2766_s17 + $0x110] sm:$0x1]  ;;  %v882_v62 = vshrl.u32 %v3091_v32, 16  ;;  %v886_v63 = vrot.slane %v884_v46, 1 }
  0x8e   : > { %2499 = vmatmul.msk.bf16.vlgmr.msra.gmra.mxu1 %vm1049_vm3, %v575_v4  ;;  %2704 = vmatpush.bf16.msra.mxu3 %v3022_v54  ;;  %v899_v25 = vor.u32 %v898_v13, %v894_v0  ;;  %v1459_v37 = vunpack.c.l.b16 %v2547_v2  ;;  %v3109_v4 = vld [vmem:[%s2766_s17 + $0xf0] sm:$0xff]  ;;  %v1606_v10 = vrot.slane %v1604_v51, 1  ;;  %v891_v13 = vrot.slane %v889_v3, 1 }
  0x8f   : > { %v887_v0 = vor.u32 %v886_v63, %v882_v62  ;;  %v470_v19 = vshrl.u32 %v3109_v4, 16  ;;  %v908_v51 = vshll.u32 %v3118_v31, 16  ;;  %v3132_v63 = vld [vmem:[%s2766_s17 + $0xd8] sm:$0xff] }
  0x90   : > { %v904_v54 = vsel %vm348_vm0, %v899_v25, %v903_v26  ;;  %v1475_v48 = vpack.c.b16 %v1459_v37, %v1459_v37  ;;  %v1607_v22 = vor.u32 %v1606_v10, %v1602_v7  ;;  %v342_v25 = vpack.c.b16 %v326_v11, %v326_v11  ;;  %v2393_v26 = vld [vmem:[%s2766_s17 + $0x104] sm:$0x1] }
  0x91   : > { %995 = vrot.lane.b32.xlu0 %v904_v54, %s2730_s18  ;;  %v892_v29 = vsel %vm348_vm0, %v887_v0, %v891_v13  ;;  %v763_v34 = vunpack.c.l.b16 %v2393_v26  ;;  %v1036_v37 = vsel %vm573_vm2, %v2809_v56, %v1004_v38  ;;  %v906_v56 = vshrl.u32 %v3118_v31, 16 }
  0x92   : > { %993 = vrot.lane.b32.xlu2 %v892_v29, %s2730_s18  ;;  %v910_v38 = vrot.slane %v908_v51, 1  ;;  %v460_v11 = vshll.u32 %v3132_v63, 16 }
  0x93   : > { %v1674_v39 = vpop.permute.xlu0 %1673 }
  0x94   : > { %v978_v53 = vpop.permute.xlu1 %977  ;;  %v1706_v57 = vsel %vm573_vm2, %v2777_v5, %v1674_v39  ;;  %v1609_v5 = vshll.u32 %v1475_v48, 16  ;;  %v477_v39 = vshll.u32 %v342_v25, 16  ;;  %v779_v48 = vpack.c.b16 %v763_v34, %v763_v34 }
  0x95   : > { %2633 = vmatmul.msk.bf16.vlgmr.msra.gmra.mxu2 %vm1049_vm3, %v1706_v57  ;;  %v1010_v61 = vsel %vm573_vm2, %v2787_v16, %v978_v53  ;;  %v472_v16 = vshll.u32 %v3109_v4, 16  ;;  %v1676_v57 = vpop.permute.xlu2 %1675 }
  0x96   : > { %2479 = vmatmul.msk.bf16.vlgmr.msra.gmra.mxu0 %vm1049_vm3, %v1010_v61  ;;  %v1611_v23 = vrot.slane %v1609_v5, 1  ;;  %v479_v58 = vrot.slane %v477_v39, 1  ;;  %v201_v61 = vld [vmem:[%s2766_s17 + $0xe0] sm:$0x1]  ;;  %v913_v62 = vshll.u32 %v779_v48, 16  ;;  %v458_v5 = vshrl.u32 %v3132_v63, 16 }
  0x97   : > { %v474_v2 = vrot.slane %v472_v16, 1  ;;  %v325_v7 = vunpack.c.l.b16 %v201_v61  ;;  %v1708_v26 = vsel %vm573_vm2, %v2821_v15, %v1676_v57  ;;  %v3154_v15 = vld [vmem:[%s2766_s17 + $0x108] sm:$0xff] }
  0x98   : > { %v1612_v54 = vsel %vm348_vm0, %v1607_v22, %v1611_v23  ;;  %v915_v10 = vrot.slane %v913_v62, 1  ;;  %v462_v22 = vrot.slane %v460_v11, 1  ;;  %v3142_v23 = vld [vmem:[%s2766_s17 + $0x180] sm:$0xff]  ;;  %v482_v62 = vshrl.u32 %v3154_v15, 16 }
  0x99   : > { %1693 = vrot.lane.b32.xlu1 %v1612_v54, %s2730_s18  ;;  %v475_v46 = vor.u32 %v474_v2, %v470_v19  ;;  %v341_v13 = vpack.c.b16 %v325_v7, %v325_v7  ;;  %v2562_v19 = vld [vmem:[%s2766_s17 + $0x188] sm:$0x1]  ;;  %v1664_v39 = vshll.u32 %v3142_v23, 16  ;;  %v1662_v48 = vshrl.u32 %v3142_v23, 16 }
  0x9a   : > { %v1464_v25 = vunpack.c.l.b16 %v2562_v19  ;;  %v2718_v2 = vld [vmem:[%s2766_s17 + $0x24] sm:$0xff] }
  0x9b   : > { %v544_v44 = vpop.permute.xlu0 %543  ;;  %v480_v3 = vsel %vm348_vm0, %v475_v46, %v479_v58  ;;  %v465_v29 = vshll.u32 %v341_v13, 16  ;;  %v207_v46 = vld [vmem:[%s2766_s17 + $0x110] sm:$0x1]  ;;  %v1666_v51 = vrot.slane %v1664_v39, 1 }
  0x9c   : > { %v577_v53 = vsel %vm573_vm2, %v2793_v30, %v544_v44  ;;  %561 = vrot.lane.b32.xlu0 %v480_v3, %s2730_s18  ;;  %v911_v30 = vor.u32 %v910_v38, %v906_v56  ;;  %v980_v0 = vpop.permute.xlu1 %979  ;;  %v1480_v54 = vpack.c.b16 %v1464_v25, %v1464_v25  ;;  %v327_v61 = vunpack.c.l.b16 %v207_v46 }
  0x9d   : > { %2492 = vmatmul.msk.bf16.gmra.mxu3 %vm1049_vm3, %v1036_v37  ;;  %v1012_v34 = vsel %vm573_vm2, %v2718_v2, %v980_v0  ;;  %v463_v37 = vor.u32 %v462_v22, %v458_v5  ;;  %v467_v44 = vrot.slane %v465_v29, 1  ;;  %v1006_v57 = vpop.permute.xlu2 %1005  ;;  %v1667_v56 = vor.u32 %v1666_v51, %v1662_v48  ;;  %v3164_v0 = vld [vmem:[%s2766_s17 + $0x168] sm:$0xff]  ;;  %v2719_v22 = vld [vmem:[%s2766_s17 + $0x30] sm:$0xff] }
  0x9e   : > { %2500 = vmatmul.msk.bf16.gmra.mxu1 %vm1049_vm3, %v577_v53  ;;  %v916_v16 = vsel %vm348_vm0, %v911_v30, %v915_v10  ;;  %v1669_v53 = vshll.u32 %v1480_v54, 16  ;;  %v484_v3 = vshll.u32 %v3154_v15, 16  ;;  %v343_v30 = vpack.c.b16 %v327_v61, %v327_v61  ;;  %v2559_v10 = vld [vmem:[%s2766_s17 + $0x170] sm:$0x1] }
  0x9f   : > { %v468_v58 = vsel %vm348_vm0, %v463_v37, %v467_v44  ;;  %v1463_v13 = vunpack.c.l.b16 %v2559_v10  ;;  %v1038_v19 = vsel %vm573_vm2, %v2831_v35, %v1006_v57  ;;  %v1652_v2 = vshll.u32 %v3164_v0, 16  ;;  %v2720_v57 = vld [vmem:[%s2766_s17 + $0x48] sm:$0xff] }
  0xa0   : > { %559 = vrot.lane.b32.xlu2 %v468_v58, %s2730_s18  ;;  %v1671_v38 = vrot.slane %v1669_v53, 1  ;;  %v486_v11 = vrot.slane %v484_v3, 1  ;;  %v1650_v54 = vshrl.u32 %v3164_v0, 16  ;;  %v3187_v3 = vld [vmem:[%s2766_s17 + $0x120] sm:$0xff] }
  0xa1   : > { %997 = vrot.lane.b32.xlu1 %v916_v16, %s2730_s18  ;;  %v489_v16 = vshll.u32 %v343_v30, 16  ;;  %v1479_v29 = vpack.c.b16 %v1463_v13, %v1463_v13  ;;  %v1654_v39 = vrot.slane %v1652_v2, 1  ;;  %v1614_v13 = vshrl.u32 %v3187_v3, 16 }
  0xa2   : > { %v1672_v5 = vsel %vm348_vm0, %v1667_v56, %v1671_v38 }
  0xa3   : > { %v491_v37 = vrot.slane %v489_v16, 1  ;;  %v1657_v44 = vshll.u32 %v1479_v29, 16  ;;  %v1655_v46 = vor.u32 %v1654_v39, %v1650_v54 }
  0xa4   : > { %v546_v7 = vpop.permute.xlu1 %545  ;;  %1703 = vrot.lane.b32.xlu0 %v1672_v5, %s2730_s18  ;;  %v1616_v5 = vshll.u32 %v3187_v3, 16 }
  0xa5   : > { %2634 = vmatmul.msk.bf16.gmra.mxu2 %vm1049_vm3, %v1708_v26  ;;  %v579_v25 = vsel %vm573_vm2, %v2719_v22, %v546_v7  ;;  %v487_v26 = vor.u32 %v486_v11, %v482_v62  ;;  %v1659_v48 = vrot.slane %v1657_v44, 1  ;;  %v982_v51 = vpop.permute.xlu2 %981  ;;  %v2550_v62 = vld [vmem:[%s2766_s17 + $0x128] sm:$0x1] }
  0xa6   : > { %2480 = vmatmul.msk.bf16.gmra.mxu0 %vm1049_vm3, %v1012_v34  ;;  %v1678_v34 = vpop.permute.xlu0 %1677  ;;  %v1014_v61 = vsel %vm573_vm2, %v2852_v9, %v982_v51  ;;  %v1460_v7 = vunpack.c.l.b16 %v2550_v62 }
  0xa7   : > { %v492_v35 = vsel %vm348_vm0, %v487_v26, %v491_v37  ;;  %v1660_v53 = vsel %vm348_vm0, %v1655_v46, %v1659_v48  ;;  %v1710_v58 = vsel %vm573_vm2, %v2720_v57, %v1678_v34  ;;  %v2721_v34 = vld [vmem:[%s2766_s17 + $0x60] sm:$0xff] }
  0xa8   : > { %1701 = vrot.lane.b32.xlu2 %v1660_v53, %s2730_s18  ;;  %v1476_v9 = vpack.c.b16 %v1460_v7, %v1460_v7 }
  0xa9   : > { %563 = vrot.lane.b32.xlu1 %v492_v35, %s2730_s18 }
  0xaa   : > { %v1621_v16 = vshll.u32 %v1476_v9, 16 }
  0xac   : > { %v1680_v11 = vpop.permute.xlu1 %1679 }
  0xad   : > { %2493 = vmatmul.msk.bf16.gmra.mxu3 %vm1049_vm3, %v1038_v19  ;;  %v548_v38 = vpop.permute.xlu2 %547  ;;  %v1618_v19 = vrot.slane %v1616_v5, 1  ;;  %v1712_v37 = vsel %vm573_vm2, %v2721_v34, %v1680_v11 }
  0xae   : > { %2501 = vmatmul.msk.bf16.gmra.mxu1 %vm1049_vm3, %v579_v25  ;;  %v1008_v56 = vpop.permute.xlu0 %1007  ;;  %v581_v10 = vsel %vm573_vm2, %v2878_v49, %v548_v38  ;;  %v1623_v25 = vrot.slane %v1621_v16, 1  ;;  %v3200_v49 = vld [vmem:[%s2766_s17 + $0x114] sm:$0xff] }
  0xaf   : > { %v1040_v30 = vsel %vm573_vm2, %v2835_v40, %v1008_v56  ;;  %v1619_v22 = vor.u32 %v1618_v19, %v1614_v13  ;;  %v2396_v40 = vld [vmem:[%s2766_s17 + $0x11c] sm:$0x1]  ;;  %v920_v44 = vshll.u32 %v3200_v49, 16  ;;  %v918_v35 = vshrl.u32 %v3200_v49, 16 }
  0xb0   : > { %v764_v2 = vunpack.c.l.b16 %v2396_v40 }
  0xb1   : > { %v1624_v29 = vsel %vm348_vm0, %v1619_v22, %v1623_v25  ;;  %v922_v46 = vrot.slane %v920_v44, 1 }
  0xb2   : > { %1695 = vrot.lane.b32.xlu2 %v1624_v29, %s2730_s18  ;;  %v780_v39 = vpack.c.b16 %v764_v2, %v764_v2 }
  0xb3   : > { %v923_v53 = vor.u32 %v922_v46, %v918_v35 }
  0xb4   : > { %v566_v48 = vpop.permute.xlu1 %565  ;;  %v925_v51 = vshll.u32 %v780_v39, 16 }
  0xb5   : > { %2635 = vmatmul.msk.bf16.gmra.mxu2 %vm1049_vm3, %v1710_v58  ;;  %v1682_v38 = vpop.permute.xlu2 %1681 }
  0xb6   : > { %2481 = vmatmul.msk.bf16.gmra.mxu0 %vm1049_vm3, %v1014_v61  ;;  %v984_v26 = vpop.permute.xlu0 %983  ;;  %v927_v58 = vrot.slane %v925_v51, 1  ;;  %v599_v61 = vsel %vm573_vm2, %v2861_v21, %v566_v48  ;;  %v1714_v7 = vsel %vm573_vm2, %v2906_v33, %v1682_v38  ;;  %v3296_v51 = vld [vmem:[%s3561_s2] ss:$0 sm:$0xff] }
  0xb7   : > { %v1016_v54 = vsel %vm573_vm2, %v2855_v12, %v984_v26 }
  0xb8   : > { %v928_v12 = vsel %vm348_vm0, %v923_v53, %v927_v58 }
  0xba   : > { %999 = vrot.lane.b32.xlu2 %v928_v12, %s2730_s18 }
  0xbc   : > { %v986_v62 = vpop.permute.xlu1 %985 }
  0xbd   : > { %2494 = vmatmul.msk.bf16.gmra.mxu3 %vm1049_vm3, %v1040_v30  ;;  %v1018_v30 = vsel %vm573_vm2, %v2883_v55, %v986_v62  ;;  %v568_v21 = vpop.permute.xlu2 %567 }
  0xbe   : > { %2502 = vmatmul.msk.bf16.gmra.mxu1 %vm1049_vm3, %v581_v10  ;;  %v550_v57 = vpop.permute.xlu0 %549  ;;  %v601_v10 = vsel %vm573_vm2, %v2922_v1, %v568_v21 }
  0xbf   : > { %v583_v56 = vsel %vm573_vm2, %v2872_v43, %v550_v57 }
  0xc4   : > { %v552_v43 = vpop.permute.xlu1 %551 }
  0xc5   : > { %2636 = vmatmul.msk.bf16.gmra.mxu2 %vm1049_vm3, %v1712_v37  ;;  %v585_v9 = vsel %vm573_vm2, %v2896_v20, %v552_v43  ;;  %v988_v33 = vpop.permute.xlu2 %987  ;;  %v2731_v37 = vmov 0.0|0.0  }
  0xc6   : > { %2482 = vmatmul.msk.bf16.gmra.mxu0 %vm1049_vm3, %v1016_v54  ;;  %v1684_v5 = vpop.permute.xlu0 %1683  ;;  %v1020_v11 = vsel %vm573_vm2, %v2961_v59, %v988_v33  ;;  %2180 = vst.msk [vmem:[%s3267_s7] sm:$0xf] %vm2179_vm4, %v2731_v37 }
  0xc7   : > { %v1716_v55 = vsel %vm573_vm2, %v2901_v27, %v1684_v5  ;;  %2181 = vst.msk [vmem:[%s3267_s7 + $0x4] sm:$0xf] %vm2179_vm4, %v2731_v37 }
  0xc8   : > { %2183 = vst.msk [vmem:[%s3267_s7 + $0x8] sm:$0x1] %vm2182_vm5, %v2731_v37 }
  0xc9   : > { %2232 = vst.msk [vmem:[%s3267_s7 + $0xcc] sm:$0xf] %vm2179_vm4, %v2731_v37 }
  0xca   : > { %2233 = vst.msk [vmem:[%s3267_s7 + $0xd0] sm:$0xf] %vm2179_vm4, %v2731_v37 }
  0xcb   : > { %2234 = vst.msk [vmem:[%s3267_s7 + $0xd4] sm:$0x1] %vm2182_vm5, %v2731_v37 }
  0xcc   : > { %v1686_v16 = vpop.permute.xlu1 %1685 }
  0xcd   : > { %2511 = vmatmul.msk.bf16.vlgmr.msrb.gmra.mxu3 %vm1049_vm3, %v599_v61  ;;  %v554_v13 = vpop.permute.xlu2 %553  ;;  %v1718_v59 = vsel %vm573_vm2, %v2935_v28, %v1686_v16 }
  0xce   : > { %2503 = vmatmul.msk.bf16.gmra.mxu1 %vm1049_vm3, %v583_v56  ;;  %v570_v1 = vpop.permute.xlu0 %569  ;;  %v587_v19 = vsel %vm573_vm2, %v3009_v41, %v554_v13 }
  0xcf   : > { %v603_v20 = vsel %vm573_vm2, %v2928_v17, %v570_v1 }
  0xd4   : > { %v572_v17 = vpop.permute.xlu1 %571 }
  0xd5   : > { %2637 = vmatmul.msk.bf16.gmra.mxu2 %vm1049_vm3, %v1714_v7  ;;  %v605_v41 = vsel %vm573_vm2, %v2970_v14, %v572_v17  ;;  %v1688_v40 = vpop.permute.xlu2 %1687 }
  0xd6   : > { %2483 = vmatmul.msk.bf16.gmra.mxu0 %vm1049_vm3, %v1018_v30  ;;  %v990_v27 = vpop.permute.xlu0 %989 }
  0xd7   : > { %v1022_v22 = vsel %vm573_vm2, %v2965_v6, %v990_v27  ;;  %v1720_v6 = vsel %vm573_vm2, %v3048_v47, %v1688_v40 }
  0xdc   : > { %v992_v28 = vpop.permute.xlu1 %991 }
  0xdd   : > { %2512 = vmatmul.msk.bf16.gmra.mxu3 %vm1049_vm3, %v601_v10  ;;  %v1024_v29 = vsel %vm573_vm2, %v3002_v24, %v992_v28  ;;  %v1690_v2 = vpop.permute.xlu2 %1689 }
  0xde   : > { %2504 = vmatmul.msk.bf16.gmra.mxu1 %vm1049_vm3, %v585_v9  ;;  %v556_v25 = vpop.permute.xlu0 %555  ;;  %v1722_v35 = vsel %vm573_vm2, %v3066_v42, %v1690_v2 }
  0xdf   : > { %v589_v26 = vsel %vm573_vm2, %v2996_v8, %v556_v25 }
  0xe4   : > { %v558_v8 = vpop.permute.xlu1 %557 }
  0xe5   : > { %2638 = vmatmul.msk.bf16.gmra.mxu2 %vm1049_vm3, %v1716_v55  ;;  %v591_v47 = vsel %vm573_vm2, %v3034_v18, %v558_v8 }
  0xe6   : > { %2484 = vmatmul.msk.bf16.gmra.mxu0 %vm1049_vm3, %v1020_v11  ;;  %v1698_v14 = vpop.permute.xlu0 %1697 }
  0xe7   : > { %v1730_v34 = vsel %vm573_vm2, %v3026_v60, %v1698_v14 }
  0xec   : > { %v994_v60 = vpop.permute.xlu2 %993  ;;  %v1700_v53 = vpop.permute.xlu1 %1699 }
  0xed   : > { %2513 = vmatmul.msk.bf16.gmra.mxu3 %vm1049_vm3, %v603_v20  ;;  %v1026_v44 = vsel %vm573_vm2, %v3091_v32, %v994_v60  ;;  %v1732_v42 = vsel %vm573_vm2, %v3054_v52, %v1700_v53 }
  0xee   : > { %2505 = vmatmul.msk.bf16.gmra.mxu1 %vm1049_vm3, %v587_v19  ;;  %v1692_v46 = vpop.permute.xlu0 %1691 }
  0xef   : > { %v1724_v13 = vsel %vm573_vm2, %v3051_v50, %v1692_v46 }
  0xf5   : > { %2639 = vmatmul.msk.bf16.gmra.mxu2 %vm1049_vm3, %v1718_v59 }
  0xf6   : > { %2485 = vmatmul.msk.bf16.gmra.mxu0 %vm1049_vm3, %v1022_v22 }
  0xfa   : > { %v560_v57 = vpop.permute.xlu2 %559 }
  0xfb   : > { %v593_v62 = vsel %vm573_vm2, %v3132_v63, %v560_v57 }
  0xfd   : > { %2514 = vmatmul.msk.bf16.gmra.mxu3 %vm1049_vm3, %v605_v41 }
  0xfe   : > { %2506 = vmatmul.msk.bf16.gmra.mxu1 %vm1049_vm3, %v589_v26 }
 0x102   : > { %v1702_v59 = vpop.permute.xlu2 %1701 }
 0x103   : > { %v996_v43 = vpop.permute.xlu0 %995  ;;  %v1734_v28 = vsel %vm573_vm2, %v3164_v0, %v1702_v59 }
 0x104   : > { %v1028_v11 = vsel %vm573_vm2, %v3069_v45, %v996_v43 }
 0x105   : > { %2640 = vmatmul.msk.bf16.gmra.mxu2 %vm1049_vm3, %v1720_v6 }
 0x106   : > { %2486 = vmatmul.msk.bf16.gmra.mxu0 %vm1049_vm3, %v1024_v29 }
 0x10b   : > { %v1224_v24 = vpop.f32.mrf.mxu1  ;;  %v1694_v16 = vpop.permute.xlu1 %1693 }
 0x10d   : > { %2645 = vmatmul.msk.bf16.vlgmr.msra.gmra.mxu3 %vm1049_vm3, %v1730_v34 }
 0x10e   : > { %2507 = vmatmul.msk.bf16.gmra.mxu1 %vm1049_vm3, %v591_v47  ;;  %v562_v22 = vpop.permute.xlu0 %561 }
 0x10f   : > { %v595_v14 = vsel %vm573_vm2, %v3109_v4, %v562_v22 }
 0x110   : > { %v3283_v54 = vpop.f32.mrf.mxu3 }
 0x113   : > { %v1095_v18 = vpop.f32.mrf.mxu0  ;;  %v1226_v39 = vpop.f32.mrf.mxu1 }
 0x114   : > { %v1225_v48 = vadd.f32 %v1224_v24, %v1095_v18  ;;  %v998_v0 = vpop.permute.xlu1 %997 }
 0x115   : > { %2641 = vmatmul.msk.bf16.gmra.mxu2 %vm1049_vm3, %v1722_v35  ;;  %v1030_v35 = vsel %vm573_vm2, %v3118_v31, %v998_v0 }
 0x116   : > { %2487 = vmatmul.msk.bf16.gmra.mxu0 %vm1049_vm3, %v1026_v44 }
 0x118   : > { %v3298_v58 = vpop.f32.mrf.mxu3  ;;  %v1789_v61 = vpop.f32.mrf.mxu2 }
 0x119   : > { %v1869_v32 = vadd.f32 %v1789_v61, %v1225_v48  ;;  %v1726_v48 = vsel %vm573_vm2, %v3094_v36, %v1694_v16  ;;  %v1696_v61 = vpop.permute.xlu2 %1695 }
 0x11a   : > { %v1728_v22 = vsel %vm573_vm2, %v3187_v3, %v1696_v61 }
 0x11b   : > { %v1905_v12 = vadd.f32 %v3296_v51, %v1869_v32  ;;  %v1097_v56 = vpop.f32.mrf.mxu0  ;;  %v1229_v38 = vpop.f32.mrf.mxu1 }
 0x11c   : > { %v1227_v21 = vadd.f32 %v1226_v39, %v1097_v56 }
 0x11d   : > { %v1937_v7 = vmax.f32 %v1905_v12, 0.0  ;;  %2646 = vmatmul.msk.bf16.gmra.mxu3 %vm1049_vm3, %v1732_v42  ;;  %v1704_v42 = vpop.permute.xlu0 %1703  ;;  %v564_v12 = vpop.permute.xlu1 %563 }
 0x11e   : > { %2508 = vmatmul.msk.bf16.gmra.mxu1 %vm1049_vm3, %v593_v62 }
 0x11f   : > { %v2002_v30 = vrot.slane %v1937_v7, 7 }
 0x120   : > { %v3307_v10 = vpop.f32.mrf.mxu3  ;;  %v1791_v52 = vpop.f32.mrf.mxu2 }
 0x121   : > { %v2098_v9 = vsel %vm2001_vm6, 0.0, %v2002_v30  ;;  %v1870_v5 = vadd.f32 %v1791_v52, %v1227_v21  ;;  %v1736_v21 = vsel %vm573_vm2, %v3142_v23, %v1704_v42  ;;  %v1000_v23 = vpop.permute.xlu2 %999 }
 0x122   : > { %v2131_v33 = vpack.c.bf16 %v2098_v9, %v2098_v9 }
 0x123   : > { %v1906_v55 = vadd.f32 %v3296_v51, %v1870_v5  ;;  %v1100_v63 = vpop.f32.mrf.mxu0  ;;  %v1231_v1 = vpop.f32.mrf.mxu1  ;;  %v597_v5 = vsel %vm573_vm2, %v3154_v15, %v564_v12 }
 0x124   : > { %2184 = vst.msk [vmem:[%s3267_s7 + $0xc] sm:$0xf] %vm2179_vm4, %v2131_v33  ;;  %v1230_v19 = vadd.f32 %v1229_v38, %v1100_v63 }
 0x125   : > { %v1938_v20 = vmax.f32 %v1906_v55, 0.0  ;;  %2642 = vmatmul.msk.bf16.gmra.mxu2 %vm1049_vm3, %v1724_v13 }
 0x126   : > { %2488 = vmatmul.msk.bf16.gmra.mxu0 %vm1049_vm3, %v1028_v11 }
 0x127   : > { %v2003_v27 = vrot.slane %v1938_v20, 7 }
 0x128   : > { %v3319_v17 = vpop.f32.mrf.mxu3  ;;  %v1794_v45 = vpop.f32.mrf.mxu2 }
 0x129   : > { %v2004_v25 = vsel %vm2001_vm6, %v2002_v30, %v2003_v27  ;;  %v2114_v41 = vsel %vm2001_vm6, %v2003_v27, 0.0  ;;  %v1871_v50 = vadd.f32 %v1794_v45, %v1230_v19  ;;  %v1032_v27 = vsel %vm573_vm2, %v3200_v49, %v1000_v23 }
 0x12a   : > { %v2132_v26 = vpack.c.bf16 %v2004_v25, %v2004_v25  ;;  %v2133_v40 = vpack.c.bf16 %v2114_v41, %v2114_v41 }
 0x12b   : > { %v1907_v6 = vadd.f32 %v3296_v51, %v1871_v50  ;;  %v1102_v29 = vpop.f32.mrf.mxu0  ;;  %v1234_v2 = vpop.f32.mrf.mxu1 }
 0x12c   : > { %2185 = vst.msk [vmem:[%s3267_s7 + $0x10] sm:$0xf] %vm2179_vm4, %v2132_v26  ;;  %v1232_v24 = vadd.f32 %v1231_v1, %v1102_v29 }
 0x12d   : > { %2186 = vst.msk [vmem:[%s3267_s7 + $0x14] sm:$0x1] %vm2182_vm5, %v2133_v40  ;;  %v1939_v8 = vmax.f32 %v1907_v6, 0.0  ;;  %2647 = vmatmul.msk.bf16.gmra.mxu3 %vm1049_vm3, %v1734_v28 }
 0x12e   : > { %2509 = vmatmul.msk.bf16.gmra.mxu1 %vm1049_vm3, %v595_v14 }
 0x12f   : > { %v2005_v34 = vrot.slane %v1939_v8, 7 }
 0x130   : > { %v3334_v47 = vpop.f32.mrf.mxu3  ;;  %v1796_v37 = vpop.f32.mrf.mxu2 }
 0x131   : > { %v2099_v60 = vsel %vm2001_vm6, 0.0, %v2005_v34  ;;  %v1872_v18 = vadd.f32 %v1796_v37, %v1232_v24 }
 0x132   : > { %v2134_v4 = vpack.c.bf16 %v2099_v60, %v2099_v60 }
 0x133   : > { %v1908_v39 = vadd.f32 %v3296_v51, %v1872_v18  ;;  %v1105_v44 = vpop.f32.mrf.mxu0  ;;  %v1236_v46 = vpop.f32.mrf.mxu1 }
 0x134   : > { %2187 = vst.msk [vmem:[%s3267_s7 + $0x18] sm:$0xf] %vm2179_vm4, %v2134_v4  ;;  %v1235_v57 = vadd.f32 %v1234_v2, %v1105_v44 }
 0x135   : > { %v1940_v53 = vmax.f32 %v1908_v39, 0.0  ;;  %2643 = vmatmul.msk.bf16.gmra.mxu2 %vm1049_vm3, %v1726_v48 }
 0x136   : > { %2489 = vmatmul.msk.bf16.gmra.mxu0 %vm1049_vm3, %v1030_v35 }
 0x137   : > { %v2006_v32 = vrot.slane %v1940_v53, 7 }
 0x138   : > { %v3346_v56 = vpop.f32.mrf.mxu3  ;;  %v1799_v31 = vpop.f32.mrf.mxu2 }
 0x139   : > { %v2007_v38 = vsel %vm2001_vm6, %v2005_v34, %v2006_v32  ;;  %v2115_v62 = vsel %vm2001_vm6, %v2006_v32, 0.0  ;;  %v1873_v36 = vadd.f32 %v1799_v31, %v1235_v57 }
 0x13a   : > { %v2135_v7 = vpack.c.bf16 %v2007_v38, %v2007_v38  ;;  %v2136_v30 = vpack.c.bf16 %v2115_v62, %v2115_v62 }
 0x13b   : > { %v1909_v43 = vadd.f32 %v3296_v51, %v1873_v36  ;;  %v1107_v52 = vpop.f32.mrf.mxu0  ;;  %v1239_v9 = vpop.f32.mrf.mxu1 }
 0x13c   : > { %2188 = vst.msk [vmem:[%s3267_s7 + $0x1c] sm:$0xf] %vm2179_vm4, %v2135_v7  ;;  %v1237_v63 = vadd.f32 %v1236_v46, %v1107_v52 }
 0x13d   : > { %2189 = vst.msk [vmem:[%s3267_s7 + $0x20] sm:$0x1] %vm2182_vm5, %v2136_v30  ;;  %v1941_v33 = vmax.f32 %v1909_v43, 0.0  ;;  %2648 = vmatmul.msk.bf16.gmra.mxu3 %vm1049_vm3, %v1736_v21 }
 0x13e   : > { %2510 = vmatmul.msk.bf16.gmra.mxu1 %vm1049_vm3, %v597_v5 }
 0x13f   : > { %v2008_v55 = vrot.slane %v1941_v33, 7 }
 0x140   : > { %v3361_v11 = vpop.f32.mrf.mxu3  ;;  %v1801_v1 = vpop.f32.mrf.mxu2 }
 0x141   : > { %v2100_v13 = vsel %vm2001_vm6, 0.0, %v2008_v55  ;;  %v1874_v20 = vadd.f32 %v1801_v1, %v1237_v63 }
 0x142   : > { %v2137_v15 = vpack.c.bf16 %v2100_v13, %v2100_v13 }
 0x143   : > { %v1910_v19 = vadd.f32 %v3296_v51, %v1874_v20  ;;  %v1110_v16 = vpop.f32.mrf.mxu0  ;;  %v1241_v59 = vpop.f32.mrf.mxu1 }
 0x144   : > { %2190 = vst.msk [vmem:[%s3267_s7 + $0x24] sm:$0xf] %vm2179_vm4, %v2137_v15  ;;  %v1240_v25 = vadd.f32 %v1239_v9, %v1110_v16 }
 0x145   : > { %v1942_v45 = vmax.f32 %v1910_v19, 0.0  ;;  %2644 = vmatmul.msk.bf16.gmra.mxu2 %vm1049_vm3, %v1728_v22 }
 0x146   : > { %2490 = vmatmul.msk.bf16.gmra.mxu0 %vm1049_vm3, %v1032_v27 }
 0x147   : > { %v2009_v41 = vrot.slane %v1942_v45, 7 }
 0x148   : > { %v3373_v50 = vpop.f32.mrf.mxu3  ;;  %v1804_v26 = vpop.f32.mrf.mxu2 }
 0x149   : > { %v2010_v49 = vsel %vm2001_vm6, %v2008_v55, %v2009_v41  ;;  %v2116_v40 = vsel %vm2001_vm6, %v2009_v41, 0.0  ;;  %v1875_v28 = vadd.f32 %v1804_v26, %v1240_v25 }
 0x14a   : > { %v2138_v6 = vpack.c.bf16 %v2010_v49, %v2010_v49  ;;  %v2139_v29 = vpack.c.bf16 %v2116_v40, %v2116_v40 }
 0x14b   : > { %v1911_v3 = vadd.f32 %v3296_v51, %v1875_v28  ;;  %v1112_v2 = vpop.f32.mrf.mxu0  ;;  %v1244_v14 = vpop.f32.mrf.mxu1 }
 0x14c   : > { %2191 = vst.msk [vmem:[%s3267_s7 + $0x28] sm:$0xf] %vm2179_vm4, %v2138_v6  ;;  %v1242_v24 = vadd.f32 %v1241_v59, %v1112_v2 }
 0x14d   : > { %2192 = vst.msk [vmem:[%s3267_s7 + $0x2c] sm:$0x1] %vm2182_vm5, %v2139_v29  ;;  %v1943_v8 = vmax.f32 %v1911_v3, 0.0 }
 0x14f   : > { %v2011_v34 = vrot.slane %v1943_v8, 7 }
 0x150   : > { %v3382_v0 = vpop.f32.mrf.mxu3  ;;  %v1806_v37 = vpop.f32.mrf.mxu2 }
 0x151   : > { %v2101_v60 = vsel %vm2001_vm6, 0.0, %v2011_v34  ;;  %v1876_v18 = vadd.f32 %v1806_v37, %v1242_v24 }
 0x152   : > { %v2140_v4 = vpack.c.bf16 %v2101_v60, %v2101_v60 }
 0x153   : > { %v1912_v39 = vadd.f32 %v3296_v51, %v1876_v18  ;;  %v1115_v44 = vpop.f32.mrf.mxu0  ;;  %v1246_v35 = vpop.f32.mrf.mxu1 }
 0x154   : > { %2193 = vst.msk [vmem:[%s3267_s7 + $0x30] sm:$0xf] %vm2179_vm4, %v2140_v4  ;;  %v1245_v48 = vadd.f32 %v1244_v14, %v1115_v44 }
 0x155   : > { %v1944_v46 = vmax.f32 %v1912_v39, 0.0 }
 0x157   : > { %v2012_v53 = vrot.slane %v1944_v46, 7 }
 0x158   : > { %v3388_v57 = vpop.f32.mrf.mxu3  ;;  %v1809_v61 = vpop.f32.mrf.mxu2 }
 0x159   : > { %v2013_v32 = vsel %vm2001_vm6, %v2011_v34, %v2012_v53  ;;  %v2117_v42 = vsel %vm2001_vm6, %v2012_v53, 0.0  ;;  %v1877_v12 = vadd.f32 %v1809_v61, %v1245_v48 }
 0x15a   : > { %v2141_v31 = vpack.c.bf16 %v2013_v32, %v2013_v32  ;;  %v2142_v38 = vpack.c.bf16 %v2117_v42, %v2117_v42 }
 0x15b   : > { %v1913_v62 = vadd.f32 %v3296_v51, %v1877_v12  ;;  %v1117_v36 = vpop.f32.mrf.mxu0  ;;  %v1249_v7 = vpop.f32.mrf.mxu1 }
 0x15c   : > { %2194 = vst.msk [vmem:[%s3267_s7 + $0x34] sm:$0xf] %vm2179_vm4, %v2141_v31  ;;  %v1247_v43 = vadd.f32 %v1246_v35, %v1117_v36 }
 0x15d   : > { %2195 = vst.msk [vmem:[%s3267_s7 + $0x38] sm:$0x1] %vm2182_vm5, %v2142_v38  ;;  %v1945_v30 = vmax.f32 %v1913_v62, 0.0 }
 0x15f   : > { %v2014_v21 = vrot.slane %v1945_v30, 7 }
 0x160   : > { %v3397_v52 = vpop.f32.mrf.mxu3  ;;  %v1811_v9 = vpop.f32.mrf.mxu2 }
 0x161   : > { %v2102_v5 = vsel %vm2001_vm6, 0.0, %v2014_v21  ;;  %v1878_v33 = vadd.f32 %v1811_v9, %v1247_v43 }
 0x162   : > { %v2143_v55 = vpack.c.bf16 %v2102_v5, %v2102_v5 }
 0x163   : > { %v1914_v63 = vadd.f32 %v3296_v51, %v1878_v33  ;;  %v1120_v23 = vpop.f32.mrf.mxu0  ;;  %v1251_v1 = vpop.f32.mrf.mxu1 }
 0x164   : > { %2196 = vst.msk [vmem:[%s3267_s7 + $0x3c] sm:$0xf] %vm2179_vm4, %v2143_v55  ;;  %v1250_v20 = vadd.f32 %v1249_v7, %v1120_v23 }
 0x165   : > { %v1946_v13 = vmax.f32 %v1914_v63, 0.0 }
 0x167   : > { %v2015_v15 = vrot.slane %v1946_v13, 7 }
 0x168   : > { %v3403_v19 = vpop.f32.mrf.mxu3  ;;  %v1814_v16 = vpop.f32.mrf.mxu2 }
 0x169   : > { %v2016_v27 = vsel %vm2001_vm6, %v2014_v21, %v2015_v15  ;;  %v2118_v59 = vsel %vm2001_vm6, %v2015_v15, 0.0  ;;  %v1879_v22 = vadd.f32 %v1814_v16, %v1250_v20 }
 0x16a   : > { %v2144_v45 = vpack.c.bf16 %v2016_v27, %v2016_v27  ;;  %v2145_v25 = vpack.c.bf16 %v2118_v59, %v2118_v59 }
 0x16b   : > { %v1915_v41 = vadd.f32 %v3296_v51, %v1879_v22  ;;  %v1122_v26 = vpop.f32.mrf.mxu0  ;;  %v1254_v49 = vpop.f32.mrf.mxu1 }
 0x16c   : > { %2197 = vst.msk [vmem:[%s3267_s7 + $0x40] sm:$0xf] %vm2179_vm4, %v2144_v45  ;;  %v1252_v6 = vadd.f32 %v1251_v1, %v1122_v26  ;;  %v1285_v26 = vadd.f32 %v3382_v0, %v3283_v54 }
 0x16d   : > { %2198 = vst.msk [vmem:[%s3267_s7 + $0x44] sm:$0x1] %vm2182_vm5, %v2145_v25  ;;  %v1947_v40 = vmax.f32 %v1915_v41, 0.0 }
 0x16f   : > { %v2017_v28 = vrot.slane %v1947_v40, 7 }
 0x170   : > { %v3412_v29 = vpop.f32.mrf.mxu3  ;;  %v1816_v3 = vpop.f32.mrf.mxu2 }
 0x171   : > { %v2103_v2 = vsel %vm2001_vm6, 0.0, %v2017_v28  ;;  %v1880_v14 = vadd.f32 %v1816_v3, %v1252_v6 }
 0x172   : > { %v2146_v8 = vpack.c.bf16 %v2103_v2, %v2103_v2 }
 0x173   : > { %v1916_v34 = vadd.f32 %v3296_v51, %v1880_v14  ;;  %v1125_v24 = vpop.f32.mrf.mxu0  ;;  %v1256_v37 = vpop.f32.mrf.mxu1 }
 0x174   : > { %2199 = vst.msk [vmem:[%s3267_s7 + $0x48] sm:$0xf] %vm2179_vm4, %v2146_v8  ;;  %v1255_v18 = vadd.f32 %v1254_v49, %v1125_v24 }
 0x175   : > { %v1948_v60 = vmax.f32 %v1916_v34, 0.0 }
 0x177   : > { %v2018_v4 = vrot.slane %v1948_v60, 7 }
 0x178   : > { %v3418_v39 = vpop.f32.mrf.mxu3  ;;  %v1819_v44 = vpop.f32.mrf.mxu2 }
 0x179   : > { %v2019_v35 = vsel %vm2001_vm6, %v2017_v28, %v2018_v4  ;;  %v2119_v46 = vsel %vm2001_vm6, %v2018_v4, 0.0  ;;  %v1881_v48 = vadd.f32 %v1819_v44, %v1255_v18 }
 0x17a   : > { %v2147_v53 = vpack.c.bf16 %v2019_v35, %v2019_v35  ;;  %v2148_v61 = vpack.c.bf16 %v2119_v46, %v2119_v46  ;;  %v1287_v35 = vadd.f32 %v3388_v57, %v3298_v58 }
 0x17b   : > { %v1917_v32 = vadd.f32 %v3296_v51, %v1881_v48  ;;  %v1127_v42 = vpop.f32.mrf.mxu0  ;;  %v1259_v12 = vpop.f32.mrf.mxu1 }
 0x17c   : > { %2200 = vst.msk [vmem:[%s3267_s7 + $0x4c] sm:$0xf] %vm2179_vm4, %v2147_v53  ;;  %v1257_v62 = vadd.f32 %v1256_v37, %v1127_v42 }
 0x17d   : > { %2201 = vst.msk [vmem:[%s3267_s7 + $0x50] sm:$0x1] %vm2182_vm5, %v2148_v61  ;;  %v1949_v31 = vmax.f32 %v1917_v32, 0.0 }
 0x17f   : > { %v2020_v38 = vrot.slane %v1949_v31, 7 }
 0x180   : > { %v3427_v36 = vpop.f32.mrf.mxu3  ;;  %v1821_v7 = vpop.f32.mrf.mxu2 }
 0x181   : > { %v2104_v30 = vsel %vm2001_vm6, 0.0, %v2020_v38  ;;  %v1882_v21 = vadd.f32 %v1821_v7, %v1257_v62 }
 0x182   : > { %v2149_v43 = vpack.c.bf16 %v2104_v30, %v2104_v30 }
 0x183   : > { %v1918_v9 = vadd.f32 %v3296_v51, %v1882_v21  ;;  %v1130_v5 = vpop.f32.mrf.mxu0  ;;  %v1261_v33 = vpop.f32.mrf.mxu1 }
 0x184   : > { %2202 = vst.msk [vmem:[%s3267_s7 + $0x54] sm:$0xf] %vm2179_vm4, %v2149_v43  ;;  %v1260_v63 = vadd.f32 %v1259_v12, %v1130_v5 }
 0x185   : > { %v1950_v55 = vmax.f32 %v1918_v9, 0.0  ;;  %v1290_v9 = vadd.f32 %v3397_v52, %v3307_v10 }
 0x187   : > { %v2021_v23 = vrot.slane %v1950_v55, 7 }
 0x188   : > { %v3433_v1 = vpop.f32.mrf.mxu3  ;;  %v1824_v13 = vpop.f32.mrf.mxu2 }
 0x189   : > { %v2022_v20 = vsel %vm2001_vm6, %v2020_v38, %v2021_v23  ;;  %v2120_v15 = vsel %vm2001_vm6, %v2021_v23, 0.0  ;;  %v1883_v16 = vadd.f32 %v1824_v13, %v1260_v63 }
 0x18a   : > { %v2150_v27 = vpack.c.bf16 %v2022_v20, %v2022_v20  ;;  %v2151_v59 = vpack.c.bf16 %v2120_v15, %v2120_v15 }
 0x18b   : > { %v1919_v22 = vadd.f32 %v3296_v51, %v1883_v16  ;;  %v1132_v45 = vpop.f32.mrf.mxu0  ;;  %v1264_v25 = vpop.f32.mrf.mxu1 }
 0x18c   : > { %2203 = vst.msk [vmem:[%s3267_s7 + $0x58] sm:$0xf] %vm2179_vm4, %v2150_v27  ;;  %v1262_v40 = vadd.f32 %v1261_v33, %v1132_v45 }
 0x18d   : > { %2204 = vst.msk [vmem:[%s3267_s7 + $0x5c] sm:$0x1] %vm2182_vm5, %v2151_v59  ;;  %v1951_v41 = vmax.f32 %v1919_v22, 0.0 }
 0x18f   : > { %v2023_v49 = vrot.slane %v1951_v41, 7 }
 0x190   : > { %v1826_v28 = vpop.f32.mrf.mxu2  ;;  %v1849_v6 = vpop.f32.mrf.mxu3 }
 0x191   : > { %v2105_v3 = vsel %vm2001_vm6, 0.0, %v2023_v49  ;;  %v1884_v2 = vadd.f32 %v1826_v28, %v1262_v40  ;;  %v1893_v14 = vadd.f32 %v1849_v6, %v1285_v26 }
 0x192   : > { %v2152_v8 = vpack.c.bf16 %v2105_v3, %v2105_v3  ;;  %v1292_v3 = vadd.f32 %v3403_v19, %v3319_v17 }
 0x193   : > { %v1920_v34 = vadd.f32 %v3296_v51, %v1884_v2  ;;  %v1929_v24 = vadd.f32 %v3296_v51, %v1893_v14  ;;  %v1135_v37 = vpop.f32.mrf.mxu0  ;;  %v1266_v60 = vpop.f32.mrf.mxu1 }
 0x194   : > { %2205 = vst.msk [vmem:[%s3267_s7 + $0x60] sm:$0xf] %vm2179_vm4, %v2152_v8  ;;  %v1265_v54 = vadd.f32 %v1264_v25, %v1135_v37 }
 0x195   : > { %v1952_v18 = vmax.f32 %v1920_v34, 0.0  ;;  %v1961_v4 = vmax.f32 %v1929_v24, 0.0 }
 0x197   : > { %v2024_v0 = vrot.slane %v1952_v18, 7  ;;  %v2038_v44 = vrot.slane %v1961_v4, 7 }
 0x198   : > { %v1829_v46 = vpop.f32.mrf.mxu2  ;;  %v1851_v48 = vpop.f32.mrf.mxu3 }
 0x199   : > { %v2025_v53 = vsel %vm2001_vm6, %v2023_v49, %v2024_v0  ;;  %v2121_v61 = vsel %vm2001_vm6, %v2024_v0, 0.0  ;;  %v2110_v32 = vsel %vm2001_vm6, 0.0, %v2038_v44  ;;  %v1885_v42 = vadd.f32 %v1829_v46, %v1265_v54 }
 0x19a   : > { %v2153_v12 = vpack.c.bf16 %v2025_v53, %v2025_v53  ;;  %v2154_v31 = vpack.c.bf16 %v2121_v61, %v2121_v61  ;;  %v2167_v38 = vpack.c.bf16 %v2110_v32, %v2110_v32  ;;  %v1894_v62 = vadd.f32 %v1851_v48, %v1287_v35 }
 0x19b   : > { %v1921_v7 = vadd.f32 %v3296_v51, %v1885_v42  ;;  %v1137_v30 = vpop.f32.mrf.mxu0  ;;  %v1269_v21 = vpop.f32.mrf.mxu1  ;;  %v1295_v46 = vadd.f32 %v3412_v29, %v3334_v47 }
 0x19c   : > { %2206 = vst.msk [vmem:[%s3267_s7 + $0x64] sm:$0xf] %vm2179_vm4, %v2153_v12  ;;  %v1930_v58 = vadd.f32 %v3296_v51, %v1894_v62  ;;  %v1267_v33 = vadd.f32 %v1266_v60, %v1137_v30 }
 0x19d   : > { %2207 = vst.msk [vmem:[%s3267_s7 + $0x68] sm:$0x1] %vm2182_vm5, %v2154_v31  ;;  %v1953_v57 = vmax.f32 %v1921_v7, 0.0 }
 0x19e   : > { %2220 = vst.msk [vmem:[%s3267_s7 + $0x9c] sm:$0xf] %vm2179_vm4, %v2167_v38  ;;  %v1962_v43 = vmax.f32 %v1930_v58, 0.0 }
 0x19f   : > { %v2026_v5 = vrot.slane %v1953_v57, 7 }
 0x1a0   : > { %v2039_v55 = vrot.slane %v1962_v43, 7  ;;  %v1831_v63 = vpop.f32.mrf.mxu2  ;;  %v1854_v23 = vpop.f32.mrf.mxu3 }
 0x1a1   : > { %v2106_v13 = vsel %vm2001_vm6, 0.0, %v2026_v5  ;;  %v1886_v20 = vadd.f32 %v1831_v63, %v1267_v33  ;;  %v1895_v15 = vadd.f32 %v1854_v23, %v1290_v9  ;;  %v1297_v23 = vadd.f32 %v3418_v39, %v3346_v56 }
 0x1a2   : > { %v2155_v16 = vpack.c.bf16 %v2106_v13, %v2106_v13  ;;  %v2040_v27 = vsel %vm2001_vm6, %v2038_v44, %v2039_v55  ;;  %v2126_v59 = vsel %vm2001_vm6, %v2039_v55, 0.0 }
 0x1a3   : > { %v2168_v22 = vpack.c.bf16 %v2040_v27, %v2040_v27  ;;  %v2169_v45 = vpack.c.bf16 %v2126_v59, %v2126_v59  ;;  %v1922_v10 = vadd.f32 %v3296_v51, %v1886_v20  ;;  %v1931_v52 = vadd.f32 %v3296_v51, %v1895_v15  ;;  %v1140_v25 = vpop.f32.mrf.mxu0  ;;  %v1271_v40 = vpop.f32.mrf.mxu1 }
 0x1a4   : > { %2208 = vst.msk [vmem:[%s3267_s7 + $0x6c] sm:$0xf] %vm2179_vm4, %v2155_v16  ;;  %v1270_v49 = vadd.f32 %v1269_v21, %v1140_v25 }
 0x1a5   : > { %2221 = vst.msk [vmem:[%s3267_s7 + $0xa0] sm:$0xf] %vm2179_vm4, %v2168_v22  ;;  %v1954_v41 = vmax.f32 %v1922_v10, 0.0  ;;  %v1963_v26 = vmax.f32 %v1931_v52, 0.0 }
 0x1a6   : > { %2222 = vst.msk [vmem:[%s3267_s7 + $0xa4] sm:$0x1] %vm2182_vm5, %v2169_v45 }
 0x1a7   : > { %v2027_v28 = vrot.slane %v1954_v41, 7  ;;  %v2041_v6 = vrot.slane %v1963_v26, 7 }
 0x1a8   : > { %v1834_v2 = vpop.f32.mrf.mxu2  ;;  %v1856_v14 = vpop.f32.mrf.mxu3 }
 0x1a9   : > { %v2028_v8 = vsel %vm2001_vm6, %v2026_v5, %v2027_v28  ;;  %v2122_v34 = vsel %vm2001_vm6, %v2027_v28, 0.0  ;;  %v2111_v24 = vsel %vm2001_vm6, 0.0, %v2041_v6  ;;  %v1887_v37 = vadd.f32 %v1834_v2, %v1270_v49 }
 0x1aa   : > { %v2156_v60 = vpack.c.bf16 %v2028_v8, %v2028_v8  ;;  %v2157_v18 = vpack.c.bf16 %v2122_v34, %v2122_v34  ;;  %v2170_v4 = vpack.c.bf16 %v2111_v24, %v2111_v24  ;;  %v1896_v54 = vadd.f32 %v1856_v14, %v1292_v3 }
 0x1ab   : > { %v1923_v0 = vadd.f32 %v3296_v51, %v1887_v37  ;;  %v1142_v44 = vpop.f32.mrf.mxu0  ;;  %v1274_v61 = vpop.f32.mrf.mxu1 }
 0x1ac   : > { %2209 = vst.msk [vmem:[%s3267_s7 + $0x70] sm:$0xf] %vm2179_vm4, %v2156_v60  ;;  %v1932_v17 = vadd.f32 %v3296_v51, %v1896_v54  ;;  %v1272_v53 = vadd.f32 %v1271_v40, %v1142_v44  ;;  %v1300_v40 = vadd.f32 %v3427_v36, %v3361_v11 }
 0x1ad   : > { %2210 = vst.msk [vmem:[%s3267_s7 + $0x74] sm:$0x1] %vm2182_vm5, %v2157_v18  ;;  %v1955_v19 = vmax.f32 %v1923_v0, 0.0 }
 0x1ae   : > { %2223 = vst.msk [vmem:[%s3267_s7 + $0xa8] sm:$0xf] %vm2179_vm4, %v2170_v4  ;;  %v1964_v35 = vmax.f32 %v1932_v17, 0.0 }
 0x1af   : > { %v2029_v48 = vrot.slane %v1955_v19, 7 }
 0x1b0   : > { %v2042_v32 = vrot.slane %v1964_v35, 7  ;;  %v1836_v42 = vpop.f32.mrf.mxu2  ;;  %v1859_v12 = vpop.f32.mrf.mxu3 }
 0x1b1   : > { %v2107_v31 = vsel %vm2001_vm6, 0.0, %v2029_v48  ;;  %v1888_v38 = vadd.f32 %v1836_v42, %v1272_v53  ;;  %v1897_v62 = vadd.f32 %v1859_v12, %v1295_v46  ;;  %v1302_v53 = vadd.f32 %v3433_v1, %v3373_v50 }
 0x1b2   : > { %v2158_v7 = vpack.c.bf16 %v2107_v31, %v2107_v31  ;;  %v2043_v30 = vsel %vm2001_vm6, %v2041_v6, %v2042_v32  ;;  %v2127_v21 = vsel %vm2001_vm6, %v2042_v32, 0.0 }
 0x1b3   : > { %v2171_v58 = vpack.c.bf16 %v2043_v30, %v2043_v30  ;;  %v2172_v47 = vpack.c.bf16 %v2127_v21, %v2127_v21  ;;  %v1924_v29 = vadd.f32 %v3296_v51, %v1888_v38  ;;  %v1933_v57 = vadd.f32 %v3296_v51, %v1897_v62  ;;  %v1145_v43 = vpop.f32.mrf.mxu0  ;;  %v1276_v52 = vpop.f32.mrf.mxu1 }
 0x1b4   : > { %2211 = vst.msk [vmem:[%s3267_s7 + $0x78] sm:$0xf] %vm2179_vm4, %v2158_v7  ;;  %v1275_v33 = vadd.f32 %v1274_v61, %v1145_v43 }
 0x1b5   : > { %2224 = vst.msk [vmem:[%s3267_s7 + $0xac] sm:$0xf] %vm2179_vm4, %v2171_v58  ;;  %v1956_v9 = vmax.f32 %v1924_v29, 0.0  ;;  %v1965_v5 = vmax.f32 %v1933_v57, 0.0 }
 0x1b6   : > { %2225 = vst.msk [vmem:[%s3267_s7 + $0xb0] sm:$0x1] %vm2182_vm5, %v2172_v47 }
 0x1b7   : > { %v2030_v55 = vrot.slane %v1956_v9, 7  ;;  %v2044_v63 = vrot.slane %v1965_v5, 7 }
 0x1b8   : > { %v1839_v13 = vpop.f32.mrf.mxu2  ;;  %v1861_v20 = vpop.f32.mrf.mxu3 }
 0x1b9   : > { %v2031_v15 = vsel %vm2001_vm6, %v2029_v48, %v2030_v55  ;;  %v2123_v16 = vsel %vm2001_vm6, %v2030_v55, 0.0  ;;  %v2112_v27 = vsel %vm2001_vm6, 0.0, %v2044_v63  ;;  %v1889_v59 = vadd.f32 %v1839_v13, %v1275_v33 }
 0x1ba   : > { %v2159_v22 = vpack.c.bf16 %v2031_v15, %v2031_v15  ;;  %v2160_v45 = vpack.c.bf16 %v2123_v16, %v2123_v16  ;;  %v2173_v10 = vpack.c.bf16 %v2112_v27, %v2112_v27  ;;  %v1898_v25 = vadd.f32 %v1861_v20, %v1297_v23 }
 0x1bb   : > { %v1925_v41 = vadd.f32 %v3296_v51, %v1889_v59  ;;  %v1147_v26 = vpop.f32.mrf.mxu0  ;;  %v1279_v44 = vpop.f32.mrf.mxu1 }
 0x1bc   : > { %2212 = vst.msk [vmem:[%s3267_s7 + $0x7c] sm:$0xf] %vm2179_vm4, %v2159_v22  ;;  %v1934_v56 = vadd.f32 %v3296_v51, %v1898_v25  ;;  %v1277_v6 = vadd.f32 %v1276_v52, %v1147_v26 }
 0x1bd   : > { %2213 = vst.msk [vmem:[%s3267_s7 + $0x80] sm:$0x1] %vm2182_vm5, %v2160_v45  ;;  %v1957_v39 = vmax.f32 %v1925_v41, 0.0 }
 0x1be   : > { %2226 = vst.msk [vmem:[%s3267_s7 + $0xb4] sm:$0xf] %vm2179_vm4, %v2173_v10  ;;  %v1966_v49 = vmax.f32 %v1934_v56, 0.0 }
 0x1bf   : > { %v2032_v28 = vrot.slane %v1957_v39, 7 }
 0x1c0   : > { %v2045_v3 = vrot.slane %v1966_v49, 7  ;;  %v1841_v2 = vpop.f32.mrf.mxu2  ;;  %v1864_v14 = vpop.f32.mrf.mxu3 }
 0x1c1   : > { %v2108_v8 = vsel %vm2001_vm6, 0.0, %v2032_v28  ;;  %v1890_v34 = vadd.f32 %v1841_v2, %v1277_v6  ;;  %v1899_v24 = vadd.f32 %v1864_v14, %v1300_v40 }
 0x1c2   : > { %v2161_v37 = vpack.c.bf16 %v2108_v8, %v2108_v8  ;;  %v2046_v60 = vsel %vm2001_vm6, %v2044_v63, %v2045_v3  ;;  %v2128_v18 = vsel %vm2001_vm6, %v2045_v3, 0.0 }
 0x1c3   : > { %v2174_v4 = vpack.c.bf16 %v2046_v60, %v2046_v60  ;;  %v2175_v54 = vpack.c.bf16 %v2128_v18, %v2128_v18  ;;  %v1926_v11 = vadd.f32 %v3296_v51, %v1890_v34  ;;  %v1935_v36 = vadd.f32 %v3296_v51, %v1899_v24  ;;  %v1150_v0 = vpop.f32.mrf.mxu0  ;;  %v1281_v29 = vpop.f32.mrf.mxu1 }
 0x1c4   : > { %2214 = vst.msk [vmem:[%s3267_s7 + $0x84] sm:$0xf] %vm2179_vm4, %v2161_v37  ;;  %v1280_v35 = vadd.f32 %v1279_v44, %v1150_v0 }
 0x1c5   : > { %2227 = vst.msk [vmem:[%s3267_s7 + $0xb8] sm:$0xf] %vm2179_vm4, %v2174_v4  ;;  %v1958_v17 = vmax.f32 %v1926_v11, 0.0  ;;  %v1967_v19 = vmax.f32 %v1935_v36, 0.0 }
 0x1c6   : > { %2228 = vst.msk [vmem:[%s3267_s7 + $0xbc] sm:$0x1] %vm2182_vm5, %v2175_v54 }
 0x1c7   : > { %v2033_v46 = vrot.slane %v1958_v17, 7  ;;  %v2047_v48 = vrot.slane %v1967_v19, 7 }
 0x1c8   : > { %v1844_v61 = vpop.f32.mrf.mxu2  ;;  %v1866_v32 = vpop.f32.mrf.mxu3 }
 0x1c9   : > { %v2034_v42 = vsel %vm2001_vm6, %v2032_v28, %v2033_v46  ;;  %v2124_v12 = vsel %vm2001_vm6, %v2033_v46, 0.0  ;;  %v2113_v31 = vsel %vm2001_vm6, 0.0, %v2047_v48  ;;  %v1891_v38 = vadd.f32 %v1844_v61, %v1280_v35 }
 0x1ca   : > { %v2162_v62 = vpack.c.bf16 %v2034_v42, %v2034_v42  ;;  %v2163_v7 = vpack.c.bf16 %v2124_v12, %v2124_v12  ;;  %v2176_v30 = vpack.c.bf16 %v2113_v31, %v2113_v31  ;;  %v1900_v21 = vadd.f32 %v1866_v32, %v1302_v53 }
 0x1cb   : > { %v1927_v58 = vadd.f32 %v3296_v51, %v1891_v38  ;;  %v1152_v1 = vpop.f32.mrf.mxu0 }
 0x1cc   : > { %2215 = vst.msk [vmem:[%s3267_s7 + $0x88] sm:$0xf] %vm2179_vm4, %v2162_v62  ;;  %v1936_v50 = vadd.f32 %v3296_v51, %v1900_v21  ;;  %v1282_v9 = vadd.f32 %v1281_v29, %v1152_v1 }
 0x1cd   : > { %2216 = vst.msk [vmem:[%s3267_s7 + $0x8c] sm:$0x1] %vm2182_vm5, %v2163_v7  ;;  %v1959_v47 = vmax.f32 %v1927_v58, 0.0 }
 0x1ce   : > { %2229 = vst.msk [vmem:[%s3267_s7 + $0xc0] sm:$0xf] %vm2179_vm4, %v2176_v30  ;;  %v1968_v57 = vmax.f32 %v1936_v50, 0.0 }
 0x1cf   : > { %v2035_v43 = vrot.slane %v1959_v47, 7 }
 0x1d0   : > { %v2048_v5 = vrot.slane %v1968_v57, 7  ;;  %v1846_v33 = vpop.f32.mrf.mxu2 }
 0x1d1   : > { %v2109_v55 = vsel %vm2001_vm6, 0.0, %v2035_v43  ;;  %v1892_v63 = vadd.f32 %v1846_v33, %v1282_v9 }
 0x1d2   : > { %v2164_v23 = vpack.c.bf16 %v2109_v55, %v2109_v55  ;;  %v2049_v13 = vsel %vm2001_vm6, %v2047_v48, %v2048_v5  ;;  %v2129_v20 = vsel %vm2001_vm6, %v2048_v5, 0.0 }
 0x1d3   : > { %v2177_v15 = vpack.c.bf16 %v2049_v13, %v2049_v13  ;;  %v2178_v16 = vpack.c.bf16 %v2129_v20, %v2129_v20  ;;  %v1928_v27 = vadd.f32 %v3296_v51, %v1892_v63 }
 0x1d4   : > { %2217 = vst.msk [vmem:[%s3267_s7 + $0x90] sm:$0xf] %vm2179_vm4, %v2164_v23 }
 0x1d5   : > { %2230 = vst.msk [vmem:[%s3267_s7 + $0xc4] sm:$0xf] %vm2179_vm4, %v2177_v15  ;;  %v1960_v59 = vmax.f32 %v1928_v27, 0.0 }
 0x1d6   : > { %2231 = vst.msk [vmem:[%s3267_s7 + $0xc8] sm:$0x1] %vm2182_vm5, %v2178_v16 }
 0x1d7   : > { %v2036_v22 = vrot.slane %v1960_v59, 7 }
 0x1d9   : > { %v2037_v45 = vsel %vm2001_vm6, %v2035_v43, %v2036_v22  ;;  %v2125_v10 = vsel %vm2001_vm6, %v2036_v22, 0.0 }
 0x1da   : > { %v2165_v52 = vpack.c.bf16 %v2037_v45, %v2037_v45  ;;  %v2166_v25 = vpack.c.bf16 %v2125_v10, %v2125_v10 }
 0x1dc   : > { %2218 = vst.msk [vmem:[%s3267_s7 + $0x94] sm:$0xf] %vm2179_vm4, %v2165_v52 }
 0x1dd   : > { %2219 = vst.msk [vmem:[%s3267_s7 + $0x98] sm:$0x1] %vm2182_vm5, %v2166_v25 }
 0x1de PF: > { %s13_s12 = sadd.s32 1, %s2728_s12  }
 0x1df   : > { %p10_p4 = scmp.ge.s32.totalorder %s13_s12, 4  }
 0x1e1   :  { %12 = sbr.rel (!%p10_p4) target bundleno = 1 (0x1), region = 66 }

// kernel: _lambda_.9
= control target key start
LH: loop header
LB: loop body
LE: loop exit
PB: predicated region body
PF: predicated region fallthrough
CT: control target
= control target key end

     0   :  { %s1821_s12 = smov 0   ;;  %s2408_s0 = inlined_call_operand.vmem [shape: bf16[2,9,2,18,16], index: 0, kind: input, shape index: {}]   ;;  %s2409_s1 = inlined_call_operand.vmem [shape: bf16[3,48,32], index: 1, kind: input, shape index: {}]   ;;  %s2410_s2 = inlined_call_operand.vmem [shape: f32[1,32], index: 2, kind: input, shape index: {}]   ;;  %s2411_s3 = inlined_call_operand.vmem [shape: bf16[2,10,18,32], index: 3, kind: output, shape index: {}]  }
   0x1 LB: > { %s1509_s13 = sadd.s32 4294967295, %s1796_s12   ;;  %p1513_p0 = scmp.ge.s32.totalorder %s1796_s12, 1  ;;  %s1796_s12 = sphi %s1821_s12, %s13_s12  }
   0x2   : > { %p137_p1 = scmp.lt.s32.totalorder %s1796_s12, 3 }
   0x4   : > { %p138_p2 = pnand %p1513_p0, %p137_p1 }
   0x5   : > { %p161_p3 = scmp.lt.s32.totalorder (!%p138_p2), %s1509_s13, 1  ;;  %s1798_s18 = smov (!%p138_p2), 32  }
   0x6   : > { %141 = sbr.rel (%p138_p2) target bundleno = 409 (0x199), region = 32  ;;  %s1799_s19 = smov (!%p138_p2), 16  }
   0xb   : > { %s2413_s13 = smov (!%p161_p3, %s1509_s13), 1  ;;  %vm373_vm0 = vcmask 1046528   ;;  %vm260_vm1 = vsmask.f32 7424  ;;  %vm414_vm2 = vcmask 130048   ;;  %vm431_vm3 = vcmask 261120  }
   0xc   : > { %s1776_s14 = smul.u32 216, %s2413_s13  ;;  %vm752_vm4 = vcmask 392192   ;;  %vm1422_vm5 = vcmask 257024   ;;  %vm1425_vm6 = vcmask 253952   ;;  %vm1332_vm7 = vcmask 1040384  }
   0xd   : > { %s1777_s11 = smul.u32 120, %s2413_s13 }
   0xe   : > { %s1835_s17 = scalar_lea.vmem %s2408_s0, %s1776_s14 }
   0xf   : > { %v1838_v0 = vld [vmem:[%s1835_s17 + $0x9c] sm:$0xff]  ;;  %v1568_v1 = vld [vmem:[%s1835_s17 + $0xa4] sm:$0x1]  ;;  %v174_v4 = vld [vmem:[%s1835_s17 + $0x8] sm:$0x1]  ;;  %s2280_s16 = scalar_lea.vmem %s2411_s3, %s1777_s11 }
  0x10   : > { %v1842_v2 = vld [vmem:[%s1835_s17] sm:$0xff]  ;;  %v533_v3 = vunpack.c.l.b16 %v1568_v1  ;;  %v244_v6 = vunpack.c.l.b16 %v174_v4  ;;  %v673_v9 = vrot.slane %v1838_v0, 1  ;;  %v618_v10 = vshll.u32 %v1838_v0, 16  ;;  %v1850_v13 = vld [vmem:[%s1835_s17 + $0x18] sm:$0xff]  ;;  %v1550_v16 = vld [vmem:[%s1835_s17 + $0x14] sm:$0x1] }
  0x11   : > { %v1652_v5 = vld [vmem:[%s1835_s17 + $0x20] sm:$0x1]  ;;  %v374_v12 = vrot.slane %v1842_v2, 1  ;;  %v616_v18 = vshrl.u32 %v1838_v0, 16  ;;  %v1102_v23 = vrot.slane %v1850_v13, 1  ;;  %v527_v24 = vunpack.c.l.b16 %v1550_v16  ;;  %v1864_v34 = vld [vmem:[%s1835_s17 + $0xc] sm:$0xff] }
  0x12   : > { %v974_v7 = vunpack.c.l.b16 %v1652_v5  ;;  %v541_v8 = vpack.c.b16 %v533_v3, %v533_v3  ;;  %v252_v11 = vpack.c.b16 %v244_v6, %v244_v6  ;;  %v620_v19 = vrot.slane %v618_v10, 1  ;;  %v1655_v33 = vld [vmem:[%s1835_s17 + $0x38] sm:$0x1]  ;;  %v1571_v42 = vld [vmem:[%s1835_s17 + $0xbc] sm:$0x1]  ;;  %v1870_v43 = vld [vmem:[%s1835_s17 + $0x30] sm:$0xff] }
  0x13   : > { %v993_v26 = vshll.u32 %v1850_v13, 16  ;;  %v262_v27 = vshrl.u32 %v1842_v2, 16  ;;  %v264_v28 = vshll.u32 %v1842_v2, 16  ;;  %v535_v35 = vpack.c.b16 %v527_v24, %v527_v24  ;;  %v1553_v54 = vld [vmem:[%s1835_s17 + $0x2c] sm:$0x1]  ;;  %v1886_v59 = vld [vmem:[%s1835_s17 + $0xb4] sm:$0xff] }
  0x14   : > { %v674_v14 = vrot.slane %v541_v8, 1  ;;  %v982_v15 = vpack.c.b16 %v974_v7, %v974_v7  ;;  %v375_v17 = vrot.slane %v252_v11, 1  ;;  %v623_v20 = vshll.u32 %v541_v8, 16  ;;  %v177_v58 = vld [vmem:[%s1835_s17 + $0x20] sm:$0x1]  ;;  %v1891_v4 = vld [vmem:[%s1835_s17 + $0x24] sm:$0xff] }
  0x15   : > { %v621_v29 = vor.u32 %v620_v19, %v616_v18  ;;  %v269_v31 = vshll.u32 %v252_v11, 16  ;;  %v266_v32 = vrot.slane %v264_v28, 1  ;;  %v991_v36 = vshrl.u32 %v1850_v13, 16  ;;  %v1896_v8 = vld [vmem:[%s1835_s17 + $0x18] sm:$0xff] }
  0x16   : > { %v675_v21 = vsel %vm373_vm0, %v673_v9, %v674_v14  ;;  %v376_v22 = vsel %vm373_vm0, %v374_v12, %v375_v17  ;;  %v1103_v25 = vrot.slane %v982_v15, 1  ;;  %v625_v30 = vrot.slane %v623_v20, 1 }
  0x17   : > { %691 = vrot.lane.b32.xlu1 %v675_v21, %s1798_s18  ;;  %398 = vrot.lane.b32.xlu0 %v376_v22, %s1798_s18  ;;  %v271_v37 = vrot.slane %v269_v31, 1  ;;  %v995_v39 = vrot.slane %v993_v26, 1  ;;  %v998_v40 = vshll.u32 %v982_v15, 16  ;;  %v267_v41 = vor.u32 %v266_v32, %v262_v27 }
  0x18   : > { %v1104_v38 = vsel %vm373_vm0, %v1102_v23, %v1103_v25  ;;  %v626_v44 = vsel %vm260_vm1, %v621_v29, %v625_v30  ;;  %v975_v45 = vunpack.c.l.b16 %v1655_v33  ;;  %v655_v47 = vrot.slane %v1864_v34, 1  ;;  %v192_v25 = vld [vmem:[%s1835_s17 + $0x98] sm:$0x1]  ;;  %v1912_v33 = vld [vmem:[%s1835_s17 + $0x90] sm:$0xff] }
  0x19   : > { %v272_v46 = vsel %vm260_vm1, %v267_v41, %v271_v37  ;;  %v534_v48 = vunpack.c.l.b16 %v1571_v42  ;;  %v656_v49 = vrot.slane %v535_v35, 1  ;;  %v996_v50 = vor.u32 %v995_v39, %v991_v36 }
  0x1a   : > { %357 = vrot.lane.b32.xlu2 %v272_v46, %s1799_s19  ;;  %v1000_v51 = vrot.slane %v998_v40, 1  ;;  %v1005_v52 = vshll.u32 %v1870_v43, 16  ;;  %v1879_v53 = vpack.c.b16 %v975_v45, %v975_v45  ;;  %v544_v55 = vshrl.u32 %v1864_v34, 16 }
  0x1b   : > { %v546_v56 = vshll.u32 %v1864_v34, 16  ;;  %v551_v57 = vshll.u32 %v535_v35, 16  ;;  %v542_v60 = vpack.c.b16 %v534_v48, %v534_v48  ;;  %v657_v63 = vsel %vm373_vm0, %v655_v47, %v656_v49 }
  0x1c   : > { %v1003_v1 = vshrl.u32 %v1870_v43, 16  ;;  %v1007_v3 = vrot.slane %v1005_v52, 1  ;;  %v528_v5 = vunpack.c.l.b16 %v1553_v54  ;;  %v1001_v6 = vsel %vm260_vm1, %v996_v50, %v1000_v51  ;;  %v1658_v54 = vld [vmem:[%s1835_s17 + $0x50] sm:$0x1] }
  0x1d   : > { %v548_v61 = vrot.slane %v546_v56, 1  ;;  %v553_v62 = vrot.slane %v551_v57, 1  ;;  %v1010_v7 = vshll.u32 %v1879_v53, 16  ;;  %v245_v9 = vunpack.c.l.b16 %v177_v58  ;;  %v1929_v57 = vld [vmem:[%s1835_s17 + $0x48] sm:$0xff] }
  0x1e   : > { %v628_v11 = vshrl.u32 %v1886_v59, 16  ;;  %v630_v12 = vshll.u32 %v1886_v59, 16  ;;  %v676_v14 = vrot.slane %v1886_v59, 1  ;;  %v677_v15 = vrot.slane %v542_v60, 1 }
  0x1f   : > { %1126 = vrot.lane.b32.xlu1 %v1104_v38, %s1798_s18  ;;  %651 = vrot.lane.b32.xlu0 %v626_v44, %s1799_s19  ;;  %v549_v10 = vor.u32 %v548_v61, %v544_v55  ;;  %v635_v17 = vshll.u32 %v542_v60, 16  ;;  %v1008_v18 = vor.u32 %v1007_v3, %v1003_v1  ;;  %v536_v19 = vpack.c.b16 %v528_v5, %v528_v5 }
  0x20   : > { %v558_v20 = vshll.u32 %v1891_v4, 16  ;;  %v632_v21 = vrot.slane %v630_v12, 1  ;;  %v1012_v22 = vrot.slane %v1010_v7, 1  ;;  %v253_v23 = vpack.c.b16 %v245_v9, %v245_v9 }
  0x21   : > { %v554_v16 = vsel %vm260_vm1, %v549_v10, %v553_v62  ;;  %v276_v24 = vshll.u32 %v1896_v8, 16  ;;  %v637_v26 = vrot.slane %v635_v17, 1  ;;  %v556_v28 = vshrl.u32 %v1891_v4, 16  ;;  %v180_v10 = vld [vmem:[%s1835_s17 + $0x38] sm:$0x1] }
  0x22   : > { %639 = vrot.lane.b32.xlu2 %v554_v16, %s1799_s19  ;;  %v633_v27 = vor.u32 %v632_v21, %v628_v11  ;;  %v274_v29 = vshrl.u32 %v1896_v8, 16  ;;  %v678_v30 = vsel %vm373_vm0, %v676_v14, %v677_v15  ;;  %v560_v31 = vrot.slane %v558_v20, 1  ;;  %v1941_v11 = vld [vmem:[%s1835_s17 + $0x3c] sm:$0xff] }
  0x23   : > { %v563_v32 = vshll.u32 %v536_v19, 16  ;;  %v250_v35 = vunpack.c.l.b16 %v192_v25  ;;  %v1013_v36 = vsel %vm260_vm1, %v1008_v18, %v1012_v22  ;;  %v278_v37 = vrot.slane %v276_v24, 1  ;;  %v1949_v22 = vld [vmem:[%s1835_s17 + $0x30] sm:$0xff] }
  0x24   : > { %v281_v38 = vshll.u32 %v253_v23, 16  ;;  %v638_v39 = vsel %vm260_vm1, %v633_v27, %v637_v26  ;;  %v561_v40 = vor.u32 %v560_v31, %v556_v28  ;;  %v336_v44 = vshll.u32 %v1912_v33, 16  ;;  %v1661_v26 = vld [vmem:[%s1835_s17 + $0x68] sm:$0x1]  ;;  %v195_v27 = vld [vmem:[%s1835_s17 + $0xb0] sm:$0x1] }
  0x25   : > { %v565_v41 = vrot.slane %v563_v32, 1  ;;  %v258_v42 = vpack.c.b16 %v250_v35, %v250_v35  ;;  %v279_v45 = vor.u32 %v278_v37, %v274_v29  ;;  %v1105_v47 = vrot.slane %v1870_v43, 1 }
  0x26   : > { %v283_v46 = vrot.slane %v281_v38, 1  ;;  %v1106_v48 = vrot.slane %v1879_v53, 1  ;;  %v334_v50 = vshrl.u32 %v1912_v33, 16  ;;  %v338_v51 = vrot.slane %v336_v44, 1 }
  0x27   : > { %679 = vrot.lane.b32.xlu1 %v657_v63, %s1798_s18  ;;  %1086 = vrot.lane.b32.xlu0 %v1001_v6, %s1799_s19  ;;  %v566_v49 = vsel %vm260_vm1, %v561_v40, %v565_v41  ;;  %v341_v52 = vshll.u32 %v258_v42, 16  ;;  %v976_v58 = vunpack.c.l.b16 %v1658_v54  ;;  %v658_v61 = vrot.slane %v1891_v4, 1  ;;  %v1556_v63 = vld [vmem:[%s1835_s17 + $0x44] sm:$0x1] }
  0x28   : > { %v284_v55 = vsel %vm260_vm1, %v279_v45, %v283_v46  ;;  %v1107_v56 = vsel %vm373_vm0, %v1105_v47, %v1106_v48  ;;  %v339_v53 = vor.u32 %v338_v51, %v334_v50  ;;  %v659_v62 = vrot.slane %v536_v19, 1 }
  0x29   : > { %v343_v60 = vrot.slane %v341_v52, 1  ;;  %v377_v1 = vrot.slane %v1896_v8, 1  ;;  %v378_v3 = vrot.slane %v253_v23, 1  ;;  %v1017_v5 = vshll.u32 %v1929_v57, 16 }
  0x2a   : > { %653 = vrot.lane.b32.xlu2 %v638_v39, %s1799_s19  ;;  %v984_v6 = vpack.c.b16 %v976_v58, %v976_v58  ;;  %v660_v9 = vsel %vm373_vm0, %v658_v61, %v659_v62  ;;  %v529_v12 = vunpack.c.l.b16 %v1556_v63  ;;  %v1015_v15 = vshrl.u32 %v1929_v57, 16  ;;  %v1964_v39 = vld [vmem:[%s1835_s17 + $0x60] sm:$0xff]  ;;  %v183_v58 = vld [vmem:[%s1835_s17 + $0x50] sm:$0x1] }
  0x2b   : > { %v344_v7 = vsel %vm260_vm1, %v339_v53, %v343_v60  ;;  %v379_v14 = vsel %vm373_vm0, %v377_v1, %v378_v3  ;;  %v1019_v16 = vrot.slane %v1017_v5, 1  ;;  %v1108_v18 = vrot.slane %v1929_v57, 1  ;;  %v1982_v5 = vld [vmem:[%s1835_s17 + $0x48] sm:$0xff] }
  0x2c   : > { %v1022_v17 = vshll.u32 %v984_v6, 16  ;;  %v1109_v19 = vrot.slane %v984_v6, 1  ;;  %v392_v20 = vrot.slane %v1912_v33, 1  ;;  %v393_v21 = vrot.slane %v258_v42, 1  ;;  %v1967_v42 = vld [vmem:[%s1835_s17 + $0xa8] sm:$0xff] }
  0x2d   : > { %v246_v23 = vunpack.c.l.b16 %v180_v10  ;;  %v1952_v24 = vpack.c.b16 %v529_v12, %v529_v12  ;;  %v570_v25 = vshll.u32 %v1941_v11, 16  ;;  %v1020_v28 = vor.u32 %v1019_v16, %v1015_v15 }
  0x2e   : > { %v1024_v29 = vrot.slane %v1022_v17, 1  ;;  %v1110_v31 = vsel %vm373_vm0, %v1108_v18, %v1109_v19  ;;  %v394_v32 = vsel %vm373_vm0, %v392_v20, %v393_v21  ;;  %v977_v40 = vunpack.c.l.b16 %v1661_v26 }
  0x2f   : > { %693 = vrot.lane.b32.xlu1 %v678_v30, %s1798_s18  ;;  %1088 = vrot.lane.b32.xlu0 %v1013_v36, %s1799_s19  ;;  %v288_v30 = vshll.u32 %v1949_v22, 16  ;;  %v254_v35 = vpack.c.b16 %v246_v23, %v246_v23  ;;  %v568_v36 = vshrl.u32 %v1941_v11, 16  ;;  %v572_v37 = vrot.slane %v570_v25, 1 }
  0x30   : > { %v575_v38 = vshll.u32 %v1952_v24, 16  ;;  %v251_v41 = vunpack.c.l.b16 %v195_v27  ;;  %v1025_v44 = vsel %vm260_vm1, %v1020_v28, %v1024_v29  ;;  %v286_v45 = vshrl.u32 %v1949_v22, 16  ;;  %v1559_v28 = vld [vmem:[%s1835_s17 + $0x5c] sm:$0x1] }
  0x31   : > { %v290_v46 = vrot.slane %v288_v30, 1  ;;  %v293_v47 = vshll.u32 %v254_v35, 16  ;;  %v380_v48 = vrot.slane %v1949_v22, 1  ;;  %v573_v50 = vor.u32 %v572_v37, %v568_v36 }
  0x32   : > { %1128 = vrot.lane.b32.xlu2 %v1107_v56, %s1798_s18  ;;  %v577_v51 = vrot.slane %v575_v38, 1  ;;  %v985_v52 = vpack.c.b16 %v977_v40, %v977_v40  ;;  %v1029_v54 = vshll.u32 %v1964_v39, 16  ;;  %v348_v56 = vshll.u32 %v1967_v42, 16  ;;  %v1670_v38 = vld [vmem:[%s1835_s17 + $0xb0] sm:$0x1] }
  0x33   : > { %v291_v53 = vor.u32 %v290_v46, %v286_v45  ;;  %v295_v60 = vrot.slane %v293_v47, 1  ;;  %v1027_v62 = vshrl.u32 %v1964_v39, 16  ;;  %v346_v3 = vshrl.u32 %v1967_v42, 16  ;;  %v2011_v46 = vld [vmem:[%s1835_s17 + $0xa8] sm:$0xff] }
  0x34   : > { %v1031_v63 = vrot.slane %v1029_v54, 1  ;;  %v1034_v1 = vshll.u32 %v985_v52, 16  ;;  %v247_v6 = vunpack.c.l.b16 %v183_v58  ;;  %v300_v17 = vshll.u32 %v1982_v5, 16 }
  0x35   : > { %v296_v12 = vsel %vm260_vm1, %v291_v53, %v295_v60  ;;  %v661_v20 = vrot.slane %v1941_v11, 1  ;;  %v662_v21 = vrot.slane %v1952_v24, 1  ;;  %v298_v25 = vshrl.u32 %v1982_v5, 16 }
  0x36   : > { %v1036_v15 = vrot.slane %v1034_v1, 1  ;;  %v1988_v16 = vpack.c.b16 %v247_v6, %v247_v6  ;;  %v302_v26 = vrot.slane %v300_v17, 1  ;;  %v1111_v36 = vrot.slane %v1964_v39, 1  ;;  %v1562_v6 = vld [vmem:[%s1835_s17 + $0x74] sm:$0x1] }
  0x37   : > { %641 = vrot.lane.b32.xlu1 %v566_v49, %s1799_s19  ;;  %359 = vrot.lane.b32.xlu0 %v284_v55, %s1799_s19  ;;  %v381_v49 = vrot.slane %v254_v35, 1  ;;  %v259_v55 = vpack.c.b16 %v251_v41, %v251_v41  ;;  %v663_v30 = vsel %vm373_vm0, %v661_v20, %v662_v21  ;;  %v1112_v37 = vrot.slane %v985_v52, 1  ;;  %v2049_v21 = vld [vmem:[%s1835_s17 + $0x6c] sm:$0xff] }
  0x38   : > { %v305_v27 = vshll.u32 %v1988_v16, 16  ;;  %v303_v24 = vor.u32 %v302_v26, %v298_v25  ;;  %v395_v40 = vrot.slane %v1967_v42, 1  ;;  %v980_v47 = vunpack.c.l.b16 %v1670_v38  ;;  %v2052_v26 = vld [vmem:[%s1835_s17 + $0x60] sm:$0xff] }
  0x39   : > { %v382_v61 = vsel %vm373_vm0, %v380_v48, %v381_v49  ;;  %v353_v10 = vshll.u32 %v259_v55, 16  ;;  %v396_v41 = vrot.slane %v259_v55, 1  ;;  %v1113_v49 = vsel %vm373_vm0, %v1111_v36, %v1112_v37  ;;  %v2020_v55 = vld [vmem:[%s1835_s17 + $0x78] sm:$0xff]  ;;  %v2062_v37 = vld [vmem:[%s2409_s1] sm:$0xff] }
  0x3a   : > { %400 = vrot.lane.b32.xlu2 %v379_v14, %s1798_s18  ;;  %v1032_v14 = vor.u32 %v1031_v63, %v1027_v62  ;;  %v307_v35 = vrot.slane %v305_v27, 1  ;;  %v2022_v53 = vpack.c.b16 %v980_v47, %v980_v47  ;;  %v1065_v60 = vshll.u32 %v2011_v46, 16  ;;  %v1667_v47 = vld [vmem:[%s1835_s17 + $0x98] sm:$0x1] }
  0x3b   : > { %v355_v19 = vrot.slane %v353_v10, 1  ;;  %v383_v1 = vrot.slane %v1982_v5, 1  ;;  %v1063_v17 = vshrl.u32 %v2011_v46, 16 }
  0x3c   : > { %v1037_v23 = vsel %vm260_vm1, %v1032_v14, %v1036_v15  ;;  %v308_v48 = vsel %vm260_vm1, %v303_v24, %v307_v35  ;;  %v2042_v14 = vld [vmem:[%s2409_s1 + $0x8] sm:$0xff] }
  0x3f   : > { %369 = vrot.lane.b32.xlu1 %v344_v7, %s1799_s19  ;;  %681 = vrot.lane.b32.xlu0 %v660_v9, %s1798_s18  ;;  %v578_v7 = vsel %vm260_vm1, %v573_v50, %v577_v51  ;;  %v350_v9 = vrot.slane %v348_v56, 1  ;;  %v1664_v50 = vld [vmem:[%s1835_s17 + $0x80] sm:$0x1]  ;;  %v397_v51 = vsel %vm373_vm0, %v395_v40, %v396_v41  ;;  %v594_v40 = vshll.u32 %v2049_v21, 16  ;;  %v1755_v41 = vld [vmem:[%s2409_s1 + $0x28] sm:$0xff] }
  0x40   : > { %v978_v58 = vunpack.c.l.b16 %v1664_v50  ;;  %1767 = vmatpush.bf16.msra.mxu3 %v1755_v41  ;;  %774 = vmatpush.bf16.msra.mxu0 %v1755_v41  ;;  %v667_v41 = vrot.slane %v2049_v21, 1 }
  0x41   : > { %v351_v18 = vor.u32 %v350_v9, %v346_v3  ;;  %v384_v3 = vrot.slane %v1988_v16, 1  ;;  %v1067_v16 = vrot.slane %v1065_v60, 1  ;;  %v979_v60 = vunpack.c.l.b16 %v1667_v47  ;;  %v1565_v47 = vld [vmem:[%s1835_s17 + $0x8c] sm:$0x1] }
  0x42   : > { %1090 = vrot.lane.b32.xlu2 %v1025_v44, %s1799_s19  ;;  %v986_v15 = vpack.c.b16 %v978_v58, %v978_v58  ;;  %v2082_v58 = vld [vmem:[%s1835_s17 + $0x90] sm:$0xff] }
  0x43   : > { %v356_v29 = vsel %vm260_vm1, %v351_v18, %v355_v19  ;;  %v1070_v18 = vshll.u32 %v2022_v53, 16  ;;  %v385_v20 = vsel %vm373_vm0, %v383_v1, %v384_v3  ;;  %v1068_v35 = vor.u32 %v1067_v16, %v1063_v17  ;;  %v2102_v17 = vld [vmem:[%s2409_s1 + $0x40] sm:$0xff] }
  0x44   : > { %v1115_v24 = vrot.slane %v986_v15, 1  ;;  %1220 = vmatpush.bf16.msra.mxu2 %v2102_v17 }
  0x45   : > { %v1072_v36 = vrot.slane %v1070_v18, 1 }
  0x47   : > { %1130 = vrot.lane.b32.xlu1 %v1110_v31, %s1798_s18  ;;  %410 = vrot.lane.b32.xlu0 %v394_v32, %s1798_s18  ;;  %v2002_v31 = vld [vmem:[%s1835_s17 + $0x54] sm:$0xff]  ;;  %v530_v32 = vunpack.c.l.b16 %v1559_v28  ;;  %v1039_v28 = vshrl.u32 %v2020_v55, 16 }
  0x48   : > { %v582_v44 = vshll.u32 %v2002_v31, 16  ;;  %v580_v52 = vshrl.u32 %v2002_v31, 16  ;;  %v664_v62 = vrot.slane %v2002_v31, 1 }
  0x49   : > { %v538_v45 = vpack.c.b16 %v530_v32, %v530_v32  ;;  %v1114_v32 = vrot.slane %v2020_v55, 1 }
  0x4a   : > { %361 = vrot.lane.b32.xlu2 %v296_v12, %s1799_s19  ;;  %v584_v54 = vrot.slane %v582_v44, 1  ;;  %v1041_v12 = vshll.u32 %v2020_v55, 16 }
  0x4b   : > { %v587_v56 = vshll.u32 %v538_v45, 16  ;;  %v665_v63 = vrot.slane %v538_v45, 1  ;;  %v312_v45 = vshll.u32 %v2052_v26, 16  ;;  %v1116_v50 = vsel %vm373_vm0, %v1114_v32, %v1115_v24  ;;  %v2127_v24 = vld [vmem:[%s1835_s17 + $0xc0] sm:$0xff] }
  0x4c   : > { %v585_v9 = vor.u32 %v584_v54, %v580_v52  ;;  %v592_v52 = vshrl.u32 %v2049_v21, 16  ;;  %v596_v54 = vrot.slane %v594_v40, 1 }
  0x4d   : > { %v589_v10 = vrot.slane %v587_v56, 1  ;;  %v666_v19 = vsel %vm373_vm0, %v664_v62, %v665_v63  ;;  %v1754_v62 = vld [vmem:[%s2409_s1 + $0x20] sm:$0xff]  ;;  %v310_v63 = vshrl.u32 %v2052_v26, 16  ;;  %v314_v1 = vrot.slane %v312_v45, 1 }
  0x4e   : > { %1768 = vmatpush.bf16.msra.mxu3 %v1754_v62  ;;  %775 = vmatpush.bf16.msra.mxu0 %v1754_v62 }
  0x4f   : > { %402 = vrot.lane.b32.xlu1 %v382_v61, %s1798_s18  ;;  %643 = vrot.lane.b32.xlu0 %v578_v7, %s1799_s19  ;;  %v2028_v61 = vld [vmem:[%s2409_s1 + $0x10] sm:$0xff]  ;;  %v186_v7 = vld [vmem:[%s1835_s17 + $0x68] sm:$0x1]  ;;  %v590_v27 = vsel %vm260_vm1, %v585_v9, %v589_v10  ;;  %v2092_v10 = vpack.c.b16 %v979_v60, %v979_v60  ;;  %v315_v16 = vor.u32 %v314_v1, %v310_v63  ;;  %v532_v60 = vunpack.c.l.b16 %v1565_v47 }
  0x50   : > { %857 = vmatpush.bf16.msra.mxu1 %v2028_v61  ;;  %v248_v25 = vunpack.c.l.b16 %v186_v7  ;;  %v597_v7 = vor.u32 %v596_v54, %v592_v52  ;;  %v189_v54 = vld [vmem:[%s1835_s17 + $0x80] sm:$0x1] }
  0x52   : > { %683 = vrot.lane.b32.xlu2 %v663_v30, %s1798_s18  ;;  %v1046_v30 = vshll.u32 %v986_v15, 16  ;;  %v2072_v44 = vpack.c.b16 %v248_v25, %v248_v25  ;;  %v1753_v15 = vld [vmem:[%s2409_s1 + $0x18] sm:$0xff]  ;;  %v1051_v25 = vshrl.u32 %v2082_v58, 16 }
  0x53   : > { %1769 = vmatpush.bf16.msra.mxu3 %v1753_v15  ;;  %776 = vmatpush.bf16.msra.mxu0 %v1753_v15  ;;  %v540_v15 = vpack.c.b16 %v532_v60, %v532_v60 }
  0x54   : > { %858 = vmatpush.bf16.msra.mxu1 %v2042_v14  ;;  %v317_v3 = vshll.u32 %v2072_v44, 16 }
  0x56   : > { %v319_v18 = vrot.slane %v317_v3, 1  ;;  %v1123_v3 = vrot.slane %v2127_v24, 1 }
  0x57   : > { %1092 = vrot.lane.b32.xlu1 %v1037_v23, %s1799_s19  ;;  %371 = vrot.lane.b32.xlu0 %v356_v29, %s1799_s19  ;;  %v531_v23 = vunpack.c.l.b16 %v1562_v6  ;;  %v1043_v29 = vrot.slane %v1041_v12, 1  ;;  %v1053_v12 = vshll.u32 %v2082_v58, 16 }
  0x58   : > { %859 = vmatpush.bf16.msra.mxu1 %v2062_v37  ;;  %1770 = vmatpush.bf16.msrb.mxu3 %v2028_v61  ;;  %v2123_v61 = vld [vmem:[%s2409_s1 + $0x30] sm:$0xff] }
  0x59   : > { %v2065_v38 = vpack.c.b16 %v531_v23, %v531_v23 }
  0x5a   : > { %412 = vrot.lane.b32.xlu2 %v397_v51, %s1798_s18  ;;  %v1073_v51 = vsel %vm260_vm1, %v1068_v35, %v1072_v36 }
  0x5b   : > { %v599_v56 = vshll.u32 %v2065_v38, 16  ;;  %v668_v45 = vrot.slane %v2065_v38, 1 }
  0x5c   : > { %1771 = vmatpush.bf16.msrb.mxu3 %v2042_v14 }
  0x5d   : > { %v601_v9 = vrot.slane %v599_v56, 1  ;;  %v669_v38 = vsel %vm373_vm0, %v667_v41, %v668_v45  ;;  %v2144_v56 = vld [vmem:[%s1835_s17 + $0x84] sm:$0xff] }
  0x5f   : > { %363 = vrot.lane.b32.xlu1 %v308_v48, %s1799_s19  ;;  %1132 = vrot.lane.b32.xlu0 %v1113_v49, %s1798_s18  ;;  %v1044_v48 = vor.u32 %v1043_v29, %v1039_v28  ;;  %v1048_v49 = vrot.slane %v1046_v30, 1  ;;  %v602_v23 = vsel %vm260_vm1, %v597_v7, %v601_v9  ;;  %v1058_v28 = vshll.u32 %v2092_v10, 16  ;;  %v1673_v29 = vld [vmem:[%s1835_s17 + $0xc8] sm:$0x1]  ;;  %v2153_v9 = vld [vmem:[%s1835_s17 + $0x78] sm:$0xff] }
  0x60   : > { %v320_v30 = vsel %vm260_vm1, %v315_v16, %v319_v18  ;;  %v981_v35 = vunpack.c.l.b16 %v1673_v29  ;;  %1772 = vmatpush.bf16.msrb.mxu3 %v2062_v37  ;;  %v1117_v37 = vrot.slane %v2082_v58, 1  ;;  %v1118_v7 = vrot.slane %v2092_v10, 1 }
  0x61   : > { %v1049_v6 = vsel %vm260_vm1, %v1044_v48, %v1048_v49  ;;  %v1060_v40 = vrot.slane %v1058_v28, 1  ;;  %v386_v48 = vrot.slane %v2052_v26, 1  ;;  %v387_v49 = vrot.slane %v2072_v44, 1 }
  0x62   : > { %645 = vrot.lane.b32.xlu2 %v590_v27, %s1799_s19  ;;  %v1055_v27 = vrot.slane %v1053_v12, 1  ;;  %v1075_v44 = vshrl.u32 %v2127_v24, 16  ;;  %v249_v12 = vunpack.c.l.b16 %v189_v54  ;;  %v606_v16 = vshll.u32 %v2144_v56, 16 }
  0x63   : > { %v388_v62 = vsel %vm373_vm0, %v386_v48, %v387_v49  ;;  %v604_v28 = vshrl.u32 %v2144_v56, 16  ;;  %v389_v45 = vrot.slane %v2153_v9, 1 }
  0x64   : > { %v1056_v36 = vor.u32 %v1055_v27, %v1051_v25  ;;  %v1119_v27 = vsel %vm373_vm0, %v1117_v37, %v1118_v7  ;;  %v257_v10 = vpack.c.b16 %v249_v12, %v249_v12  ;;  %v608_v29 = vrot.slane %v606_v16, 1 }
  0x66   : > { %v1061_v52 = vsel %vm260_vm1, %v1056_v36, %v1060_v40  ;;  %v329_v40 = vshll.u32 %v257_v10, 16  ;;  %v390_v47 = vrot.slane %v257_v10, 1  ;;  %v609_v49 = vor.u32 %v608_v29, %v604_v28 }
  0x67   : > { %685 = vrot.lane.b32.xlu1 %v666_v19, %s1798_s18  ;;  %404 = vrot.lane.b32.xlu0 %v385_v20, %s1798_s18  ;;  %v1120_v19 = vrot.slane %v2011_v46, 1  ;;  %v1121_v20 = vrot.slane %v2022_v53, 1  ;;  %v2115_v53 = vld [vmem:[%s2409_s1 + $0x38] sm:$0xff] }
  0x68   : > { %1221 = vmatpush.bf16.msra.mxu2 %v2115_v53 }
  0x69   : > { %v1122_v32 = vsel %vm373_vm0, %v1120_v19, %v1121_v20  ;;  %v324_v20 = vshll.u32 %v2153_v9, 16 }
  0x6a   : > { %1094 = vrot.lane.b32.xlu2 %v1049_v6, %s1799_s19 }
  0x6b   : > { %v326_v36 = vrot.slane %v324_v20, 1 }
  0x6c   : > { %1222 = vmatpush.bf16.msra.mxu2 %v2123_v61 }
  0x6f   : > { %1134 = vrot.lane.b32.xlu1 %v1116_v50, %s1798_s18  ;;  %1098 = vrot.lane.b32.xlu0 %v1073_v51, %s1799_s19  ;;  %v1077_v50 = vshll.u32 %v2127_v24, 16  ;;  %v989_v51 = vpack.c.b16 %v981_v35, %v981_v35  ;;  %v322_v35 = vshrl.u32 %v2153_v9, 16 }
  0x71   : > { %v1079_v63 = vrot.slane %v1077_v50, 1  ;;  %v1082_v1 = vshll.u32 %v989_v51, 16  ;;  %v1124_v6 = vrot.slane %v989_v51, 1  ;;  %v327_v51 = vor.u32 %v326_v36, %v322_v35 }
  0x72   : > { %1138 = vrot.lane.b32.xlu2 %v1122_v32, %s1798_s18 }
  0x73   : > { %v1080_v18 = vor.u32 %v1079_v63, %v1075_v44  ;;  %v1084_v19 = vrot.slane %v1082_v1, 1  ;;  %v1125_v25 = vsel %vm373_vm0, %v1123_v3, %v1124_v6  ;;  %v670_v63 = vrot.slane %v2144_v56, 1 }
  0x74   : > { %v358_v14 = vpop.permute.xlu2 %357  ;;  %v671_v1 = vrot.slane %v540_v15, 1 }
  0x75   : > { %v1085_v32 = vsel %vm260_vm1, %v1080_v18, %v1084_v19  ;;  %v416_v41 = vsel %vm414_vm2, %v1842_v2, %v358_v14 }
  0x76   : > { %v672_v12 = vsel %vm373_vm0, %v670_v63, %v671_v1 }
  0x77   : > { %647 = vrot.lane.b32.xlu1 %v602_v23, %s1799_s19  ;;  %365 = vrot.lane.b32.xlu0 %v320_v30, %s1799_s19  ;;  %v611_v30 = vshll.u32 %v540_v15, 16 }
  0x79   : > { %v613_v50 = vrot.slane %v611_v30, 1 }
  0x7a   : > { %406 = vrot.lane.b32.xlu2 %v388_v62, %s1798_s18  ;;  %v391_v62 = vsel %vm373_vm0, %v389_v45, %v390_v47 }
  0x7b   : > { %v614_v2 = vsel %vm260_vm1, %v609_v49, %v613_v50 }
  0x7c   : > { %v640_v23 = vpop.permute.xlu2 %639 }
  0x7d   : > { %v696_v16 = vsel %vm414_vm2, %v1864_v34, %v640_v23 }
  0x7f   : > { %1096 = vrot.lane.b32.xlu1 %v1061_v52, %s1799_s19  ;;  %687 = vrot.lane.b32.xlu0 %v669_v38, %s1798_s18  ;;  %v331_v52 = vrot.slane %v329_v40, 1 }
  0x81   : > { %v332_v14 = vsel %vm260_vm1, %v327_v51, %v331_v52 }
  0x82   : > { %1100 = vrot.lane.b32.xlu2 %v1085_v32, %s1799_s19 }
  0x84   : > { %v654_v54 = vpop.permute.xlu2 %653 }
  0x85   : > { %v710_v34 = vsel %vm414_vm2, %v1886_v59, %v654_v54 }
  0x87   : > { %1140 = vrot.lane.b32.xlu1 %v1125_v25, %s1798_s18  ;;  %1136 = vrot.lane.b32.xlu0 %v1119_v27, %s1798_s18 }
  0x89   : > { %v692_v48 = vpop.permute.xlu1 %691  ;;  %v399_v38 = vpop.permute.xlu0 %398 }
  0x8a   : > { %v433_v60 = vsel %vm431_vm3, %v416_v41, %v399_v38  ;;  %367 = vrot.lane.b32.xlu2 %v332_v14, %s1799_s19 }
  0x8b   : > { %1642 = vmatmul.msk.bf16.vlgmr.msra.gmra.mxu1 %vm752_vm4, %v433_v60 }
  0x8c   : > { %v1129_v6 = vpop.permute.xlu2 %1128 }
  0x8f   : > { %408 = vrot.lane.b32.xlu1 %v391_v62, %s1798_s18  ;;  %649 = vrot.lane.b32.xlu0 %v614_v2, %s1799_s19 }
  0x91   : > { %v1127_v44 = vpop.permute.xlu1 %1126  ;;  %v652_v3 = vpop.permute.xlu0 %651 }
  0x92   : > { %v708_v37 = vsel %vm414_vm2, %v1838_v0, %v652_v3  ;;  %689 = vrot.lane.b32.xlu2 %v672_v12, %s1798_s18 }
  0x93   : > { %v724_v7 = vsel %vm431_vm3, %v708_v37, %v692_v48 }
  0x94   : > { %1628 = vmatmul.msk.bf16.vlgmr.msra.gmra.mxu3 %vm752_vm4, %v724_v7  ;;  %v401_v20 = vpop.permute.xlu2 %400 }
  0x95   : > { %1773 = vmatpush.bf16.msra.mxu3 %v2102_v17 }
  0x99   : > { %v680_v18 = vpop.permute.xlu1 %679  ;;  %v1087_v15 = vpop.permute.xlu0 %1086  ;;  %1774 = vmatpush.bf16.msra.mxu3 %v2115_v53 }
  0x9a   : > { %v712_v19 = vsel %vm431_vm3, %v696_v16, %v680_v18  ;;  %v1143_v0 = vsel %vm414_vm2, %v1850_v13, %v1087_v15 }
  0x9b   : > { %1622 = vmatmul.msk.bf16.vlgmr.msra.gmra.mxu0 %vm752_vm4, %v712_v19  ;;  %v1159_v25 = vsel %vm431_vm3, %v1143_v0, %v1127_v44 }
  0x9c   : > { %1724 = vmatmul.msk.bf16.vlgmr.msra.gmra.mxu2 %vm752_vm4, %v1159_v25  ;;  %v1091_v10 = vpop.permute.xlu2 %1090 }
  0x9d   : > { %1775 = vmatpush.bf16.msra.mxu3 %v2123_v61 }
  0xa1   : > { %v694_v17 = vpop.permute.xlu1 %693  ;;  %v1089_v23 = vpop.permute.xlu0 %1088 }
  0xa2   : > { %v726_v27 = vsel %vm431_vm3, %v710_v34, %v694_v17  ;;  %v1145_v13 = vsel %vm414_vm2, %v1870_v43, %v1089_v23 }
  0xa3   : > { %v1161_v59 = vsel %vm431_vm3, %v1145_v13, %v1129_v6 }
  0xa4   : > { %1629 = vmatmul.msk.bf16.gmra.mxu3 %vm752_vm4, %v726_v27  ;;  %v362_v29 = vpop.permute.xlu2 %361 }
  0xa9   : > { %v642_v53 = vpop.permute.xlu1 %641  ;;  %v360_v28 = vpop.permute.xlu0 %359 }
  0xaa   : > { %v418_v30 = vsel %vm414_vm2, %v1896_v8, %v360_v28  ;;  %v698_v35 = vsel %vm414_vm2, %v1891_v4, %v642_v53  ;;  %v1147_v8 = vsel %vm414_vm2, %v1929_v57, %v1091_v10  ;;  %v420_v4 = vsel %vm414_vm2, %v1949_v22, %v362_v29 }
  0xab   : > { %v435_v61 = vsel %vm431_vm3, %v418_v30, %v401_v20 }
  0xac   : > { %1643 = vmatmul.msk.bf16.gmra.mxu1 %vm752_vm4, %v435_v61  ;;  %1725 = vmatmul.msk.bf16.gmra.mxu2 %vm752_vm4, %v1161_v59  ;;  %v684_v43 = vpop.permute.xlu2 %683 }
  0xb1   : > { %v370_v32 = vpop.permute.xlu1 %369  ;;  %v682_v36 = vpop.permute.xlu0 %681 }
  0xb2   : > { %v714_v40 = vsel %vm431_vm3, %v698_v35, %v682_v36  ;;  %v428_v45 = vsel %vm414_vm2, %v1912_v33, %v370_v32 }
  0xb3   : > { %1623 = vmatmul.msk.bf16.gmra.mxu0 %vm752_vm4, %v714_v40 }
  0xb4   : > { %v413_v50 = vpop.permute.xlu2 %412 }
  0xb9   : > { %v1131_v41 = vpop.permute.xlu1 %1130  ;;  %v411_v47 = vpop.permute.xlu0 %410 }
  0xba   : > { %v1163_v48 = vsel %vm431_vm3, %v1147_v8, %v1131_v41  ;;  %v445_v49 = vsel %vm431_vm3, %v428_v45, %v411_v47  ;;  %v2299_v41 = vld [vmem:[%s2410_s2] ss:$0 sm:$0xff] }
  0xbb   : > { %1648 = vmatmul.msk.bf16.vlgmr.msrb.gmra.mxu3 %vm752_vm4, %v445_v49 }
  0xbc   : > { %1726 = vmatmul.msk.bf16.gmra.mxu2 %vm752_vm4, %v1163_v48  ;;  %v646_v54 = vpop.permute.xlu2 %645 }
  0xbd   : > { %v702_v3 = vsel %vm414_vm2, %v2002_v31, %v646_v54 }
  0xc1   : > { %v403_v51 = vpop.permute.xlu1 %402  ;;  %v644_v52 = vpop.permute.xlu0 %643 }
  0xc2   : > { %v437_v57 = vsel %vm431_vm3, %v420_v4, %v403_v51  ;;  %v700_v33 = vsel %vm414_vm2, %v1941_v11, %v644_v52 }
  0xc3   : > { %1644 = vmatmul.msk.bf16.gmra.mxu1 %vm752_vm4, %v437_v57  ;;  %v716_v38 = vsel %vm431_vm3, %v700_v33, %v684_v43 }
  0xc4   : > { %1624 = vmatmul.msk.bf16.gmra.mxu0 %vm752_vm4, %v716_v38  ;;  %v1095_v14 = vpop.permute.xlu2 %1094 }
  0xc5   : > { %v1151_v16 = vsel %vm414_vm2, %v2020_v55, %v1095_v14 }
  0xc9   : > { %v1093_v60 = vpop.permute.xlu1 %1092  ;;  %v372_v62 = vpop.permute.xlu0 %371 }
  0xca   : > { %v430_v2 = vsel %vm414_vm2, %v1967_v42, %v372_v62  ;;  %v1149_v11 = vsel %vm414_vm2, %v1964_v39, %v1093_v60 }
  0xcb   : > { %v447_v22 = vsel %vm431_vm3, %v430_v2, %v413_v50 }
  0xcc   : > { %1649 = vmatmul.msk.bf16.gmra.mxu3 %vm752_vm4, %v447_v22  ;;  %v1139_v37 = vpop.permute.xlu2 %1138 }
  0xd1   : > { %v364_v44 = vpop.permute.xlu1 %363  ;;  %v1133_v63 = vpop.permute.xlu0 %1132 }
  0xd2   : > { %v1165_v1 = vsel %vm431_vm3, %v1149_v11, %v1133_v63  ;;  %v422_v42 = vsel %vm414_vm2, %v1982_v5, %v364_v44 }
  0xd3   : > { %1727 = vmatmul.msk.bf16.gmra.mxu2 %vm752_vm4, %v1165_v1 }
  0xd4   : > { %v407_v5 = vpop.permute.xlu2 %406 }
  0xd9   : > { %v686_v6 = vpop.permute.xlu1 %685  ;;  %v405_v7 = vpop.permute.xlu0 %404 }
  0xda   : > { %v718_v12 = vsel %vm431_vm3, %v702_v3, %v686_v6  ;;  %v439_v39 = vsel %vm431_vm3, %v422_v42, %v405_v7 }
  0xdb   : > { %1625 = vmatmul.msk.bf16.gmra.mxu0 %vm752_vm4, %v718_v12  ;;  %1645 = vmatmul.msk.bf16.gmra.mxu1 %vm752_vm4, %v439_v39 }
  0xdc   : > { %v1101_v17 = vpop.permute.xlu2 %1100 }
  0xdd   : > { %v1157_v53 = vsel %vm414_vm2, %v2127_v24, %v1101_v17 }
  0xe1   : > { %v1135_v18 = vpop.permute.xlu1 %1134  ;;  %v1099_v15 = vpop.permute.xlu0 %1098 }
  0xe2   : > { %v1167_v31 = vsel %vm431_vm3, %v1151_v16, %v1135_v18  ;;  %v1155_v19 = vsel %vm414_vm2, %v2011_v46, %v1099_v15 }
  0xe3   : > { %v1171_v20 = vsel %vm431_vm3, %v1155_v19, %v1139_v37  ;;  %1728 = vmatmul.msk.bf16.gmra.mxu2 %vm752_vm4, %v1167_v31 }
  0xe4   : > { %1730 = vmatmul.msk.bf16.vlgmr.msra.gmra.mxu3 %vm752_vm4, %v1171_v20  ;;  %v368_v13 = vpop.permute.xlu2 %367 }
  0xe9   : > { %v648_v0 = vpop.permute.xlu1 %647  ;;  %v366_v25 = vpop.permute.xlu0 %365 }
  0xea   : > { %v424_v34 = vsel %vm414_vm2, %v2052_v26, %v366_v25  ;;  %v704_v46 = vsel %vm414_vm2, %v2049_v21, %v648_v0  ;;  %v426_v21 = vsel %vm414_vm2, %v2153_v9, %v368_v13 }
  0xeb   : > { %v441_v55 = vsel %vm431_vm3, %v424_v34, %v407_v5 }
  0xec   : > { %1646 = vmatmul.msk.bf16.gmra.mxu1 %vm752_vm4, %v441_v55  ;;  %v690_v32 = vpop.permute.xlu2 %689 }
  0xf1   : > { %v1097_v23 = vpop.permute.xlu1 %1096  ;;  %v688_v27 = vpop.permute.xlu0 %687 }
  0xf2   : > { %v720_v10 = vsel %vm431_vm3, %v704_v46, %v688_v27  ;;  %v1153_v26 = vsel %vm414_vm2, %v2082_v58, %v1097_v23 }
  0xf3   : > { %1626 = vmatmul.msk.bf16.gmra.mxu0 %vm752_vm4, %v720_v10 }
  0xf9   : > { %v1141_v28 = vpop.permute.xlu1 %1140  ;;  %v1137_v29 = vpop.permute.xlu0 %1136 }
  0xfa   : > { %v1173_v30 = vsel %vm431_vm3, %v1157_v53, %v1141_v28  ;;  %v1169_v61 = vsel %vm431_vm3, %v1153_v26, %v1137_v29 }
  0xfb   : > { %1731 = vmatmul.msk.bf16.gmra.mxu3 %vm752_vm4, %v1173_v30  ;;  %1729 = vmatmul.msk.bf16.gmra.mxu2 %vm752_vm4, %v1169_v61 }
 0x101   : > { %v409_v59 = vpop.permute.xlu1 %408  ;;  %v650_v24 = vpop.permute.xlu0 %649 }
 0x102   : > { %v443_v35 = vsel %vm431_vm3, %v426_v21, %v409_v59  ;;  %v706_v58 = vsel %vm414_vm2, %v2144_v56, %v650_v24  ;;  %v1800_v56 = vmov 0.0|0.0  }
 0x103   : > { %1647 = vmatmul.msk.bf16.gmra.mxu1 %vm752_vm4, %v443_v35  ;;  %v722_v36 = vsel %vm431_vm3, %v706_v58, %v690_v32  ;;  %1423 = vst.msk [vmem:[%s2280_s16] sm:$0xf] %vm1422_vm5, %v1800_v56 }
 0x104   : > { %1627 = vmatmul.msk.bf16.gmra.mxu0 %vm752_vm4, %v722_v36  ;;  %1424 = vst.msk [vmem:[%s2280_s16 + $0x4] sm:$0xf] %vm1422_vm5, %v1800_v56 }
 0x105   : > { %1426 = vst.msk [vmem:[%s2280_s16 + $0x8] sm:$0x1] %vm1425_vm6, %v1800_v56 }
 0x106   : > { %1451 = vst.msk [vmem:[%s2280_s16 + $0x6c] sm:$0xf] %vm1422_vm5, %v1800_v56 }
 0x107   : > { %1452 = vst.msk [vmem:[%s2280_s16 + $0x70] sm:$0xf] %vm1422_vm5, %v1800_v56 }
 0x108   : > { %1453 = vst.msk [vmem:[%s2280_s16 + $0x74] sm:$0x1] %vm1425_vm6, %v1800_v56  ;;  %v861_v40 = vpop.f32.mrf.mxu1 }
 0x110   : > { %v863_v51 = vpop.f32.mrf.mxu1 }
 0x117   : > { %v2294_v43 = vpop.f32.mrf.mxu3 }
 0x118   : > { %v778_v9 = vpop.f32.mrf.mxu0 }
 0x119   : > { %v862_v8 = vadd.f32 %v861_v40, %v778_v9 }
 0x11f   : > { %v1224_v45 = vpop.f32.mrf.mxu2  ;;  %v2302_v50 = vpop.f32.mrf.mxu3 }
 0x120   : > { %v1264_v47 = vadd.f32 %v1224_v45, %v862_v8  ;;  %v780_v49 = vpop.f32.mrf.mxu0 }
 0x121   : > { %v864_v57 = vadd.f32 %v863_v51, %v780_v49 }
 0x122   : > { %v1284_v48 = vadd.f32 %v2299_v41, %v1264_v47 }
 0x124   : > { %v1300_v4 = vmax.f32 %v1284_v48, 0.0 }
 0x126   : > { %v1333_v52 = vrot.slane %v1300_v4, 7 }
 0x127   : > { %v1226_v33 = vpop.f32.mrf.mxu2  ;;  %v2308_v14 = vpop.f32.mrf.mxu3 }
 0x128   : > { %v1381_v38 = vsel %vm1332_vm7, 0.0, %v1333_v52  ;;  %v1265_v54 = vadd.f32 %v1226_v33, %v864_v57 }
 0x129   : > { %v1398_v60 = vpack.c.bf16 %v1381_v38, %v1381_v38  ;;  %v866_v22 = vpop.f32.mrf.mxu1 }
 0x12a   : > { %v1285_v62 = vadd.f32 %v2299_v41, %v1265_v54 }
 0x12b   : > { %1427 = vst.msk [vmem:[%s2280_s16 + $0xc] sm:$0xf] %vm1422_vm5, %v1398_v60 }
 0x12c   : > { %v1301_v2 = vmax.f32 %v1285_v62, 0.0 }
 0x12e   : > { %v1334_v44 = vrot.slane %v1301_v2, 7 }
 0x12f   : > { %v1229_v11 = vpop.f32.mrf.mxu2  ;;  %v2317_v15 = vpop.f32.mrf.mxu3 }
 0x130   : > { %v1335_v63 = vsel %vm1332_vm7, %v1333_v52, %v1334_v44  ;;  %v1389_v1 = vsel %vm1332_vm7, %v1334_v44, 0.0  ;;  %v783_v3 = vpop.f32.mrf.mxu0 }
 0x131   : > { %v1399_v6 = vpack.c.bf16 %v1335_v63, %v1335_v63  ;;  %v1400_v37 = vpack.c.bf16 %v1389_v1, %v1389_v1  ;;  %v867_v42 = vadd.f32 %v866_v22, %v783_v3  ;;  %v868_v16 = vpop.f32.mrf.mxu1 }
 0x133   : > { %1428 = vst.msk [vmem:[%s2280_s16 + $0x10] sm:$0xf] %vm1422_vm5, %v1399_v6  ;;  %v1266_v7 = vadd.f32 %v1229_v11, %v867_v42 }
 0x134   : > { %1429 = vst.msk [vmem:[%s2280_s16 + $0x14] sm:$0x1] %vm1425_vm6, %v1400_v37 }
 0x135   : > { %v1286_v12 = vadd.f32 %v2299_v41, %v1266_v7 }
 0x137   : > { %v1302_v39 = vmax.f32 %v1286_v12, 0.0  ;;  %v1231_v18 = vpop.f32.mrf.mxu2 }
 0x138   : > { %v785_v31 = vpop.f32.mrf.mxu0 }
 0x139   : > { %v1336_v19 = vrot.slane %v1302_v39, 7  ;;  %v869_v5 = vadd.f32 %v868_v16, %v785_v31 }
 0x13b   : > { %v1382_v20 = vsel %vm1332_vm7, 0.0, %v1336_v19  ;;  %v1267_v0 = vadd.f32 %v1231_v18, %v869_v5 }
 0x13c   : > { %v1401_v25 = vpack.c.bf16 %v1382_v20, %v1382_v20 }
 0x13d   : > { %v1287_v34 = vadd.f32 %v2299_v41, %v1267_v0 }
 0x13e   : > { %1430 = vst.msk [vmem:[%s2280_s16 + $0x18] sm:$0xf] %vm1422_vm5, %v1401_v25  ;;  %v891_v23 = vpop.f32.mrf.mxu3 }
 0x13f   : > { %v1303_v55 = vmax.f32 %v1287_v34, 0.0  ;;  %v1234_v27 = vpop.f32.mrf.mxu2  ;;  %v892_v12 = vadd.f32 %v891_v23, %v2294_v43 }
 0x140   : > { %v871_v17 = vpop.f32.mrf.mxu1 }
 0x141   : > { %v1337_v46 = vrot.slane %v1303_v55, 7  ;;  %v788_v10 = vpop.f32.mrf.mxu0 }
 0x142   : > { %v872_v13 = vadd.f32 %v871_v17, %v788_v10 }
 0x143   : > { %v1338_v53 = vsel %vm1332_vm7, %v1336_v19, %v1337_v46  ;;  %v1390_v28 = vsel %vm1332_vm7, %v1337_v46, 0.0 }
 0x144   : > { %v1402_v26 = vpack.c.bf16 %v1338_v53, %v1338_v53  ;;  %v1403_v29 = vpack.c.bf16 %v1390_v28, %v1390_v28  ;;  %v1268_v30 = vadd.f32 %v1234_v27, %v872_v13 }
 0x146   : > { %1431 = vst.msk [vmem:[%s2280_s16 + $0x1c] sm:$0xf] %vm1422_vm5, %v1402_v26  ;;  %v1288_v61 = vadd.f32 %v2299_v41, %v1268_v30  ;;  %v893_v58 = vpop.f32.mrf.mxu3 }
 0x147   : > { %1432 = vst.msk [vmem:[%s2280_s16 + $0x20] sm:$0x1] %vm1425_vm6, %v1403_v29  ;;  %v1236_v36 = vpop.f32.mrf.mxu2  ;;  %v894_v43 = vadd.f32 %v893_v58, %v2302_v50 }
 0x148   : > { %v873_v21 = vpop.f32.mrf.mxu1  ;;  %v1304_v59 = vmax.f32 %v1288_v61, 0.0 }
 0x149   : > { %v790_v32 = vpop.f32.mrf.mxu0 }
 0x14a   : > { %v1339_v24 = vrot.slane %v1304_v59, 7  ;;  %v874_v35 = vadd.f32 %v873_v21, %v790_v32 }
 0x14c   : > { %v1383_v56 = vsel %vm1332_vm7, 0.0, %v1339_v24  ;;  %v1269_v9 = vadd.f32 %v1236_v36, %v874_v35 }
 0x14d   : > { %v1404_v40 = vpack.c.bf16 %v1383_v56, %v1383_v56 }
 0x14e   : > { %v1289_v8 = vadd.f32 %v2299_v41, %v1269_v9 }
 0x14f   : > { %1433 = vst.msk [vmem:[%s2280_s16 + $0x24] sm:$0xf] %vm1422_vm5, %v1404_v40  ;;  %v2336_v52 = vpop.f32.mrf.mxu3 }
 0x150   : > { %v1305_v45 = vmax.f32 %v1289_v8, 0.0 }
 0x152   : > { %v1340_v47 = vrot.slane %v1305_v45, 7 }
 0x154   : > { %v1341_v48 = vsel %vm1332_vm7, %v1339_v24, %v1340_v47  ;;  %v1391_v49 = vsel %vm1332_vm7, %v1340_v47, 0.0  ;;  %v897_v47 = vadd.f32 %v2336_v52, %v2308_v14 }
 0x155   : > { %v1405_v4 = vpack.c.bf16 %v1341_v48, %v1341_v48  ;;  %v1406_v51 = vpack.c.bf16 %v1391_v49, %v1391_v49 }
 0x156   : > { %v1239_v33 = vpop.f32.mrf.mxu2 }
 0x157   : > { %1434 = vst.msk [vmem:[%s2280_s16 + $0x28] sm:$0xf] %vm1422_vm5, %v1405_v4  ;;  %v2343_v2 = vpop.f32.mrf.mxu3 }
 0x158   : > { %v793_v57 = vpop.f32.mrf.mxu0  ;;  %1435 = vst.msk [vmem:[%s2280_s16 + $0x2c] sm:$0x1] %vm1425_vm6, %v1406_v51  ;;  %v876_v38 = vpop.f32.mrf.mxu1  ;;  %v899_v52 = vadd.f32 %v2343_v2, %v2317_v15 }
 0x159   : > { %v877_v54 = vadd.f32 %v876_v38, %v793_v57 }
 0x15b   : > { %v1270_v60 = vadd.f32 %v1239_v33, %v877_v54 }
 0x15d   : > { %v1290_v62 = vadd.f32 %v2299_v41, %v1270_v60 }
 0x15e   : > { %v1241_v3 = vpop.f32.mrf.mxu2 }
 0x15f   : > { %v1306_v22 = vmax.f32 %v1290_v62, 0.0 }
 0x160   : > { %v795_v44 = vpop.f32.mrf.mxu0  ;;  %v878_v11 = vpop.f32.mrf.mxu1 }
 0x161   : > { %v1342_v63 = vrot.slane %v1306_v22, 7  ;;  %v879_v1 = vadd.f32 %v878_v11, %v795_v44 }
 0x163   : > { %v1384_v6 = vsel %vm1332_vm7, 0.0, %v1342_v63  ;;  %v1271_v37 = vadd.f32 %v1241_v3, %v879_v1 }
 0x164   : > { %v1407_v42 = vpack.c.bf16 %v1384_v6, %v1384_v6 }
 0x165   : > { %v1291_v7 = vadd.f32 %v2299_v41, %v1271_v37 }
 0x166   : > { %1436 = vst.msk [vmem:[%s2280_s16 + $0x30] sm:$0xf] %vm1422_vm5, %v1407_v42  ;;  %v1244_v23 = vpop.f32.mrf.mxu2 }
 0x167   : > { %v1307_v39 = vmax.f32 %v1291_v7, 0.0  ;;  %v1254_v16 = vpop.f32.mrf.mxu3 }
 0x168   : > { %v1276_v18 = vadd.f32 %v1254_v16, %v892_v12 }
 0x169   : > { %v1343_v31 = vrot.slane %v1307_v39, 7  ;;  %v881_v55 = vpop.f32.mrf.mxu1 }
 0x16a   : > { %v1296_v19 = vadd.f32 %v2299_v41, %v1276_v18 }
 0x16b   : > { %v1344_v5 = vsel %vm1332_vm7, %v1342_v63, %v1343_v31  ;;  %v1392_v20 = vsel %vm1332_vm7, %v1343_v31, 0.0 }
 0x16c   : > { %v1408_v0 = vpack.c.bf16 %v1344_v5, %v1344_v5  ;;  %v1409_v25 = vpack.c.bf16 %v1392_v20, %v1392_v20  ;;  %v1312_v34 = vmax.f32 %v1296_v19, 0.0 }
 0x16e   : > { %1437 = vst.msk [vmem:[%s2280_s16 + $0x34] sm:$0xf] %vm1422_vm5, %v1408_v0  ;;  %v1351_v17 = vrot.slane %v1312_v34, 7  ;;  %v1246_v58 = vpop.f32.mrf.mxu2 }
 0x16f   : > { %1438 = vst.msk [vmem:[%s2280_s16 + $0x38] sm:$0x1] %vm1425_vm6, %v1409_v25  ;;  %v1256_v46 = vpop.f32.mrf.mxu3 }
 0x170   : > { %v1387_v27 = vsel %vm1332_vm7, 0.0, %v1351_v17  ;;  %v1277_v10 = vadd.f32 %v1256_v46, %v894_v43  ;;  %v798_v13 = vpop.f32.mrf.mxu0 }
 0x171   : > { %v1416_v53 = vpack.c.bf16 %v1387_v27, %v1387_v27  ;;  %v882_v28 = vadd.f32 %v881_v55, %v798_v13  ;;  %v883_v59 = vpop.f32.mrf.mxu1 }
 0x172   : > { %v1297_v26 = vadd.f32 %v2299_v41, %v1277_v10 }
 0x173   : > { %1445 = vst.msk [vmem:[%s2280_s16 + $0x54] sm:$0xf] %vm1422_vm5, %v1416_v53  ;;  %v1272_v29 = vadd.f32 %v1244_v23, %v882_v28 }
 0x174   : > { %v1313_v50 = vmax.f32 %v1297_v26, 0.0 }
 0x175   : > { %v1292_v30 = vadd.f32 %v2299_v41, %v1272_v29 }
 0x176   : > { %v1352_v61 = vrot.slane %v1313_v50, 7 }
 0x177   : > { %v1308_v21 = vmax.f32 %v1292_v30, 0.0 }
 0x178   : > { %v1353_v32 = vsel %vm1332_vm7, %v1351_v17, %v1352_v61  ;;  %v1395_v24 = vsel %vm1332_vm7, %v1352_v61, 0.0  ;;  %v800_v35 = vpop.f32.mrf.mxu0 }
 0x179   : > { %v1417_v36 = vpack.c.bf16 %v1353_v32, %v1353_v32  ;;  %v1418_v56 = vpack.c.bf16 %v1395_v24, %v1395_v24  ;;  %v1345_v9 = vrot.slane %v1308_v21, 7  ;;  %v884_v40 = vadd.f32 %v883_v59, %v800_v35 }
 0x17b   : > { %1446 = vst.msk [vmem:[%s2280_s16 + $0x58] sm:$0xf] %vm1422_vm5, %v1417_v36  ;;  %v1385_v8 = vsel %vm1332_vm7, 0.0, %v1345_v9  ;;  %v1273_v45 = vadd.f32 %v1246_v58, %v884_v40 }
 0x17c   : > { %1447 = vst.msk [vmem:[%s2280_s16 + $0x5c] sm:$0x1] %vm1425_vm6, %v1418_v56  ;;  %v1410_v48 = vpack.c.bf16 %v1385_v8, %v1385_v8 }
 0x17d   : > { %v1293_v49 = vadd.f32 %v2299_v41, %v1273_v45 }
 0x17e   : > { %v1259_v4 = vpop.f32.mrf.mxu3  ;;  %1439 = vst.msk [vmem:[%s2280_s16 + $0x3c] sm:$0xf] %vm1422_vm5, %v1410_v48  ;;  %v1249_v60 = vpop.f32.mrf.mxu2 }
 0x17f   : > { %v1278_v51 = vadd.f32 %v1259_v4, %v897_v47  ;;  %v1309_v57 = vmax.f32 %v1293_v49, 0.0 }
 0x180   : > { %v886_v33 = vpop.f32.mrf.mxu1 }
 0x181   : > { %v1298_v38 = vadd.f32 %v2299_v41, %v1278_v51  ;;  %v1346_v54 = vrot.slane %v1309_v57, 7  ;;  %v803_v62 = vpop.f32.mrf.mxu0 }
 0x182   : > { %v887_v14 = vadd.f32 %v886_v33, %v803_v62 }
 0x183   : > { %v1314_v22 = vmax.f32 %v1298_v38, 0.0  ;;  %v1347_v44 = vsel %vm1332_vm7, %v1345_v9, %v1346_v54  ;;  %v1393_v11 = vsel %vm1332_vm7, %v1346_v54, 0.0 }
 0x184   : > { %v1411_v63 = vpack.c.bf16 %v1347_v44, %v1347_v44  ;;  %v1412_v1 = vpack.c.bf16 %v1393_v11, %v1393_v11  ;;  %v1274_v6 = vadd.f32 %v1249_v60, %v887_v14 }
 0x185   : > { %v1354_v3 = vrot.slane %v1314_v22, 7 }
 0x186   : > { %v1261_v37 = vpop.f32.mrf.mxu3  ;;  %1440 = vst.msk [vmem:[%s2280_s16 + $0x40] sm:$0xf] %vm1422_vm5, %v1411_v63  ;;  %v1294_v7 = vadd.f32 %v2299_v41, %v1274_v6  ;;  %v1251_v20 = vpop.f32.mrf.mxu2 }
 0x187   : > { %v1388_v42 = vsel %vm1332_vm7, 0.0, %v1354_v3  ;;  %v1279_v12 = vadd.f32 %v1261_v37, %v899_v52  ;;  %1441 = vst.msk [vmem:[%s2280_s16 + $0x44] sm:$0x1] %vm1425_vm6, %v1412_v1 }
 0x188   : > { %v1419_v15 = vpack.c.bf16 %v1388_v42, %v1388_v42  ;;  %v888_v2 = vpop.f32.mrf.mxu1  ;;  %v1310_v39 = vmax.f32 %v1294_v7, 0.0 }
 0x189   : > { %v1299_v16 = vadd.f32 %v2299_v41, %v1279_v12  ;;  %v805_v18 = vpop.f32.mrf.mxu0 }
 0x18a   : > { %1448 = vst.msk [vmem:[%s2280_s16 + $0x60] sm:$0xf] %vm1422_vm5, %v1419_v15  ;;  %v1348_v31 = vrot.slane %v1310_v39, 7  ;;  %v889_v5 = vadd.f32 %v888_v2, %v805_v18 }
 0x18b   : > { %v1315_v19 = vmax.f32 %v1299_v16, 0.0 }
 0x18c   : > { %v1386_v0 = vsel %vm1332_vm7, 0.0, %v1348_v31  ;;  %v1275_v34 = vadd.f32 %v1251_v20, %v889_v5 }
 0x18d   : > { %v1355_v25 = vrot.slane %v1315_v19, 7  ;;  %v1413_v55 = vpack.c.bf16 %v1386_v0, %v1386_v0 }
 0x18e   : > { %v1295_v23 = vadd.f32 %v2299_v41, %v1275_v34 }
 0x18f   : > { %v1356_v43 = vsel %vm1332_vm7, %v1354_v3, %v1355_v25  ;;  %v1396_v17 = vsel %vm1332_vm7, %v1355_v25, 0.0  ;;  %1442 = vst.msk [vmem:[%s2280_s16 + $0x48] sm:$0xf] %vm1422_vm5, %v1413_v55 }
 0x190   : > { %v1420_v46 = vpack.c.bf16 %v1356_v43, %v1356_v43  ;;  %v1421_v27 = vpack.c.bf16 %v1396_v17, %v1396_v17  ;;  %v1311_v10 = vmax.f32 %v1295_v23, 0.0 }
 0x192   : > { %1449 = vst.msk [vmem:[%s2280_s16 + $0x64] sm:$0xf] %vm1422_vm5, %v1420_v46  ;;  %v1349_v13 = vrot.slane %v1311_v10, 7 }
 0x193   : > { %1450 = vst.msk [vmem:[%s2280_s16 + $0x68] sm:$0x1] %vm1425_vm6, %v1421_v27 }
 0x194   : > { %v1350_v53 = vsel %vm1332_vm7, %v1348_v31, %v1349_v13  ;;  %v1394_v28 = vsel %vm1332_vm7, %v1349_v13, 0.0 }
 0x195   : > { %v1414_v26 = vpack.c.bf16 %v1350_v53, %v1350_v53  ;;  %v1415_v29 = vpack.c.bf16 %v1394_v28, %v1394_v28 }
 0x197   : > { %1443 = vst.msk [vmem:[%s2280_s16 + $0x4c] sm:$0xf] %vm1422_vm5, %v1414_v26 }
 0x198   : > { %1444 = vst.msk [vmem:[%s2280_s16 + $0x50] sm:$0x1] %vm1425_vm6, %v1415_v29 }
 0x199 PF: > { %s13_s12 = sadd.s32 1, %s1796_s12  }
 0x19a   : > { %p10_p4 = scmp.ge.s32.totalorder %s13_s12, 4  }
 0x19c   :  { %12 = sbr.rel (!%p10_p4) target bundleno = 1 (0x1), region = 66 }

// kernel: _lambda_.8
= control target key start
LH: loop header
LB: loop body
LE: loop exit
PB: predicated region body
PF: predicated region fallthrough
CT: control target
= control target key end

     0   :  { %s3182_s12 = smov 0   ;;  %s4366_s0 = inlined_call_operand.vmem [shape: bf16[2,18,1,18,16], index: 0, kind: input, shape index: {}]   ;;  %s4367_s1 = inlined_call_operand.vmem [shape: bf16[3,48,16], index: 1, kind: input, shape index: {}]   ;;  %s4368_s2 = inlined_call_operand.vmem [shape: f32[1,16], index: 2, kind: input, shape index: {}]   ;;  %s4369_s3 = inlined_call_operand.vmem [shape: bf16[2,18,18,16], index: 3, kind: output, shape index: {}]  }
   0x1 LB: > { %s2669_s13 = sadd.s32 4294967295, %s3157_s12   ;;  %p2673_p0 = scmp.ge.s32.totalorder %s3157_s12, 1  ;;  %s3157_s12 = sphi %s3182_s12, %s13_s12  }
   0x2   : > { %p137_p1 = scmp.lt.s32.totalorder %s3157_s12, 3 }
   0x4   : > { %p138_p2 = pnand %p2673_p0, %p137_p1 }
   0x5   : > { %p161_p3 = scmp.lt.s32.totalorder (!%p138_p2), %s2669_s13, 1  ;;  %s3159_s18 = smov (!%p138_p2), 32  }
   0x6   : > { %141 = sbr.rel (%p138_p2) target bundleno = 537 (0x219), region = 32  ;;  %s3160_s19 = smov (!%p138_p2), 16  }
   0xb   : > { %s4371_s13 = smov (!%p161_p3, %s2669_s13), 1  ;;  %vm573_vm0 = vcmask 1046528   ;;  %vm348_vm1 = vsmask.f32 7424  ;;  %vm654_vm2 = vcmask 130048   ;;  %vm687_vm3 = vcmask 261120  }
   0xc   : > { %s3128_s14 = smul.u32 216, %s4371_s13  ;;  %vm1296_vm4 = vcmask 392192   ;;  %vm2558_vm5 = vcmask 125952   ;;  %vm2561_vm6 = vcmask 122880   ;;  %vm2380_vm7 = vcmask 1040384  }
   0xe   : > { %s3198_s17 = scalar_lea.vmem %s4366_s0, %s3128_s14  ;;  %s4028_s16 = scalar_lea.vmem %s4369_s3, %s3128_s14 }
   0xf   : > { %v3201_v0 = vld [vmem:[%s3198_s17 + $0x9c] sm:$0xff]  ;;  %v2778_v1 = vld [vmem:[%s3198_s17 + $0xa4] sm:$0x1]  ;;  %v174_v4 = vld [vmem:[%s3198_s17 + $0x8] sm:$0x1] }
  0x10   : > { %v3205_v2 = vld [vmem:[%s3198_s17] sm:$0xff]  ;;  %v883_v3 = vunpack.c.l.b16 %v2778_v1  ;;  %v316_v6 = vunpack.c.l.b16 %v174_v4  ;;  %v1163_v9 = vrot.slane %v3201_v0, 1  ;;  %v1050_v10 = vshll.u32 %v3201_v0, 16  ;;  %v3213_v13 = vld [vmem:[%s3198_s17 + $0x18] sm:$0xff]  ;;  %v2742_v16 = vld [vmem:[%s3198_s17 + $0x14] sm:$0x1] }
  0x11   : > { %v2916_v5 = vld [vmem:[%s3198_s17 + $0x20] sm:$0x1]  ;;  %v574_v12 = vrot.slane %v3205_v2, 1  ;;  %v1048_v18 = vshrl.u32 %v3201_v0, 16  ;;  %v1958_v23 = vrot.slane %v3213_v13, 1  ;;  %v871_v24 = vunpack.c.l.b16 %v2742_v16  ;;  %v3227_v34 = vld [vmem:[%s3198_s17 + $0xc] sm:$0xff] }
  0x12   : > { %v1702_v7 = vunpack.c.l.b16 %v2916_v5  ;;  %v899_v8 = vpack.c.b16 %v883_v3, %v883_v3  ;;  %v332_v11 = vpack.c.b16 %v316_v6, %v316_v6  ;;  %v1052_v19 = vrot.slane %v1050_v10, 1  ;;  %v2919_v33 = vld [vmem:[%s3198_s17 + $0x2c] sm:$0x1]  ;;  %v2781_v42 = vld [vmem:[%s3198_s17 + $0xb0] sm:$0x1]  ;;  %v3233_v43 = vld [vmem:[%s3198_s17 + $0x24] sm:$0xff] }
  0x13   : > { %v1737_v26 = vshll.u32 %v3213_v13, 16  ;;  %v350_v27 = vshrl.u32 %v3205_v2, 16  ;;  %v352_v28 = vshll.u32 %v3205_v2, 16  ;;  %v887_v35 = vpack.c.b16 %v871_v24, %v871_v24  ;;  %v2745_v54 = vld [vmem:[%s3198_s17 + $0x20] sm:$0x1]  ;;  %v3249_v59 = vld [vmem:[%s3198_s17 + $0xa8] sm:$0xff] }
  0x14   : > { %v1164_v14 = vrot.slane %v899_v8, 1  ;;  %v1718_v15 = vpack.c.b16 %v1702_v7, %v1702_v7  ;;  %v575_v17 = vrot.slane %v332_v11, 1  ;;  %v1055_v20 = vshll.u32 %v899_v8, 16  ;;  %v177_v58 = vld [vmem:[%s3198_s17 + $0x14] sm:$0x1]  ;;  %v3254_v4 = vld [vmem:[%s3198_s17 + $0x18] sm:$0xff] }
  0x15   : > { %v1053_v29 = vor.u32 %v1052_v19, %v1048_v18  ;;  %v357_v31 = vshll.u32 %v332_v11, 16  ;;  %v354_v32 = vrot.slane %v352_v28, 1  ;;  %v1735_v36 = vshrl.u32 %v3213_v13, 16  ;;  %v3259_v8 = vld [vmem:[%s3198_s17 + $0xc] sm:$0xff] }
  0x16   : > { %v1165_v21 = vsel %vm573_vm0, %v1163_v9, %v1164_v14  ;;  %v576_v22 = vsel %vm573_vm0, %v574_v12, %v575_v17  ;;  %v1959_v25 = vrot.slane %v1718_v15, 1  ;;  %v1057_v30 = vrot.slane %v1055_v20, 1 }
  0x17   : > { %1199 = vrot.lane.b32.xlu1 %v1165_v21, %s3159_s18  ;;  %622 = vrot.lane.b32.xlu0 %v576_v22, %s3159_s18  ;;  %v359_v37 = vrot.slane %v357_v31, 1  ;;  %v1739_v39 = vrot.slane %v1737_v26, 1  ;;  %v1742_v40 = vshll.u32 %v1718_v15, 16  ;;  %v355_v41 = vor.u32 %v354_v32, %v350_v27 }
  0x18   : > { %v1960_v38 = vsel %vm573_vm0, %v1958_v23, %v1959_v25  ;;  %v1058_v44 = vsel %vm348_vm1, %v1053_v29, %v1057_v30  ;;  %v1703_v45 = vunpack.c.l.b16 %v2919_v33  ;;  %v1127_v47 = vrot.slane %v3227_v34, 1  ;;  %v2784_v25 = vld [vmem:[%s3198_s17 + $0xbc] sm:$0x1]  ;;  %v3275_v33 = vld [vmem:[%s3198_s17 + $0xb4] sm:$0xff] }
  0x19   : > { %v360_v46 = vsel %vm348_vm1, %v355_v41, %v359_v37  ;;  %v884_v48 = vunpack.c.l.b16 %v2781_v42  ;;  %v1128_v49 = vrot.slane %v887_v35, 1  ;;  %v1740_v50 = vor.u32 %v1739_v39, %v1735_v36 }
  0x1a   : > { %541 = vrot.lane.b32.xlu2 %v360_v46, %s3160_s19  ;;  %v1744_v51 = vrot.slane %v1742_v40, 1  ;;  %v1749_v52 = vshll.u32 %v3233_v43, 16  ;;  %v3242_v53 = vpack.c.b16 %v1703_v45, %v1703_v45  ;;  %v904_v55 = vshrl.u32 %v3227_v34, 16 }
  0x1b   : > { %v906_v56 = vshll.u32 %v3227_v34, 16  ;;  %v911_v57 = vshll.u32 %v887_v35, 16  ;;  %v900_v60 = vpack.c.b16 %v884_v48, %v884_v48  ;;  %v1129_v63 = vsel %vm573_vm0, %v1127_v47, %v1128_v49 }
  0x1c   : > { %v1747_v1 = vshrl.u32 %v3233_v43, 16  ;;  %v1751_v3 = vrot.slane %v1749_v52, 1  ;;  %v872_v5 = vunpack.c.l.b16 %v2745_v54  ;;  %v1745_v6 = vsel %vm348_vm1, %v1740_v50, %v1744_v51  ;;  %v2922_v54 = vld [vmem:[%s3198_s17 + $0x38] sm:$0x1] }
  0x1d   : > { %v908_v61 = vrot.slane %v906_v56, 1  ;;  %v913_v62 = vrot.slane %v911_v57, 1  ;;  %v1754_v7 = vshll.u32 %v3242_v53, 16  ;;  %v317_v9 = vunpack.c.l.b16 %v177_v58  ;;  %v3292_v57 = vld [vmem:[%s3198_s17 + $0x30] sm:$0xff] }
  0x1e   : > { %v1060_v11 = vshrl.u32 %v3249_v59, 16  ;;  %v1062_v12 = vshll.u32 %v3249_v59, 16  ;;  %v1166_v14 = vrot.slane %v3249_v59, 1  ;;  %v1167_v15 = vrot.slane %v900_v60, 1 }
  0x1f   : > { %2006 = vrot.lane.b32.xlu1 %v1960_v38, %s3159_s18  ;;  %1119 = vrot.lane.b32.xlu0 %v1058_v44, %s3160_s19  ;;  %v909_v10 = vor.u32 %v908_v61, %v904_v55  ;;  %v1067_v17 = vshll.u32 %v900_v60, 16  ;;  %v1752_v18 = vor.u32 %v1751_v3, %v1747_v1  ;;  %v888_v19 = vpack.c.b16 %v872_v5, %v872_v5 }
  0x20   : > { %v918_v20 = vshll.u32 %v3254_v4, 16  ;;  %v1064_v21 = vrot.slane %v1062_v12, 1  ;;  %v1756_v22 = vrot.slane %v1754_v7, 1  ;;  %v333_v23 = vpack.c.b16 %v317_v9, %v317_v9 }
  0x21   : > { %v914_v16 = vsel %vm348_vm1, %v909_v10, %v913_v62  ;;  %v364_v24 = vshll.u32 %v3259_v8, 16  ;;  %v1069_v26 = vrot.slane %v1067_v17, 1  ;;  %v916_v28 = vshrl.u32 %v3254_v4, 16  ;;  %v180_v10 = vld [vmem:[%s3198_s17 + $0x20] sm:$0x1] }
  0x22   : > { %1095 = vrot.lane.b32.xlu2 %v914_v16, %s3160_s19  ;;  %v1065_v27 = vor.u32 %v1064_v21, %v1060_v11  ;;  %v362_v29 = vshrl.u32 %v3259_v8, 16  ;;  %v1168_v30 = vsel %vm573_vm0, %v1166_v14, %v1167_v15  ;;  %v920_v31 = vrot.slane %v918_v20, 1  ;;  %v3304_v11 = vld [vmem:[%s3198_s17 + $0x24] sm:$0xff] }
  0x23   : > { %v923_v32 = vshll.u32 %v888_v19, 16  ;;  %v885_v35 = vunpack.c.l.b16 %v2784_v25  ;;  %v1757_v36 = vsel %vm348_vm1, %v1752_v18, %v1756_v22  ;;  %v366_v37 = vrot.slane %v364_v24, 1  ;;  %v3312_v22 = vld [vmem:[%s3198_s17 + $0x18] sm:$0xff] }
  0x24   : > { %v369_v38 = vshll.u32 %v333_v23, 16  ;;  %v1070_v39 = vsel %vm348_vm1, %v1065_v27, %v1069_v26  ;;  %v921_v40 = vor.u32 %v920_v31, %v916_v28  ;;  %v1074_v44 = vshll.u32 %v3275_v33, 16  ;;  %v2925_v26 = vld [vmem:[%s3198_s17 + $0x44] sm:$0x1]  ;;  %v2787_v27 = vld [vmem:[%s3198_s17 + $0xc8] sm:$0x1] }
  0x25   : > { %v925_v41 = vrot.slane %v923_v32, 1  ;;  %v901_v42 = vpack.c.b16 %v885_v35, %v885_v35  ;;  %v367_v45 = vor.u32 %v366_v37, %v362_v29  ;;  %v1961_v47 = vrot.slane %v3233_v43, 1 }
  0x26   : > { %v371_v46 = vrot.slane %v369_v38, 1  ;;  %v1962_v48 = vrot.slane %v3242_v53, 1  ;;  %v1072_v50 = vshrl.u32 %v3275_v33, 16  ;;  %v1076_v51 = vrot.slane %v1074_v44, 1 }
  0x27   : > { %1175 = vrot.lane.b32.xlu1 %v1129_v63, %s3159_s18  ;;  %1926 = vrot.lane.b32.xlu0 %v1745_v6, %s3160_s19  ;;  %v926_v49 = vsel %vm348_vm1, %v921_v40, %v925_v41  ;;  %v1079_v52 = vshll.u32 %v901_v42, 16  ;;  %v1704_v58 = vunpack.c.l.b16 %v2922_v54  ;;  %v1130_v61 = vrot.slane %v3254_v4, 1  ;;  %v2748_v63 = vld [vmem:[%s3198_s17 + $0x2c] sm:$0x1] }
  0x28   : > { %v372_v55 = vsel %vm348_vm1, %v367_v45, %v371_v46  ;;  %v1963_v56 = vsel %vm573_vm0, %v1961_v47, %v1962_v48  ;;  %v1077_v53 = vor.u32 %v1076_v51, %v1072_v50  ;;  %v1131_v62 = vrot.slane %v888_v19, 1 }
  0x29   : > { %v1081_v60 = vrot.slane %v1079_v52, 1  ;;  %v577_v1 = vrot.slane %v3259_v8, 1  ;;  %v578_v3 = vrot.slane %v333_v23, 1  ;;  %v1761_v5 = vshll.u32 %v3292_v57, 16 }
  0x2a   : > { %1121 = vrot.lane.b32.xlu2 %v1070_v39, %s3160_s19  ;;  %v1720_v6 = vpack.c.b16 %v1704_v58, %v1704_v58  ;;  %v1132_v9 = vsel %vm573_vm0, %v1130_v61, %v1131_v62  ;;  %v873_v12 = vunpack.c.l.b16 %v2748_v63  ;;  %v1759_v15 = vshrl.u32 %v3292_v57, 16  ;;  %v3327_v39 = vld [vmem:[%s3198_s17 + $0x3c] sm:$0xff]  ;;  %v183_v58 = vld [vmem:[%s3198_s17 + $0x2c] sm:$0x1] }
  0x2b   : > { %v1082_v7 = vsel %vm348_vm1, %v1077_v53, %v1081_v60  ;;  %v579_v14 = vsel %vm573_vm0, %v577_v1, %v578_v3  ;;  %v1763_v16 = vrot.slane %v1761_v5, 1  ;;  %v1964_v18 = vrot.slane %v3292_v57, 1  ;;  %v3345_v5 = vld [vmem:[%s3198_s17 + $0x24] sm:$0xff] }
  0x2c   : > { %v1766_v17 = vshll.u32 %v1720_v6, 16  ;;  %v1965_v19 = vrot.slane %v1720_v6, 1  ;;  %v1169_v20 = vrot.slane %v3275_v33, 1  ;;  %v1170_v21 = vrot.slane %v901_v42, 1  ;;  %v3330_v42 = vld [vmem:[%s3198_s17 + $0xc0] sm:$0xff] }
  0x2d   : > { %v318_v23 = vunpack.c.l.b16 %v180_v10  ;;  %v3315_v24 = vpack.c.b16 %v873_v12, %v873_v12  ;;  %v930_v25 = vshll.u32 %v3304_v11, 16  ;;  %v1764_v28 = vor.u32 %v1763_v16, %v1759_v15 }
  0x2e   : > { %v1768_v29 = vrot.slane %v1766_v17, 1  ;;  %v1966_v31 = vsel %vm573_vm0, %v1964_v18, %v1965_v19  ;;  %v1171_v32 = vsel %vm573_vm0, %v1169_v20, %v1170_v21  ;;  %v1705_v40 = vunpack.c.l.b16 %v2925_v26 }
  0x2f   : > { %1201 = vrot.lane.b32.xlu1 %v1168_v30, %s3159_s18  ;;  %1928 = vrot.lane.b32.xlu0 %v1757_v36, %s3160_s19  ;;  %v376_v30 = vshll.u32 %v3312_v22, 16  ;;  %v334_v35 = vpack.c.b16 %v318_v23, %v318_v23  ;;  %v928_v36 = vshrl.u32 %v3304_v11, 16  ;;  %v932_v37 = vrot.slane %v930_v25, 1 }
  0x30   : > { %v935_v38 = vshll.u32 %v3315_v24, 16  ;;  %v886_v41 = vunpack.c.l.b16 %v2787_v27  ;;  %v1769_v44 = vsel %vm348_vm1, %v1764_v28, %v1768_v29  ;;  %v374_v45 = vshrl.u32 %v3312_v22, 16  ;;  %v2751_v28 = vld [vmem:[%s3198_s17 + $0x38] sm:$0x1] }
  0x31   : > { %v378_v46 = vrot.slane %v376_v30, 1  ;;  %v381_v47 = vshll.u32 %v334_v35, 16  ;;  %v580_v48 = vrot.slane %v3312_v22, 1  ;;  %v933_v50 = vor.u32 %v932_v37, %v928_v36 }
  0x32   : > { %2008 = vrot.lane.b32.xlu2 %v1963_v56, %s3159_s18  ;;  %v937_v51 = vrot.slane %v935_v38, 1  ;;  %v1721_v52 = vpack.c.b16 %v1705_v40, %v1705_v40  ;;  %v1773_v54 = vshll.u32 %v3327_v39, 16  ;;  %v1086_v56 = vshll.u32 %v3330_v42, 16  ;;  %v2928_v38 = vld [vmem:[%s3198_s17 + $0x50] sm:$0x1] }
  0x33   : > { %v379_v53 = vor.u32 %v378_v46, %v374_v45  ;;  %v383_v60 = vrot.slane %v381_v47, 1  ;;  %v1771_v62 = vshrl.u32 %v3327_v39, 16  ;;  %v1084_v3 = vshrl.u32 %v3330_v42, 16  ;;  %v3374_v46 = vld [vmem:[%s3198_s17 + $0x48] sm:$0xff] }
  0x34   : > { %v1775_v63 = vrot.slane %v1773_v54, 1  ;;  %v1778_v1 = vshll.u32 %v1721_v52, 16  ;;  %v319_v6 = vunpack.c.l.b16 %v183_v58  ;;  %v388_v17 = vshll.u32 %v3345_v5, 16 }
  0x35   : > { %v384_v12 = vsel %vm348_vm1, %v379_v53, %v383_v60  ;;  %v1133_v20 = vrot.slane %v3304_v11, 1  ;;  %v1134_v21 = vrot.slane %v3315_v24, 1  ;;  %v386_v25 = vshrl.u32 %v3345_v5, 16  ;;  %v3391_v60 = vld [vmem:[%s4367_s1 + $0x10] sm:$0xff] }
  0x36   : > { %v1780_v15 = vrot.slane %v1778_v1, 1  ;;  %v3351_v16 = vpack.c.b16 %v319_v6, %v319_v6  ;;  %v390_v26 = vrot.slane %v388_v17, 1  ;;  %v1967_v36 = vrot.slane %v3327_v39, 1  ;;  %v186_v6 = vld [vmem:[%s3198_s17 + $0x38] sm:$0x1]  ;;  %1473 = vmatpush.bf16.msra.mxu1 %v3391_v60 }
  0x37   : > { %1097 = vrot.lane.b32.xlu1 %v926_v49, %s3160_s19  ;;  %543 = vrot.lane.b32.xlu0 %v372_v55, %s3160_s19  ;;  %v581_v49 = vrot.slane %v334_v35, 1  ;;  %v902_v55 = vpack.c.b16 %v886_v41, %v886_v41  ;;  %v1135_v30 = vsel %vm573_vm0, %v1133_v20, %v1134_v21  ;;  %v1968_v37 = vrot.slane %v1721_v52, 1 }
  0x38   : > { %v393_v27 = vshll.u32 %v3351_v16, 16  ;;  %v391_v24 = vor.u32 %v390_v26, %v386_v25  ;;  %v1172_v40 = vrot.slane %v3330_v42, 1  ;;  %v1706_v47 = vunpack.c.l.b16 %v2928_v38  ;;  %v3099_v38 = vld [vmem:[%s4367_s1 + $0x28] sm:$0xff] }
  0x39   : > { %v582_v61 = vsel %vm573_vm0, %v580_v48, %v581_v49  ;;  %v1091_v10 = vshll.u32 %v902_v55, 16  ;;  %v1173_v41 = vrot.slane %v902_v55, 1  ;;  %v1969_v49 = vsel %vm573_vm0, %v1967_v36, %v1968_v37  ;;  %v3383_v55 = vld [vmem:[%s3198_s17 + $0x90] sm:$0xff]  ;;  %3119 = vmatpush.bf16.msra.mxu3 %v3099_v38  ;;  %1334 = vmatpush.bf16.msra.mxu0 %v3099_v38 }
  0x3a   : > { %624 = vrot.lane.b32.xlu2 %v579_v14, %s3159_s18  ;;  %v1776_v14 = vor.u32 %v1775_v63, %v1771_v62  ;;  %v395_v35 = vrot.slane %v393_v27, 1  ;;  %v3385_v58 = vpack.c.b16 %v1706_v47, %v1706_v47  ;;  %v1785_v53 = vshll.u32 %v3374_v46, 16 }
  0x3b   : > { %v1093_v19 = vrot.slane %v1091_v10, 1  ;;  %v1174_v39 = vsel %vm573_vm0, %v1172_v40, %v1173_v41  ;;  %v583_v63 = vrot.slane %v3345_v5, 1  ;;  %v584_v1 = vrot.slane %v3351_v16, 1 }
  0x3c   : > { %v1781_v23 = vsel %vm348_vm1, %v1776_v14, %v1780_v15  ;;  %v396_v48 = vsel %vm348_vm1, %v391_v24, %v395_v35  ;;  %v496_v10 = vshll.u32 %v3383_v55, 16  ;;  %v1783_v14 = vshrl.u32 %v3374_v46, 16  ;;  %v3425_v35 = vld [vmem:[%s4367_s1] sm:$0xff] }
  0x3d   : > { %v1787_v15 = vrot.slane %v1785_v53, 1  ;;  %v1790_v16 = vshll.u32 %v3385_v58, 16  ;;  %v320_v21 = vunpack.c.l.b16 %v186_v6  ;;  %v494_v26 = vshrl.u32 %v3383_v55, 16 }
  0x3e   : > { %v498_v27 = vrot.slane %v496_v10, 1  ;;  %v3465_v10 = vld [vmem:[%s4367_s1 + $0x40] sm:$0xff] }
  0x3f   : > { %1123 = vrot.lane.b32.xlu1 %v1082_v7, %s3160_s19  ;;  %1177 = vrot.lane.b32.xlu0 %v1132_v9, %s3159_s18  ;;  %v938_v7 = vsel %vm348_vm1, %v933_v50, %v937_v51  ;;  %v1088_v9 = vrot.slane %v1086_v56, 1  ;;  %v210_v50 = vld [vmem:[%s3198_s17 + $0x98] sm:$0x1]  ;;  %v1792_v24 = vrot.slane %v1790_v16, 1  ;;  %v3435_v40 = vpack.c.b16 %v320_v21, %v320_v21 }
  0x40   : > { %v328_v56 = vunpack.c.l.b16 %v210_v50  ;;  %v1971_v16 = vrot.slane %v3385_v58, 1  ;;  %2164 = vmatpush.bf16.msra.mxu2 %v3465_v10 }
  0x41   : > { %v1089_v18 = vor.u32 %v1088_v9, %v1084_v3  ;;  %v2754_v3 = vld [vmem:[%s3198_s17 + $0x44] sm:$0x1]  ;;  %v587_v38 = vrot.slane %v3435_v40, 1 }
  0x42   : > { %1930 = vrot.lane.b32.xlu2 %v1769_v44, %s3160_s19  ;;  %v344_v5 = vpack.c.b16 %v328_v56, %v328_v56  ;;  %v875_v20 = vunpack.c.l.b16 %v2754_v3  ;;  %v3098_v56 = vld [vmem:[%s4367_s1 + $0x20] sm:$0xff] }
  0x43   : > { %v1094_v29 = vsel %vm348_vm1, %v1089_v18, %v1093_v19  ;;  %v585_v18 = vsel %vm573_vm0, %v583_v63, %v584_v1  ;;  %v3412_v19 = vld [vmem:[%s3198_s17 + $0x3c] sm:$0xff]  ;;  %3120 = vmatpush.bf16.msra.mxu3 %v3098_v56  ;;  %1335 = vmatpush.bf16.msra.mxu0 %v3098_v56 }
  0x44   : > { %v3428_v36 = vpack.c.b16 %v875_v20, %v875_v20  ;;  %v954_v37 = vshll.u32 %v3412_v19, 16  ;;  %v952_v50 = vshrl.u32 %v3412_v19, 16 }
  0x47   : > { %2010 = vrot.lane.b32.xlu1 %v1966_v31, %s3159_s18  ;;  %1203 = vrot.lane.b32.xlu0 %v1171_v32, %s3159_s18  ;;  %v3365_v31 = vld [vmem:[%s3198_s17 + $0x30] sm:$0xff]  ;;  %v874_v32 = vunpack.c.l.b16 %v2751_v28  ;;  %v501_v28 = vshll.u32 %v344_v5, 16 }
  0x48   : > { %v942_v44 = vshll.u32 %v3365_v31, 16  ;;  %v940_v51 = vshrl.u32 %v3365_v31, 16 }
  0x49   : > { %v890_v45 = vpack.c.b16 %v874_v32, %v874_v32  ;;  %v1788_v32 = vor.u32 %v1787_v15, %v1783_v14  ;;  %v503_v47 = vrot.slane %v501_v28, 1  ;;  %v1970_v15 = vrot.slane %v3374_v46, 1  ;;  %v3478_v46 = vld [vmem:[%s4367_s1 + $0x38] sm:$0xff] }
  0x4a   : > { %545 = vrot.lane.b32.xlu2 %v384_v12, %s3160_s19  ;;  %v944_v52 = vrot.slane %v942_v44, 1  ;;  %v3405_v12 = vld [vmem:[%s4367_s1 + $0x8] sm:$0xff]  ;;  %v213_v44 = vld [vmem:[%s3198_s17 + $0xa4] sm:$0x1]  ;;  %2165 = vmatpush.bf16.msra.mxu2 %v3478_v46 }
  0x4b   : > { %v947_v54 = vshll.u32 %v890_v45, 16  ;;  %v1137_v62 = vrot.slane %v890_v45, 1  ;;  %1474 = vmatpush.bf16.msra.mxu1 %v3405_v12  ;;  %v499_v45 = vor.u32 %v498_v27, %v494_v26  ;;  %v1972_v26 = vsel %vm573_vm0, %v1970_v15, %v1971_v16  ;;  %v3531_v16 = vld [vmem:[%s3198_s17 + $0x60] sm:$0xff] }
  0x4d   : > { %v949_v9 = vrot.slane %v947_v54, 1  ;;  %v329_v54 = vunpack.c.l.b16 %v213_v44  ;;  %v504_v63 = vsel %vm348_vm1, %v499_v45, %v503_v47  ;;  %v189_v47 = vld [vmem:[%s3198_s17 + $0x44] sm:$0x1] }
  0x4f   : > { %626 = vrot.lane.b32.xlu1 %v582_v61, %s3159_s18  ;;  %1099 = vrot.lane.b32.xlu0 %v938_v7, %s3160_s19  ;;  %v1136_v61 = vrot.slane %v3365_v31, 1  ;;  %v945_v7 = vor.u32 %v944_v52, %v940_v51  ;;  %v959_v51 = vshll.u32 %v3428_v36, 16  ;;  %v3445_v52 = vld [vmem:[%s3198_s17 + $0x9c] sm:$0xff]  ;;  %v3455_v6 = vpack.c.b16 %v329_v54, %v329_v54 }
  0x50   : > { %1475 = vmatpush.bf16.msra.mxu1 %v3425_v35 }
  0x51   : > { %v1138_v17 = vsel %vm573_vm0, %v1136_v61, %v1137_v62  ;;  %v950_v25 = vsel %vm348_vm1, %v945_v7, %v949_v9  ;;  %v405_v62 = vshll.u32 %v3435_v40, 16  ;;  %v961_v3 = vrot.slane %v959_v51, 1  ;;  %v3097_v9 = vld [vmem:[%s4367_s1 + $0x18] sm:$0xff] }
  0x52   : > { %1179 = vrot.lane.b32.xlu2 %v1135_v30, %s3159_s18  ;;  %v611_v30 = vrot.slane %v344_v5, 1  ;;  %v508_v7 = vshll.u32 %v3445_v52, 16  ;;  %3121 = vmatpush.bf16.msra.mxu3 %v3097_v9  ;;  %v513_v21 = vshll.u32 %v3455_v6, 16  ;;  %v613_v51 = vrot.slane %v3445_v52, 1 }
  0x53   : > { %v407_v14 = vrot.slane %v405_v62, 1  ;;  %1336 = vmatpush.bf16.msra.mxu0 %v3097_v9 }
  0x54   : > { %v510_v20 = vrot.slane %v508_v7, 1 }
  0x56   : > { %3122 = vmatpush.bf16.msrb.mxu3 %v3391_v60  ;;  %v3485_v60 = vld [vmem:[%s3198_s17 + $0x54] sm:$0xff] }
  0x57   : > { %1932 = vrot.lane.b32.xlu1 %v1781_v23, %s3160_s19  ;;  %1125 = vrot.lane.b32.xlu0 %v1094_v29, %s3160_s19  ;;  %v3415_v23 = vld [vmem:[%s3198_s17 + $0x30] sm:$0xff]  ;;  %v610_v29 = vrot.slane %v3383_v55, 1  ;;  %v1795_v40 = vshrl.u32 %v3485_v60, 16  ;;  %v1973_v54 = vrot.slane %v3485_v60, 1 }
  0x58   : > { %v400_v41 = vshll.u32 %v3415_v23, 16  ;;  %v398_v53 = vshrl.u32 %v3415_v23, 16 }
  0x5a   : > { %1205 = vrot.lane.b32.xlu2 %v1174_v39, %s3159_s18  ;;  %v956_v39 = vrot.slane %v954_v37, 1  ;;  %v402_v61 = vrot.slane %v400_v41, 1  ;;  %3123 = vmatpush.bf16.msrb.mxu3 %v3405_v12  ;;  %v2757_v37 = vld [vmem:[%s3198_s17 + $0x50] sm:$0x1]  ;;  %v586_v12 = vrot.slane %v3415_v23, 1  ;;  %v1797_v41 = vshll.u32 %v3485_v60, 16 }
  0x5c   : > { %v957_v1 = vor.u32 %v956_v39, %v952_v50  ;;  %v403_v5 = vor.u32 %v402_v61, %v398_v53  ;;  %v588_v23 = vsel %vm573_vm0, %v586_v12, %v587_v38  ;;  %v1799_v50 = vrot.slane %v1797_v41, 1  ;;  %v3516_v53 = vld [vmem:[%s3198_s17 + $0x3c] sm:$0xff] }
  0x5d   : > { %v321_v61 = vunpack.c.l.b16 %v189_v47  ;;  %v412_v7 = vshll.u32 %v3516_v53, 16 }
  0x5e   : > { %v408_v58 = vsel %vm348_vm1, %v403_v5, %v407_v14  ;;  %3124 = vmatpush.bf16.msrb.mxu3 %v3425_v35  ;;  %v614_v35 = vrot.slane %v3455_v6, 1 }
  0x5f   : > { %547 = vrot.lane.b32.xlu1 %v396_v48, %s3160_s19  ;;  %2012 = vrot.lane.b32.xlu0 %v1969_v49, %s3159_s18  ;;  %v612_v48 = vsel %vm573_vm0, %v610_v29, %v611_v30  ;;  %v1793_v49 = vsel %vm348_vm1, %v1788_v32, %v1792_v24  ;;  %v515_v29 = vrot.slane %v513_v21, 1  ;;  %v1139_v30 = vrot.slane %v3412_v19, 1  ;;  %v3495_v24 = vld [vmem:[%s4367_s1 + $0x30] sm:$0xff] }
  0x60   : > { %v1140_v32 = vrot.slane %v3428_v36, 1  ;;  %2166 = vmatpush.bf16.msra.mxu2 %v3495_v24  ;;  %v615_v9 = vsel %vm573_vm0, %v613_v51, %v614_v35  ;;  %v337_v15 = vpack.c.b16 %v321_v61, %v321_v61  ;;  %v3562_v61 = vld [vmem:[%s3198_s17 + $0x48] sm:$0xff] }
  0x62   : > { %1101 = vrot.lane.b32.xlu2 %v950_v25, %s3160_s19  ;;  %v2931_v25 = vld [vmem:[%s3198_s17 + $0x5c] sm:$0x1]  ;;  %v1141_v45 = vsel %vm573_vm0, %v1139_v30, %v1140_v32  ;;  %v589_v30 = vrot.slane %v3516_v53, 1  ;;  %v590_v38 = vrot.slane %v337_v15, 1 }
  0x63   : > { %v1707_v27 = vunpack.c.l.b16 %v2931_v25 }
  0x65   : > { %v1723_v19 = vpack.c.b16 %v1707_v27, %v1707_v27  ;;  %v410_v27 = vshrl.u32 %v3516_v53, 16 }
  0x67   : > { %1181 = vrot.lane.b32.xlu1 %v1138_v17, %s3159_s18  ;;  %628 = vrot.lane.b32.xlu0 %v585_v18, %s3159_s18  ;;  %v962_v17 = vsel %vm348_vm1, %v957_v1, %v961_v3  ;;  %v506_v18 = vshrl.u32 %v3445_v52, 16  ;;  %v1802_v39 = vshll.u32 %v1723_v19, 16  ;;  %v1974_v56 = vrot.slane %v1723_v19, 1  ;;  %v2934_v52 = vld [vmem:[%s3198_s17 + $0x68] sm:$0x1] }
  0x68   : > { %v216_v1 = vld [vmem:[%s3198_s17 + $0xb0] sm:$0x1]  ;;  %v1800_v3 = vor.u32 %v1799_v50, %v1795_v40 }
  0x69   : > { %v511_v28 = vor.u32 %v510_v20, %v506_v18  ;;  %v1804_v6 = vrot.slane %v1802_v39, 1  ;;  %v1975_v14 = vsel %vm573_vm0, %v1973_v54, %v1974_v56  ;;  %v330_v25 = vunpack.c.l.b16 %v216_v1 }
  0x6a   : > { %565 = vrot.lane.b32.xlu2 %v504_v63, %s3160_s19  ;;  %v591_v54 = vsel %vm573_vm0, %v589_v30, %v590_v38 }
  0x6b   : > { %v516_v36 = vsel %vm348_vm1, %v511_v28, %v515_v29  ;;  %v414_v28 = vrot.slane %v412_v7, 1  ;;  %v417_v29 = vshll.u32 %v337_v15, 16  ;;  %v424_v15 = vshll.u32 %v3562_v61, 16 }
  0x6d   : > { %v419_v40 = vrot.slane %v417_v29, 1 }
  0x6f   : > { %646 = vrot.lane.b32.xlu1 %v612_v48, %s3159_s18  ;;  %1934 = vrot.lane.b32.xlu0 %v1793_v49, %s3160_s19  ;;  %v3507_v48 = vld [vmem:[%s3198_s17 + $0x48] sm:$0xff]  ;;  %v876_v49 = vunpack.c.l.b16 %v2757_v37  ;;  %v1809_v37 = vshll.u32 %v3531_v16, 16 }
  0x70   : > { %v966_v63 = vshll.u32 %v3507_v48, 16  ;;  %v964_v18 = vshrl.u32 %v3507_v48, 16 }
  0x71   : > { %v3519_v62 = vpack.c.b16 %v876_v49, %v876_v49  ;;  %v192_v49 = vld [vmem:[%s3198_s17 + $0x50] sm:$0x1] }
  0x72   : > { %2014 = vrot.lane.b32.xlu2 %v1972_v26, %s3159_s18  ;;  %v968_v20 = vrot.slane %v966_v63, 1  ;;  %v1805_v26 = vsel %vm348_vm1, %v1800_v3, %v1804_v6  ;;  %v322_v63 = vunpack.c.l.b16 %v192_v49  ;;  %v1976_v49 = vrot.slane %v3531_v16, 1 }
  0x73   : > { %v971_v21 = vshll.u32 %v3519_v62, 16 }
  0x74   : > { %v542_v44 = vpop.permute.xlu2 %541  ;;  %v969_v41 = vor.u32 %v968_v20, %v964_v18 }
  0x75   : > { %v656_v12 = vsel %vm654_vm2, %v3205_v2, %v542_v44  ;;  %v973_v19 = vrot.slane %v971_v21, 1  ;;  %v1807_v2 = vshrl.u32 %v3531_v16, 16  ;;  %v1811_v44 = vrot.slane %v1809_v37, 1 }
  0x76   : > { %v1142_v21 = vrot.slane %v3507_v48, 1  ;;  %v422_v37 = vshrl.u32 %v3562_v61, 16  ;;  %v2760_v48 = vld [vmem:[%s3198_s17 + $0x5c] sm:$0x1] }
  0x77   : > { %1103 = vrot.lane.b32.xlu1 %v962_v17, %s3160_s19  ;;  %549 = vrot.lane.b32.xlu0 %v408_v58, %s3160_s19  ;;  %v1708_v17 = vunpack.c.l.b16 %v2934_v52  ;;  %v3536_v58 = vld [vmem:[%s3198_s17 + $0xa8] sm:$0xff]  ;;  %v974_v56 = vsel %vm348_vm1, %v969_v41, %v973_v19  ;;  %v1812_v7 = vor.u32 %v1811_v44, %v1807_v2  ;;  %v877_v19 = vunpack.c.l.b16 %v2760_v48 }
  0x78   : > { %v520_v47 = vshll.u32 %v3536_v58, 16  ;;  %v518_v52 = vshrl.u32 %v3536_v58, 16 }
  0x79   : > { %v3542_v32 = vpack.c.b16 %v1708_v17, %v1708_v17 }
  0x7a   : > { %630 = vrot.lane.b32.xlu2 %v588_v23, %s3159_s18  ;;  %v415_v23 = vor.u32 %v414_v28, %v410_v27  ;;  %v522_v1 = vrot.slane %v520_v47, 1 }
  0x7b   : > { %v1814_v35 = vshll.u32 %v3542_v32, 16 }
  0x7c   : > { %v3527_v5 = vpop.permute.xlu2 %1095  ;;  %v420_v6 = vsel %vm348_vm1, %v415_v23, %v419_v40  ;;  %v523_v18 = vor.u32 %v522_v1, %v518_v52  ;;  %v1977_v23 = vrot.slane %v3542_v32, 1  ;;  %v2937_v40 = vld [vmem:[%s3198_s17 + $0x74] sm:$0x1] }
  0x7e   : > { %v1978_v52 = vsel %vm573_vm0, %v1976_v49, %v1977_v23 }
  0x7f   : > { %567 = vrot.lane.b32.xlu1 %v516_v36, %s3160_s19  ;;  %1183 = vrot.lane.b32.xlu0 %v1141_v45, %s3159_s18  ;;  %v3549_v45 = vpack.c.b16 %v330_v25, %v330_v25  ;;  %v1143_v25 = vrot.slane %v3519_v62, 1 }
  0x81   : > { %v525_v3 = vshll.u32 %v3549_v45, 16  ;;  %v1144_v41 = vsel %vm573_vm0, %v1142_v21, %v1143_v25  ;;  %v617_v2 = vrot.slane %v3549_v45, 1  ;;  %v1709_v45 = vunpack.c.l.b16 %v2937_v40 }
  0x82   : > { %1936 = vrot.lane.b32.xlu2 %v1805_v26, %s3160_s19 }
  0x83   : > { %v527_v20 = vrot.slane %v525_v3, 1 }
  0x84   : > { %v3553_v39 = vpop.permute.xlu2 %1121 }
  0x85   : > { %v528_v62 = vsel %vm348_vm1, %v523_v18, %v527_v20  ;;  %v592_v20 = vrot.slane %v3562_v61, 1 }
  0x87   : > { %2016 = vrot.lane.b32.xlu1 %v1975_v14, %s3159_s18  ;;  %648 = vrot.lane.b32.xlu0 %v615_v9, %s3159_s18  ;;  %v1816_v9 = vrot.slane %v1814_v35, 1  ;;  %v3569_v14 = vpack.c.b16 %v322_v63, %v322_v63 }
  0x89   : > { %v1200_v36 = vpop.permute.xlu1 %1199  ;;  %v623_v50 = vpop.permute.xlu0 %622  ;;  %v1817_v29 = vsel %vm348_vm1, %v1812_v7, %v1816_v9  ;;  %v429_v38 = vshll.u32 %v3569_v14, 16  ;;  %v3623_v7 = vld [vmem:[%s3198_s17 + $0xb4] sm:$0xff]  ;;  %v3625_v9 = vpack.c.b16 %v1709_v45, %v1709_v45  ;;  %v593_v21 = vrot.slane %v3569_v14, 1 }
  0x8a   : > { %v689_v51 = vsel %vm687_vm3, %v656_v12, %v623_v50  ;;  %551 = vrot.lane.b32.xlu2 %v420_v6, %s3160_s19  ;;  %v426_v12 = vrot.slane %v424_v15, 1  ;;  %v530_v40 = vshrl.u32 %v3623_v7, 16 }
  0x8b   : > { %2898 = vmatmul.msk.bf16.vlgmr.msra.gmra.mxu1 %vm1296_vm4, %v689_v51  ;;  %v431_v47 = vrot.slane %v429_v38, 1  ;;  %v616_v51 = vrot.slane %v3536_v58, 1  ;;  %v3612_v58 = vld [vmem:[%s3198_s17 + $0x6c] sm:$0xff] }
  0x8c   : > { %v3575_v27 = vpop.permute.xlu2 %2008  ;;  %v1821_v15 = vshll.u32 %v3612_v58, 16  ;;  %v1819_v48 = vshrl.u32 %v3612_v58, 16 }
  0x8f   : > { %632 = vrot.lane.b32.xlu1 %v591_v54, %s3159_s18  ;;  %1105 = vrot.lane.b32.xlu0 %v974_v56, %s3160_s19 }
  0x91   : > { %v2007_v17 = vpop.permute.xlu1 %2006  ;;  %v1120_v26 = vpop.permute.xlu0 %1119 }
  0x92   : > { %v1232_v28 = vsel %vm654_vm2, %v3201_v0, %v1120_v26  ;;  %v3590_v0 = vld [vmem:[%s3198_s17 + $0x54] sm:$0xff]  ;;  %1185 = vrot.lane.b32.xlu2 %v1144_v41, %s3159_s18  ;;  %v2763_v26 = vld [vmem:[%s3198_s17 + $0x68] sm:$0x1]  ;;  %v1826_v41 = vshll.u32 %v3625_v9, 16 }
  0x93   : > { %v1264_v30 = vsel %vm687_vm3, %v1232_v28, %v1200_v36  ;;  %v427_v36 = vor.u32 %v426_v12, %v422_v37  ;;  %v978_v44 = vshll.u32 %v3590_v0, 16  ;;  %v195_v28 = vld [vmem:[%s3198_s17 + $0x5c] sm:$0x1]  ;;  %v532_v37 = vshll.u32 %v3623_v7, 16 }
  0x94   : > { %2882 = vmatmul.msk.bf16.vlgmr.msra.gmra.mxu3 %vm1296_vm4, %v1264_v30  ;;  %v3604_v54 = vpop.permute.xlu2 %624  ;;  %v323_v49 = vunpack.c.l.b16 %v195_v28 }
  0x95   : > { %3125 = vmatpush.bf16.msra.mxu3 %v3465_v10  ;;  %v1208_v10 = vsel %vm654_vm2, %v3227_v34, %v3527_v5  ;;  %v893_v34 = vpack.c.b16 %v877_v19, %v877_v19  ;;  %v219_v5 = vld [vmem:[%s3198_s17 + $0xbc] sm:$0x1]  ;;  %v432_v63 = vsel %vm348_vm1, %v427_v36, %v431_v47  ;;  %v980_v1 = vrot.slane %v978_v44, 1  ;;  %v3650_v47 = vld [vmem:[%s3198_s17 + $0x54] sm:$0xff] }
  0x96   : > { %v331_v6 = vunpack.c.l.b16 %v219_v5  ;;  %v594_v19 = vsel %vm573_vm0, %v592_v20, %v593_v21  ;;  %v878_v36 = vunpack.c.l.b16 %v2763_v26 }
  0x97   : > { %1938 = vrot.lane.b32.xlu1 %v1817_v29, %s3160_s19  ;;  %569 = vrot.lane.b32.xlu0 %v528_v62, %s3160_s19  ;;  %v983_v3 = vshll.u32 %v893_v34, 16  ;;  %v1146_v18 = vrot.slane %v893_v34, 1  ;;  %v1823_v62 = vrot.slane %v1821_v15, 1  ;;  %v436_v34 = vshll.u32 %v3650_v47, 16 }
  0x98   : > { %v347_v38 = vpack.c.b16 %v331_v6, %v331_v6 }
  0x99   : > { %v1176_v50 = vpop.permute.xlu1 %1175  ;;  %v1927_v35 = vpop.permute.xlu0 %1926  ;;  %3126 = vmatpush.bf16.msra.mxu3 %v3478_v46  ;;  %v618_v46 = vsel %vm573_vm0, %v616_v51, %v617_v2  ;;  %v985_v30 = vrot.slane %v983_v3, 1  ;;  %v619_v51 = vrot.slane %v3623_v7, 1  ;;  %v1824_v44 = vor.u32 %v1823_v62, %v1819_v48 }
  0x9a   : > { %v1240_v16 = vsel %vm687_vm3, %v1208_v10, %v1176_v50  ;;  %v2039_v32 = vsel %vm654_vm2, %v3213_v13, %v1927_v35  ;;  %v976_v13 = vshrl.u32 %v3590_v0, 16  ;;  %650 = vrot.lane.b32.xlu2 %v618_v46, %s3159_s18  ;;  %v534_v10 = vrot.slane %v532_v37, 1 }
  0x9b   : > { %2870 = vmatmul.msk.bf16.vlgmr.msra.gmra.mxu0 %vm1296_vm4, %v1240_v16  ;;  %v2071_v56 = vsel %vm687_vm3, %v2039_v32, %v2007_v17  ;;  %v1145_v17 = vrot.slane %v3590_v0, 1  ;;  %v537_v50 = vshll.u32 %v347_v38, 16  ;;  %v620_v2 = vrot.slane %v347_v38, 1 }
  0x9c   : > { %3044 = vmatmul.msk.bf16.vlgmr.msra.gmra.mxu2 %vm1296_vm4, %v2071_v56  ;;  %v981_v29 = vor.u32 %v980_v1, %v976_v13  ;;  %v3640_v14 = vpop.permute.xlu2 %1930  ;;  %v1828_v35 = vrot.slane %v1826_v41, 1  ;;  %v3659_v32 = vpack.c.b16 %v878_v36, %v878_v36  ;;  %v3665_v56 = vpack.c.b16 %v323_v49, %v323_v49  ;;  %v2952_v49 = vld [vmem:[%s3198_s17 + $0xb0] sm:$0x1] }
  0x9d   : > { %3127 = vmatpush.bf16.msra.mxu3 %v3495_v24  ;;  %v1234_v24 = vsel %vm654_vm2, %v3249_v59, %v3553_v39  ;;  %v3645_v59 = vld [vmem:[%s3198_s17 + $0x60] sm:$0xff]  ;;  %v1147_v39 = vsel %vm573_vm0, %v1145_v17, %v1146_v18  ;;  %v539_v46 = vrot.slane %v537_v50, 1  ;;  %v621_v1 = vsel %vm573_vm0, %v619_v51, %v620_v2  ;;  %v3710_v2 = vld [vmem:[%s3198_s17 + $0xa8] sm:$0xff] }
  0x9e   : > { %v986_v23 = vsel %vm348_vm1, %v981_v29, %v985_v30  ;;  %v990_v16 = vshll.u32 %v3645_v59, 16  ;;  %v1829_v15 = vsel %vm348_vm1, %v1824_v44, %v1828_v35  ;;  %v988_v17 = vshrl.u32 %v3645_v59, 16 }
  0x9f   : > { %553 = vrot.lane.b32.xlu1 %v432_v63, %s3160_s19  ;;  %2018 = vrot.lane.b32.xlu0 %v1978_v52, %s3159_s18  ;;  %v2940_v63 = vld [vmem:[%s3198_s17 + $0x80] sm:$0x1]  ;;  %v535_v52 = vor.u32 %v534_v10, %v530_v40  ;;  %v995_v21 = vshll.u32 %v3659_v32, 16  ;;  %v438_v26 = vrot.slane %v436_v34, 1  ;;  %v441_v28 = vshll.u32 %v3665_v56, 16 }
  0xa0   : > { %v1979_v48 = vrot.slane %v3612_v58, 1  ;;  %v1980_v62 = vrot.slane %v3625_v9, 1  ;;  %v1714_v51 = vunpack.c.l.b16 %v2952_v49  ;;  %v1149_v34 = vrot.slane %v3659_v32, 1 }
  0xa1   : > { %v1202_v25 = vpop.permute.xlu1 %1201  ;;  %v1929_v12 = vpop.permute.xlu0 %1928  ;;  %v540_v29 = vsel %vm348_vm1, %v535_v52, %v539_v46  ;;  %v443_v38 = vrot.slane %v441_v28, 1  ;;  %v595_v52 = vrot.slane %v3650_v47, 1  ;;  %v596_v46 = vrot.slane %v3665_v56, 1 }
  0xa2   : > { %v1266_v61 = vsel %vm687_vm3, %v1234_v24, %v1202_v25  ;;  %1107 = vrot.lane.b32.xlu2 %v986_v23, %s3160_s19  ;;  %v2041_v5 = vsel %vm654_vm2, %v3233_v43, %v1929_v12  ;;  %v992_v43 = vrot.slane %v990_v16, 1  ;;  %v3681_v24 = vld [vmem:[%s3198_s17 + $0x78] sm:$0xff]  ;;  %v1710_v25 = vunpack.c.l.b16 %v2940_v63 }
  0xa3   : > { %v2073_v20 = vsel %vm687_vm3, %v2041_v5, %v3575_v27  ;;  %v1833_v37 = vshll.u32 %v3681_v24, 16  ;;  %v1831_v40 = vshrl.u32 %v3681_v24, 16  ;;  %v1148_v16 = vrot.slane %v3645_v59, 1  ;;  %v2766_v5 = vld [vmem:[%s3198_s17 + $0x74] sm:$0x1] }
  0xa4   : > { %2883 = vmatmul.msk.bf16.gmra.mxu3 %vm1296_vm4, %v1266_v61  ;;  %v3669_v3 = vpop.permute.xlu2 %545  ;;  %v993_v27 = vor.u32 %v992_v43, %v988_v17  ;;  %v3690_v30 = vpack.c.b16 %v1710_v25, %v1710_v25 }
  0xa5   : > { %v1835_v10 = vrot.slane %v1833_v37, 1 }
  0xa6   : > { %v1838_v50 = vshll.u32 %v3690_v30, 16 }
  0xa7   : > { %1187 = vrot.lane.b32.xlu1 %v1147_v39, %s3159_s18  ;;  %634 = vrot.lane.b32.xlu0 %v594_v19, %s3159_s18  ;;  %v1836_v44 = vor.u32 %v1835_v10, %v1831_v40 }
  0xa8   : > { %v1840_v35 = vrot.slane %v1838_v50, 1 }
  0xa9   : > { %v1098_v45 = vpop.permute.xlu1 %1097  ;;  %v544_v13 = vpop.permute.xlu0 %543 }
  0xaa   : > { %v658_v6 = vsel %vm654_vm2, %v3259_v8, %v544_v13  ;;  %v434_v8 = vshrl.u32 %v3650_v47, 16  ;;  %571 = vrot.lane.b32.xlu2 %v540_v29, %s3160_s19  ;;  %v1210_v41 = vsel %vm654_vm2, %v3254_v4, %v1098_v45  ;;  %v1981_v4 = vsel %vm573_vm0, %v1979_v48, %v1980_v62  ;;  %v2955_v62 = vld [vmem:[%s3198_s17 + $0xbc] sm:$0x1] }
  0xab   : > { %v691_v18 = vsel %vm687_vm3, %v658_v6, %v3604_v54  ;;  %v997_v54 = vrot.slane %v995_v21, 1  ;;  %v2043_v45 = vsel %vm654_vm2, %v3292_v57, %v3640_v14  ;;  %v1881_v13 = vshll.u32 %v3710_v2, 16  ;;  %v198_v57 = vld [vmem:[%s3198_s17 + $0x68] sm:$0x1]  ;;  %v3731_v14 = vld [vmem:[%s3198_s17 + $0x6c] sm:$0xff] }
  0xac   : > { %2899 = vmatmul.msk.bf16.gmra.mxu1 %vm1296_vm4, %v691_v18  ;;  %3045 = vmatmul.msk.bf16.gmra.mxu2 %vm1296_vm4, %v2073_v20  ;;  %v439_v61 = vor.u32 %v438_v26, %v434_v8  ;;  %v3698_v19 = vpop.permute.xlu2 %1179  ;;  %v879_v18 = vunpack.c.l.b16 %v2766_v5  ;;  %v1841_v56 = vsel %vm348_vm1, %v1836_v44, %v1840_v35  ;;  %v1150_v20 = vsel %vm573_vm0, %v1148_v16, %v1149_v34  ;;  %v3770_v35 = vld [vmem:[%s3198_s17 + $0xb4] sm:$0xff]  ;;  %v3774_v5 = vld [vmem:[%s3198_s17 + $0x84] sm:$0xff] }
  0xad   : > { %v998_v23 = vsel %vm348_vm1, %v993_v27, %v997_v54  ;;  %v1879_v21 = vshrl.u32 %v3710_v2, 16  ;;  %v1883_v25 = vrot.slane %v1881_v13, 1  ;;  %v1994_v26 = vrot.slane %v3710_v2, 1  ;;  %v3742_v27 = vld [vmem:[%s3198_s17 + $0x60] sm:$0xff] }
  0xae   : > { %v444_v9 = vsel %vm348_vm1, %v439_v61, %v443_v38  ;;  %v324_v29 = vunpack.c.l.b16 %v198_v57  ;;  %v3744_v54 = vpack.c.b16 %v879_v18, %v879_v18  ;;  %v1002_v37 = vshll.u32 %v3731_v14, 16  ;;  %v201_v18 = vld [vmem:[%s3198_s17 + $0x74] sm:$0x1] }
  0xaf   : > { %652 = vrot.lane.b32.xlu1 %v621_v1, %s3159_s18  ;;  %1940 = vrot.lane.b32.xlu0 %v1829_v15, %s3160_s19  ;;  %v1730_v15 = vpack.c.b16 %v1714_v51, %v1714_v51  ;;  %v1983_v61 = vrot.slane %v3690_v30, 1  ;;  %v660_v38 = vsel %vm654_vm2, %v3312_v22, %v3669_v3  ;;  %v448_v49 = vshll.u32 %v3742_v27, 16 }
  0xb0   : > { %v340_v10 = vpack.c.b16 %v324_v29, %v324_v29  ;;  %v1000_v3 = vshrl.u32 %v3731_v14, 16  ;;  %v1715_v16 = vunpack.c.l.b16 %v2955_v62  ;;  %v1845_v57 = vshll.u32 %v3774_v5, 16 }
  0xb1   : > { %v1124_v12 = vpop.permute.xlu1 %1123  ;;  %v1178_v39 = vpop.permute.xlu0 %1177  ;;  %v1886_v8 = vshll.u32 %v1730_v15, 16  ;;  %v1995_v28 = vrot.slane %v1730_v15, 1 }
  0xb2   : > { %v1242_v36 = vsel %vm687_vm3, %v1210_v41, %v1178_v39  ;;  %2020 = vrot.lane.b32.xlu2 %v1981_v4, %s3159_s18  ;;  %v1236_v1 = vsel %vm654_vm2, %v3275_v33, %v1124_v12  ;;  %v597_v33 = vsel %vm573_vm0, %v595_v52, %v596_v46  ;;  %v1982_v12 = vrot.slane %v3681_v24, 1  ;;  %v2943_v41 = vld [vmem:[%s3198_s17 + $0x8c] sm:$0x1] }
  0xb3   : > { %2871 = vmatmul.msk.bf16.gmra.mxu0 %vm1296_vm4, %v1242_v36  ;;  %v1884_v39 = vor.u32 %v1883_v25, %v1879_v21  ;;  %v1888_v36 = vrot.slane %v1886_v8, 1  ;;  %v1996_v30 = vsel %vm573_vm0, %v1994_v26, %v1995_v28  ;;  %v1007_v4 = vshll.u32 %v3744_v54, 16 }
  0xb4   : > { %v3726_v17 = vpop.permute.xlu2 %1205  ;;  %v1984_v44 = vsel %vm573_vm0, %v1982_v12, %v1983_v61  ;;  %v1711_v34 = vunpack.c.l.b16 %v2943_v41  ;;  %v453_v52 = vshll.u32 %v340_v10, 16  ;;  %v599_v46 = vrot.slane %v340_v10, 1  ;;  %v3800_v61 = vld [vmem:[%s3198_s17 + $0x6c] sm:$0xff] }
  0xb5   : > { %v1891_v28 = vshrl.u32 %v3770_v35, 16  ;;  %v1151_v10 = vrot.slane %v3731_v14, 1 }
  0xb7   : > { %1109 = vrot.lane.b32.xlu1 %v998_v23, %s3160_s19  ;;  %555 = vrot.lane.b32.xlu0 %v444_v9, %s3160_s19  ;;  %v1004_v9 = vrot.slane %v1002_v37, 1 }
  0xb9   : > { %v2011_v63 = vpop.permute.xlu1 %2010  ;;  %v1204_v6 = vpop.permute.xlu0 %1203  ;;  %v1005_v13 = vor.u32 %v1004_v9, %v1000_v3  ;;  %v3141_v3 = vld [vmem:[%s3198_s17 + $0x3c] sm:$0xff] }
  0xba   : > { %v2075_v32 = vsel %vm687_vm3, %v2043_v45, %v2011_v63  ;;  %v1268_v43 = vsel %vm687_vm3, %v1236_v1, %v1204_v6  ;;  %636 = vrot.lane.b32.xlu2 %v597_v33, %s3159_s18  ;;  %v446_v45 = vshrl.u32 %v3742_v27, 16  ;;  %v450_v63 = vrot.slane %v448_v49, 1 }
  0xbb   : > { %2884 = vmatmul.msk.bf16.gmra.mxu3 %vm1296_vm4, %v1268_v43  ;;  %v1009_v1 = vrot.slane %v1007_v4, 1  ;;  %v3781_v6 = vpack.c.b16 %v1715_v16, %v1715_v16  ;;  %v3785_v43 = vpack.c.b16 %v1711_v34, %v1711_v34  ;;  %v460_v49 = vshll.u32 %v3800_v61, 16  ;;  %v2769_v16 = vld [vmem:[%s3198_s17 + $0x80] sm:$0x1] }
  0xbc   : > { %3046 = vmatmul.msk.bf16.gmra.mxu2 %vm1296_vm4, %v2075_v32  ;;  %v3759_v50 = vpop.permute.xlu2 %1101  ;;  %v1893_v32 = vshll.u32 %v3770_v35, 16 }
  0xbd   : > { %v1010_v26 = vsel %vm348_vm1, %v1005_v13, %v1009_v1  ;;  %v1898_v12 = vshll.u32 %v3781_v6, 16  ;;  %v1850_v62 = vshll.u32 %v3785_v43, 16 }
  0xbe   : > { %v1895_v37 = vrot.slane %v1893_v32, 1  ;;  %v1997_v32 = vrot.slane %v3770_v35, 1 }
  0xbf   : > { %1942 = vrot.lane.b32.xlu1 %v1841_v56, %s3160_s19  ;;  %1189 = vrot.lane.b32.xlu0 %v1150_v20, %s3159_s18  ;;  %v451_v56 = vor.u32 %v450_v63, %v446_v45  ;;  %v455_v20 = vrot.slane %v453_v52, 1  ;;  %v462_v45 = vrot.slane %v460_v49, 1 }
  0xc1   : > { %v627_v48 = vpop.permute.xlu1 %626  ;;  %v1100_v23 = vpop.permute.xlu0 %1099  ;;  %v456_v41 = vsel %vm348_vm1, %v451_v56, %v455_v20  ;;  %v1985_v20 = vrot.slane %v3774_v5, 1 }
  0xc2   : > { %v693_v40 = vsel %vm687_vm3, %v660_v38, %v627_v48  ;;  %v1212_v22 = vsel %vm654_vm2, %v3304_v11, %v1100_v23  ;;  %v1889_v11 = vsel %vm348_vm1, %v1884_v39, %v1888_v36  ;;  %v325_v38 = vunpack.c.l.b16 %v201_v18 }
  0xc3   : > { %2900 = vmatmul.msk.bf16.gmra.mxu1 %vm1296_vm4, %v693_v40  ;;  %v1244_v51 = vsel %vm687_vm3, %v1212_v22, %v3698_v19  ;;  %v598_v19 = vrot.slane %v3742_v27, 1  ;;  %1950 = vrot.lane.b32.xlu2 %v1889_v11, %s3160_s19  ;;  %v1843_v48 = vshrl.u32 %v3774_v5, 16  ;;  %v1900_v39 = vrot.slane %v1898_v12, 1  ;;  %v3850_v12 = vld [vmem:[%s3198_s17 + $0xc0] sm:$0xff] }
  0xc4   : > { %2872 = vmatmul.msk.bf16.gmra.mxu0 %vm1296_vm4, %v1244_v51  ;;  %v3789_v21 = vpop.permute.xlu2 %565  ;;  %v3808_v36 = vpack.c.b16 %v325_v38, %v325_v38  ;;  %v1152_v22 = vrot.slane %v3744_v54, 1  ;;  %v458_v11 = vshrl.u32 %v3800_v61, 16  ;;  %v1214_v18 = vsel %vm654_vm2, %v3365_v31, %v3759_v50  ;;  %v2946_v50 = vld [vmem:[%s3198_s17 + $0x98] sm:$0x1] }
  0xc5   : > { %v600_v8 = vsel %vm573_vm0, %v598_v19, %v599_v46  ;;  %v880_v19 = vunpack.c.l.b16 %v2769_v16  ;;  %v3828_v46 = vld [vmem:[%s3198_s17 + $0x78] sm:$0xff]  ;;  %v204_v16 = vld [vmem:[%s3198_s17 + $0x80] sm:$0x1] }
  0xc6   : > { %v465_v54 = vshll.u32 %v3808_v36, 16  ;;  %v1153_v52 = vsel %vm573_vm0, %v1151_v10, %v1152_v22  ;;  %v463_v13 = vor.u32 %v462_v45, %v458_v11  ;;  %v1905_v10 = vshll.u32 %v3850_v12, 16 }
  0xc7   : > { %2030 = vrot.lane.b32.xlu1 %v1996_v30, %s3159_s18  ;;  %2022 = vrot.lane.b32.xlu0 %v1984_v44, %s3159_s18  ;;  %v1852_v30 = vrot.slane %v1850_v62, 1  ;;  %v1012_v62 = vshrl.u32 %v3828_v46, 16  ;;  %v601_v22 = vrot.slane %v3800_v61, 1 }
  0xc8   : > { %v467_v1 = vrot.slane %v465_v54, 1 }
  0xc9   : > { %v1933_v15 = vpop.permute.xlu1 %1932  ;;  %v1126_v33 = vpop.permute.xlu0 %1125 }
  0xca   : > { %v1238_v25 = vsel %vm654_vm2, %v3330_v42, %v1126_v33  ;;  %v1847_v42 = vrot.slane %v1845_v57, 1  ;;  %v2045_v9 = vsel %vm654_vm2, %v3141_v3, %v1933_v15  ;;  %v1998_v15 = vrot.slane %v3781_v6, 1  ;;  %v2958_v57 = vld [vmem:[%s3198_s17 + $0xc8] sm:$0x1] }
  0xcb   : > { %v1270_v29 = vsel %vm687_vm3, %v1238_v25, %v3726_v17  ;;  %v1896_v17 = vor.u32 %v1895_v37, %v1891_v28  ;;  %557 = vrot.lane.b32.xlu2 %v456_v41, %s3160_s19  ;;  %v1986_v33 = vrot.slane %v3785_v43, 1  ;;  %v1014_v25 = vshll.u32 %v3828_v46, 16 }
  0xcc   : > { %2885 = vmatmul.msk.bf16.gmra.mxu3 %vm1296_vm4, %v1270_v29  ;;  %v1848_v40 = vor.u32 %v1847_v42, %v1843_v48  ;;  %v3816_v51 = vpop.permute.xlu2 %2014  ;;  %v896_v29 = vpack.c.b16 %v880_v19, %v880_v19  ;;  %v1716_v43 = vunpack.c.l.b16 %v2958_v57  ;;  %v468_v38 = vsel %vm348_vm1, %v463_v13, %v467_v1  ;;  %v3143_v13 = vld [vmem:[%s3198_s17 + $0x48] sm:$0xff] }
  0xcd   : > { %v1901_v34 = vsel %vm348_vm1, %v1896_v17, %v1900_v39  ;;  %v1999_v48 = vsel %vm573_vm0, %v1997_v32, %v1998_v15  ;;  %v1987_v42 = vsel %vm573_vm0, %v1985_v20, %v1986_v33  ;;  %v1016_v41 = vrot.slane %v1014_v25, 1  ;;  %v3892_v33 = vld [vmem:[%s3198_s17 + $0x78] sm:$0xff] }
  0xce   : > { %v1853_v63 = vsel %vm348_vm1, %v1848_v40, %v1852_v30  ;;  %v1019_v17 = vshll.u32 %v896_v29, 16  ;;  %v1154_v39 = vrot.slane %v3828_v46, 1  ;;  %v1155_v49 = vrot.slane %v896_v29, 1  ;;  %v3860_v40 = vld [vmem:[%s3198_s17 + $0x90] sm:$0xff] }
  0xcf   : > { %638 = vrot.lane.b32.xlu1 %v600_v8, %s3159_s18  ;;  %1111 = vrot.lane.b32.xlu0 %v1010_v26, %s3160_s19  ;;  %v3142_v8 = vld [vmem:[%s3198_s17 + $0x24] sm:$0xff]  ;;  %v3862_v30 = vpack.c.b16 %v1716_v43, %v1716_v43  ;;  %v602_v3 = vrot.slane %v3808_v36, 1  ;;  %v1857_v45 = vshll.u32 %v3860_v40, 16  ;;  %v1907_v1 = vrot.slane %v1905_v10, 1 }
  0xd0   : > { %v1021_v11 = vrot.slane %v1019_v17, 1  ;;  %v1156_v36 = vsel %vm573_vm0, %v1154_v39, %v1155_v49  ;;  %v326_v20 = vunpack.c.l.b16 %v204_v16 }
  0xd1   : > { %v548_v23 = vpop.permute.xlu1 %547  ;;  %v2013_v4 = vpop.permute.xlu0 %2012  ;;  %v1910_v32 = vshll.u32 %v3862_v30, 16  ;;  %v603_v57 = vsel %vm573_vm0, %v601_v22, %v602_v3 }
  0xd2   : > { %v2077_v44 = vsel %vm687_vm3, %v2045_v9, %v2013_v4  ;;  %v662_v26 = vsel %vm654_vm2, %v3142_v8, %v548_v23  ;;  %v1712_v23 = vunpack.c.l.b16 %v2946_v50  ;;  %v680_v9 = vsel %vm654_vm2, %v3383_v55, %v3789_v21 }
  0xd3   : > { %3047 = vmatmul.msk.bf16.gmra.mxu2 %vm1296_vm4, %v2077_v44  ;;  %1191 = vrot.lane.b32.xlu2 %v1153_v52, %s3159_s18  ;;  %v2772_v44 = vld [vmem:[%s3198_s17 + $0x8c] sm:$0x1]  ;;  %v1903_v21 = vshrl.u32 %v3850_v12, 16  ;;  %v1855_v8 = vshrl.u32 %v3860_v40, 16 }
  0xd4   : > { %v3844_v37 = vpop.permute.xlu2 %630  ;;  %v1728_v52 = vpack.c.b16 %v1712_v23, %v1712_v23  ;;  %v3144_v23 = vld [vmem:[%s3198_s17 + $0x30] sm:$0xff] }
  0xd5   : > { %v1908_v29 = vor.u32 %v1907_v1, %v1903_v21 }
  0xd7   : > { %1952 = vrot.lane.b32.xlu1 %v1901_v34, %s3160_s19  ;;  %1944 = vrot.lane.b32.xlu0 %v1853_v63, %s3160_s19  ;;  %v1017_v34 = vor.u32 %v1016_v41, %v1012_v62  ;;  %v2949_v62 = vld [vmem:[%s3198_s17 + $0xa4] sm:$0x1] }
  0xd9   : > { %v1182_v56 = vpop.permute.xlu1 %1181  ;;  %v629_v6 = vpop.permute.xlu0 %628  ;;  %v1022_v25 = vsel %vm348_vm1, %v1017_v34, %v1021_v11  ;;  %v3918_v34 = vld [vmem:[%s3198_s17 + $0x9c] sm:$0xff]  ;;  %v1713_v11 = vunpack.c.l.b16 %v2949_v62 }
  0xda   : > { %v1246_v28 = vsel %vm687_vm3, %v1214_v18, %v1182_v56  ;;  %v695_v31 = vsel %vm687_vm3, %v662_v26, %v629_v6  ;;  %v3888_v18 = vld [vmem:[%s3198_s17 + $0x84] sm:$0xff]  ;;  %v881_v56 = vunpack.c.l.b16 %v2772_v44  ;;  %v1859_v26 = vrot.slane %v1857_v45, 1 }
  0xdb   : > { %2873 = vmatmul.msk.bf16.gmra.mxu0 %vm1296_vm4, %v1246_v28  ;;  %2901 = vmatmul.msk.bf16.gmra.mxu1 %vm1296_vm4, %v695_v31  ;;  %v1862_v6 = vshll.u32 %v1728_v52, 16  ;;  %v1989_v28 = vrot.slane %v1728_v52, 1  ;;  %v1912_v31 = vrot.slane %v1910_v32, 1  ;;  %v1026_v43 = vshll.u32 %v3888_v18, 16 }
  0xdc   : > { %2024 = vrot.lane.b32.xlu2 %v1987_v42, %s3159_s18  ;;  %v3877_v19 = vpop.permute.xlu2 %1936  ;;  %v3899_v50 = vpack.c.b16 %v881_v56, %v881_v56  ;;  %v472_v42 = vshll.u32 %v3892_v33, 16  ;;  %v1860_v41 = vor.u32 %v1859_v26, %v1855_v8  ;;  %v470_v45 = vshrl.u32 %v3892_v33, 16  ;;  %v3145_v56 = vld [vmem:[%s3198_s17 + $0x3c] sm:$0xff] }
  0xdd   : > { %v1864_v17 = vrot.slane %v1862_v6, 1  ;;  %v1913_v3 = vsel %vm348_vm1, %v1908_v29, %v1912_v31  ;;  %v1028_v44 = vrot.slane %v1026_v43, 1  ;;  %v2961_v31 = vld [vmem:[%s3198_s17 + $0xd4] sm:$0x1] }
  0xde   : > { %v1031_v16 = vshll.u32 %v3899_v50, 16 }
  0xdf   : > { %559 = vrot.lane.b32.xlu1 %v468_v38, %s3160_s19  ;;  %2032 = vrot.lane.b32.xlu0 %v1999_v48, %s3159_s18  ;;  %v3903_v48 = vpack.c.b16 %v326_v20, %v326_v20 }
  0xe0   : > { %v1033_v52 = vrot.slane %v1031_v16, 1 }
  0xe1   : > { %v647_v4 = vpop.permute.xlu1 %646  ;;  %v1935_v63 = vpop.permute.xlu0 %1934 }
  0xe2   : > { %v713_v54 = vsel %vm687_vm3, %v680_v9, %v647_v4  ;;  %v2047_v55 = vsel %vm654_vm2, %v3143_v13, %v1935_v63  ;;  %v1024_v9 = vshrl.u32 %v3888_v18, 16  ;;  %v477_v63 = vshll.u32 %v3903_v48, 16 }
  0xe3   : > { %2910 = vmatmul.msk.bf16.vlgmr.msrb.gmra.mxu3 %vm1296_vm4, %v713_v54  ;;  %v2079_v15 = vsel %vm687_vm3, %v2047_v55, %v3816_v51  ;;  %v1988_v51 = vrot.slane %v3860_v40, 1  ;;  %v474_v54 = vrot.slane %v472_v42, 1  ;;  %v3926_v13 = vpack.c.b16 %v1713_v11, %v1713_v11 }
  0xe4   : > { %3048 = vmatmul.msk.bf16.gmra.mxu2 %vm1296_vm4, %v2079_v15  ;;  %1113 = vrot.lane.b32.xlu2 %v1022_v25, %s3160_s19  ;;  %v3907_v49 = vpop.permute.xlu2 %551  ;;  %v1869_v55 = vshll.u32 %v3918_v34, 16  ;;  %v479_v32 = vrot.slane %v477_v63, 1  ;;  %v2000_v15 = vrot.slane %v3850_v12, 1  ;;  %v1717_v42 = vunpack.c.l.b16 %v2961_v31  ;;  %v207_v63 = vld [vmem:[%s3198_s17 + $0x8c] sm:$0x1] }
  0xe5   : > { %v1990_v22 = vsel %vm573_vm0, %v1988_v51, %v1989_v28  ;;  %v475_v1 = vor.u32 %v474_v54, %v470_v45  ;;  %v1867_v51 = vshrl.u32 %v3918_v34, 16  ;;  %v1874_v29 = vshll.u32 %v3926_v13, 16 }
  0xe6   : > { %v1871_v28 = vrot.slane %v1869_v55, 1 }
  0xe7   : > { %1193 = vrot.lane.b32.xlu1 %v1156_v36, %s3159_s18  ;;  %640 = vrot.lane.b32.xlu0 %v603_v57, %s3159_s18  ;;  %v1865_v36 = vsel %vm348_vm1, %v1860_v41, %v1864_v17  ;;  %v2001_v57 = vrot.slane %v3862_v30, 1  ;;  %v480_v30 = vsel %vm348_vm1, %v475_v1, %v479_v32  ;;  %v1876_v41 = vrot.slane %v1874_v29, 1 }
  0xe8   : > { %v1872_v62 = vor.u32 %v1871_v28, %v1867_v51  ;;  %v1157_v17 = vrot.slane %v3888_v18, 1  ;;  %v666_v51 = vsel %vm654_vm2, %v3516_v53, %v3907_v49 }
  0xe9   : > { %v1104_v38 = vpop.permute.xlu1 %1103  ;;  %v550_v39 = vpop.permute.xlu0 %549  ;;  %v2002_v43 = vsel %vm573_vm0, %v2000_v15, %v2001_v57  ;;  %v1991_v57 = vrot.slane %v3918_v34, 1 }
  0xea   : > { %v664_v10 = vsel %vm654_vm2, %v3144_v23, %v550_v39  ;;  %v1216_v20 = vsel %vm654_vm2, %v3145_v56, %v1104_v38  ;;  %v3946_v38 = vld [vmem:[%s3198_s17 + $0xcc] sm:$0xff]  ;;  %v1158_v39 = vrot.slane %v3899_v50, 1  ;;  %v2049_v23 = vsel %vm654_vm2, %v3485_v60, %v3877_v19 }
  0xeb   : > { %v697_v4 = vsel %vm687_vm3, %v664_v10, %v3844_v37  ;;  %v1029_v37 = vor.u32 %v1028_v44, %v1024_v9  ;;  %v605_v9 = vrot.slane %v3903_v48, 1  ;;  %v3146_v44 = vld [vmem:[%s3198_s17 + $0x9c] sm:$0xff]  ;;  %v1733_v19 = vpack.c.b16 %v1717_v42, %v1717_v42 }
  0xec   : > { %2902 = vmatmul.msk.bf16.gmra.mxu1 %vm1296_vm4, %v697_v4  ;;  %1946 = vrot.lane.b32.xlu2 %v1865_v36, %s3160_s19  ;;  %v3934_v8 = vpop.permute.xlu2 %1185  ;;  %v1917_v4 = vshll.u32 %v3946_v38, 16  ;;  %v1877_v48 = vsel %vm348_vm1, %v1872_v62, %v1876_v41  ;;  %v1159_v54 = vsel %vm573_vm0, %v1157_v17, %v1158_v39  ;;  %v3971_v36 = vld [vmem:[%s3198_s17 + $0x90] sm:$0xff]  ;;  %v1915_v55 = vshrl.u32 %v3946_v38, 16  ;;  %v3147_v62 = vld [vmem:[%s3198_s17 + $0x48] sm:$0xff] }
  0xed   : > { %v1034_v6 = vsel %vm348_vm1, %v1029_v37, %v1033_v52  ;;  %v1922_v1 = vshll.u32 %v1733_v19, 16  ;;  %v2003_v32 = vrot.slane %v3946_v38, 1  ;;  %v2004_v15 = vrot.slane %v1733_v19, 1 }
  0xee   : > { %v1992_v56 = vrot.slane %v3926_v13, 1  ;;  %v1036_v49 = vshrl.u32 %v3971_v36, 16 }
  0xef   : > { %2026 = vrot.lane.b32.xlu1 %v1990_v22, %s3159_s18  ;;  %1954 = vrot.lane.b32.xlu0 %v1913_v3, %s3160_s19  ;;  %v2775_v22 = vld [vmem:[%s3198_s17 + $0x98] sm:$0x1]  ;;  %v604_v3 = vrot.slane %v3892_v33, 1  ;;  %v1924_v31 = vrot.slane %v1922_v1, 1  ;;  %v2005_v17 = vsel %vm573_vm0, %v2003_v32, %v2004_v15 }
  0xf0   : > { %v882_v37 = vunpack.c.l.b16 %v2775_v22  ;;  %v1993_v39 = vsel %vm573_vm0, %v1991_v57, %v1992_v56  ;;  %v1160_v57 = vrot.slane %v3971_v36, 1 }
  0xf1   : > { %v568_v21 = vpop.permute.xlu1 %567  ;;  %v1184_v25 = vpop.permute.xlu0 %1183  ;;  %v606_v52 = vsel %vm573_vm0, %v604_v3, %v605_v9 }
  0xf2   : > { %v1248_v26 = vsel %vm687_vm3, %v1216_v20, %v1184_v25  ;;  %v682_v16 = vsel %vm654_vm2, %v3146_v44, %v568_v21  ;;  %v1919_v21 = vrot.slane %v1917_v4, 1  ;;  %v3980_v20 = vld [vmem:[%s3198_s17 + $0x84] sm:$0xff]  ;;  %v327_v25 = vunpack.c.l.b16 %v207_v63 }
  0xf3   : > { %2874 = vmatmul.msk.bf16.gmra.mxu0 %vm1296_vm4, %v1248_v26  ;;  %v3983_v26 = vpack.c.b16 %v882_v37, %v882_v37  ;;  %v484_v13 = vshll.u32 %v3980_v20, 16  ;;  %v482_v9 = vshrl.u32 %v3980_v20, 16  ;;  %v3148_v37 = vld [vmem:[%s3198_s17 + $0xa8] sm:$0xff] }
  0xf4   : > { %2034 = vrot.lane.b32.xlu2 %v2002_v43, %s3159_s18  ;;  %v3962_v45 = vpop.permute.xlu2 %650  ;;  %v1920_v29 = vor.u32 %v1919_v21, %v1915_v55 }
  0xf5   : > { %v1043_v22 = vshll.u32 %v3983_v26, 16  ;;  %v486_v4 = vrot.slane %v484_v13, 1  ;;  %v1161_v56 = vrot.slane %v3983_v26, 1 }
  0xf6   : > { %v1925_v3 = vsel %vm348_vm1, %v1920_v29, %v1924_v31 }
  0xf7   : > { %1115 = vrot.lane.b32.xlu1 %v1034_v6, %s3160_s19  ;;  %561 = vrot.lane.b32.xlu0 %v480_v30, %s3160_s19  ;;  %v1038_v6 = vshll.u32 %v3971_v36, 16  ;;  %v487_v19 = vor.u32 %v486_v4, %v482_v9  ;;  %v1162_v29 = vsel %vm573_vm0, %v1160_v57, %v1161_v56 }
  0xf9   : > { %v2017_v10 = vpop.permute.xlu1 %2016  ;;  %v649_v50 = vpop.permute.xlu0 %648 }
  0xfa   : > { %v2081_v11 = vsel %vm687_vm3, %v2049_v23, %v2017_v10  ;;  %v715_v60 = vsel %vm687_vm3, %v682_v16, %v649_v50  ;;  %v343_v23 = vpack.c.b16 %v327_v25, %v327_v25  ;;  %v1040_v10 = vrot.slane %v1038_v6, 1 }
  0xfb   : > { %3049 = vmatmul.msk.bf16.gmra.mxu2 %vm1296_vm4, %v2081_v11  ;;  %2911 = vmatmul.msk.bf16.gmra.mxu3 %vm1296_vm4, %v715_v60  ;;  %v1045_v60 = vrot.slane %v1043_v22, 1 }
  0xfc   : > { %642 = vrot.lane.b32.xlu2 %v606_v52, %s3159_s18  ;;  %v1108_v42 = vpop.permute.xlu2 %1107  ;;  %v489_v44 = vshll.u32 %v343_v23, 16  ;;  %v608_v16 = vrot.slane %v343_v23, 1  ;;  %v1041_v11 = vor.u32 %v1040_v10, %v1036_v49 }
  0xfd   : > { %v1220_v31 = vsel %vm654_vm2, %v3590_v0, %v1108_v42  ;;  %v4057_v0 = vld [vmem:[%s4368_s2] ss:$0 sm:$0xff] }
  0xfe   : > { %v1046_v1 = vsel %vm348_vm1, %v1041_v11, %v1045_v60 }
  0xff   : > { %1948 = vrot.lane.b32.xlu1 %v1877_v48, %s3160_s19  ;;  %1195 = vrot.lane.b32.xlu0 %v1159_v54, %s3159_s18  ;;  %v491_v48 = vrot.slane %v489_v44, 1 }
 0x101   : > { %v633_v28 = vpop.permute.xlu1 %632  ;;  %v1106_v30 = vpop.permute.xlu0 %1105  ;;  %v492_v32 = vsel %vm348_vm1, %v487_v19, %v491_v48 }
 0x102   : > { %v699_v43 = vsel %vm687_vm3, %v666_v51, %v633_v28  ;;  %v1218_v41 = vsel %vm654_vm2, %v3147_v62, %v1106_v30  ;;  %v3161_v28 = vmov 0.0|0.0  }
 0x103   : > { %2903 = vmatmul.msk.bf16.gmra.mxu1 %vm1296_vm4, %v699_v43  ;;  %v1250_v53 = vsel %vm687_vm3, %v1218_v41, %v3934_v8  ;;  %v607_v8 = vrot.slane %v3980_v20, 1  ;;  %2559 = vst.msk [vmem:[%s4028_s16] sm:$0xf] %vm2558_vm5, %v3161_v28  ;;  %v3150_v43 = vld [vmem:[%s3198_s17 + $0x48] sm:$0xff] }
 0x104   : > { %2875 = vmatmul.msk.bf16.gmra.mxu0 %vm1296_vm4, %v1250_v53  ;;  %1956 = vrot.lane.b32.xlu2 %v1925_v3, %s3160_s19  ;;  %v572_v63 = vpop.permute.xlu2 %571  ;;  %2560 = vst.msk [vmem:[%s4028_s16 + $0x4] sm:$0xf] %vm2558_vm5, %v3161_v28 }
 0x105   : > { %v609_v21 = vsel %vm573_vm0, %v607_v8, %v608_v16  ;;  %2562 = vst.msk [vmem:[%s4028_s16 + $0x8] sm:$0x1] %vm2561_vm6, %v3161_v28  ;;  %v686_v10 = vsel %vm654_vm2, %v3623_v7, %v572_v63 }
 0x106   : > { %2611 = vst.msk [vmem:[%s4028_s16 + $0xcc] sm:$0xf] %vm2558_vm5, %v3161_v28 }
 0x107   : > { %2036 = vrot.lane.b32.xlu1 %v2005_v17, %s3159_s18  ;;  %2028 = vrot.lane.b32.xlu0 %v1993_v39, %s3159_s18  ;;  %2612 = vst.msk [vmem:[%s4028_s16 + $0xd0] sm:$0xf] %vm2558_vm5, %v3161_v28 }
 0x108   : > { %2613 = vst.msk [vmem:[%s4028_s16 + $0xd4] sm:$0x1] %vm2561_vm6, %v3161_v28  ;;  %v1477_v53 = vpop.f32.mrf.mxu1 }
 0x109   : > { %v1939_v50 = vpop.permute.xlu1 %1938  ;;  %v570_v54 = vpop.permute.xlu0 %569 }
 0x10a   : > { %v684_v52 = vsel %vm654_vm2, %v3148_v37, %v570_v54 }
 0x10b   : > { %v717_v55 = vsel %vm687_vm3, %v684_v52, %v3962_v45  ;;  %v3149_v45 = vld [vmem:[%s3198_s17 + $0x60] sm:$0xff] }
 0x10c   : > { %2912 = vmatmul.msk.bf16.gmra.mxu3 %vm1296_vm4, %v717_v55  ;;  %563 = vrot.lane.b32.xlu2 %v492_v32, %s3160_s19  ;;  %v2051_v25 = vsel %vm654_vm2, %v3149_v45, %v1939_v50  ;;  %v2021_v51 = vpop.permute.xlu2 %2020 }
 0x10f   : > { %644 = vrot.lane.b32.xlu1 %v609_v21, %s3159_s18  ;;  %1117 = vrot.lane.b32.xlu0 %v1046_v1, %s3160_s19 }
 0x110   : > { %v1479_v7 = vpop.f32.mrf.mxu1 }
 0x111   : > { %v554_v15 = vpop.permute.xlu1 %553  ;;  %v2019_v6 = vpop.permute.xlu0 %2018 }
 0x112   : > { %v2083_v26 = vsel %vm687_vm3, %v2051_v25, %v2019_v6  ;;  %v668_v62 = vsel %vm654_vm2, %v3150_v43, %v554_v15 }
 0x113   : > { %3050 = vmatmul.msk.bf16.gmra.mxu2 %vm1296_vm4, %v2083_v26 }
 0x114   : > { %1197 = vrot.lane.b32.xlu2 %v1162_v29, %s3159_s18  ;;  %v637_v39 = vpop.permute.xlu2 %636 }
 0x117   : > { %v4068_v19 = vpop.f32.mrf.mxu3 }
 0x118   : > { %v1338_v13 = vpop.f32.mrf.mxu0 }
 0x119   : > { %v1188_v30 = vpop.permute.xlu1 %1187  ;;  %v635_v41 = vpop.permute.xlu0 %634  ;;  %v1478_v49 = vadd.f32 %v1477_v53, %v1338_v13 }
 0x11a   : > { %v1252_v17 = vsel %vm687_vm3, %v1220_v31, %v1188_v30  ;;  %v701_v23 = vsel %vm687_vm3, %v668_v62, %v635_v41 }
 0x11b   : > { %2876 = vmatmul.msk.bf16.gmra.mxu0 %vm1296_vm4, %v1252_v17  ;;  %2904 = vmatmul.msk.bf16.gmra.mxu1 %vm1296_vm4, %v701_v23 }
 0x11d   : > { %v1951_v44 = vpop.permute.xlu2 %1950 }
 0x11f   : > { %v2168_v42 = vpop.f32.mrf.mxu2  ;;  %v4078_v6 = vpop.f32.mrf.mxu3 }
 0x120   : > { %v2248_v22 = vadd.f32 %v2168_v42, %v1478_v49  ;;  %v1340_v50 = vpop.f32.mrf.mxu0 }
 0x121   : > { %v653_v3 = vpop.permute.xlu1 %652  ;;  %v1941_v9 = vpop.permute.xlu0 %1940  ;;  %v1480_v54 = vadd.f32 %v1479_v7, %v1340_v50 }
 0x122   : > { %v719_v4 = vsel %vm687_vm3, %v686_v10, %v653_v3  ;;  %v2284_v8 = vadd.f32 %v4057_v0, %v2248_v22  ;;  %v2053_v16 = vsel %vm654_vm2, %v3612_v58, %v1941_v9 }
 0x123   : > { %2913 = vmatmul.msk.bf16.gmra.mxu3 %vm1296_vm4, %v719_v4  ;;  %v2085_v11 = vsel %vm687_vm3, %v2053_v16, %v2021_v51 }
 0x124   : > { %v2316_v60 = vmax.f32 %v2284_v8, 0.0  ;;  %3051 = vmatmul.msk.bf16.gmra.mxu2 %vm1296_vm4, %v2085_v11 }
 0x125   : > { %v558_v15 = vpop.permute.xlu2 %557 }
 0x126   : > { %v2381_v48 = vrot.slane %v2316_v60, 7 }
 0x127   : > { %v2170_v63 = vpop.f32.mrf.mxu2  ;;  %v4093_v3 = vpop.f32.mrf.mxu3 }
 0x128   : > { %v2477_v37 = vsel %vm2380_vm7, 0.0, %v2381_v48  ;;  %v2249_v52 = vadd.f32 %v2170_v63, %v1480_v54  ;;  %v672_v63 = vsel %vm654_vm2, %v3742_v27, %v558_v15 }
 0x129   : > { %v1110_v58 = vpop.permute.xlu1 %1109  ;;  %v2510_v55 = vpack.c.bf16 %v2477_v37, %v2477_v37  ;;  %v556_v21 = vpop.permute.xlu0 %555 }
 0x12a   : > { %v2285_v1 = vadd.f32 %v4057_v0, %v2249_v52  ;;  %v670_v32 = vsel %vm654_vm2, %v3650_v47, %v556_v21  ;;  %v1482_v45 = vpop.f32.mrf.mxu1  ;;  %v1222_v30 = vsel %vm654_vm2, %v3645_v59, %v1110_v58  ;;  %v2063_v59 = vsel %vm654_vm2, %v3710_v2, %v1951_v44 }
 0x12b   : > { %2563 = vst.msk [vmem:[%s4028_s16 + $0xc] sm:$0xf] %vm2558_vm5, %v2510_v55  ;;  %v703_v57 = vsel %vm687_vm3, %v670_v32, %v637_v39 }
 0x12c   : > { %v2317_v56 = vmax.f32 %v2285_v1, 0.0  ;;  %2905 = vmatmul.msk.bf16.gmra.mxu1 %vm1296_vm4, %v703_v57 }
 0x12d   : > { %v1192_v17 = vpop.permute.xlu2 %1191 }
 0x12e   : > { %v2382_v25 = vrot.slane %v2317_v56, 7 }
 0x12f   : > { %v2173_v51 = vpop.f32.mrf.mxu2 }
 0x130   : > { %v2383_v26 = vsel %vm2380_vm7, %v2381_v48, %v2382_v25  ;;  %v2493_v28 = vsel %vm2380_vm7, %v2382_v25, 0.0  ;;  %v1343_v47 = vpop.f32.mrf.mxu0 }
 0x131   : > { %v1943_v29 = vpop.permute.xlu1 %1942  ;;  %v2511_v31 = vpack.c.bf16 %v2383_v26, %v2383_v26  ;;  %v2512_v13 = vpack.c.bf16 %v2493_v28, %v2493_v28  ;;  %v1483_v43 = vadd.f32 %v1482_v45, %v1343_v47  ;;  %v1190_v62 = vpop.permute.xlu0 %1189 }
 0x132   : > { %v1254_v41 = vsel %vm687_vm3, %v1222_v30, %v1190_v62  ;;  %v1484_v49 = vpop.f32.mrf.mxu1  ;;  %v2055_v4 = vsel %vm654_vm2, %v3681_v24, %v1943_v29  ;;  %v4111_v45 = vpop.f32.mrf.mxu3 }
 0x133   : > { %2564 = vst.msk [vmem:[%s4028_s16 + $0x10] sm:$0xf] %vm2558_vm5, %v2511_v31  ;;  %v2250_v39 = vadd.f32 %v2173_v51, %v1483_v43  ;;  %2877 = vmatmul.msk.bf16.gmra.mxu0 %vm1296_vm4, %v1254_v41 }
 0x134   : > { %2565 = vst.msk [vmem:[%s4028_s16 + $0x14] sm:$0x1] %vm2561_vm6, %v2512_v13 }
 0x135   : > { %v2286_v23 = vadd.f32 %v4057_v0, %v2250_v39 }
 0x136   : > { %v2025_v60 = vpop.permute.xlu2 %2024 }
 0x137   : > { %v2318_v53 = vmax.f32 %v2286_v23, 0.0  ;;  %v2175_v42 = vpop.f32.mrf.mxu2 }
 0x138   : > { %v1345_v10 = vpop.f32.mrf.mxu0 }
 0x139   : > { %v2031_v22 = vpop.permute.xlu1 %2030  ;;  %v2384_v9 = vrot.slane %v2318_v53, 7  ;;  %v1485_v8 = vadd.f32 %v1484_v49, %v1345_v10  ;;  %v2023_v50 = vpop.permute.xlu0 %2022 }
 0x13a   : > { %v2095_v16 = vsel %vm687_vm3, %v2063_v59, %v2031_v22  ;;  %v2087_v11 = vsel %vm687_vm3, %v2055_v4, %v2023_v50 }
 0x13b   : > { %3056 = vmatmul.msk.bf16.vlgmr.msra.gmra.mxu3 %vm1296_vm4, %v2095_v16  ;;  %v2478_v2 = vsel %vm2380_vm7, 0.0, %v2384_v9  ;;  %v2251_v44 = vadd.f32 %v2175_v42, %v1485_v8  ;;  %3052 = vmatmul.msk.bf16.gmra.mxu2 %vm1296_vm4, %v2087_v11 }
 0x13c   : > { %v2513_v7 = vpack.c.bf16 %v2478_v2, %v2478_v2 }
 0x13d   : > { %v2287_v48 = vadd.f32 %v4057_v0, %v2251_v44 }
 0x13e   : > { %2566 = vst.msk [vmem:[%s4028_s16 + $0x18] sm:$0xf] %vm2558_vm5, %v2513_v7  ;;  %v1114_v56 = vpop.permute.xlu2 %1113 }
 0x13f   : > { %v2319_v24 = vmax.f32 %v2287_v48, 0.0  ;;  %v2178_v37 = vpop.f32.mrf.mxu2 }
 0x140   : > { %v1487_v54 = vpop.f32.mrf.mxu1 }
 0x141   : > { %v639_v52 = vpop.permute.xlu1 %638  ;;  %v2385_v58 = vrot.slane %v2319_v24, 7  ;;  %v1112_v55 = vpop.permute.xlu0 %1111 }
 0x142   : > { %v1348_v21 = vpop.f32.mrf.mxu0  ;;  %v705_v1 = vsel %vm687_vm3, %v672_v63, %v639_v52  ;;  %v1224_v32 = vsel %vm654_vm2, %v3731_v14, %v1112_v55 }
 0x143   : > { %v1488_v57 = vadd.f32 %v1487_v54, %v1348_v21  ;;  %2906 = vmatmul.msk.bf16.gmra.mxu1 %vm1296_vm4, %v705_v1  ;;  %v2386_v27 = vsel %vm2380_vm7, %v2384_v9, %v2385_v58  ;;  %v2494_v15 = vsel %vm2380_vm7, %v2385_v58, 0.0  ;;  %v1256_v25 = vsel %vm687_vm3, %v1224_v32, %v1192_v17  ;;  %v4124_v17 = vpop.f32.mrf.mxu3 }
 0x144   : > { %v2514_v51 = vpack.c.bf16 %v2386_v27, %v2386_v27  ;;  %v2515_v26 = vpack.c.bf16 %v2494_v15, %v2494_v15  ;;  %2878 = vmatmul.msk.bf16.gmra.mxu0 %vm1296_vm4, %v1256_v25 }
 0x145   : > { %v2252_v28 = vadd.f32 %v2178_v37, %v1488_v57 }
 0x146   : > { %2567 = vst.msk [vmem:[%s4028_s16 + $0x1c] sm:$0xf] %vm2558_vm5, %v2514_v51  ;;  %v1947_v42 = vpop.permute.xlu2 %1946 }
 0x147   : > { %v2288_v14 = vadd.f32 %v4057_v0, %v2252_v28  ;;  %2568 = vst.msk [vmem:[%s4028_s16 + $0x20] sm:$0x1] %vm2561_vm6, %v2515_v26  ;;  %v2180_v39 = vpop.f32.mrf.mxu2 }
 0x148   : > { %v1489_v47 = vpop.f32.mrf.mxu1 }
 0x149   : > { %v2320_v29 = vmax.f32 %v2288_v14, 0.0  ;;  %v1953_v31 = vpop.permute.xlu1 %1952  ;;  %v1945_v13 = vpop.permute.xlu0 %1944 }
 0x14a   : > { %v1350_v30 = vpop.f32.mrf.mxu0  ;;  %v2057_v62 = vsel %vm654_vm2, %v3774_v5, %v1945_v13  ;;  %v2065_v9 = vsel %vm654_vm2, %v3770_v35, %v1953_v31  ;;  %v1226_v35 = vsel %vm654_vm2, %v3828_v46, %v1114_v56 }
 0x14b   : > { %v2387_v43 = vrot.slane %v2320_v29, 7  ;;  %v1490_v41 = vadd.f32 %v1489_v47, %v1350_v30  ;;  %v2089_v23 = vsel %vm687_vm3, %v2057_v62, %v2025_v60  ;;  %v4138_v60 = vpop.f32.mrf.mxu3 }
 0x14c   : > { %3053 = vmatmul.msk.bf16.gmra.mxu2 %vm1296_vm4, %v2089_v23 }
 0x14d   : > { %v2479_v53 = vsel %vm2380_vm7, 0.0, %v2387_v43  ;;  %v2253_v49 = vadd.f32 %v2180_v39, %v1490_v41 }
 0x14e   : > { %v2516_v59 = vpack.c.bf16 %v2479_v53, %v2479_v53  ;;  %v2035_v7 = vpop.permute.xlu2 %2034 }
 0x14f   : > { %v2289_v10 = vadd.f32 %v4057_v0, %v2253_v49 }
 0x150   : > { %2569 = vst.msk [vmem:[%s4028_s16 + $0x24] sm:$0xf] %vm2558_vm5, %v2516_v59 }
 0x151   : > { %v2321_v22 = vmax.f32 %v2289_v10, 0.0  ;;  %v560_v5 = vpop.permute.xlu1 %559  ;;  %v2033_v4 = vpop.permute.xlu0 %2032 }
 0x152   : > { %v2097_v16 = vsel %vm687_vm3, %v2065_v9, %v2033_v4  ;;  %v674_v37 = vsel %vm654_vm2, %v3800_v61, %v560_v5  ;;  %v2059_v61 = vsel %vm654_vm2, %v3860_v40, %v1947_v42 }
 0x153   : > { %v2388_v8 = vrot.slane %v2321_v22, 7  ;;  %3057 = vmatmul.msk.bf16.gmra.mxu3 %vm1296_vm4, %v2097_v16  ;;  %v4153_v57 = vpop.f32.mrf.mxu3 }
 0x155   : > { %v2389_v50 = vsel %vm2380_vm7, %v2387_v43, %v2388_v8  ;;  %v2495_v11 = vsel %vm2380_vm7, %v2388_v8, 0.0 }
 0x156   : > { %v2517_v2 = vpack.c.bf16 %v2389_v50, %v2389_v50  ;;  %v2518_v44 = vpack.c.bf16 %v2495_v11, %v2495_v11  ;;  %v2183_v48 = vpop.f32.mrf.mxu2  ;;  %v643_v14 = vpop.permute.xlu2 %642 }
 0x158   : > { %2570 = vst.msk [vmem:[%s4028_s16 + $0x28] sm:$0xf] %vm2558_vm5, %v2517_v2  ;;  %v1353_v24 = vpop.f32.mrf.mxu0  ;;  %v1492_v54 = vpop.f32.mrf.mxu1 }
 0x159   : > { %2571 = vst.msk [vmem:[%s4028_s16 + $0x2c] sm:$0x1] %vm2561_vm6, %v2518_v44  ;;  %v1194_v63 = vpop.permute.xlu1 %1193  ;;  %v1493_v52 = vadd.f32 %v1492_v54, %v1353_v24  ;;  %v641_v58 = vpop.permute.xlu0 %640 }
 0x15a   : > { %v1258_v55 = vsel %vm687_vm3, %v1226_v35, %v1194_v63  ;;  %v707_v21 = vsel %vm687_vm3, %v674_v37, %v641_v58 }
 0x15b   : > { %2879 = vmatmul.msk.bf16.gmra.mxu0 %vm1296_vm4, %v1258_v55  ;;  %v2254_v1 = vadd.f32 %v2183_v48, %v1493_v52  ;;  %2907 = vmatmul.msk.bf16.gmra.mxu1 %vm1296_vm4, %v707_v21  ;;  %v4169_v53 = vpop.f32.mrf.mxu3 }
 0x15d   : > { %v2290_v32 = vadd.f32 %v4057_v0, %v2254_v1 }
 0x15e   : > { %v2185_v47 = vpop.f32.mrf.mxu2  ;;  %v1957_v10 = vpop.permute.xlu2 %1956 }
 0x15f   : > { %v2322_v46 = vmax.f32 %v2290_v32, 0.0  ;;  %v2069_v37 = vsel %vm654_vm2, %v3946_v38, %v1957_v10 }
 0x160   : > { %v1355_v56 = vpop.f32.mrf.mxu0  ;;  %v1494_v27 = vpop.f32.mrf.mxu1 }
 0x161   : > { %v2027_v15 = vpop.permute.xlu1 %2026  ;;  %v2390_v25 = vrot.slane %v2322_v46, 7  ;;  %v1495_v51 = vadd.f32 %v1494_v27, %v1355_v56  ;;  %v1955_v26 = vpop.permute.xlu0 %1954 }
 0x162   : > { %v2091_v28 = vsel %vm687_vm3, %v2059_v61, %v2027_v15  ;;  %v2067_v29 = vsel %vm654_vm2, %v3850_v12, %v1955_v26 }
 0x163   : > { %3054 = vmatmul.msk.bf16.gmra.mxu2 %vm1296_vm4, %v2091_v28  ;;  %v2480_v31 = vsel %vm2380_vm7, 0.0, %v2390_v25  ;;  %v2255_v13 = vadd.f32 %v2185_v47, %v1495_v51  ;;  %v2099_v40 = vsel %vm687_vm3, %v2067_v29, %v2035_v7 }
 0x164   : > { %v2519_v30 = vpack.c.bf16 %v2480_v31, %v2480_v31  ;;  %3058 = vmatmul.msk.bf16.gmra.mxu3 %vm1296_vm4, %v2099_v40 }
 0x165   : > { %v2291_v43 = vadd.f32 %v4057_v0, %v2255_v13 }
 0x166   : > { %2572 = vst.msk [vmem:[%s4028_s16 + $0x30] sm:$0xf] %vm2558_vm5, %v2519_v30  ;;  %v4182_v44 = vpop.f32.mrf.mxu3  ;;  %v564_v24 = vpop.permute.xlu2 %563 }
 0x167   : > { %v2323_v62 = vmax.f32 %v2291_v43, 0.0  ;;  %v2188_v9 = vpop.f32.mrf.mxu2  ;;  %v678_v26 = vsel %vm654_vm2, %v3980_v20, %v564_v24 }
 0x169   : > { %v1116_v41 = vpop.permute.xlu1 %1115  ;;  %v2391_v39 = vrot.slane %v2323_v62, 7  ;;  %v562_v12 = vpop.permute.xlu0 %561 }
 0x16a   : > { %v676_v23 = vsel %vm654_vm2, %v3892_v33, %v562_v12  ;;  %v1497_v4 = vpop.f32.mrf.mxu1  ;;  %v1228_v16 = vsel %vm654_vm2, %v3888_v18, %v1116_v41 }
 0x16b   : > { %v2392_v49 = vsel %vm2380_vm7, %v2390_v25, %v2391_v39  ;;  %v2496_v42 = vsel %vm2380_vm7, %v2391_v39, 0.0  ;;  %v709_v59 = vsel %vm687_vm3, %v676_v23, %v643_v14 }
 0x16c   : > { %v2520_v22 = vpack.c.bf16 %v2392_v49, %v2392_v49  ;;  %v2521_v5 = vpack.c.bf16 %v2496_v42, %v2496_v42  ;;  %2908 = vmatmul.msk.bf16.gmra.mxu1 %vm1296_vm4, %v709_v59 }
 0x16e   : > { %2573 = vst.msk [vmem:[%s4028_s16 + $0x34] sm:$0xf] %vm2558_vm5, %v2520_v22  ;;  %v4195_v27 = vpop.f32.mrf.mxu3  ;;  %v1198_v51 = vpop.permute.xlu2 %1197 }
 0x16f   : > { %2574 = vst.msk [vmem:[%s4028_s16 + $0x38] sm:$0x1] %vm2561_vm6, %v2521_v5  ;;  %v2190_v35 = vpop.f32.mrf.mxu2 }
 0x170   : > { %v1358_v33 = vpop.f32.mrf.mxu0 }
 0x171   : > { %v1949_v8 = vpop.permute.xlu1 %1948  ;;  %v1498_v50 = vadd.f32 %v1497_v4, %v1358_v33  ;;  %v1196_v11 = vpop.permute.xlu0 %1195 }
 0x172   : > { %v1260_v2 = vsel %vm687_vm3, %v1228_v16, %v1196_v11  ;;  %v1499_v63 = vpop.f32.mrf.mxu1  ;;  %v2061_v55 = vsel %vm654_vm2, %v3918_v34, %v1949_v8 }
 0x173   : > { %v2256_v7 = vadd.f32 %v2188_v9, %v1498_v50  ;;  %2880 = vmatmul.msk.bf16.gmra.mxu0 %vm1296_vm4, %v1260_v2 }
 0x175   : > { %v2292_v48 = vadd.f32 %v4057_v0, %v2256_v7 }
 0x177   : > { %v2324_v54 = vmax.f32 %v2292_v48, 0.0 }
 0x178   : > { %v1360_v18 = vpop.f32.mrf.mxu0 }
 0x179   : > { %v2037_v52 = vpop.permute.xlu1 %2036  ;;  %v2393_v58 = vrot.slane %v2324_v54, 7  ;;  %v1500_v21 = vadd.f32 %v1499_v63, %v1360_v18  ;;  %v2029_v1 = vpop.permute.xlu0 %2028 }
 0x17a   : > { %v2101_v32 = vsel %vm687_vm3, %v2069_v37, %v2037_v52  ;;  %v2093_v46 = vsel %vm687_vm3, %v2061_v55, %v2029_v1 }
 0x17b   : > { %3059 = vmatmul.msk.bf16.gmra.mxu3 %vm1296_vm4, %v2101_v32  ;;  %v2481_v56 = vsel %vm2380_vm7, 0.0, %v2393_v58  ;;  %v2257_v61 = vadd.f32 %v2190_v35, %v1500_v21  ;;  %3055 = vmatmul.msk.bf16.gmra.mxu2 %vm1296_vm4, %v2093_v46 }
 0x17c   : > { %v2522_v38 = vpack.c.bf16 %v2481_v56, %v2481_v56 }
 0x17d   : > { %v2293_v15 = vadd.f32 %v4057_v0, %v2257_v61 }
 0x17e   : > { %2575 = vst.msk [vmem:[%s4028_s16 + $0x3c] sm:$0xf] %vm2558_vm5, %v2522_v38  ;;  %v2193_v28 = vpop.f32.mrf.mxu2  ;;  %v4210_v23 = vpop.f32.mrf.mxu3 }
 0x17f   : > { %v2325_v34 = vmax.f32 %v2293_v15, 0.0 }
 0x180   : > { %v1502_v25 = vpop.f32.mrf.mxu1 }
 0x181   : > { %v645_v14 = vpop.permute.xlu1 %644  ;;  %v2394_v47 = vrot.slane %v2325_v34, 7  ;;  %v1118_v29 = vpop.permute.xlu0 %1117 }
 0x182   : > { %v1363_v31 = vpop.f32.mrf.mxu0  ;;  %v711_v13 = vsel %vm687_vm3, %v678_v26, %v645_v14  ;;  %v1230_v40 = vsel %vm654_vm2, %v3971_v36, %v1118_v29 }
 0x183   : > { %v1503_v30 = vadd.f32 %v1502_v25, %v1363_v31  ;;  %2909 = vmatmul.msk.bf16.gmra.mxu1 %vm1296_vm4, %v711_v13  ;;  %v2395_v43 = vsel %vm2380_vm7, %v2393_v58, %v2394_v47  ;;  %v2497_v62 = vsel %vm2380_vm7, %v2394_v47, 0.0  ;;  %v1262_v20 = vsel %vm687_vm3, %v1230_v40, %v1198_v51 }
 0x184   : > { %v2523_v41 = vpack.c.bf16 %v2395_v43, %v2395_v43  ;;  %v2524_v39 = vpack.c.bf16 %v2497_v62, %v2497_v62  ;;  %2881 = vmatmul.msk.bf16.gmra.mxu0 %vm1296_vm4, %v1262_v20 }
 0x185   : > { %v2258_v12 = vadd.f32 %v2193_v28, %v1503_v30 }
 0x186   : > { %2576 = vst.msk [vmem:[%s4028_s16 + $0x40] sm:$0xf] %vm2558_vm5, %v2523_v41  ;;  %v2195_v5 = vpop.f32.mrf.mxu2  ;;  %v4221_v16 = vpop.f32.mrf.mxu3 }
 0x187   : > { %v2294_v36 = vadd.f32 %v4057_v0, %v2258_v12  ;;  %2577 = vst.msk [vmem:[%s4028_s16 + $0x44] sm:$0x1] %vm2561_vm6, %v2524_v39 }
 0x188   : > { %v1504_v49 = vpop.f32.mrf.mxu1 }
 0x189   : > { %v2326_v42 = vmax.f32 %v2294_v36, 0.0 }
 0x18a   : > { %v1365_v59 = vpop.f32.mrf.mxu0 }
 0x18b   : > { %v2396_v10 = vrot.slane %v2326_v42, 7  ;;  %v1505_v22 = vadd.f32 %v1504_v49, %v1365_v59 }
 0x18d   : > { %v2482_v9 = vsel %vm2380_vm7, 0.0, %v2396_v10  ;;  %v2259_v4 = vadd.f32 %v2195_v5, %v1505_v22  ;;  %v1538_v5 = vadd.f32 %v4182_v44, %v4068_v19  ;;  %v1540_v19 = vadd.f32 %v4195_v27, %v4078_v6 }
 0x18e   : > { %v2525_v33 = vpack.c.bf16 %v2482_v9, %v2482_v9 }
 0x18f   : > { %v2295_v8 = vadd.f32 %v4057_v0, %v2259_v4  ;;  %v4229_v37 = vpop.f32.mrf.mxu3 }
 0x190   : > { %2578 = vst.msk [vmem:[%s4028_s16 + $0x48] sm:$0xf] %vm2558_vm5, %v2525_v33 }
 0x191   : > { %v2327_v50 = vmax.f32 %v2295_v8, 0.0 }
 0x193   : > { %v2397_v11 = vrot.slane %v2327_v50, 7 }
 0x195   : > { %v2398_v2 = vsel %vm2380_vm7, %v2396_v10, %v2397_v11  ;;  %v2498_v7 = vsel %vm2380_vm7, %v2397_v11, 0.0 }
 0x196   : > { %v2526_v48 = vpack.c.bf16 %v2398_v2, %v2398_v2  ;;  %v2527_v24 = vpack.c.bf16 %v2498_v7, %v2498_v7  ;;  %v2198_v54 = vpop.f32.mrf.mxu2 }
 0x197   : > { %v4232_v61 = vpop.f32.mrf.mxu3 }
 0x198   : > { %2579 = vst.msk [vmem:[%s4028_s16 + $0x4c] sm:$0xf] %vm2558_vm5, %v2526_v48  ;;  %v1368_v35 = vpop.f32.mrf.mxu0  ;;  %v1507_v63 = vpop.f32.mrf.mxu1 }
 0x199   : > { %2580 = vst.msk [vmem:[%s4028_s16 + $0x50] sm:$0x1] %vm2561_vm6, %v2527_v24  ;;  %v1508_v18 = vadd.f32 %v1507_v63, %v1368_v35 }
 0x19b   : > { %v2260_v52 = vadd.f32 %v2198_v54, %v1508_v18 }
 0x19d   : > { %v2296_v58 = vadd.f32 %v4057_v0, %v2260_v52 }
 0x19e   : > { %v2200_v56 = vpop.f32.mrf.mxu2 }
 0x19f   : > { %v2328_v55 = vmax.f32 %v2296_v58, 0.0 }
 0x1a0   : > { %v1370_v21 = vpop.f32.mrf.mxu0  ;;  %v1509_v1 = vpop.f32.mrf.mxu1 }
 0x1a1   : > { %v2399_v32 = vrot.slane %v2328_v55, 7  ;;  %v1510_v46 = vadd.f32 %v1509_v1, %v1370_v21 }
 0x1a3   : > { %v2483_v38 = vsel %vm2380_vm7, 0.0, %v2399_v32  ;;  %v2261_v15 = vadd.f32 %v2200_v56, %v1510_v46 }
 0x1a4   : > { %v2528_v34 = vpack.c.bf16 %v2483_v38, %v2483_v38 }
 0x1a5   : > { %v2297_v25 = vadd.f32 %v4057_v0, %v2261_v15 }
 0x1a6   : > { %2581 = vst.msk [vmem:[%s4028_s16 + $0x54] sm:$0xf] %vm2558_vm5, %v2528_v34  ;;  %v4240_v47 = vpop.f32.mrf.mxu3 }
 0x1a7   : > { %v2329_v51 = vmax.f32 %v2297_v25, 0.0  ;;  %v2203_v40 = vpop.f32.mrf.mxu2 }
 0x1a9   : > { %v2400_v26 = vrot.slane %v2329_v51, 7  ;;  %v1512_v13 = vpop.f32.mrf.mxu1 }
 0x1ab   : > { %v2401_v28 = vsel %vm2380_vm7, %v2399_v32, %v2400_v26  ;;  %v2499_v14 = vsel %vm2380_vm7, %v2400_v26, 0.0 }
 0x1ac   : > { %v2529_v29 = vpack.c.bf16 %v2401_v28, %v2401_v28  ;;  %v2530_v31 = vpack.c.bf16 %v2499_v14, %v2499_v14 }
 0x1ae   : > { %2582 = vst.msk [vmem:[%s4028_s16 + $0x58] sm:$0xf] %vm2558_vm5, %v2529_v29  ;;  %v4246_v20 = vpop.f32.mrf.mxu3 }
 0x1af   : > { %2583 = vst.msk [vmem:[%s4028_s16 + $0x5c] sm:$0x1] %vm2561_vm6, %v2530_v31  ;;  %v2205_v49 = vpop.f32.mrf.mxu2 }
 0x1b0   : > { %v1373_v30 = vpop.f32.mrf.mxu0 }
 0x1b1   : > { %v1513_v43 = vadd.f32 %v1512_v13, %v1373_v30  ;;  %v1514_v12 = vpop.f32.mrf.mxu1 }
 0x1b3   : > { %v2262_v62 = vadd.f32 %v2203_v40, %v1513_v43 }
 0x1b5   : > { %v2298_v41 = vadd.f32 %v4057_v0, %v2262_v62 }
 0x1b7   : > { %v2330_v39 = vmax.f32 %v2298_v41, 0.0 }
 0x1b8   : > { %v1375_v36 = vpop.f32.mrf.mxu0 }
 0x1b9   : > { %v2402_v42 = vrot.slane %v2330_v39, 7  ;;  %v1515_v59 = vadd.f32 %v1514_v12, %v1375_v36 }
 0x1bb   : > { %v2484_v10 = vsel %vm2380_vm7, 0.0, %v2402_v42  ;;  %v2263_v22 = vadd.f32 %v2205_v49, %v1515_v59  ;;  %v1543_v49 = vadd.f32 %v4210_v23, %v4093_v3  ;;  %v1545_v3 = vadd.f32 %v4221_v16, %v4111_v45 }
 0x1bc   : > { %v2531_v9 = vpack.c.bf16 %v2484_v10, %v2484_v10 }
 0x1bd   : > { %v2299_v4 = vadd.f32 %v4057_v0, %v2263_v22 }
 0x1be   : > { %v2228_v33 = vpop.f32.mrf.mxu3  ;;  %2584 = vst.msk [vmem:[%s4028_s16 + $0x60] sm:$0xf] %vm2558_vm5, %v2531_v9  ;;  %v2208_v48 = vpop.f32.mrf.mxu2 }
 0x1bf   : > { %v2272_v8 = vadd.f32 %v2228_v33, %v1538_v5  ;;  %v2331_v50 = vmax.f32 %v2299_v4, 0.0 }
 0x1c0   : > { %v1517_v11 = vpop.f32.mrf.mxu1 }
 0x1c1   : > { %v2308_v2 = vadd.f32 %v4057_v0, %v2272_v8  ;;  %v2403_v7 = vrot.slane %v2331_v50, 7  ;;  %v1378_v24 = vpop.f32.mrf.mxu0 }
 0x1c2   : > { %v1518_v54 = vadd.f32 %v1517_v11, %v1378_v24 }
 0x1c3   : > { %v2340_v35 = vmax.f32 %v2308_v2, 0.0  ;;  %v2404_v44 = vsel %vm2380_vm7, %v2402_v42, %v2403_v7  ;;  %v2500_v63 = vsel %vm2380_vm7, %v2403_v7, 0.0 }
 0x1c4   : > { %v2532_v18 = vpack.c.bf16 %v2404_v44, %v2404_v44  ;;  %v2533_v52 = vpack.c.bf16 %v2500_v63, %v2500_v63  ;;  %v2264_v55 = vadd.f32 %v2208_v48, %v1518_v54 }
 0x1c5   : > { %v2417_v58 = vrot.slane %v2340_v35, 7 }
 0x1c6   : > { %v2230_v21 = vpop.f32.mrf.mxu3  ;;  %2585 = vst.msk [vmem:[%s4028_s16 + $0x64] sm:$0xf] %vm2558_vm5, %v2532_v18  ;;  %v2300_v32 = vadd.f32 %v4057_v0, %v2264_v55  ;;  %v2210_v26 = vpop.f32.mrf.mxu2 }
 0x1c7   : > { %v2489_v1 = vsel %vm2380_vm7, 0.0, %v2417_v58  ;;  %v2273_v46 = vadd.f32 %v2230_v21, %v1540_v19  ;;  %2586 = vst.msk [vmem:[%s4028_s16 + $0x68] sm:$0x1] %vm2561_vm6, %v2533_v52 }
 0x1c8   : > { %v2546_v6 = vpack.c.bf16 %v2489_v1, %v2489_v1  ;;  %v1519_v27 = vpop.f32.mrf.mxu1  ;;  %v2332_v56 = vmax.f32 %v2300_v32, 0.0 }
 0x1c9   : > { %v2309_v38 = vadd.f32 %v4057_v0, %v2273_v46  ;;  %v1380_v15 = vpop.f32.mrf.mxu0  ;;  %v1548_v46 = vadd.f32 %v4229_v37, %v4124_v17 }
 0x1ca   : > { %2599 = vst.msk [vmem:[%s4028_s16 + $0x9c] sm:$0xf] %vm2558_vm5, %v2546_v6  ;;  %v2405_v34 = vrot.slane %v2332_v56, 7  ;;  %v1520_v51 = vadd.f32 %v1519_v27, %v1380_v15 }
 0x1cb   : > { %v2341_v25 = vmax.f32 %v2309_v38, 0.0 }
 0x1cc   : > { %v2485_v28 = vsel %vm2380_vm7, 0.0, %v2405_v34  ;;  %v2265_v29 = vadd.f32 %v2210_v26, %v1520_v51 }
 0x1cd   : > { %v2418_v14 = vrot.slane %v2341_v25, 7  ;;  %v2534_v31 = vpack.c.bf16 %v2485_v28, %v2485_v28 }
 0x1ce   : > { %v2301_v30 = vadd.f32 %v4057_v0, %v2265_v29 }
 0x1cf   : > { %v2419_v13 = vsel %vm2380_vm7, %v2417_v58, %v2418_v14  ;;  %v2505_v40 = vsel %vm2380_vm7, %v2418_v14, 0.0  ;;  %2587 = vst.msk [vmem:[%s4028_s16 + $0x6c] sm:$0xf] %vm2558_vm5, %v2534_v31  ;;  %v2213_v9 = vpop.f32.mrf.mxu2 }
 0x1d0   : > { %v2547_v43 = vpack.c.bf16 %v2419_v13, %v2419_v13  ;;  %v2548_v62 = vpack.c.bf16 %v2505_v40, %v2505_v40  ;;  %v2333_v41 = vmax.f32 %v2301_v30, 0.0  ;;  %v1550_v13 = vadd.f32 %v4232_v61, %v4138_v60 }
 0x1d2   : > { %2600 = vst.msk [vmem:[%s4028_s16 + $0xa0] sm:$0xf] %vm2558_vm5, %v2547_v43  ;;  %v2406_v39 = vrot.slane %v2333_v41, 7 }
 0x1d3   : > { %2601 = vst.msk [vmem:[%s4028_s16 + $0xa4] sm:$0x1] %vm2561_vm6, %v2548_v62 }
 0x1d4   : > { %v2407_v12 = vsel %vm2380_vm7, %v2405_v34, %v2406_v39  ;;  %v2501_v36 = vsel %vm2380_vm7, %v2406_v39, 0.0 }
 0x1d5   : > { %v2535_v42 = vpack.c.bf16 %v2407_v12, %v2407_v12  ;;  %v2536_v59 = vpack.c.bf16 %v2501_v36, %v2501_v36 }
 0x1d6   : > { %v2233_v10 = vpop.f32.mrf.mxu3 }
 0x1d7   : > { %2588 = vst.msk [vmem:[%s4028_s16 + $0x70] sm:$0xf] %vm2558_vm5, %v2535_v42  ;;  %v2274_v22 = vadd.f32 %v2233_v10, %v1543_v49  ;;  %v2215_v58 = vpop.f32.mrf.mxu2 }
 0x1d8   : > { %v1383_v5 = vpop.f32.mrf.mxu0  ;;  %2589 = vst.msk [vmem:[%s4028_s16 + $0x74] sm:$0x1] %vm2561_vm6, %v2536_v59  ;;  %v1522_v4 = vpop.f32.mrf.mxu1 }
 0x1d9   : > { %v2310_v33 = vadd.f32 %v4057_v0, %v2274_v22  ;;  %v1523_v8 = vadd.f32 %v1522_v4, %v1383_v5 }
 0x1db   : > { %v2342_v50 = vmax.f32 %v2310_v33, 0.0  ;;  %v2266_v11 = vadd.f32 %v2213_v9, %v1523_v8 }
 0x1dd   : > { %v2420_v23 = vrot.slane %v2342_v50, 7  ;;  %v2302_v2 = vadd.f32 %v4057_v0, %v2266_v11 }
 0x1de   : > { %v2235_v7 = vpop.f32.mrf.mxu3 }
 0x1df   : > { %v2490_v48 = vsel %vm2380_vm7, 0.0, %v2420_v23  ;;  %v2334_v24 = vmax.f32 %v2302_v2, 0.0  ;;  %v2275_v35 = vadd.f32 %v2235_v7, %v1545_v3  ;;  %v1553_v7 = vadd.f32 %v4240_v47, %v4153_v57 }
 0x1e0   : > { %v1385_v54 = vpop.f32.mrf.mxu0  ;;  %v2549_v19 = vpack.c.bf16 %v2490_v48, %v2490_v48  ;;  %v1524_v44 = vpop.f32.mrf.mxu1  ;;  %v1555_v47 = vadd.f32 %v4246_v20, %v4169_v53 }
 0x1e1   : > { %v2408_v63 = vrot.slane %v2334_v24, 7  ;;  %v2311_v18 = vadd.f32 %v4057_v0, %v2275_v35  ;;  %v1525_v52 = vadd.f32 %v1524_v44, %v1385_v54 }
 0x1e2   : > { %2602 = vst.msk [vmem:[%s4028_s16 + $0xa8] sm:$0xf] %vm2558_vm5, %v2549_v19 }
 0x1e3   : > { %v2486_v45 = vsel %vm2380_vm7, 0.0, %v2408_v63  ;;  %v2343_v16 = vmax.f32 %v2311_v18, 0.0  ;;  %v2267_v55 = vadd.f32 %v2215_v58, %v1525_v52 }
 0x1e4   : > { %v2537_v21 = vpack.c.bf16 %v2486_v45, %v2486_v45 }
 0x1e5   : > { %v2421_v1 = vrot.slane %v2343_v16, 7  ;;  %v2303_v32 = vadd.f32 %v4057_v0, %v2267_v55 }
 0x1e6   : > { %2590 = vst.msk [vmem:[%s4028_s16 + $0x78] sm:$0xf] %vm2558_vm5, %v2537_v21  ;;  %v2218_v30 = vpop.f32.mrf.mxu2 }
 0x1e7   : > { %v2422_v6 = vsel %vm2380_vm7, %v2420_v23, %v2421_v1  ;;  %v2506_v27 = vsel %vm2380_vm7, %v2421_v1, 0.0  ;;  %v2335_v56 = vmax.f32 %v2303_v32, 0.0  ;;  %v2238_v38 = vpop.f32.mrf.mxu3 }
 0x1e8   : > { %v2550_v15 = vpack.c.bf16 %v2422_v6, %v2422_v6  ;;  %v2551_v34 = vpack.c.bf16 %v2506_v27, %v2506_v27  ;;  %v2276_v25 = vadd.f32 %v2238_v38, %v1548_v46 }
 0x1e9   : > { %v2409_v51 = vrot.slane %v2335_v56, 7  ;;  %v1527_v31 = vpop.f32.mrf.mxu1 }
 0x1ea   : > { %2603 = vst.msk [vmem:[%s4028_s16 + $0xac] sm:$0xf] %vm2558_vm5, %v2550_v15  ;;  %v2312_v26 = vadd.f32 %v4057_v0, %v2276_v25 }
 0x1eb   : > { %2604 = vst.msk [vmem:[%s4028_s16 + $0xb0] sm:$0x1] %vm2561_vm6, %v2551_v34  ;;  %v2410_v17 = vsel %vm2380_vm7, %v2408_v63, %v2409_v51  ;;  %v2502_v37 = vsel %vm2380_vm7, %v2409_v51, 0.0 }
 0x1ec   : > { %v2538_v28 = vpack.c.bf16 %v2410_v17, %v2410_v17  ;;  %v2539_v14 = vpack.c.bf16 %v2502_v37, %v2502_v37  ;;  %v2344_v29 = vmax.f32 %v2312_v26, 0.0 }
 0x1ee   : > { %2591 = vst.msk [vmem:[%s4028_s16 + $0x7c] sm:$0xf] %vm2558_vm5, %v2538_v28  ;;  %v2423_v40 = vrot.slane %v2344_v29, 7  ;;  %v2220_v33 = vpop.f32.mrf.mxu2 }
 0x1ef   : > { %2592 = vst.msk [vmem:[%s4028_s16 + $0x80] sm:$0x1] %vm2561_vm6, %v2539_v14  ;;  %v2240_v43 = vpop.f32.mrf.mxu3 }
 0x1f0   : > { %v2491_v62 = vsel %vm2380_vm7, 0.0, %v2423_v40  ;;  %v2277_v41 = vadd.f32 %v2240_v43, %v1550_v13  ;;  %v1388_v39 = vpop.f32.mrf.mxu0 }
 0x1f1   : > { %v2552_v12 = vpack.c.bf16 %v2491_v62, %v2491_v62  ;;  %v1528_v36 = vadd.f32 %v1527_v31, %v1388_v39  ;;  %v1529_v22 = vpop.f32.mrf.mxu1 }
 0x1f2   : > { %v2313_v49 = vadd.f32 %v4057_v0, %v2277_v41 }
 0x1f3   : > { %2605 = vst.msk [vmem:[%s4028_s16 + $0xb4] sm:$0xf] %vm2558_vm5, %v2552_v12  ;;  %v2268_v42 = vadd.f32 %v2218_v30, %v1528_v36 }
 0x1f4   : > { %v2345_v60 = vmax.f32 %v2313_v49, 0.0 }
 0x1f5   : > { %v2304_v61 = vadd.f32 %v4057_v0, %v2268_v42 }
 0x1f6   : > { %v2424_v59 = vrot.slane %v2345_v60, 7 }
 0x1f7   : > { %v2336_v10 = vmax.f32 %v2304_v61, 0.0 }
 0x1f8   : > { %v2425_v5 = vsel %vm2380_vm7, %v2423_v40, %v2424_v59  ;;  %v2507_v9 = vsel %vm2380_vm7, %v2424_v59, 0.0  ;;  %v1390_v4 = vpop.f32.mrf.mxu0 }
 0x1f9   : > { %v2553_v8 = vpack.c.bf16 %v2425_v5, %v2425_v5  ;;  %v2554_v50 = vpack.c.bf16 %v2507_v9, %v2507_v9  ;;  %v2411_v11 = vrot.slane %v2336_v10, 7  ;;  %v1530_v3 = vadd.f32 %v1529_v22, %v1390_v4 }
 0x1fb   : > { %2606 = vst.msk [vmem:[%s4028_s16 + $0xb8] sm:$0xf] %vm2558_vm5, %v2553_v8  ;;  %v2487_v23 = vsel %vm2380_vm7, 0.0, %v2411_v11  ;;  %v2269_v2 = vadd.f32 %v2220_v33, %v1530_v3 }
 0x1fc   : > { %2607 = vst.msk [vmem:[%s4028_s16 + $0xbc] sm:$0x1] %vm2561_vm6, %v2554_v50  ;;  %v2540_v48 = vpack.c.bf16 %v2487_v23, %v2487_v23 }
 0x1fd   : > { %v2305_v24 = vadd.f32 %v4057_v0, %v2269_v2 }
 0x1fe   : > { %v2243_v35 = vpop.f32.mrf.mxu3  ;;  %2593 = vst.msk [vmem:[%s4028_s16 + $0x84] sm:$0xf] %vm2558_vm5, %v2540_v48  ;;  %v2223_v52 = vpop.f32.mrf.mxu2 }
 0x1ff   : > { %v2278_v54 = vadd.f32 %v2243_v35, %v1553_v7  ;;  %v2337_v19 = vmax.f32 %v2305_v24, 0.0 }
 0x200   : > { %v1532_v44 = vpop.f32.mrf.mxu1 }
 0x201   : > { %v2314_v63 = vadd.f32 %v4057_v0, %v2278_v54  ;;  %v2412_v18 = vrot.slane %v2337_v19, 7  ;;  %v1393_v58 = vpop.f32.mrf.mxu0 }
 0x202   : > { %v1533_v57 = vadd.f32 %v1532_v44, %v1393_v58 }
 0x203   : > { %v2346_v45 = vmax.f32 %v2314_v63, 0.0  ;;  %v2413_v16 = vsel %vm2380_vm7, %v2411_v11, %v2412_v18  ;;  %v2503_v55 = vsel %vm2380_vm7, %v2412_v18, 0.0 }
 0x204   : > { %v2541_v21 = vpack.c.bf16 %v2413_v16, %v2413_v16  ;;  %v2542_v1 = vpack.c.bf16 %v2503_v55, %v2503_v55  ;;  %v2270_v46 = vadd.f32 %v2223_v52, %v1533_v57 }
 0x205   : > { %v2426_v32 = vrot.slane %v2346_v45, 7 }
 0x206   : > { %v2245_v6 = vpop.f32.mrf.mxu3  ;;  %2594 = vst.msk [vmem:[%s4028_s16 + $0x88] sm:$0xf] %vm2558_vm5, %v2541_v21  ;;  %v2306_v56 = vadd.f32 %v4057_v0, %v2270_v46  ;;  %v2225_v37 = vpop.f32.mrf.mxu2 }
 0x207   : > { %v2492_v27 = vsel %vm2380_vm7, 0.0, %v2426_v32  ;;  %v2279_v38 = vadd.f32 %v2245_v6, %v1555_v47  ;;  %2595 = vst.msk [vmem:[%s4028_s16 + $0x8c] sm:$0x1] %vm2561_vm6, %v2542_v1 }
 0x208   : > { %v2555_v53 = vpack.c.bf16 %v2492_v27, %v2492_v27  ;;  %v1534_v20 = vpop.f32.mrf.mxu1  ;;  %v2338_v15 = vmax.f32 %v2306_v56, 0.0 }
 0x209   : > { %v2315_v34 = vadd.f32 %v4057_v0, %v2279_v38  ;;  %v1395_v25 = vpop.f32.mrf.mxu0 }
 0x20a   : > { %2608 = vst.msk [vmem:[%s4028_s16 + $0xc0] sm:$0xf] %vm2558_vm5, %v2555_v53  ;;  %v2414_v51 = vrot.slane %v2338_v15, 7  ;;  %v1535_v17 = vadd.f32 %v1534_v20, %v1395_v25 }
 0x20b   : > { %v2347_v26 = vmax.f32 %v2315_v34, 0.0 }
 0x20c   : > { %v2488_v28 = vsel %vm2380_vm7, 0.0, %v2414_v51  ;;  %v2271_v29 = vadd.f32 %v2225_v37, %v1535_v17 }
 0x20d   : > { %v2427_v14 = vrot.slane %v2347_v26, 7  ;;  %v2543_v31 = vpack.c.bf16 %v2488_v28, %v2488_v28 }
 0x20e   : > { %v2307_v30 = vadd.f32 %v4057_v0, %v2271_v29 }
 0x20f   : > { %v2428_v13 = vsel %vm2380_vm7, %v2426_v32, %v2427_v14  ;;  %v2508_v40 = vsel %vm2380_vm7, %v2427_v14, 0.0  ;;  %2596 = vst.msk [vmem:[%s4028_s16 + $0x90] sm:$0xf] %vm2558_vm5, %v2543_v31 }
 0x210   : > { %v2556_v43 = vpack.c.bf16 %v2428_v13, %v2428_v13  ;;  %v2557_v62 = vpack.c.bf16 %v2508_v40, %v2508_v40  ;;  %v2339_v41 = vmax.f32 %v2307_v30, 0.0 }
 0x212   : > { %2609 = vst.msk [vmem:[%s4028_s16 + $0xc4] sm:$0xf] %vm2558_vm5, %v2556_v43  ;;  %v2415_v39 = vrot.slane %v2339_v41, 7 }
 0x213   : > { %2610 = vst.msk [vmem:[%s4028_s16 + $0xc8] sm:$0x1] %vm2561_vm6, %v2557_v62 }
 0x214   : > { %v2416_v12 = vsel %vm2380_vm7, %v2414_v51, %v2415_v39  ;;  %v2504_v36 = vsel %vm2380_vm7, %v2415_v39, 0.0 }
 0x215   : > { %v2544_v49 = vpack.c.bf16 %v2416_v12, %v2416_v12  ;;  %v2545_v42 = vpack.c.bf16 %v2504_v36, %v2504_v36 }
 0x217   : > { %2597 = vst.msk [vmem:[%s4028_s16 + $0x94] sm:$0xf] %vm2558_vm5, %v2544_v49 }
 0x218   : > { %2598 = vst.msk [vmem:[%s4028_s16 + $0x98] sm:$0x1] %vm2561_vm6, %v2545_v42 }
 0x219 PF: > { %s13_s12 = sadd.s32 1, %s3157_s12  }
 0x21a   : > { %p10_p4 = scmp.ge.s32.totalorder %s13_s12, 4  }
 0x21c   :  { %12 = sbr.rel (!%p10_p4) target bundleno = 1 (0x1), region = 66 }

// kernel: _lambda_.11
= control target key start
LH: loop header
LB: loop body
LE: loop exit
PB: predicated region body
PF: predicated region fallthrough
CT: control target
= control target key end

     0   :  { %s1271_s12 = smov 0   ;;  %s1597_s0 = inlined_call_operand.vmem [shape: bf16[2,5,2,18,32], index: 0, kind: input, shape index: {}]   ;;  %s1598_s1 = inlined_call_operand.vmem [shape: bf16[3,96,64], index: 1, kind: input, shape index: {}]   ;;  %s1599_s2 = inlined_call_operand.vmem [shape: f32[1,64], index: 2, kind: input, shape index: {}]   ;;  %s1600_s3 = inlined_call_operand.vmem [shape: bf16[2,6,18,64], index: 3, kind: output, shape index: {}]  }
   0x1 LB: > { %s1001_s13 = sadd.s32 4294967295, %s1246_s12   ;;  %p1005_p0 = scmp.ge.s32.totalorder %s1246_s12, 1  ;;  %s1246_s12 = sphi %s1271_s12, %s13_s12  }
   0x2   : > { %p137_p1 = scmp.lt.s32.totalorder %s1246_s12, 3 }
   0x4   : > { %p138_p2 = pnand %p1005_p0, %p137_p1 }
   0x5   : > { %p161_p3 = scmp.lt.s32.totalorder (!%p138_p2), %s1001_s13, 1  ;;  %s1248_s18 = smov (!%p138_p2), 32  }
   0x6   : > { %141 = sbr.rel (%p138_p2) target bundleno = 350 (0x15e), region = 32  ;;  %s1249_s19 = smov (!%p138_p2), 64  }
   0xb   : > { %s1602_s13 = smov (!%p161_p3, %s1001_s13), 1  ;;  %vm216_vm0 = vsmask.f32 7424  ;;  %vm273_vm1 = vcmask 1046528   ;;  %vm294_vm2 = vcmask 261120   ;;  %vm303_vm3 = vcmask 523264  }
   0xc   : > { %s1226_s14 = smul.u32 120, %s1602_s13  ;;  %vm510_vm4 = vcmask 785408   ;;  %vm926_vm5 = vcmask 519168   ;;  %vm929_vm6 = vcmask 516096   ;;  %vm880_vm7 = vcmask 1040384  }
   0xd   : > { %s1227_s4 = smul.u32 72, %s1602_s13 }
   0xe   : > { %s1285_s17 = scalar_lea.vmem %s1597_s0, %s1226_s14 }
   0xf   : > { %v1288_v0 = vld [vmem:[%s1285_s17 + $0x18] sm:$0xff]  ;;  %v1122_v1 = vld [vmem:[%s1285_s17 + $0x20] sm:$0x1]  ;;  %v174_v4 = vld [vmem:[%s1285_s17 + $0x8] sm:$0x1]  ;;  %s1525_s7 = scalar_lea.vmem %s1600_s3, %s1227_s4 }
  0x10   : > { %v1292_v2 = vld [vmem:[%s1285_s17] sm:$0xff]  ;;  %v658_v3 = vunpack.c.l.b16 %v1122_v1  ;;  %v1029_v6 = vld [vmem:[%s1285_s17 + $0x2c] sm:$0x1]  ;;  %v667_v7 = vshrl.u32 %v1288_v0, 16  ;;  %v669_v8 = vshll.u32 %v1288_v0, 16  ;;  %v208_v9 = vunpack.c.l.b16 %v174_v4  ;;  %v1306_v26 = vld [vmem:[%s1285_s17 + $0x30] sm:$0xff] }
  0x11   : > { %v1296_v5 = vld [vmem:[%s1285_s17 + $0x24] sm:$0xff]  ;;  %v218_v11 = vshrl.u32 %v1292_v2, 16  ;;  %v220_v12 = vshll.u32 %v1292_v2, 16  ;;  %v1125_v13 = vld [vmem:[%s1285_s17 + $0x38] sm:$0x1]  ;;  %v362_v16 = vunpack.c.l.b16 %v1029_v6  ;;  %v722_v30 = vrot.slane %v1288_v0, 1 }
  0x12   : > { %v662_v10 = vpack.c.b16 %v658_v3, %v658_v3  ;;  %v671_v14 = vrot.slane %v669_v8, 1  ;;  %v212_v15 = vpack.c.b16 %v208_v9, %v208_v9  ;;  %v428_v19 = vrot.slane %v1296_v5, 1  ;;  %v177_v43 = vld [vmem:[%s1285_s17 + $0x20] sm:$0x1]  ;;  %v1032_v44 = vld [vmem:[%s1285_s17 + $0x44] sm:$0x1] }
  0x13   : > { %v222_v18 = vrot.slane %v220_v12, 1  ;;  %v366_v22 = vpack.c.b16 %v362_v16, %v362_v16  ;;  %v659_v23 = vunpack.c.l.b16 %v1125_v13  ;;  %v681_v35 = vshll.u32 %v1306_v26, 16  ;;  %v1325_v52 = vld [vmem:[%s1285_s17 + $0x3c] sm:$0xff]  ;;  %v1128_v63 = vld [vmem:[%s1285_s17 + $0x50] sm:$0x1]  ;;  %v1343_v9 = vld [vmem:[%s1285_s17 + $0x48] sm:$0xff] }
  0x14   : > { %v674_v17 = vshll.u32 %v662_v10, 16  ;;  %v672_v20 = vor.u32 %v671_v14, %v667_v7  ;;  %v225_v21 = vshll.u32 %v212_v15, 16  ;;  %v723_v32 = vrot.slane %v662_v10, 1  ;;  %v1333_v59 = vld [vmem:[%s1285_s17 + $0x18] sm:$0xff] }
  0x15   : > { %v223_v25 = vor.u32 %v222_v18, %v218_v11  ;;  %v429_v28 = vrot.slane %v366_v22, 1  ;;  %v663_v34 = vpack.c.b16 %v659_v23, %v659_v23  ;;  %v382_v36 = vshrl.u32 %v1296_v5, 16  ;;  %v1351_v23 = vld [vmem:[%s1285_s17 + $0x30] sm:$0xff] }
  0x16   : > { %v676_v24 = vrot.slane %v674_v17, 1  ;;  %v227_v27 = vrot.slane %v225_v21, 1  ;;  %v384_v37 = vshll.u32 %v1296_v5, 16  ;;  %v389_v38 = vshll.u32 %v366_v22, 16 }
  0x17   : > { %v430_v33 = vsel %vm273_vm1, %v428_v19, %v429_v28  ;;  %v274_v39 = vrot.slane %v1292_v2, 1  ;;  %v275_v40 = vrot.slane %v212_v15, 1  ;;  %v724_v45 = vsel %vm273_vm1, %v722_v30, %v723_v32  ;;  %v180_v15 = vld [vmem:[%s1285_s17 + $0x38] sm:$0x1] }
  0x18   : > { %v677_v29 = vsel %vm216_vm0, %v672_v20, %v676_v24  ;;  %v228_v31 = vsel %vm216_vm0, %v223_v25, %v227_v27  ;;  %439 = vrot.lane.b32.xlu2 %v430_v33, %s1249_s19  ;;  %v386_v41 = vrot.slane %v384_v37, 1  ;;  %v391_v42 = vrot.slane %v389_v38, 1  ;;  %v1035_v27 = vld [vmem:[%s1285_s17 + $0x5c] sm:$0x1]  ;;  %v1362_v37 = vld [vmem:[%s1285_s17 + $0x54] sm:$0xff] }
  0x19   : > { %714 = vrot.lane.b32.xlu0 %v677_v29, %s1248_s18  ;;  %265 = vrot.lane.b32.xlu1 %v228_v31, %s1248_s18  ;;  %v679_v46 = vshrl.u32 %v1306_v26, 16  ;;  %v683_v47 = vrot.slane %v681_v35, 1  ;;  %v686_v48 = vshll.u32 %v663_v34, 16  ;;  %v276_v50 = vsel %vm273_vm1, %v274_v39, %v275_v40 }
  0x1a   : > { %v387_v49 = vor.u32 %v386_v41, %v382_v36  ;;  %v209_v51 = vunpack.c.l.b16 %v177_v43  ;;  %v363_v53 = vunpack.c.l.b16 %v1032_v44  ;;  %v725_v57 = vrot.slane %v1306_v26, 1 }
  0x1b   : > { %v684_v55 = vor.u32 %v683_v47, %v679_v46  ;;  %v688_v56 = vrot.slane %v686_v48, 1  ;;  %v726_v58 = vrot.slane %v663_v34, 1  ;;  %v396_v62 = vshll.u32 %v1325_v52, 16 }
  0x1c   : > { %v392_v54 = vsel %vm216_vm0, %v387_v49, %v391_v42  ;;  %v213_v60 = vpack.c.b16 %v209_v51, %v209_v51  ;;  %v367_v61 = vpack.c.b16 %v363_v53, %v363_v53  ;;  %v230_v1 = vshrl.u32 %v1333_v59, 16  ;;  %v1131_v49 = vld [vmem:[%s1285_s17 + $0x68] sm:$0x1] }
  0x1d   : > { %v232_v3 = vshll.u32 %v1333_v59, 16  ;;  %v689_v6 = vsel %vm216_vm0, %v684_v55, %v688_v56  ;;  %v727_v7 = vsel %vm273_vm1, %v725_v57, %v726_v58  ;;  %v394_v8 = vshrl.u32 %v1325_v52, 16  ;;  %v1219_v55 = vld [vmem:[%s1598_s1 + $0x88] sm:$0xff]  ;;  %v1383_v57 = vld [vmem:[%s1285_s17 + $0x60] sm:$0xff] }
  0x1e   : > { %v237_v4 = vshll.u32 %v213_v60, 16  ;;  %v660_v10 = vunpack.c.l.b16 %v1128_v63  ;;  %v398_v11 = vrot.slane %v396_v62, 1  ;;  %v401_v12 = vshll.u32 %v367_v61, 16  ;;  %817 = vmatpush.bf16.msra.mxu2 %v1219_v55 }
  0x1f   : > { %v234_v13 = vrot.slane %v232_v3, 1  ;;  %v277_v17 = vrot.slane %v1333_v59, 1  ;;  %v278_v18 = vrot.slane %v213_v60, 1  ;;  %v693_v20 = vshll.u32 %v1343_v9, 16  ;;  %v1208_v60 = vld [vmem:[%s1598_s1 + $0x50] sm:$0xff] }
  0x20   : > { %419 = vrot.lane.b32.xlu2 %v392_v54, %s1248_s18  ;;  %v239_v14 = vrot.slane %v237_v4, 1  ;;  %v664_v19 = vpack.c.b16 %v660_v10, %v660_v10  ;;  %v399_v21 = vor.u32 %v398_v11, %v394_v8  ;;  %v403_v22 = vrot.slane %v401_v12, 1  ;;  %v1199_v54 = vld [vmem:[%s1598_s1 + $0x28] sm:$0xff]  ;;  %v183_v3 = vld [vmem:[%s1285_s17 + $0x50] sm:$0x1] }
  0x21   : > { %734 = vrot.lane.b32.xlu0 %v724_v45, %s1249_s19  ;;  %286 = vrot.lane.b32.xlu1 %v276_v50, %s1249_s19  ;;  %v235_v16 = vor.u32 %v234_v13, %v230_v1  ;;  %v210_v24 = vunpack.c.l.b16 %v180_v15  ;;  %v431_v28 = vrot.slane %v1325_v52, 1  ;;  %v432_v29 = vrot.slane %v367_v61, 1  ;;  %v1209_v50 = vld [vmem:[%s1598_s1 + $0x58] sm:$0xff]  ;;  %v1207_v11 = vld [vmem:[%s1598_s1 + $0x48] sm:$0xff] }
  0x22   : > { %v244_v30 = vshll.u32 %v1351_v23, 16  ;;  %v279_v31 = vsel %vm273_vm1, %v277_v17, %v278_v18  ;;  %v691_v32 = vshrl.u32 %v1343_v9, 16  ;;  %v695_v33 = vrot.slane %v693_v20, 1  ;;  %1220 = vmatpush.bf16.msra.mxu3 %v1209_v50  ;;  %521 = vmatpush.bf16.msra.mxu0 %v1209_v50  ;;  %v1401_v15 = vld [vmem:[%s1285_s17 + $0x48] sm:$0xff] }
  0x23   : > { %v240_v25 = vsel %vm216_vm0, %v235_v16, %v239_v14  ;;  %v698_v34 = vshll.u32 %v664_v19, 16  ;;  %v404_v35 = vsel %vm216_vm0, %v399_v21, %v403_v22  ;;  %v214_v36 = vpack.c.b16 %v210_v24, %v210_v24  ;;  %594 = vmatpush.bf16.msra.mxu1 %v1199_v54  ;;  %v1026_v14 = vld [vmem:[%s1285_s17 + $0x14] sm:$0x1] }
  0x24   : > { %v364_v38 = vunpack.c.l.b16 %v1035_v27  ;;  %v433_v39 = vsel %vm273_vm1, %v431_v28, %v432_v29  ;;  %v242_v40 = vshrl.u32 %v1351_v23, 16  ;;  %v246_v41 = vrot.slane %v244_v30, 1  ;;  %v1206_v28 = vld [vmem:[%s1598_s1 + $0x40] sm:$0xff] }
  0x25   : > { %v249_v42 = vshll.u32 %v214_v36, 16  ;;  %v696_v43 = vor.u32 %v695_v33, %v691_v32  ;;  %v700_v44 = vrot.slane %v698_v34, 1  ;;  %v728_v45 = vrot.slane %v1343_v9, 1 }
  0x26   : > { %v729_v46 = vrot.slane %v664_v19, 1  ;;  %v368_v47 = vpack.c.b16 %v364_v38, %v364_v38  ;;  %v408_v48 = vshll.u32 %v1362_v37, 16  ;;  %v247_v51 = vor.u32 %v246_v41, %v242_v40  ;;  %1221 = vmatpush.bf16.msra.mxu3 %v1208_v60  ;;  %522 = vmatpush.bf16.msra.mxu0 %v1208_v60 }
  0x27   : > { %v251_v53 = vrot.slane %v249_v42, 1  ;;  %v701_v56 = vsel %vm216_vm0, %v696_v43, %v700_v44  ;;  %v661_v58 = vunpack.c.l.b16 %v1131_v49  ;;  %v406_v62 = vshrl.u32 %v1362_v37, 16 }
  0x28   : > { %267 = vrot.lane.b32.xlu2 %v240_v25, %s1248_s18  ;;  %v730_v61 = vsel %vm273_vm1, %v728_v45, %v729_v46  ;;  %v410_v63 = vrot.slane %v408_v48, 1  ;;  %v413_v1 = vshll.u32 %v368_v47, 16  ;;  %v280_v4 = vrot.slane %v1351_v23, 1  ;;  %v1409_v25 = vld [vmem:[%s1285_s17 + $0xc] sm:$0xff] }
  0x29   : > { %716 = vrot.lane.b32.xlu0 %v689_v6, %s1248_s18  ;;  %736 = vrot.lane.b32.xlu1 %v727_v7, %s1249_s19  ;;  %v281_v6 = vrot.slane %v214_v36, 1  ;;  %v252_v7 = vsel %vm216_vm0, %v247_v51, %v251_v53  ;;  %v665_v8 = vpack.c.b16 %v661_v58, %v661_v58  ;;  %v705_v10 = vshll.u32 %v1383_v57, 16 }
  0x2a   : > { %v411_v12 = vor.u32 %v410_v63, %v406_v62  ;;  %v415_v13 = vrot.slane %v413_v1, 1  ;;  %v211_v16 = vunpack.c.l.b16 %v183_v3  ;;  %v434_v18 = vrot.slane %v1362_v37, 1  ;;  %1222 = vmatpush.bf16.msra.mxu3 %v1207_v11  ;;  %523 = vmatpush.bf16.msra.mxu0 %v1207_v11  ;;  %v1205_v62 = vld [vmem:[%s1598_s1 + $0x38] sm:$0xff]  ;;  %v1198_v63 = vld [vmem:[%s1598_s1 + $0x20] sm:$0xff]  ;;  %v1204_v3 = vld [vmem:[%s1598_s1 + $0x30] sm:$0xff] }
  0x2b   : > { %v282_v17 = vsel %vm273_vm1, %v280_v4, %v281_v6  ;;  %v435_v19 = vrot.slane %v368_v47, 1  ;;  %v256_v20 = vshll.u32 %v1401_v15, 16  ;;  %v703_v21 = vshrl.u32 %v1383_v57, 16  ;;  %v1218_v1 = vld [vmem:[%s1598_s1 + $0x80] sm:$0xff]  ;;  %595 = vmatpush.bf16.msra.mxu1 %v1198_v63  ;;  %v1197_v4 = vld [vmem:[%s1598_s1 + $0x18] sm:$0xff]  ;;  %v1215_v11 = vld [vmem:[%s1598_s1 + $0x68] sm:$0xff] }
  0x2c   : > { %v707_v22 = vrot.slane %v705_v10, 1  ;;  %v710_v24 = vshll.u32 %v665_v8, 16  ;;  %v361_v27 = vunpack.c.l.b16 %v1026_v14  ;;  %v416_v29 = vsel %vm216_vm0, %v411_v12, %v415_v13  ;;  %818 = vmatpush.bf16.msra.mxu2 %v1218_v1  ;;  %v1217_v6 = vld [vmem:[%s1598_s1 + $0x78] sm:$0xff]  ;;  %v1195_v10 = vld [vmem:[%s1598_s1 + $0x8] sm:$0xff]  ;;  %v1194_v12 = vld [vmem:[%s1598_s1] sm:$0xff] }
  0x2d   : > { %v215_v30 = vpack.c.b16 %v211_v16, %v211_v16  ;;  %v254_v32 = vshrl.u32 %v1401_v15, 16  ;;  %v258_v33 = vrot.slane %v256_v20, 1  ;;  %v731_v40 = vrot.slane %v1383_v57, 1  ;;  %v1214_v13 = vld [vmem:[%s1598_s1 + $0x60] sm:$0xff] }
  0x2e   : > { %v712_v36 = vrot.slane %v710_v24, 1  ;;  %v365_v38 = vpack.c.b16 %v361_v27, %v361_v27  ;;  %1223 = vmatpush.bf16.msra.mxu3 %v1206_v28  ;;  %v732_v41 = vrot.slane %v665_v8, 1  ;;  %524 = vmatpush.bf16.msra.mxu0 %v1206_v28  ;;  %v370_v45 = vshrl.u32 %v1409_v25, 16  ;;  %v1216_v8 = vld [vmem:[%s1598_s1 + $0x70] sm:$0xff] }
  0x2f   : > { %v261_v34 = vshll.u32 %v215_v30, 16  ;;  %v259_v42 = vor.u32 %v258_v33, %v254_v32  ;;  %v283_v53 = vrot.slane %v1401_v15, 1  ;;  %v284_v54 = vrot.slane %v215_v30, 1  ;;  %596 = vmatpush.bf16.msra.mxu1 %v1197_v4  ;;  %v1546_v4 = vld [vmem:[%s1599_s2] ss:$0 sm:$0xff] }
  0x30   : > { %441 = vrot.lane.b32.xlu2 %v433_v39, %s1249_s19  ;;  %v372_v39 = vshll.u32 %v1409_v25, 16  ;;  %v377_v47 = vshll.u32 %v365_v38, 16  ;;  %v733_v48 = vsel %vm273_vm1, %v731_v40, %v732_v41  ;;  %v425_v55 = vrot.slane %v1409_v25, 1  ;;  %819 = vmatpush.bf16.msra.mxu2 %v1217_v6 }
  0x31   : > { %288 = vrot.lane.b32.xlu0 %v279_v31, %s1249_s19  ;;  %421 = vrot.lane.b32.xlu1 %v404_v35, %s1248_s18  ;;  %v436_v31 = vsel %vm273_vm1, %v434_v18, %v435_v19  ;;  %v708_v35 = vor.u32 %v707_v22, %v703_v21  ;;  %v263_v43 = vrot.slane %v261_v34, 1  ;;  %v285_v60 = vsel %vm273_vm1, %v283_v53, %v284_v54 }
  0x32   : > { %v374_v46 = vrot.slane %v372_v39, 1  ;;  %v379_v51 = vrot.slane %v377_v47, 1  ;;  %1224 = vmatpush.bf16.msra.mxu3 %v1205_v62  ;;  %525 = vmatpush.bf16.msra.mxu0 %v1205_v62 }
  0x33   : > { %v713_v44 = vsel %vm216_vm0, %v708_v35, %v712_v36  ;;  %v264_v49 = vsel %vm216_vm0, %v259_v42, %v263_v43 }
  0x34   : > { %v375_v50 = vor.u32 %v374_v46, %v370_v45  ;;  %820 = vmatpush.bf16.msra.mxu2 %v1216_v8 }
  0x36   : > { %v380_v58 = vsel %vm216_vm0, %v375_v50, %v379_v51  ;;  %1225 = vmatpush.bf16.msra.mxu3 %v1204_v3  ;;  %526 = vmatpush.bf16.msra.mxu0 %v1204_v3 }
  0x38   : > { %269 = vrot.lane.b32.xlu2 %v252_v7, %s1248_s18  ;;  %v1196_v7 = vld [vmem:[%s1598_s1 + $0x10] sm:$0xff]  ;;  %821 = vmatpush.bf16.msra.mxu2 %v1215_v11 }
  0x39   : > { %718 = vrot.lane.b32.xlu0 %v701_v56, %s1248_s18  ;;  %738 = vrot.lane.b32.xlu1 %v730_v61, %s1249_s19  ;;  %v426_v56 = vrot.slane %v365_v38, 1 }
  0x3a   : > { %597 = vmatpush.bf16.msra.mxu1 %v1196_v7 }
  0x3b   : > { %v427_v61 = vsel %vm273_vm1, %v425_v55, %v426_v56 }
  0x3c   : > { %822 = vmatpush.bf16.msra.mxu2 %v1214_v13 }
  0x3e   : > { %598 = vmatpush.bf16.msra.mxu1 %v1195_v10 }
  0x40   : > { %443 = vrot.lane.b32.xlu2 %v436_v31, %s1249_s19 }
  0x41   : > { %290 = vrot.lane.b32.xlu0 %v282_v17, %s1249_s19  ;;  %423 = vrot.lane.b32.xlu1 %v416_v29, %s1248_s18 }
  0x42   : > { %599 = vmatpush.bf16.msra.mxu1 %v1194_v12 }
  0x48   : > { %271 = vrot.lane.b32.xlu2 %v264_v49, %s1248_s18 }
  0x49   : > { %720 = vrot.lane.b32.xlu0 %v713_v44, %s1248_s18  ;;  %740 = vrot.lane.b32.xlu1 %v733_v48, %s1249_s19 }
  0x50   : > { %437 = vrot.lane.b32.xlu2 %v427_v61, %s1249_s19 }
  0x51   : > { %417 = vrot.lane.b32.xlu0 %v380_v58, %s1248_s18  ;;  %292 = vrot.lane.b32.xlu1 %v285_v60, %s1249_s19 }
  0x72   : > { %v440_v14 = vpop.permute.xlu2 %439 }
  0x7a   : > { %v420_v16 = vpop.permute.xlu2 %419 }
  0x7b   : > { %v448_v17 = vsel %vm294_vm2, %v1296_v5, %v420_v16 }
  0x7c   : > { %v456_v18 = vsel %vm303_vm3, %v448_v17, %v440_v14 }
  0x7d   : > { %1089 = vmatmul.msk.bf16.vlgmr.msra.gmra.mxu3 %vm510_vm4, %v456_v18 }
  0x82   : > { %v268_v21 = vpop.permute.xlu2 %267 }
  0x8a   : > { %v442_v5 = vpop.permute.xlu2 %441 }
  0x8b   : > { %v715_v19 = vpop.permute.xlu0 %714  ;;  %v266_v20 = vpop.permute.xlu1 %265 }
  0x8c   : > { %v743_v22 = vsel %vm294_vm2, %v1288_v0, %v715_v19  ;;  %v296_v27 = vsel %vm294_vm2, %v1292_v2, %v266_v20  ;;  %v298_v0 = vsel %vm294_vm2, %v1333_v59, %v268_v21 }
  0x92   : > { %v270_v38 = vpop.permute.xlu2 %269 }
  0x93   : > { %v735_v24 = vpop.permute.xlu0 %734  ;;  %v287_v28 = vpop.permute.xlu1 %286  ;;  %v300_v43 = vsel %vm294_vm2, %v1351_v23, %v270_v38 }
  0x94   : > { %v751_v29 = vsel %vm303_vm3, %v743_v22, %v735_v24  ;;  %v305_v30 = vsel %vm303_vm3, %v296_v27, %v287_v28 }
  0x95   : > { %1184 = vmatmul.msk.bf16.vlgmr.msra.gmra.mxu2 %vm510_vm4, %v751_v29  ;;  %1116 = vmatmul.msk.bf16.vlgmr.msra.gmra.mxu1 %vm510_vm4, %v305_v30 }
  0x9a   : > { %v444_v41 = vpop.permute.xlu2 %443 }
  0x9b   : > { %v717_v31 = vpop.permute.xlu0 %716  ;;  %v737_v32 = vpop.permute.xlu1 %736 }
  0x9c   : > { %v745_v33 = vsel %vm294_vm2, %v1306_v26, %v717_v31 }
  0x9d   : > { %v753_v36 = vsel %vm303_vm3, %v745_v33, %v737_v32 }
  0xa3   : > { %v289_v34 = vpop.permute.xlu0 %288  ;;  %v422_v2 = vpop.permute.xlu1 %421 }
  0xa4   : > { %v307_v35 = vsel %vm303_vm3, %v298_v0, %v289_v34  ;;  %v450_v39 = vsel %vm294_vm2, %v1325_v52, %v422_v2 }
  0xa5   : > { %1185 = vmatmul.msk.bf16.gmra.mxu2 %vm510_vm4, %v753_v36  ;;  %1117 = vmatmul.msk.bf16.gmra.mxu1 %vm510_vm4, %v307_v35  ;;  %v458_v40 = vsel %vm303_vm3, %v450_v39, %v442_v5 }
  0xa6   : > { %1090 = vmatmul.msk.bf16.gmra.mxu3 %vm510_vm4, %v458_v40 }
  0xab   : > { %v719_v26 = vpop.permute.xlu0 %718  ;;  %v739_v59 = vpop.permute.xlu1 %738 }
  0xac   : > { %v747_v42 = vsel %vm294_vm2, %v1343_v9, %v719_v26  ;;  %v272_v9 = vpop.permute.xlu2 %271 }
  0xad   : > { %v755_v46 = vsel %vm303_vm3, %v747_v42, %v739_v59 }
  0xb3   : > { %v291_v44 = vpop.permute.xlu0 %290  ;;  %v424_v45 = vpop.permute.xlu1 %423 }
  0xb4   : > { %v309_v52 = vsel %vm303_vm3, %v300_v43, %v291_v44  ;;  %v452_v47 = vsel %vm294_vm2, %v1362_v37, %v424_v45  ;;  %v438_v51 = vpop.permute.xlu2 %437  ;;  %v302_v37 = vsel %vm294_vm2, %v1401_v15, %v272_v9 }
  0xb5   : > { %1186 = vmatmul.msk.bf16.gmra.mxu2 %vm510_vm4, %v755_v46  ;;  %1118 = vmatmul.msk.bf16.gmra.mxu1 %vm510_vm4, %v309_v52  ;;  %v460_v48 = vsel %vm303_vm3, %v452_v47, %v444_v41 }
  0xb6   : > { %1091 = vmatmul.msk.bf16.gmra.mxu3 %vm510_vm4, %v460_v48 }
  0xbb   : > { %v721_v23 = vpop.permute.xlu0 %720  ;;  %v741_v49 = vpop.permute.xlu1 %740 }
  0xbc   : > { %v749_v50 = vsel %vm294_vm2, %v1383_v57, %v721_v23 }
  0xbd   : > { %v757_v56 = vsel %vm303_vm3, %v749_v50, %v741_v49 }
  0xc3   : > { %v418_v53 = vpop.permute.xlu0 %417  ;;  %v293_v55 = vpop.permute.xlu1 %292 }
  0xc4   : > { %v446_v54 = vsel %vm294_vm2, %v1409_v25, %v418_v53  ;;  %v311_v58 = vsel %vm303_vm3, %v302_v37, %v293_v55  ;;  %v1250_v25 = vmov 0.0|0.0  }
  0xc5   : > { %1187 = vmatmul.msk.bf16.gmra.mxu2 %vm510_vm4, %v757_v56  ;;  %v454_v60 = vsel %vm303_vm3, %v446_v54, %v438_v51  ;;  %1119 = vmatmul.msk.bf16.gmra.mxu1 %vm510_vm4, %v311_v58  ;;  %927 = vst.msk [vmem:[%s1525_s7] sm:$0xf] %vm926_vm5, %v1250_v25 }
  0xc6   : > { %1088 = vmatmul.msk.bf16.vlgmr.msra.gmra.mxu0 %vm510_vm4, %v454_v60  ;;  %928 = vst.msk [vmem:[%s1525_s7 + $0x4] sm:$0xf] %vm926_vm5, %v1250_v25 }
  0xc7   : > { %930 = vst.msk [vmem:[%s1525_s7 + $0x8] sm:$0x1] %vm929_vm6, %v1250_v25 }
  0xc8   : > { %943 = vst.msk [vmem:[%s1525_s7 + $0x3c] sm:$0xf] %vm926_vm5, %v1250_v25 }
  0xc9   : > { %944 = vst.msk [vmem:[%s1525_s7 + $0x40] sm:$0xf] %vm926_vm5, %v1250_v25 }
  0xca   : > { %945 = vst.msk [vmem:[%s1525_s7 + $0x44] sm:$0x1] %vm929_vm6, %v1250_v25 }
 0x100   : > { %v533_v62 = vpop.f32.mrf.mxu3 }
 0x108   : > { %v535_v6 = vpop.f32.mrf.mxu3 }
 0x112   : > { %v601_v57 = vpop.f32.mrf.mxu1 }
 0x118   : > { %v824_v61 = vpop.f32.mrf.mxu2 }
 0x11a   : > { %v1527_v15 = vpop.f32.mrf.mxu1 }
 0x120   : > { %v1539_v63 = vpop.f32.mrf.mxu2 }
 0x122   : > { %v606_v1 = vpop.f32.mrf.mxu1 }
 0x123   : > { %v607_v3 = vadd.f32 %v606_v1, %v533_v62 }
 0x128   : > { %v829_v7 = vpop.f32.mrf.mxu2 }
 0x129   : > { %v846_v8 = vadd.f32 %v829_v7, %v607_v3  ;;  %v538_v16 = vpop.f32.mrf.mxu3 }
 0x12a   : > { %v608_v11 = vpop.f32.mrf.mxu1 }
 0x12b   : > { %v858_v10 = vadd.f32 %v1546_v4, %v846_v8  ;;  %v609_v14 = vadd.f32 %v608_v11, %v535_v6 }
 0x12d   : > { %v866_v12 = vmax.f32 %v858_v10, 0.0 }
 0x12f   : > { %v884_v13 = vrot.slane %v866_v12, 7 }
 0x130   : > { %v831_v17 = vpop.f32.mrf.mxu2 }
 0x131   : > { %v906_v18 = vsel %vm880_vm7, 0.0, %v884_v13  ;;  %v847_v19 = vadd.f32 %v831_v17, %v609_v14  ;;  %v540_v0 = vpop.f32.mrf.mxu3 }
 0x132   : > { %v917_v20 = vpack.c.bf16 %v906_v18, %v906_v18  ;;  %v611_v22 = vpop.f32.mrf.mxu1 }
 0x133   : > { %v859_v21 = vadd.f32 %v1546_v4, %v847_v19  ;;  %v612_v28 = vadd.f32 %v611_v22, %v538_v16 }
 0x134   : > { %934 = vst.msk [vmem:[%s1525_s7 + $0x18] sm:$0xf] %vm926_vm5, %v917_v20 }
 0x135   : > { %v867_v24 = vmax.f32 %v859_v21, 0.0 }
 0x137   : > { %v885_v27 = vrot.slane %v867_v24, 7 }
 0x138   : > { %v834_v29 = vpop.f32.mrf.mxu2 }
 0x139   : > { %v886_v30 = vsel %vm880_vm7, %v884_v13, %v885_v27  ;;  %v910_v5 = vsel %vm880_vm7, %v885_v27, 0.0  ;;  %v848_v31 = vadd.f32 %v834_v29, %v612_v28  ;;  %v543_v44 = vpop.f32.mrf.mxu3 }
 0x13a   : > { %v918_v32 = vpack.c.bf16 %v886_v30, %v886_v30  ;;  %v919_v33 = vpack.c.bf16 %v910_v5, %v910_v5  ;;  %v613_v2 = vpop.f32.mrf.mxu1 }
 0x13b   : > { %v860_v34 = vadd.f32 %v1546_v4, %v848_v31  ;;  %v614_v38 = vadd.f32 %v613_v2, %v540_v0 }
 0x13c   : > { %935 = vst.msk [vmem:[%s1525_s7 + $0x1c] sm:$0xf] %vm926_vm5, %v918_v32 }
 0x13d   : > { %936 = vst.msk [vmem:[%s1525_s7 + $0x20] sm:$0x1] %vm929_vm6, %v919_v33  ;;  %v868_v35 = vmax.f32 %v860_v34, 0.0 }
 0x13f   : > { %v887_v36 = vrot.slane %v868_v35, 7 }
 0x140   : > { %v836_v39 = vpop.f32.mrf.mxu2 }
 0x141   : > { %v907_v40 = vsel %vm880_vm7, 0.0, %v887_v36  ;;  %v849_v26 = vadd.f32 %v836_v39, %v614_v38  ;;  %v545_v25 = vpop.f32.mrf.mxu3 }
 0x142   : > { %v920_v59 = vpack.c.bf16 %v907_v40, %v907_v40  ;;  %v616_v42 = vpop.f32.mrf.mxu1 }
 0x143   : > { %v861_v41 = vadd.f32 %v1546_v4, %v849_v26  ;;  %v528_v43 = vpop.f32.mrf.mxu0  ;;  %v617_v48 = vadd.f32 %v616_v42, %v543_v44 }
 0x144   : > { %937 = vst.msk [vmem:[%s1525_s7 + $0x24] sm:$0xf] %vm926_vm5, %v920_v59  ;;  %v602_v45 = vadd.f32 %v601_v57, %v528_v43 }
 0x145   : > { %v869_v52 = vmax.f32 %v861_v41, 0.0 }
 0x146   : > { %v844_v46 = vadd.f32 %v824_v61, %v602_v45 }
 0x147   : > { %v888_v47 = vrot.slane %v869_v52, 7 }
 0x148   : > { %v856_v9 = vadd.f32 %v1546_v4, %v844_v46  ;;  %v839_v23 = vpop.f32.mrf.mxu2 }
 0x149   : > { %v889_v49 = vsel %vm880_vm7, %v887_v36, %v888_v47  ;;  %v911_v50 = vsel %vm880_vm7, %v888_v47, 0.0  ;;  %v850_v51 = vadd.f32 %v839_v23, %v617_v48 }
 0x14a   : > { %v921_v53 = vpack.c.bf16 %v889_v49, %v889_v49  ;;  %v922_v37 = vpack.c.bf16 %v911_v50, %v911_v50  ;;  %v864_v54 = vmax.f32 %v856_v9, 0.0  ;;  %v618_v60 = vpop.f32.mrf.mxu1 }
 0x14b   : > { %v862_v55 = vadd.f32 %v1546_v4, %v850_v51  ;;  %v530_v56 = vpop.f32.mrf.mxu0  ;;  %v619_v7 = vadd.f32 %v618_v60, %v545_v25 }
 0x14c   : > { %938 = vst.msk [vmem:[%s1525_s7 + $0x28] sm:$0xf] %vm926_vm5, %v921_v53  ;;  %v881_v58 = vrot.slane %v864_v54, 7  ;;  %v604_v57 = vadd.f32 %v1527_v15, %v530_v56 }
 0x14d   : > { %939 = vst.msk [vmem:[%s1525_s7 + $0x2c] sm:$0x1] %vm929_vm6, %v922_v37  ;;  %v870_v61 = vmax.f32 %v862_v55, 0.0 }
 0x14e   : > { %v905_v62 = vsel %vm880_vm7, 0.0, %v881_v58  ;;  %v845_v1 = vadd.f32 %v1539_v63, %v604_v57 }
 0x14f   : > { %v914_v3 = vpack.c.bf16 %v905_v62, %v905_v62  ;;  %v890_v6 = vrot.slane %v870_v61, 7 }
 0x150   : > { %v857_v8 = vadd.f32 %v1546_v4, %v845_v1  ;;  %v841_v10 = vpop.f32.mrf.mxu2 }
 0x151   : > { %931 = vst.msk [vmem:[%s1525_s7 + $0xc] sm:$0xf] %vm926_vm5, %v914_v3  ;;  %v908_v15 = vsel %vm880_vm7, 0.0, %v890_v6  ;;  %v851_v11 = vadd.f32 %v841_v10, %v619_v7 }
 0x152   : > { %v923_v12 = vpack.c.bf16 %v908_v15, %v908_v15  ;;  %v865_v13 = vmax.f32 %v857_v8, 0.0 }
 0x153   : > { %v863_v14 = vadd.f32 %v1546_v4, %v851_v11 }
 0x154   : > { %940 = vst.msk [vmem:[%s1525_s7 + $0x30] sm:$0xf] %vm926_vm5, %v923_v12  ;;  %v882_v63 = vrot.slane %v865_v13, 7 }
 0x155   : > { %v871_v16 = vmax.f32 %v863_v14, 0.0 }
 0x156   : > { %v883_v17 = vsel %vm880_vm7, %v881_v58, %v882_v63  ;;  %v909_v18 = vsel %vm880_vm7, %v882_v63, 0.0 }
 0x157   : > { %v915_v19 = vpack.c.bf16 %v883_v17, %v883_v17  ;;  %v916_v20 = vpack.c.bf16 %v909_v18, %v909_v18  ;;  %v891_v21 = vrot.slane %v871_v16, 7 }
 0x159   : > { %932 = vst.msk [vmem:[%s1525_s7 + $0x10] sm:$0xf] %vm926_vm5, %v915_v19  ;;  %v892_v22 = vsel %vm880_vm7, %v890_v6, %v891_v21  ;;  %v912_v24 = vsel %vm880_vm7, %v891_v21, 0.0 }
 0x15a   : > { %933 = vst.msk [vmem:[%s1525_s7 + $0x14] sm:$0x1] %vm929_vm6, %v916_v20  ;;  %v924_v4 = vpack.c.bf16 %v892_v22, %v892_v22  ;;  %v925_v27 = vpack.c.bf16 %v912_v24, %v912_v24 }
 0x15c   : > { %941 = vst.msk [vmem:[%s1525_s7 + $0x34] sm:$0xf] %vm926_vm5, %v924_v4 }
 0x15d   : > { %942 = vst.msk [vmem:[%s1525_s7 + $0x38] sm:$0x1] %vm929_vm6, %v925_v27 }
 0x15e PF: > { %s13_s12 = sadd.s32 1, %s1246_s12  }
 0x15f   : > { %p10_p4 = scmp.ge.s32.totalorder %s13_s12, 4  }
 0x161   :  { %12 = sbr.rel (!%p10_p4) target bundleno = 1 (0x1), region = 66 }

// kernel: _lambda_.12
= control target key start
LH: loop header
LB: loop body
LE: loop exit
PB: predicated region body
PF: predicated region fallthrough
CT: control target
= control target key end

     0   :  { %s1202_s12 = smov 0   ;;  %s1438_s0 = inlined_call_operand.vmem [shape: bf16[2,3,2,18,64], index: 0, kind: input, shape index: {}]   ;;  %s1439_s1 = inlined_call_operand.vmem [shape: bf16[3,192,128], index: 1, kind: input, shape index: {}]   ;;  %s1440_s2 = inlined_call_operand.vmem [shape: f32[1,128], index: 2, kind: input, shape index: {}]   ;;  %s1441_s3 = inlined_call_operand.vmem [shape: bf16[2,2,16,128], index: 3, kind: output, shape index: {}]  }
   0x1 LB: > { %s864_s13 = sadd.s32 4294967295, %s1179_s12   ;;  %p868_p0 = scmp.ge.s32.totalorder %s1179_s12, 1  ;;  %s1179_s12 = sphi %s1202_s12, %s13_s12  }
   0x2   : > { %p137_p1 = scmp.lt.s32.totalorder %s1179_s12, 3 }
   0x4   : > { %p138_p2 = pnand %p868_p0, %p137_p1 }
   0x5   : > { %p161_p3 = scmp.lt.s32.totalorder (!%p138_p2), %s864_s13, 1  ;;  %s1181_s7 = smov (!%p138_p2), 64  }
   0x6   : > { %141 = sbr.rel (%p138_p2) target bundleno = 314 (0x13a), region = 32 }
   0xb   : > { %v1122_v0 = vld [vmem:[%s1439_s1 + $0x58] sm:$0xff]  ;;  %s1443_s13 = smov (!%p161_p3, %s864_s13), 1  ;;  %v1121_v2 = vld [vmem:[%s1439_s1 + $0x50] sm:$0xff]  ;;  %v1120_v6 = vld [vmem:[%s1439_s1 + $0x48] sm:$0xff]  ;;  %vm194_vm0 = vsmask.f32 7424 }
   0xc   : > { %v1136_v1 = vld [vmem:[%s1439_s1 + $0xb8] sm:$0xff]  ;;  %566 = vmatpush.bf16.msra.mxu3 %v1122_v0  ;;  %v1135_v3 = vld [vmem:[%s1439_s1 + $0xb0] sm:$0xff]  ;;  %s1162_s24 = smul.u32 72, %s1443_s13  ;;  %v1134_v8 = vld [vmem:[%s1439_s1 + $0xa8] sm:$0xff]  ;;  %vm223_vm1 = vcmask 1046528   ;;  %vm230_vm2 = vcmask 523264  }
   0xd   : > { %450 = vmatpush.bf16.msra.mxu1 %v1136_v1  ;;  %v1118_v4 = vld [vmem:[%s1439_s1 + $0x38] sm:$0xff]  ;;  %v1117_v7 = vld [vmem:[%s1439_s1 + $0x30] sm:$0xff]  ;;  %v1116_v22 = vld [vmem:[%s1439_s1 + $0x28] sm:$0xff]  ;;  %s1108_s18 = sshll.u32 %s1443_s13, 4 }
   0xe   : > { %v1132_v5 = vld [vmem:[%s1439_s1 + $0x98] sm:$0xff]  ;;  %543 = vmatpush.bf16.msra.mxu2 %v1118_v4  ;;  %s1240_s6 = scalar_lea.vmem %s1438_s0, %s1162_s24  ;;  %v1131_v9 = vld [vmem:[%s1439_s1 + $0x90] sm:$0xff]  ;;  %v1119_v28 = vld [vmem:[%s1439_s1 + $0x40] sm:$0xff]  ;;  %s170_s21 = scalar_lea.vmem %s1441_s3, %s1108_s18 }
   0xf   : > { %427 = vmatpush.bf16.msra.mxu0 %v1132_v5  ;;  %v1249_v10 = vld [vmem:[%s1240_s6] sm:$0xff]  ;;  %v174_v11 = vld [vmem:[%s1240_s6 + $0x8] sm:$0x1]  ;;  %v1253_v12 = vld [vmem:[%s1240_s6 + $0x18] sm:$0xff] }
  0x10   : > { %567 = vmatpush.bf16.msra.mxu3 %v1121_v2  ;;  %v190_v13 = vunpack.c.l.b16 %v174_v11  ;;  %v1020_v14 = vld [vmem:[%s1240_s6 + $0x20] sm:$0x1]  ;;  %v1257_v15 = vld [vmem:[%s1240_s6 + $0xc] sm:$0xff]  ;;  %v882_v16 = vld [vmem:[%s1240_s6 + $0x14] sm:$0x1]  ;;  %v196_v17 = vshrl.u32 %v1249_v10, 16 }
  0x11   : > { %451 = vmatpush.bf16.msra.mxu1 %v1135_v3  ;;  %v198_v18 = vshll.u32 %v1249_v10, 16  ;;  %v600_v19 = vunpack.c.l.b16 %v1020_v14  ;;  %v605_v20 = vshrl.u32 %v1253_v12, 16  ;;  %v177_v21 = vld [vmem:[%s1240_s6 + $0x20] sm:$0x1]  ;;  %v607_v24 = vshll.u32 %v1253_v12, 16  ;;  %v1272_v27 = vld [vmem:[%s1240_s6 + $0x18] sm:$0xff] }
  0x12   : > { %544 = vmatpush.bf16.msra.mxu2 %v1117_v7  ;;  %v1267_v23 = vpack.c.b16 %v190_v13, %v190_v13  ;;  %v280_v25 = vunpack.c.l.b16 %v882_v16  ;;  %v285_v26 = vshrl.u32 %v1257_v15, 16  ;;  %v287_v31 = vshll.u32 %v1257_v15, 16  ;;  %v1133_v33 = vld [vmem:[%s1439_s1 + $0xa0] sm:$0xff]  ;;  %v1150_v34 = vld [vmem:[%s1439_s1 + $0x118] sm:$0xff]  ;;  %v1130_v35 = vld [vmem:[%s1439_s1 + $0x88] sm:$0xff] }
  0x13   : > { %428 = vmatpush.bf16.msra.mxu0 %v1131_v9  ;;  %v200_v29 = vrot.slane %v198_v18, 1  ;;  %v1277_v30 = vpack.c.b16 %v600_v19, %v600_v19  ;;  %v191_v32 = vunpack.c.l.b16 %v177_v21  ;;  %v609_v37 = vrot.slane %v607_v24, 1  ;;  %v885_v40 = vld [vmem:[%s1240_s6 + $0x2c] sm:$0x1]  ;;  %v1146_v41 = vld [vmem:[%s1439_s1 + $0xf8] sm:$0xff]  ;;  %v1301_v46 = vld [vmem:[%s1240_s6 + $0x24] sm:$0xff] }
  0x14   : > { %568 = vmatpush.bf16.msra.mxu3 %v1120_v6  ;;  %v203_v36 = vshll.u32 %v1267_v23, 16  ;;  %v1290_v38 = vpack.c.b16 %v280_v25, %v280_v25  ;;  %v208_v39 = vshrl.u32 %v1272_v27, 16  ;;  %v289_v44 = vrot.slane %v287_v31, 1  ;;  %v1115_v47 = vld [vmem:[%s1439_s1 + $0x20] sm:$0xff]  ;;  %v1313_v56 = vld [vmem:[%s1240_s6 + $0x30] sm:$0xff]  ;;  %v1114_v3 = vld [vmem:[%s1439_s1 + $0x18] sm:$0xff] }
  0x15   : > { %452 = vmatpush.bf16.msra.mxu1 %v1134_v8  ;;  %v201_v42 = vor.u32 %v200_v29, %v196_v17  ;;  %v612_v43 = vshll.u32 %v1277_v30, 16  ;;  %v1298_v45 = vpack.c.b16 %v191_v32, %v191_v32  ;;  %v610_v49 = vor.u32 %v609_v37, %v605_v20  ;;  %v1129_v52 = vld [vmem:[%s1439_s1 + $0x80] sm:$0xff]  ;;  %v1023_v57 = vld [vmem:[%s1240_s6 + $0x38] sm:$0x1]  ;;  %v1149_v58 = vld [vmem:[%s1439_s1 + $0x110] sm:$0xff] }
  0x16   : > { %545 = vmatpush.bf16.msra.mxu2 %v1116_v22  ;;  %v205_v48 = vrot.slane %v203_v36, 1  ;;  %v292_v50 = vshll.u32 %v1290_v38, 16  ;;  %v210_v51 = vshll.u32 %v1272_v27, 16  ;;  %v281_v55 = vunpack.c.l.b16 %v885_v40  ;;  %v1145_v62 = vld [vmem:[%s1439_s1 + $0xf0] sm:$0xff]  ;;  %v1128_v8 = vld [vmem:[%s1439_s1 + $0x78] sm:$0xff]  ;;  %v1144_v25 = vld [vmem:[%s1439_s1 + $0xe8] sm:$0xff] }
  0x17   : > { %429 = vmatpush.bf16.msra.mxu0 %v1130_v35  ;;  %v614_v53 = vrot.slane %v612_v43, 1  ;;  %v215_v54 = vshll.u32 %v1298_v45, 16  ;;  %v290_v60 = vor.u32 %v289_v44, %v285_v26  ;;  %v297_v1 = vshrl.u32 %v1301_v46, 16  ;;  %v1127_v35 = vld [vmem:[%s1439_s1 + $0x70] sm:$0xff]  ;;  %v1147_v40 = vld [vmem:[%s1439_s1 + $0x100] sm:$0xff] }
  0x18   : > { %569 = vmatpush.bf16.msra.mxu3 %v1119_v28  ;;  %v206_v59 = vsel %vm194_vm0, %v201_v42, %v205_v48  ;;  %v212_v61 = vrot.slane %v210_v51, 1  ;;  %v1325_v0 = vpack.c.b16 %v281_v55, %v281_v55  ;;  %v299_v2 = vshll.u32 %v1301_v46, 16  ;;  %v1142_v42 = vld [vmem:[%s1439_s1 + $0xd8] sm:$0xff]  ;;  %v1111_v43 = vld [vmem:[%s1439_s1] sm:$0xff] }
  0x19   : > { %453 = vmatpush.bf16.msra.mxu1 %v1133_v33  ;;  %219 = vrot.lane.b32.xlu0 %v206_v59, %s1181_s7  ;;  %v615_v63 = vsel %vm194_vm0, %v610_v49, %v614_v53  ;;  %v294_v4 = vrot.slane %v292_v50, 1  ;;  %v217_v6 = vrot.slane %v215_v54, 1  ;;  %v601_v7 = vunpack.c.l.b16 %v1023_v57  ;;  %v1141_v50 = vld [vmem:[%s1439_s1 + $0xd0] sm:$0xff]  ;;  %v1140_v53 = vld [vmem:[%s1439_s1 + $0xc8] sm:$0xff]  ;;  %v1125_v59 = vld [vmem:[%s1439_s1 + $0x60] sm:$0xff] }
  0x1a   : > { %546 = vmatpush.bf16.msra.mxu2 %v1115_v47  ;;  %628 = vrot.lane.b32.xlu1 %v615_v63, %s1181_s7  ;;  %v213_v5 = vor.u32 %v212_v61, %v208_v39  ;;  %v301_v9 = vrot.slane %v299_v2, 1  ;;  %v304_v11 = vshll.u32 %v1325_v0, 16  ;;  %v619_v13 = vshll.u32 %v1313_v56, 16  ;;  %v1112_v39 = vld [vmem:[%s1439_s1 + $0x8] sm:$0xff] }
  0x1b   : > { %430 = vmatpush.bf16.msra.mxu0 %v1129_v52  ;;  %v224_v14 = vrot.slane %v1249_v10, 1  ;;  %v1339_v16 = vpack.c.b16 %v601_v7, %v601_v7  ;;  %v617_v17 = vshrl.u32 %v1313_v56, 16  ;;  %v225_v18 = vrot.slane %v1267_v23, 1  ;;  %v1113_v23 = vld [vmem:[%s1439_s1 + $0x10] sm:$0xff]  ;;  %v1126_v57 = vld [vmem:[%s1439_s1 + $0x68] sm:$0xff] }
  0x1c   : > { %770 = vmatpush.bf16.msrb.mxu3 %v1150_v34  ;;  %v312_v19 = vrot.slane %v1257_v15, 1  ;;  %v302_v20 = vor.u32 %v301_v9, %v297_v1  ;;  %v306_v21 = vrot.slane %v304_v11, 1  ;;  %v621_v22 = vrot.slane %v619_v13, 1  ;;  %v1148_v34 = vld [vmem:[%s1439_s1 + $0x108] sm:$0xff] }
  0x1d   : > { %747 = vmatpush.bf16.msrb.mxu1 %v1146_v41  ;;  %v313_v24 = vrot.slane %v1290_v38, 1  ;;  %v295_v26 = vsel %vm194_vm0, %v290_v60, %v294_v4  ;;  %v624_v28 = vshll.u32 %v1339_v16, 16  ;;  %v226_v29 = vsel %vm223_vm1, %v224_v14, %v225_v18  ;;  %v1143_v38 = vld [vmem:[%s1439_s1 + $0xe0] sm:$0xff] }
  0x1e   : > { %547 = vmatpush.bf16.msra.mxu2 %v1114_v3  ;;  %v218_v31 = vsel %vm194_vm0, %v213_v5, %v217_v6  ;;  %v307_v32 = vsel %vm194_vm0, %v302_v20, %v306_v21  ;;  %1016 = vmatmul.msk.bf16.vlgmr.msra.gmra.mxu3 %vm230_vm2, %v226_v29  ;;  %v622_v36 = vor.u32 %v621_v22, %v617_v17  ;;  %v227_v44 = vrot.slane %v1272_v27, 1 }
  0x1f   : > { %431 = vmatpush.bf16.msra.mxu0 %v1128_v8  ;;  %v314_v33 = vsel %vm223_vm1, %v312_v19, %v313_v24  ;;  %310 = vrot.lane.b32.xlu2 %v307_v32, %s1181_s7  ;;  %v626_v37 = vrot.slane %v624_v28, 1  ;;  %v228_v47 = vrot.slane %v1298_v45, 1  ;;  %v315_v48 = vrot.slane %v1301_v46, 1 }
  0x20   : > { %771 = vmatpush.bf16.msrb.mxu3 %v1149_v58  ;;  %966 = vmatmul.msk.bf16.vlgmr.msra.gmra.mxu1 %vm230_vm2, %v314_v33  ;;  %v316_v49 = vrot.slane %v1325_v0, 1  ;;  %v632_v45 = vrot.slane %v1253_v12, 1  ;;  %v633_v54 = vrot.slane %v1277_v30, 1  ;;  %v1139_v58 = vld [vmem:[%s1439_s1 + $0xc0] sm:$0xff]  ;;  %v635_v30 = vrot.slane %v1313_v56, 1 }
  0x21   : > { %748 = vmatpush.bf16.msrb.mxu1 %v1145_v62  ;;  %308 = vrot.lane.b32.xlu0 %v295_v26, %s1181_s7  ;;  %v627_v41 = vsel %vm194_vm0, %v622_v36, %v626_v37  ;;  %v229_v51 = vsel %vm223_vm1, %v227_v44, %v228_v47  ;;  %v636_v60 = vrot.slane %v1339_v16, 1 }
  0x22   : > { %221 = vrot.lane.b32.xlu1 %v218_v31, %s1181_s7  ;;  %548 = vmatpush.bf16.msra.mxu2 %v1113_v23  ;;  %v317_v52 = vsel %vm223_vm1, %v315_v48, %v316_v49  ;;  %v634_v55 = vsel %vm223_vm1, %v632_v45, %v633_v54  ;;  %v1172_v31 = vld [vmem:[%s1440_s2] ss:$0 sm:$0xff] }
  0x23   : > { %432 = vmatpush.bf16.msra.mxu0 %v1127_v35  ;;  %v637_v61 = vsel %vm223_vm1, %v635_v30, %v636_v60 }
  0x24   : > { %772 = vmatpush.bf16.msrb.mxu3 %v1148_v34 }
  0x25   : > { %749 = vmatpush.bf16.msrb.mxu1 %v1144_v25 }
  0x26   : > { %549 = vmatpush.bf16.msra.mxu2 %v1112_v39 }
  0x27   : > { %630 = vrot.lane.b32.xlu2 %v627_v41, %s1181_s7  ;;  %433 = vmatpush.bf16.msra.mxu0 %v1126_v57 }
  0x28   : > { %773 = vmatpush.bf16.msrb.mxu3 %v1147_v40 }
  0x29   : > { %750 = vmatpush.bf16.msrb.mxu1 %v1143_v38 }
  0x2a   : > { %550 = vmatpush.bf16.msra.mxu2 %v1111_v43 }
  0x2b   : > { %434 = vmatpush.bf16.msra.mxu0 %v1125_v59 }
  0x2d   : > { %751 = vmatpush.bf16.msrb.mxu1 %v1142_v42 }
  0x2e   : > { %1017 = vmatmul.msk.bf16.gmra.mxu3 %vm230_vm2, %v229_v51 }
  0x30   : > { %967 = vmatmul.msk.bf16.gmra.mxu1 %vm230_vm2, %v317_v52 }
  0x31   : > { %752 = vmatpush.bf16.msrb.mxu1 %v1141_v50 }
  0x35   : > { %753 = vmatpush.bf16.msrb.mxu1 %v1140_v53 }
  0x39   : > { %754 = vmatpush.bf16.msrb.mxu1 %v1139_v58 }
  0x3e   : > { %1104 = vmatmul.msk.bf16.vlgmr.msrb.gmra.mxu3 %vm230_vm2, %v634_v55 }
  0x4e   : > { %1105 = vmatmul.msk.bf16.gmra.mxu3 %vm230_vm2, %v637_v61 }
  0x79   : > { %v311_v2 = vpop.permute.xlu2 %310 }
  0x81   : > { %v631_v6 = vpop.permute.xlu2 %630 }
  0x8b   : > { %v220_v62 = vpop.permute.xlu0 %219 }
  0x8c   : > { %v232_v63 = vsel %vm230_vm2, %v1249_v10, %v220_v62  ;;  %v629_v0 = vpop.permute.xlu1 %628  ;;  %v642_v10 = vsel %vm230_vm2, %v1313_v56, %v631_v6 }
  0x8d   : > { %551 = vmatmul.bf16.vlgmr.msra.gmra.mxu2 %v232_v63  ;;  %v639_v1 = vsel %vm230_vm2, %v1253_v12, %v629_v0  ;;  %v322_v12 = vsel %vm230_vm2, %v1301_v46, %v311_v2 }
  0x8e   : > { %755 = vmatmul.bf16.vlgmr.msrb.gmra.mxu1 %v639_v1 }
  0x93   : > { %v309_v3 = vpop.permute.xlu0 %308 }
  0x94   : > { %v319_v4 = vsel %vm230_vm2, %v1257_v15, %v309_v3  ;;  %v222_v5 = vpop.permute.xlu1 %221 }
  0x95   : > { %435 = vmatmul.bf16.vlgmr.msra.gmra.mxu0 %v319_v4  ;;  %v235_v7 = vsel %vm230_vm2, %v1272_v27, %v222_v5 }
  0x9d   : > { %556 = vmatmul.bf16.gmra.mxu2 %v235_v7  ;;  %v455_v8 = vpop.f32.mrf.mxu1 }
  0x9e   : > { %760 = vmatmul.bf16.gmra.mxu1 %v642_v10 }
  0xa1   : > { %v571_v9 = vpop.f32.mrf.mxu3 }
  0xa5   : > { %440 = vmatmul.bf16.gmra.mxu0 %v322_v12  ;;  %v457_v11 = vpop.f32.mrf.mxu1 }
  0xa9   : > { %v573_v13 = vpop.f32.mrf.mxu3 }
  0xad   : > { %v460_v15 = vpop.f32.mrf.mxu1 }
  0xb1   : > { %v576_v14 = vpop.f32.mrf.mxu3 }
  0xb5   : > { %v462_v16 = vpop.f32.mrf.mxu1 }
  0xb9   : > { %v578_v17 = vpop.f32.mrf.mxu3 }
  0xc1   : > { %v775_v19 = vpop.f32.mrf.mxu3 }
  0xc9   : > { %v777_v24 = vpop.f32.mrf.mxu3 }
  0xd1   : > { %v780_v38 = vpop.f32.mrf.mxu3 }
  0xd9   : > { %v782_v52 = vpop.f32.mrf.mxu3 }
 0x10b   : > { %v756_v18 = vpop.f32.mrf.mxu1 }
 0x10c   : > { %v776_v46 = vadd.f32 %v775_v19, %v756_v18 }
 0x110   : > { %v552_v27 = vpop.f32.mrf.mxu2 }
 0x112   : > { %v436_v20 = vpop.f32.mrf.mxu0 }
 0x113   : > { %v456_v21 = vadd.f32 %v455_v8, %v436_v20  ;;  %v758_v22 = vpop.f32.mrf.mxu1 }
 0x114   : > { %v778_v33 = vadd.f32 %v777_v24, %v758_v22 }
 0x115   : > { %v553_v56 = vadd.f32 %v552_v27, %v456_v21 }
 0x117   : > { %v572_v26 = vadd.f32 %v571_v9, %v553_v56 }
 0x118   : > { %v554_v25 = vpop.f32.mrf.mxu2 }
 0x119   : > { %v785_v23 = vadd.f32 %v776_v46, %v572_v26 }
 0x11a   : > { %v438_v28 = vpop.f32.mrf.mxu0 }
 0x11b   : > { %v458_v29 = vadd.f32 %v457_v11, %v438_v28  ;;  %v793_v35 = vadd.f32 %v1172_v31, %v785_v23  ;;  %v761_v37 = vpop.f32.mrf.mxu1 }
 0x11c   : > { %v781_v49 = vadd.f32 %v780_v38, %v761_v37 }
 0x11d   : > { %v555_v32 = vadd.f32 %v554_v25, %v458_v29  ;;  %v797_v43 = vmax.f32 %v793_v35, 0.0 }
 0x11f   : > { %v574_v34 = vadd.f32 %v573_v13, %v555_v32 }
 0x120   : > { %v557_v39 = vpop.f32.mrf.mxu2 }
 0x121   : > { %v786_v36 = vadd.f32 %v778_v33, %v574_v34 }
 0x122   : > { %v441_v40 = vpop.f32.mrf.mxu0 }
 0x123   : > { %v794_v41 = vadd.f32 %v1172_v31, %v786_v36  ;;  %v461_v42 = vadd.f32 %v460_v15, %v441_v40  ;;  %v763_v45 = vpop.f32.mrf.mxu1 }
 0x124   : > { %v783_v58 = vadd.f32 %v782_v52, %v763_v45 }
 0x125   : > { %v798_v44 = vmax.f32 %v794_v41, 0.0  ;;  %v558_v47 = vadd.f32 %v557_v39, %v461_v42 }
 0x127   : > { %v1154_v48 = vpack.c.bf16 %v798_v44, %v797_v43  ;;  %v577_v50 = vadd.f32 %v576_v14, %v558_v47 }
 0x128   : > { %v559_v54 = vpop.f32.mrf.mxu2 }
 0x129   : > { %1155 = vst [vmem:[%s170_s21] sm:$0xff] %v1154_v48   ;;  %v787_v55 = vadd.f32 %v781_v49, %v577_v50 }
 0x12a   : > { %v443_v51 = vpop.f32.mrf.mxu0 }
 0x12b   : > { %v463_v53 = vadd.f32 %v462_v16, %v443_v51  ;;  %v795_v30 = vadd.f32 %v1172_v31, %v787_v55 }
 0x12d   : > { %v560_v57 = vadd.f32 %v559_v54, %v463_v53  ;;  %v799_v62 = vmax.f32 %v795_v30, 0.0 }
 0x12f   : > { %v579_v59 = vadd.f32 %v578_v17, %v560_v57 }
 0x131   : > { %v788_v60 = vadd.f32 %v783_v58, %v579_v59 }
 0x133   : > { %v796_v61 = vadd.f32 %v1172_v31, %v788_v60 }
 0x135   : > { %v800_v63 = vmax.f32 %v796_v61, 0.0 }
 0x137   : > { %v1159_v0 = vpack.c.bf16 %v800_v63, %v799_v62 }
 0x139   : > { %1161 = vst [vmem:[%s170_s21 + $0x8] sm:$0xff] %v1159_v0  }
 0x13a PF: > { %s13_s12 = sadd.s32 1, %s1179_s12  }
 0x13b   : > { %p10_p4 = scmp.ge.s32.totalorder %s13_s12, 4  }
 0x13d   :  { %12 = sbr.rel (!%p10_p4) target bundleno = 1 (0x1), region = 66 }

// kernel: _lambda_.10
= control target key start
LH: loop header
LB: loop body
LE: loop exit
PB: predicated region body
PF: predicated region fallthrough
CT: control target
= control target key end

     0   :  { %s1958_s12 = smov 0   ;;  %s2607_s0 = inlined_call_operand.vmem [shape: bf16[2,10,1,18,32], index: 0, kind: input, shape index: {}]   ;;  %s2608_s1 = inlined_call_operand.vmem [shape: bf16[3,96,32], index: 1, kind: input, shape index: {}]   ;;  %s2609_s2 = inlined_call_operand.vmem [shape: f32[1,32], index: 2, kind: input, shape index: {}]   ;;  %s2610_s3 = inlined_call_operand.vmem [shape: bf16[2,10,18,32], index: 3, kind: output, shape index: {}]  }
   0x1 LB: > { %s1581_s13 = sadd.s32 4294967295, %s1933_s12   ;;  %p1585_p0 = scmp.ge.s32.totalorder %s1933_s12, 1  ;;  %s1933_s12 = sphi %s1958_s12, %s13_s12  }
   0x2   : > { %p137_p1 = scmp.lt.s32.totalorder %s1933_s12, 3 }
   0x4   : > { %p138_p2 = pnand %p1585_p0, %p137_p1 }
   0x5   : > { %p161_p3 = scmp.lt.s32.totalorder (!%p138_p2), %s1581_s13, 1  ;;  %s1935_s18 = smov (!%p138_p2), 64  }
   0x6   : > { %141 = sbr.rel (%p138_p2) target bundleno = 410 (0x19a), region = 32  ;;  %s1936_s19 = smov (!%p138_p2), 32  }
   0xb   : > { %s2612_s13 = smov (!%p161_p3, %s1581_s13), 1  ;;  %vm373_vm0 = vcmask 1046528   ;;  %vm260_vm1 = vsmask.f32 7424  ;;  %vm414_vm2 = vcmask 261120   ;;  %vm431_vm3 = vcmask 523264  }
   0xc   : > { %s1914_s14 = smul.u32 120, %s2612_s13  ;;  %vm782_vm4 = vcmask 785408   ;;  %vm1494_vm5 = vcmask 257024   ;;  %vm1497_vm6 = vcmask 253952   ;;  %vm1404_vm7 = vcmask 1040384  }
   0xe   : > { %s1974_s17 = scalar_lea.vmem %s2607_s0, %s1914_s14 }
   0xf   : > { %v1977_v0 = vld [vmem:[%s1974_s17 + $0x54] sm:$0xff]  ;;  %v1640_v1 = vld [vmem:[%s1974_s17 + $0x5c] sm:$0x1]  ;;  %v1981_v2 = vld [vmem:[%s1974_s17] sm:$0xff] }
  0x10   : > { %v539_v3 = vunpack.c.l.b16 %v1640_v1  ;;  %v174_v4 = vld [vmem:[%s1974_s17 + $0x8] sm:$0x1]  ;;  %v1754_v5 = vld [vmem:[%s1974_s17 + $0x20] sm:$0x1]  ;;  %v679_v9 = vrot.slane %v1977_v0, 1  ;;  %v624_v10 = vshll.u32 %v1977_v0, 16 }
  0x11   : > { %v244_v6 = vunpack.c.l.b16 %v174_v4  ;;  %v1022_v7 = vunpack.c.l.b16 %v1754_v5  ;;  %v374_v12 = vrot.slane %v1981_v2, 1  ;;  %v1989_v13 = vld [vmem:[%s1974_s17 + $0x18] sm:$0xff]  ;;  %v1622_v16 = vld [vmem:[%s1974_s17 + $0x14] sm:$0x1]  ;;  %v622_v18 = vshrl.u32 %v1977_v0, 16  ;;  %v2003_v34 = vld [vmem:[%s1974_s17 + $0xc] sm:$0xff] }
  0x12   : > { %v547_v8 = vpack.c.b16 %v539_v3, %v539_v3  ;;  %v626_v19 = vrot.slane %v624_v10, 1  ;;  %v1150_v23 = vrot.slane %v1989_v13, 1  ;;  %v533_v24 = vunpack.c.l.b16 %v1622_v16  ;;  %v1757_v33 = vld [vmem:[%s1974_s17 + $0x2c] sm:$0x1]  ;;  %v1643_v42 = vld [vmem:[%s1974_s17 + $0x68] sm:$0x1] }
  0x13   : > { %v252_v11 = vpack.c.b16 %v244_v6, %v244_v6  ;;  %v1030_v15 = vpack.c.b16 %v1022_v7, %v1022_v7  ;;  %v1041_v26 = vshll.u32 %v1989_v13, 16  ;;  %v262_v27 = vshrl.u32 %v1981_v2, 16  ;;  %v2009_v43 = vld [vmem:[%s1974_s17 + $0x24] sm:$0xff]  ;;  %v1625_v54 = vld [vmem:[%s1974_s17 + $0x20] sm:$0x1]  ;;  %v2030_v4 = vld [vmem:[%s1974_s17 + $0x18] sm:$0xff] }
  0x14   : > { %v680_v14 = vrot.slane %v547_v8, 1  ;;  %v629_v20 = vshll.u32 %v547_v8, 16  ;;  %v264_v28 = vshll.u32 %v1981_v2, 16  ;;  %v627_v29 = vor.u32 %v626_v19, %v622_v18  ;;  %v177_v58 = vld [vmem:[%s1974_s17 + $0x14] sm:$0x1]  ;;  %v2025_v59 = vld [vmem:[%s1974_s17 + $0x60] sm:$0xff] }
  0x15   : > { %v375_v17 = vrot.slane %v252_v11, 1  ;;  %v1151_v25 = vrot.slane %v1030_v15, 1  ;;  %v269_v31 = vshll.u32 %v252_v11, 16  ;;  %v541_v35 = vpack.c.b16 %v533_v24, %v533_v24  ;;  %v2035_v8 = vld [vmem:[%s1974_s17 + $0xc] sm:$0xff] }
  0x16   : > { %v681_v21 = vsel %vm373_vm0, %v679_v9, %v680_v14  ;;  %v631_v30 = vrot.slane %v629_v20, 1  ;;  %v266_v32 = vrot.slane %v264_v28, 1  ;;  %v1039_v36 = vshrl.u32 %v1989_v13, 16 }
  0x17   : > { %697 = vrot.lane.b32.xlu1 %v681_v21, %s1935_s18  ;;  %v376_v22 = vsel %vm373_vm0, %v374_v12, %v375_v17  ;;  %v271_v37 = vrot.slane %v269_v31, 1  ;;  %v1152_v38 = vsel %vm373_vm0, %v1150_v23, %v1151_v25  ;;  %v1043_v39 = vrot.slane %v1041_v26, 1  ;;  %v192_v25 = vld [vmem:[%s1974_s17 + $0x50] sm:$0x1] }
  0x18   : > { %398 = vrot.lane.b32.xlu0 %v376_v22, %s1935_s18  ;;  %v1046_v40 = vshll.u32 %v1030_v15, 16  ;;  %v267_v41 = vor.u32 %v266_v32, %v262_v27  ;;  %v632_v44 = vsel %vm260_vm1, %v627_v29, %v631_v30  ;;  %v1023_v45 = vunpack.c.l.b16 %v1757_v33  ;;  %v2051_v33 = vld [vmem:[%s1974_s17 + $0x48] sm:$0xff] }
  0x19   : > { %v661_v47 = vrot.slane %v2003_v34, 1  ;;  %v540_v48 = vunpack.c.l.b16 %v1643_v42  ;;  %v662_v49 = vrot.slane %v541_v35, 1  ;;  %v1044_v50 = vor.u32 %v1043_v39, %v1039_v36 }
  0x1a   : > { %v272_v46 = vsel %vm260_vm1, %v267_v41, %v271_v37  ;;  %v1048_v51 = vrot.slane %v1046_v40, 1  ;;  %v1053_v52 = vshll.u32 %v2009_v43, 16  ;;  %v2018_v53 = vpack.c.b16 %v1023_v45, %v1023_v45 }
  0x1b   : > { %357 = vrot.lane.b32.xlu2 %v272_v46, %s1936_s19  ;;  %v550_v55 = vshrl.u32 %v2003_v34, 16  ;;  %v552_v56 = vshll.u32 %v2003_v34, 16  ;;  %v557_v57 = vshll.u32 %v541_v35, 16  ;;  %v548_v60 = vpack.c.b16 %v540_v48, %v540_v48 }
  0x1c   : > { %v663_v63 = vsel %vm373_vm0, %v661_v47, %v662_v49  ;;  %v1051_v1 = vshrl.u32 %v2009_v43, 16  ;;  %v1055_v3 = vrot.slane %v1053_v52, 1  ;;  %v534_v5 = vunpack.c.l.b16 %v1625_v54  ;;  %v1760_v54 = vld [vmem:[%s1974_s17 + $0x38] sm:$0x1] }
  0x1d   : > { %v554_v61 = vrot.slane %v552_v56, 1  ;;  %v559_v62 = vrot.slane %v557_v57, 1  ;;  %v1049_v6 = vsel %vm260_vm1, %v1044_v50, %v1048_v51  ;;  %v1058_v7 = vshll.u32 %v2018_v53, 16  ;;  %v2068_v57 = vld [vmem:[%s1974_s17 + $0x30] sm:$0xff] }
  0x1e   : > { %v245_v9 = vunpack.c.l.b16 %v177_v58  ;;  %v634_v11 = vshrl.u32 %v2025_v59, 16  ;;  %v636_v12 = vshll.u32 %v2025_v59, 16  ;;  %v682_v14 = vrot.slane %v2025_v59, 1 }
  0x1f   : > { %1174 = vrot.lane.b32.xlu1 %v1152_v38, %s1935_s18  ;;  %v555_v10 = vor.u32 %v554_v61, %v550_v55  ;;  %v683_v15 = vrot.slane %v548_v60, 1  ;;  %v641_v17 = vshll.u32 %v548_v60, 16  ;;  %v1056_v18 = vor.u32 %v1055_v3, %v1051_v1 }
  0x20   : > { %657 = vrot.lane.b32.xlu0 %v632_v44, %s1936_s19  ;;  %v542_v19 = vpack.c.b16 %v534_v5, %v534_v5  ;;  %v564_v20 = vshll.u32 %v2030_v4, 16  ;;  %v638_v21 = vrot.slane %v636_v12, 1  ;;  %v1060_v22 = vrot.slane %v1058_v7, 1 }
  0x21   : > { %v560_v16 = vsel %vm260_vm1, %v555_v10, %v559_v62  ;;  %v253_v23 = vpack.c.b16 %v245_v9, %v245_v9  ;;  %v276_v24 = vshll.u32 %v2035_v8, 16  ;;  %v643_v26 = vrot.slane %v641_v17, 1  ;;  %v180_v10 = vld [vmem:[%s1974_s17 + $0x20] sm:$0x1] }
  0x22   : > { %v639_v27 = vor.u32 %v638_v21, %v634_v11  ;;  %v562_v28 = vshrl.u32 %v2030_v4, 16  ;;  %v274_v29 = vshrl.u32 %v2035_v8, 16  ;;  %v684_v30 = vsel %vm373_vm0, %v682_v14, %v683_v15  ;;  %v2080_v11 = vld [vmem:[%s1974_s17 + $0x24] sm:$0xff] }
  0x23   : > { %645 = vrot.lane.b32.xlu2 %v560_v16, %s1936_s19  ;;  %v566_v31 = vrot.slane %v564_v20, 1  ;;  %v569_v32 = vshll.u32 %v542_v19, 16  ;;  %v250_v35 = vunpack.c.l.b16 %v192_v25  ;;  %v1061_v36 = vsel %vm260_vm1, %v1056_v18, %v1060_v22  ;;  %v2088_v22 = vld [vmem:[%s1974_s17 + $0x18] sm:$0xff] }
  0x24   : > { %v278_v37 = vrot.slane %v276_v24, 1  ;;  %v281_v38 = vshll.u32 %v253_v23, 16  ;;  %v644_v39 = vsel %vm260_vm1, %v639_v27, %v643_v26  ;;  %v336_v44 = vshll.u32 %v2051_v33, 16  ;;  %v1763_v26 = vld [vmem:[%s1974_s17 + $0x44] sm:$0x1] }
  0x25   : > { %v567_v40 = vor.u32 %v566_v31, %v562_v28  ;;  %v571_v41 = vrot.slane %v569_v32, 1  ;;  %v258_v42 = vpack.c.b16 %v250_v35, %v250_v35  ;;  %v1153_v47 = vrot.slane %v2009_v43, 1  ;;  %v195_v27 = vld [vmem:[%s1974_s17 + $0x5c] sm:$0x1] }
  0x26   : > { %v279_v45 = vor.u32 %v278_v37, %v274_v29  ;;  %v283_v46 = vrot.slane %v281_v38, 1  ;;  %v1154_v48 = vrot.slane %v2018_v53, 1  ;;  %v334_v50 = vshrl.u32 %v2051_v33, 16 }
  0x27   : > { %685 = vrot.lane.b32.xlu1 %v663_v63, %s1935_s18  ;;  %v572_v49 = vsel %vm260_vm1, %v567_v40, %v571_v41  ;;  %v338_v51 = vrot.slane %v336_v44, 1  ;;  %v341_v52 = vshll.u32 %v258_v42, 16  ;;  %v1024_v58 = vunpack.c.l.b16 %v1760_v54  ;;  %v1628_v63 = vld [vmem:[%s1974_s17 + $0x2c] sm:$0x1] }
  0x28   : > { %1134 = vrot.lane.b32.xlu0 %v1049_v6, %s1936_s19  ;;  %v284_v55 = vsel %vm260_vm1, %v279_v45, %v283_v46  ;;  %v1155_v56 = vsel %vm373_vm0, %v1153_v47, %v1154_v48  ;;  %v664_v61 = vrot.slane %v2030_v4, 1  ;;  %v665_v62 = vrot.slane %v542_v19, 1 }
  0x29   : > { %v339_v53 = vor.u32 %v338_v51, %v334_v50  ;;  %v343_v60 = vrot.slane %v341_v52, 1  ;;  %v377_v1 = vrot.slane %v2035_v8, 1  ;;  %v378_v3 = vrot.slane %v253_v23, 1 }
  0x2a   : > { %v1065_v5 = vshll.u32 %v2068_v57, 16  ;;  %v1032_v6 = vpack.c.b16 %v1024_v58, %v1024_v58  ;;  %v666_v9 = vsel %vm373_vm0, %v664_v61, %v665_v62  ;;  %v535_v12 = vunpack.c.l.b16 %v1628_v63  ;;  %v183_v58 = vld [vmem:[%s1974_s17 + $0x2c] sm:$0x1] }
  0x2b   : > { %659 = vrot.lane.b32.xlu2 %v644_v39, %s1936_s19  ;;  %v344_v7 = vsel %vm260_vm1, %v339_v53, %v343_v60  ;;  %v379_v14 = vsel %vm373_vm0, %v377_v1, %v378_v3  ;;  %v1063_v15 = vshrl.u32 %v2068_v57, 16  ;;  %v1156_v18 = vrot.slane %v2068_v57, 1  ;;  %v2103_v39 = vld [vmem:[%s1974_s17 + $0x3c] sm:$0xff] }
  0x2c   : > { %v1067_v16 = vrot.slane %v1065_v5, 1  ;;  %v1070_v17 = vshll.u32 %v1032_v6, 16  ;;  %v1157_v19 = vrot.slane %v1032_v6, 1  ;;  %v392_v20 = vrot.slane %v2051_v33, 1  ;;  %v2126_v5 = vld [vmem:[%s1974_s17 + $0x24] sm:$0xff] }
  0x2d   : > { %v393_v21 = vrot.slane %v258_v42, 1  ;;  %v246_v23 = vunpack.c.l.b16 %v180_v10  ;;  %v2091_v24 = vpack.c.b16 %v535_v12, %v535_v12  ;;  %v576_v25 = vshll.u32 %v2080_v11, 16  ;;  %v2106_v42 = vld [vmem:[%s1974_s17 + $0x54] sm:$0xff] }
  0x2e   : > { %v1068_v28 = vor.u32 %v1067_v16, %v1063_v15  ;;  %v1072_v29 = vrot.slane %v1070_v17, 1  ;;  %v1158_v31 = vsel %vm373_vm0, %v1156_v18, %v1157_v19  ;;  %v1025_v40 = vunpack.c.l.b16 %v1763_v26  ;;  %v2140_v18 = vld [vmem:[%s2608_s1 + $0x28] sm:$0xff] }
  0x2f   : > { %699 = vrot.lane.b32.xlu1 %v684_v30, %s1935_s18  ;;  %v288_v30 = vshll.u32 %v2088_v22, 16  ;;  %v394_v32 = vsel %vm373_vm0, %v392_v20, %v393_v21  ;;  %v254_v35 = vpack.c.b16 %v246_v23, %v246_v23  ;;  %v578_v37 = vrot.slane %v576_v25, 1  ;;  %902 = vmatpush.bf16.msra.mxu1 %v2140_v18 }
  0x30   : > { %1136 = vrot.lane.b32.xlu0 %v1061_v36, %s1936_s19  ;;  %v574_v36 = vshrl.u32 %v2080_v11, 16  ;;  %v581_v38 = vshll.u32 %v2091_v24, 16  ;;  %v251_v41 = vunpack.c.l.b16 %v195_v27  ;;  %v1073_v44 = vsel %vm260_vm1, %v1068_v28, %v1072_v29  ;;  %v1631_v29 = vld [vmem:[%s1974_s17 + $0x38] sm:$0x1] }
  0x31   : > { %v286_v45 = vshrl.u32 %v2088_v22, 16  ;;  %v290_v46 = vrot.slane %v288_v30, 1  ;;  %v293_v47 = vshll.u32 %v254_v35, 16  ;;  %v380_v48 = vrot.slane %v2088_v22, 1 }
  0x32   : > { %v579_v50 = vor.u32 %v578_v37, %v574_v36  ;;  %v583_v51 = vrot.slane %v581_v38, 1  ;;  %v2113_v52 = vpack.c.b16 %v1025_v40, %v1025_v40  ;;  %v1077_v54 = vshll.u32 %v2103_v39, 16 }
  0x33   : > { %1176 = vrot.lane.b32.xlu2 %v1155_v56, %s1935_s18  ;;  %v348_v56 = vshll.u32 %v2106_v42, 16  ;;  %v291_v53 = vor.u32 %v290_v46, %v286_v45  ;;  %v295_v60 = vrot.slane %v293_v47, 1  ;;  %v1075_v62 = vshrl.u32 %v2103_v39, 16 }
  0x34   : > { %v1079_v63 = vrot.slane %v1077_v54, 1  ;;  %v1082_v1 = vshll.u32 %v2113_v52, 16  ;;  %v346_v3 = vshrl.u32 %v2106_v42, 16  ;;  %v247_v6 = vunpack.c.l.b16 %v183_v58 }
  0x35   : > { %v296_v12 = vsel %vm260_vm1, %v291_v53, %v295_v60  ;;  %v300_v17 = vshll.u32 %v2126_v5, 16  ;;  %v667_v21 = vrot.slane %v2080_v11, 1  ;;  %v668_v23 = vrot.slane %v2091_v24, 1 }
  0x36   : > { %v1084_v15 = vrot.slane %v1082_v1, 1  ;;  %v2133_v16 = vpack.c.b16 %v247_v6, %v247_v6  ;;  %v298_v26 = vshrl.u32 %v2126_v5, 16  ;;  %v536_v24 = vunpack.c.l.b16 %v1631_v29  ;;  %v2197_v6 = vld [vmem:[%s2608_s1 + $0x10] sm:$0xff] }
  0x37   : > { %647 = vrot.lane.b32.xlu1 %v572_v49, %s1936_s19  ;;  %v381_v49 = vrot.slane %v254_v35, 1  ;;  %v302_v27 = vrot.slane %v300_v17, 1  ;;  %v2158_v35 = vld [vmem:[%s2608_s1 + $0x20] sm:$0xff]  ;;  %v1159_v38 = vrot.slane %v2103_v39, 1  ;;  %v1160_v40 = vrot.slane %v2113_v52, 1 }
  0x38   : > { %359 = vrot.lane.b32.xlu0 %v284_v55, %s1936_s19  ;;  %v2117_v55 = vpack.c.b16 %v251_v41, %v251_v41  ;;  %v305_v28 = vshll.u32 %v2133_v16, 16  ;;  %v1772_v41 = vld [vmem:[%s1974_s17 + $0x68] sm:$0x1]  ;;  %v395_v45 = vrot.slane %v2106_v42, 1  ;;  %903 = vmatpush.bf16.msra.mxu1 %v2158_v35 }
  0x39   : > { %v382_v61 = vsel %vm373_vm0, %v380_v48, %v381_v49  ;;  %v303_v36 = vor.u32 %v302_v27, %v298_v26  ;;  %v2175_v48 = vld [vmem:[%s2608_s1 + $0x18] sm:$0xff]  ;;  %v544_v49 = vpack.c.b16 %v536_v24, %v536_v24  ;;  %v1161_v54 = vsel %vm373_vm0, %v1159_v38, %v1160_v40 }
  0x3a   : > { %v353_v10 = vshll.u32 %v2117_v55, 16  ;;  %v307_v37 = vrot.slane %v305_v28, 1  ;;  %v396_v46 = vrot.slane %v2117_v55, 1  ;;  %v1766_v55 = vld [vmem:[%s1974_s17 + $0x50] sm:$0x1] }
  0x3b   : > { %400 = vrot.lane.b32.xlu2 %v379_v14, %s1935_s18  ;;  %v1080_v14 = vor.u32 %v1079_v63, %v1075_v62  ;;  %v593_v60 = vshll.u32 %v544_v49, 16  ;;  %v2189_v62 = vld [vmem:[%s1974_s17 + $0x48] sm:$0xff]  ;;  %v1026_v63 = vunpack.c.l.b16 %v1766_v55  ;;  %v1878_v55 = vld [vmem:[%s2608_s1 + $0x40] sm:$0xff] }
  0x3c   : > { %v355_v20 = vrot.slane %v353_v10, 1  ;;  %v308_v52 = vsel %vm260_vm1, %v303_v36, %v307_v37  ;;  %904 = vmatpush.bf16.msra.mxu1 %v2175_v48  ;;  %v384_v10 = vrot.slane %v2133_v16, 1  ;;  %v2213_v16 = vld [vmem:[%s2608_s1 + $0x8] sm:$0xff]  ;;  %v2232_v37 = vld [vmem:[%s1974_s17 + $0x30] sm:$0xff]  ;;  %v1087_v40 = vshrl.u32 %v2189_v62, 16 }
  0x3d   : > { %v1085_v25 = vsel %vm260_vm1, %v1080_v14, %v1084_v15  ;;  %v1880_v14 = vld [vmem:[%s2608_s1 + $0x50] sm:$0xff]  ;;  %v186_v15 = vld [vmem:[%s1974_s17 + $0x38] sm:$0x1] }
  0x3e   : > { %v248_v36 = vunpack.c.l.b16 %v186_v15 }
  0x3f   : > { %369 = vrot.lane.b32.xlu1 %v344_v7, %s1936_s19  ;;  %v584_v7 = vsel %vm260_vm1, %v579_v50, %v583_v51  ;;  %v2178_v50 = vld [vmem:[%s1974_s17 + $0x60] sm:$0xff]  ;;  %v1028_v51 = vunpack.c.l.b16 %v1772_v41 }
  0x40   : > { %687 = vrot.lane.b32.xlu0 %v666_v9, %s1935_s18  ;;  %v350_v9 = vrot.slane %v348_v56, 1  ;;  %v397_v56 = vsel %vm373_vm0, %v395_v45, %v396_v46  ;;  %905 = vmatpush.bf16.msra.mxu1 %v2197_v6  ;;  %v1111_v26 = vshrl.u32 %v2178_v50, 16  ;;  %v1162_v45 = vrot.slane %v2189_v62, 1 }
  0x41   : > { %v2191_v1 = vpack.c.b16 %v1028_v51, %v1028_v51  ;;  %v2242_v51 = vld [vmem:[%s2608_s1] sm:$0xff] }
  0x42   : > { %v351_v19 = vor.u32 %v350_v9, %v346_v3  ;;  %v1113_v3 = vshll.u32 %v2178_v50, 16  ;;  %v383_v9 = vrot.slane %v2126_v5, 1 }
  0x43   : > { %1138 = vrot.lane.b32.xlu2 %v1073_v44, %s1936_s19  ;;  %v1881_v44 = vld [vmem:[%s2608_s1 + $0x58] sm:$0xff]  ;;  %v1118_v28 = vshll.u32 %v2191_v1, 16 }
  0x44   : > { %v356_v30 = vsel %vm260_vm1, %v351_v19, %v355_v20  ;;  %1896 = vmatpush.bf16.msra.mxu3 %v1881_v44  ;;  %801 = vmatpush.bf16.msra.mxu0 %v1881_v44  ;;  %v595_v19 = vrot.slane %v593_v60, 1  ;;  %v1089_v20 = vshll.u32 %v2189_v62, 16  ;;  %v1115_v27 = vrot.slane %v1113_v3, 1  ;;  %v1769_v60 = vld [vmem:[%s1974_s17 + $0x5c] sm:$0x1] }
  0x45   : > { %906 = vmatpush.bf16.msra.mxu1 %v2213_v16  ;;  %v1027_v15 = vunpack.c.l.b16 %v1769_v60  ;;  %v2319_v60 = vld [vmem:[%s1974_s17 + $0x6c] sm:$0xff] }
  0x46   : > { %v1091_v41 = vrot.slane %v1089_v20, 1  ;;  %v310_v20 = vshrl.u32 %v2232_v37, 16 }
  0x47   : > { %1178 = vrot.lane.b32.xlu1 %v1158_v31, %s1935_s18  ;;  %v669_v31 = vsel %vm373_vm0, %v667_v21, %v668_v23  ;;  %v2218_v21 = vld [vmem:[%s2608_s1 + $0x88] sm:$0xff] }
  0x48   : > { %410 = vrot.lane.b32.xlu0 %v394_v32, %s1935_s18  ;;  %v2153_v32 = vld [vmem:[%s1974_s17 + $0x30] sm:$0xff]  ;;  %1897 = vmatpush.bf16.msra.mxu3 %v1880_v14  ;;  %v1879_v23 = vld [vmem:[%s2608_s1 + $0x48] sm:$0xff] }
  0x49   : > { %v588_v47 = vshll.u32 %v2153_v32, 16  ;;  %v586_v58 = vshrl.u32 %v2153_v32, 16  ;;  %802 = vmatpush.bf16.msra.mxu0 %v1880_v14  ;;  %1289 = vmatpush.bf16.msra.mxu2 %v2218_v21  ;;  %v2268_v14 = vld [vmem:[%s1974_s17 + $0x54] sm:$0xff] }
  0x4a   : > { %907 = vmatpush.bf16.msra.mxu1 %v2242_v51 }
  0x4b   : > { %361 = vrot.lane.b32.xlu2 %v296_v12, %s1936_s19  ;;  %v590_v53 = vrot.slane %v588_v47, 1  ;;  %v1634_v12 = vld [vmem:[%s1974_s17 + $0x44] sm:$0x1]  ;;  %v1116_v47 = vor.u32 %v1115_v27, %v1111_v26 }
  0x4c   : > { %v537_v24 = vunpack.c.l.b16 %v1634_v12  ;;  %1898 = vmatpush.bf16.msra.mxu3 %v1879_v23 }
  0x4d   : > { %v591_v17 = vor.u32 %v590_v53, %v586_v58  ;;  %803 = vmatpush.bf16.msra.mxu0 %v1879_v23  ;;  %v2257_v58 = vpack.c.b16 %v248_v36, %v248_v36  ;;  %v312_v53 = vshll.u32 %v2232_v37, 16  ;;  %v2294_v36 = vld [vmem:[%s2608_s1 + $0x70] sm:$0xff] }
  0x4f   : > { %402 = vrot.lane.b32.xlu1 %v382_v61, %s1935_s18  ;;  %v670_v61 = vrot.slane %v2153_v32, 1  ;;  %v596_v38 = vsel %vm260_vm1, %v591_v17, %v595_v19  ;;  %v1877_v17 = vld [vmem:[%s2608_s1 + $0x38] sm:$0xff]  ;;  %v314_v23 = vrot.slane %v312_v53, 1 }
  0x50   : > { %649 = vrot.lane.b32.xlu0 %v584_v7, %s1936_s19  ;;  %v671_v7 = vrot.slane %v544_v49, 1  ;;  %v1120_v49 = vrot.slane %v1118_v28, 1  ;;  %1899 = vmatpush.bf16.msra.mxu3 %v1878_v55  ;;  %v2276_v19 = vld [vmem:[%s2608_s1 + $0x78] sm:$0xff] }
  0x51   : > { %804 = vmatpush.bf16.msra.mxu0 %v1878_v55 }
  0x52   : > { %v672_v29 = vsel %vm373_vm0, %v670_v61, %v671_v7  ;;  %v1092_v61 = vor.u32 %v1091_v41, %v1087_v40  ;;  %v1121_v7 = vsel %vm260_vm1, %v1116_v47, %v1120_v49  ;;  %v1168_v41 = vrot.slane %v2178_v50, 1 }
  0x53   : > { %689 = vrot.lane.b32.xlu2 %v669_v31, %s1935_s18  ;;  %v2229_v31 = vld [vmem:[%s1974_s17 + $0x3c] sm:$0xff] }
  0x54   : > { %1900 = vmatpush.bf16.msra.mxu3 %v1877_v17 }
  0x55   : > { %805 = vmatpush.bf16.msra.mxu0 %v1877_v17  ;;  %v1125_v17 = vshll.u32 %v2319_v60, 16 }
  0x57   : > { %1140 = vrot.lane.b32.xlu1 %v1085_v25, %s1936_s19  ;;  %v1034_v25 = vpack.c.b16 %v1026_v63, %v1026_v63 }
  0x58   : > { %371 = vrot.lane.b32.xlu0 %v356_v30, %s1936_s19  ;;  %v385_v30 = vsel %vm373_vm0, %v383_v9, %v384_v10  ;;  %v598_v9 = vshrl.u32 %v2229_v31, 16 }
  0x59   : > { %v1094_v44 = vshll.u32 %v1034_v25, 16  ;;  %v1163_v46 = vrot.slane %v1034_v25, 1  ;;  %v317_v25 = vshll.u32 %v2257_v58, 16 }
  0x5b   : > { %412 = vrot.lane.b32.xlu2 %v397_v56, %s1935_s18  ;;  %v2255_v56 = vld [vmem:[%s2608_s1 + $0x80] sm:$0xff]  ;;  %v1096_v63 = vrot.slane %v1094_v44, 1  ;;  %v1164_v3 = vsel %vm373_vm0, %v1162_v45, %v1163_v46  ;;  %v319_v40 = vrot.slane %v317_v25, 1  ;;  %v1169_v44 = vrot.slane %v2191_v1, 1  ;;  %v2307_v1 = vld [vmem:[%s2608_s1 + $0x68] sm:$0xff] }
  0x5c   : > { %1290 = vmatpush.bf16.msra.mxu2 %v2255_v56  ;;  %v1099_v46 = vshrl.u32 %v2268_v14, 16  ;;  %v189_v25 = vld [vmem:[%s1974_s17 + $0x44] sm:$0x1] }
  0x5d   : > { %v1097_v26 = vsel %vm260_vm1, %v1092_v61, %v1096_v63  ;;  %v1170_v53 = vsel %vm373_vm0, %v1168_v41, %v1169_v44  ;;  %v249_v41 = vunpack.c.l.b16 %v189_v25  ;;  %v1171_v44 = vrot.slane %v2319_v60, 1 }
  0x5f   : > { %363 = vrot.lane.b32.xlu1 %v308_v52, %s1936_s19  ;;  %v2245_v52 = vpack.c.b16 %v537_v24, %v537_v24  ;;  %v1876_v24 = vld [vmem:[%s2608_s1 + $0x30] sm:$0xff] }
  0x60   : > { %1180 = vrot.lane.b32.xlu0 %v1161_v54, %s1935_s18  ;;  %v600_v54 = vshll.u32 %v2229_v31, 16  ;;  %1291 = vmatpush.bf16.msra.mxu2 %v2276_v19 }
  0x61   : > { %v605_v12 = vshll.u32 %v2245_v52, 16  ;;  %1901 = vmatpush.bf16.msra.mxu3 %v1876_v24  ;;  %806 = vmatpush.bf16.msra.mxu0 %v1876_v24 }
  0x62   : > { %v602_v10 = vrot.slane %v600_v54, 1  ;;  %v1775_v54 = vld [vmem:[%s1974_s17 + $0x74] sm:$0x1] }
  0x63   : > { %651 = vrot.lane.b32.xlu2 %v596_v38, %s1936_s19  ;;  %v607_v28 = vrot.slane %v605_v12, 1  ;;  %v315_v38 = vor.u32 %v314_v23, %v310_v20  ;;  %v1029_v61 = vunpack.c.l.b16 %v1775_v54  ;;  %v386_v12 = vrot.slane %v2232_v37, 1 }
  0x64   : > { %v603_v27 = vor.u32 %v602_v10, %v598_v9  ;;  %1292 = vmatpush.bf16.msra.mxu2 %v2294_v36  ;;  %v674_v9 = vrot.slane %v2245_v52, 1  ;;  %v1637_v10 = vld [vmem:[%s1974_s17 + $0x50] sm:$0x1] }
  0x65   : > { %1902 = vmatpush.bf16.msrb.mxu3 %v2140_v18  ;;  %v320_v55 = vsel %vm260_vm1, %v315_v38, %v319_v40  ;;  %v2315_v18 = vld [vmem:[%s2608_s1 + $0x60] sm:$0xff]  ;;  %v1037_v20 = vpack.c.b16 %v1029_v61, %v1029_v61  ;;  %v1165_v38 = vrot.slane %v2268_v14, 1  ;;  %v257_v61 = vpack.c.b16 %v249_v41, %v249_v41 }
  0x66   : > { %v608_v45 = vsel %vm260_vm1, %v603_v27, %v607_v28  ;;  %v538_v27 = vunpack.c.l.b16 %v1637_v10  ;;  %v2344_v40 = vld [vmem:[%s1974_s17 + $0x3c] sm:$0xff] }
  0x67   : > { %691 = vrot.lane.b32.xlu1 %v672_v29, %s1935_s18  ;;  %v2284_v29 = vpack.c.b16 %v1027_v15, %v1027_v15  ;;  %v387_v15 = vrot.slane %v2257_v58, 1  ;;  %v1123_v58 = vshrl.u32 %v2319_v60, 16  ;;  %v1130_v24 = vshll.u32 %v1037_v20, 16 }
  0x68   : > { %404 = vrot.lane.b32.xlu0 %v385_v30, %s1935_s18  ;;  %v1101_v30 = vshll.u32 %v2268_v14, 16  ;;  %1293 = vmatpush.bf16.msra.mxu2 %v2307_v1  ;;  %v322_v10 = vshrl.u32 %v2344_v40, 16 }
  0x69   : > { %v1106_v49 = vshll.u32 %v2284_v29, 16  ;;  %1903 = vmatpush.bf16.msrb.mxu3 %v2158_v35  ;;  %v388_v28 = vsel %vm373_vm0, %v386_v12, %v387_v15  ;;  %v1132_v54 = vrot.slane %v1130_v24, 1  ;;  %v329_v15 = vshll.u32 %v257_v61, 16 }
  0x6a   : > { %v1103_v47 = vrot.slane %v1101_v30, 1  ;;  %v1127_v30 = vrot.slane %v1125_v17, 1  ;;  %v389_v17 = vrot.slane %v2344_v40, 1 }
  0x6b   : > { %1142 = vrot.lane.b32.xlu2 %v1097_v26, %s1936_s19  ;;  %v2336_v26 = vld [vmem:[%s1974_s17 + $0x48] sm:$0xff] }
  0x6c   : > { %v1104_v63 = vor.u32 %v1103_v47, %v1099_v46  ;;  %1294 = vmatpush.bf16.msra.mxu2 %v2315_v18  ;;  %v546_v46 = vpack.c.b16 %v538_v27, %v538_v27  ;;  %v612_v47 = vshll.u32 %v2336_v26, 16 }
  0x6d   : > { %1904 = vmatpush.bf16.msrb.mxu3 %v2175_v48  ;;  %v1166_v48 = vrot.slane %v2284_v29, 1 }
  0x6e   : > { %v677_v41 = vrot.slane %v546_v46, 1 }
  0x6f   : > { %1182 = vrot.lane.b32.xlu1 %v1164_v3, %s1935_s18  ;;  %v1108_v3 = vrot.slane %v1106_v49, 1  ;;  %v1128_v49 = vor.u32 %v1127_v30, %v1123_v58 }
  0x70   : > { %1146 = vrot.lane.b32.xlu0 %v1121_v7, %s1936_s19  ;;  %v673_v7 = vrot.slane %v2229_v31, 1 }
  0x71   : > { %v1109_v23 = vsel %vm260_vm1, %v1104_v63, %v1108_v3  ;;  %1905 = vmatpush.bf16.msrb.mxu3 %v2197_v6  ;;  %v610_v63 = vshrl.u32 %v2336_v26, 16  ;;  %v614_v3 = vrot.slane %v612_v47, 1 }
  0x72   : > { %v675_v52 = vsel %vm373_vm0, %v673_v7, %v674_v9  ;;  %v617_v7 = vshll.u32 %v546_v46, 16  ;;  %v1133_v9 = vsel %vm260_vm1, %v1128_v49, %v1132_v54 }
  0x73   : > { %1186 = vrot.lane.b32.xlu2 %v1170_v53, %s1935_s18  ;;  %v1167_v53 = vsel %vm373_vm0, %v1165_v38, %v1166_v48  ;;  %v676_v48 = vrot.slane %v2336_v26, 1 }
  0x74   : > { %v619_v25 = vrot.slane %v617_v7, 1 }
  0x75   : > { %v358_v35 = vpop.permute.xlu2 %357  ;;  %1906 = vmatpush.bf16.msrb.mxu3 %v2213_v16  ;;  %v678_v54 = vsel %vm373_vm0, %v676_v48, %v677_v41 }
  0x76   : > { %v416_v16 = vsel %vm414_vm2, %v1981_v2, %v358_v35 }
  0x77   : > { %653 = vrot.lane.b32.xlu1 %v608_v45, %s1936_s19  ;;  %v1172_v45 = vrot.slane %v1037_v20, 1  ;;  %v390_v20 = vrot.slane %v257_v61, 1 }
  0x78   : > { %365 = vrot.lane.b32.xlu0 %v320_v55, %s1936_s19  ;;  %v324_v55 = vshll.u32 %v2344_v40, 16 }
  0x79   : > { %v1173_v6 = vsel %vm373_vm0, %v1171_v44, %v1172_v45  ;;  %1907 = vmatpush.bf16.msrb.mxu3 %v2242_v51  ;;  %v391_v24 = vsel %vm373_vm0, %v389_v17, %v390_v20 }
  0x7a   : > { %v326_v12 = vrot.slane %v324_v55, 1 }
  0x7b   : > { %406 = vrot.lane.b32.xlu2 %v388_v28, %s1935_s18  ;;  %v331_v28 = vrot.slane %v329_v15, 1 }
  0x7c   : > { %v327_v27 = vor.u32 %v326_v12, %v322_v10 }
  0x7d   : > { %v646_v29 = vpop.permute.xlu2 %645 }
  0x7e   : > { %v332_v35 = vsel %vm260_vm1, %v327_v27, %v331_v28  ;;  %v702_v55 = vsel %vm414_vm2, %v2003_v34, %v646_v29 }
  0x7f   : > { %1144 = vrot.lane.b32.xlu1 %v1109_v23, %s1936_s19 }
  0x80   : > { %693 = vrot.lane.b32.xlu0 %v675_v52, %s1935_s18  ;;  %v615_v52 = vor.u32 %v614_v3, %v610_v63 }
  0x82   : > { %v620_v2 = vsel %vm260_vm1, %v615_v52, %v619_v25 }
  0x83   : > { %1148 = vrot.lane.b32.xlu2 %v1133_v9, %s1936_s19 }
  0x85   : > { %v660_v30 = vpop.permute.xlu2 %659 }
  0x86   : > { %v716_v34 = vsel %vm414_vm2, %v2025_v59, %v660_v30 }
  0x87   : > { %1188 = vrot.lane.b32.xlu1 %v1173_v6, %s1935_s18 }
  0x88   : > { %1184 = vrot.lane.b32.xlu0 %v1167_v53, %s1935_s18 }
  0x89   : > { %v698_v23 = vpop.permute.xlu1 %697 }
  0x8a   : > { %v399_v58 = vpop.permute.xlu0 %398 }
  0x8b   : > { %v433_v51 = vsel %vm431_vm3, %v416_v16, %v399_v58  ;;  %367 = vrot.lane.b32.xlu2 %v332_v35, %s1936_s19 }
  0x8c   : > { %1744 = vmatmul.msk.bf16.vlgmr.msra.gmra.mxu1 %vm782_vm4, %v433_v51 }
  0x8d   : > { %v1177_v45 = vpop.permute.xlu2 %1176 }
  0x8f   : > { %408 = vrot.lane.b32.xlu1 %v391_v24, %s1935_s18 }
  0x90   : > { %655 = vrot.lane.b32.xlu0 %v620_v2, %s1936_s19  ;;  %s2479_s19 = scalar_lea.vmem %s2610_s3, %s1914_s14 }
  0x91   : > { %v1175_v38 = vpop.permute.xlu1 %1174 }
  0x92   : > { %v658_v44 = vpop.permute.xlu0 %657 }
  0x93   : > { %v714_v47 = vsel %vm414_vm2, %v1977_v0, %v658_v44  ;;  %695 = vrot.lane.b32.xlu2 %v678_v54, %s1935_s18 }
  0x94   : > { %v730_v49 = vsel %vm431_vm3, %v714_v47, %v698_v23 }
  0x95   : > { %1718 = vmatmul.msk.bf16.vlgmr.msra.gmra.mxu3 %vm782_vm4, %v730_v49  ;;  %v401_v6 = vpop.permute.xlu2 %400 }
  0x96   : > { %1908 = vmatpush.bf16.msra.mxu3 %v2218_v21 }
  0x99   : > { %v686_v53 = vpop.permute.xlu1 %685 }
  0x9a   : > { %v1135_v46 = vpop.permute.xlu0 %1134  ;;  %v718_v61 = vsel %vm431_vm3, %v702_v55, %v686_v53  ;;  %1909 = vmatpush.bf16.msra.mxu3 %v2255_v56 }
  0x9b   : > { %v1191_v0 = vsel %vm414_vm2, %v1989_v13, %v1135_v46  ;;  %1712 = vmatmul.msk.bf16.vlgmr.msra.gmra.mxu0 %vm782_vm4, %v718_v61 }
  0x9c   : > { %v1207_v63 = vsel %vm431_vm3, %v1191_v0, %v1175_v38 }
  0x9d   : > { %1844 = vmatmul.msk.bf16.vlgmr.msra.gmra.mxu2 %vm782_vm4, %v1207_v63  ;;  %v1139_v7 = vpop.permute.xlu2 %1138 }
  0x9e   : > { %1910 = vmatpush.bf16.msra.mxu3 %v2276_v19 }
  0xa1   : > { %v700_v21 = vpop.permute.xlu1 %699 }
  0xa2   : > { %v1137_v29 = vpop.permute.xlu0 %1136  ;;  %v732_v3 = vsel %vm431_vm3, %v716_v34, %v700_v21  ;;  %1911 = vmatpush.bf16.msra.mxu3 %v2294_v36 }
  0xa3   : > { %v1193_v13 = vsel %vm414_vm2, %v2009_v43, %v1137_v29 }
  0xa4   : > { %v1209_v12 = vsel %vm431_vm3, %v1193_v13, %v1177_v45 }
  0xa5   : > { %1719 = vmatmul.msk.bf16.gmra.mxu3 %vm782_vm4, %v732_v3  ;;  %v362_v19 = vpop.permute.xlu2 %361 }
  0xa6   : > { %1912 = vmatpush.bf16.msra.mxu3 %v2307_v1 }
  0xa9   : > { %v648_v56 = vpop.permute.xlu1 %647 }
  0xaa   : > { %v360_v9 = vpop.permute.xlu0 %359  ;;  %1913 = vmatpush.bf16.msra.mxu3 %v2315_v18  ;;  %v704_v43 = vsel %vm414_vm2, %v2030_v4, %v648_v56  ;;  %v420_v4 = vsel %vm414_vm2, %v2088_v22, %v362_v19 }
  0xab   : > { %v418_v59 = vsel %vm414_vm2, %v2035_v8, %v360_v9  ;;  %v1195_v8 = vsel %vm414_vm2, %v2068_v57, %v1139_v7 }
  0xac   : > { %v435_v10 = vsel %vm431_vm3, %v418_v59, %v401_v6 }
  0xad   : > { %1745 = vmatmul.msk.bf16.gmra.mxu1 %vm782_vm4, %v435_v10  ;;  %1845 = vmatmul.msk.bf16.gmra.mxu2 %vm782_vm4, %v1209_v12  ;;  %v690_v15 = vpop.permute.xlu2 %689 }
  0xb1   : > { %v370_v36 = vpop.permute.xlu1 %369 }
  0xb2   : > { %v688_v1 = vpop.permute.xlu0 %687  ;;  %v428_v17 = vsel %vm414_vm2, %v2051_v33, %v370_v36 }
  0xb3   : > { %v720_v16 = vsel %vm431_vm3, %v704_v43, %v688_v1 }
  0xb4   : > { %1713 = vmatmul.msk.bf16.gmra.mxu0 %vm782_vm4, %v720_v16 }
  0xb5   : > { %v413_v25 = vpop.permute.xlu2 %412 }
  0xb9   : > { %v1179_v18 = vpop.permute.xlu1 %1178 }
  0xba   : > { %v411_v20 = vpop.permute.xlu0 %410  ;;  %v1211_v23 = vsel %vm431_vm3, %v1195_v8, %v1179_v18  ;;  %v2498_v18 = vld [vmem:[%s2609_s2] ss:$0 sm:$0xff] }
  0xbb   : > { %v445_v52 = vsel %vm431_vm3, %v428_v17, %v411_v20 }
  0xbc   : > { %1750 = vmatmul.msk.bf16.vlgmr.msrb.gmra.mxu3 %vm782_vm4, %v445_v52 }
  0xbd   : > { %1846 = vmatmul.msk.bf16.gmra.mxu2 %vm782_vm4, %v1211_v23  ;;  %v652_v30 = vpop.permute.xlu2 %651 }
  0xbe   : > { %v708_v44 = vsel %vm414_vm2, %v2153_v32, %v652_v30 }
  0xc1   : > { %v403_v27 = vpop.permute.xlu1 %402 }
  0xc2   : > { %v650_v28 = vpop.permute.xlu0 %649  ;;  %v437_v57 = vsel %vm431_vm3, %v420_v4, %v403_v27 }
  0xc3   : > { %v706_v33 = vsel %vm414_vm2, %v2080_v11, %v650_v28  ;;  %1746 = vmatmul.msk.bf16.gmra.mxu1 %vm782_vm4, %v437_v57 }
  0xc4   : > { %v722_v58 = vsel %vm431_vm3, %v706_v33, %v690_v15 }
  0xc5   : > { %1714 = vmatmul.msk.bf16.gmra.mxu0 %vm782_vm4, %v722_v58  ;;  %v1143_v35 = vpop.permute.xlu2 %1142 }
  0xc6   : > { %v1199_v55 = vsel %vm414_vm2, %v2189_v62, %v1143_v35 }
  0xc9   : > { %v1141_v51 = vpop.permute.xlu1 %1140 }
  0xca   : > { %v372_v24 = vpop.permute.xlu0 %371  ;;  %v1197_v11 = vsel %vm414_vm2, %v2103_v39, %v1141_v51 }
  0xcb   : > { %v430_v2 = vsel %vm414_vm2, %v2106_v42, %v372_v24 }
  0xcc   : > { %v447_v22 = vsel %vm431_vm3, %v430_v2, %v413_v25 }
  0xcd   : > { %1751 = vmatmul.msk.bf16.gmra.mxu3 %vm782_vm4, %v447_v22  ;;  %v1187_v47 = vpop.permute.xlu2 %1186 }
  0xd1   : > { %v364_v38 = vpop.permute.xlu1 %363 }
  0xd2   : > { %v1181_v48 = vpop.permute.xlu0 %1180  ;;  %v422_v42 = vsel %vm414_vm2, %v2126_v5, %v364_v38 }
  0xd3   : > { %v1213_v41 = vsel %vm431_vm3, %v1197_v11, %v1181_v48 }
  0xd4   : > { %1847 = vmatmul.msk.bf16.gmra.mxu2 %vm782_vm4, %v1213_v41 }
  0xd5   : > { %v407_v5 = vpop.permute.xlu2 %406 }
  0xd9   : > { %v692_v45 = vpop.permute.xlu1 %691 }
  0xda   : > { %v405_v49 = vpop.permute.xlu0 %404  ;;  %v724_v54 = vsel %vm431_vm3, %v708_v44, %v692_v45 }
  0xdb   : > { %1715 = vmatmul.msk.bf16.gmra.mxu0 %vm782_vm4, %v724_v54  ;;  %v439_v39 = vsel %vm431_vm3, %v422_v42, %v405_v49 }
  0xdc   : > { %1747 = vmatmul.msk.bf16.gmra.mxu1 %vm782_vm4, %v439_v39 }
  0xdd   : > { %v1149_v21 = vpop.permute.xlu2 %1148 }
  0xde   : > { %v1205_v56 = vsel %vm414_vm2, %v2319_v60, %v1149_v21 }
  0xe1   : > { %v1183_v53 = vpop.permute.xlu1 %1182 }
  0xe2   : > { %v1147_v46 = vpop.permute.xlu0 %1146  ;;  %v1215_v32 = vsel %vm431_vm3, %v1199_v55, %v1183_v53 }
  0xe3   : > { %v1203_v61 = vsel %vm414_vm2, %v2178_v50, %v1147_v46 }
  0xe4   : > { %v1219_v6 = vsel %vm431_vm3, %v1203_v61, %v1187_v47  ;;  %1848 = vmatmul.msk.bf16.gmra.mxu2 %vm782_vm4, %v1215_v32 }
  0xe5   : > { %1850 = vmatmul.msk.bf16.vlgmr.msra.gmra.mxu3 %vm782_vm4, %v1219_v6  ;;  %v368_v13 = vpop.permute.xlu2 %367 }
  0xe9   : > { %v654_v0 = vpop.permute.xlu1 %653 }
  0xea   : > { %v366_v63 = vpop.permute.xlu0 %365  ;;  %v710_v50 = vsel %vm414_vm2, %v2229_v31, %v654_v0  ;;  %v426_v31 = vsel %vm414_vm2, %v2344_v40, %v368_v13 }
  0xeb   : > { %v424_v34 = vsel %vm414_vm2, %v2232_v37, %v366_v63 }
  0xec   : > { %v441_v62 = vsel %vm431_vm3, %v424_v34, %v407_v5 }
  0xed   : > { %1748 = vmatmul.msk.bf16.gmra.mxu1 %vm782_vm4, %v441_v62  ;;  %v696_v36 = vpop.permute.xlu2 %695 }
  0xf1   : > { %v1145_v29 = vpop.permute.xlu1 %1144 }
  0xf2   : > { %v694_v3 = vpop.permute.xlu0 %693  ;;  %v1201_v37 = vsel %vm414_vm2, %v2268_v14, %v1145_v29 }
  0xf3   : > { %v726_v7 = vsel %vm431_vm3, %v710_v50, %v694_v3 }
  0xf4   : > { %1716 = vmatmul.msk.bf16.gmra.mxu0 %vm782_vm4, %v726_v7 }
  0xf9   : > { %v1189_v9 = vpop.permute.xlu1 %1188 }
  0xfa   : > { %v1185_v19 = vpop.permute.xlu0 %1184  ;;  %v1221_v59 = vsel %vm431_vm3, %v1205_v56, %v1189_v9 }
  0xfb   : > { %v1217_v10 = vsel %vm431_vm3, %v1201_v37, %v1185_v19  ;;  %1851 = vmatmul.msk.bf16.gmra.mxu3 %vm782_vm4, %v1221_v59 }
  0xfc   : > { %1849 = vmatmul.msk.bf16.gmra.mxu2 %vm782_vm4, %v1217_v10 }
 0x101   : > { %v409_v12 = vpop.permute.xlu1 %408 }
 0x102   : > { %v656_v60 = vpop.permute.xlu0 %655  ;;  %v443_v43 = vsel %vm431_vm3, %v426_v31, %v409_v12 }
 0x103   : > { %v712_v14 = vsel %vm414_vm2, %v2336_v26, %v656_v60  ;;  %1749 = vmatmul.msk.bf16.gmra.mxu1 %vm782_vm4, %v443_v43  ;;  %v1937_v26 = vmov 0.0|0.0  }
 0x104   : > { %v728_v1 = vsel %vm431_vm3, %v712_v14, %v696_v36  ;;  %1495 = vst.msk [vmem:[%s2479_s19] sm:$0xf] %vm1494_vm5, %v1937_v26 }
 0x105   : > { %1717 = vmatmul.msk.bf16.gmra.mxu0 %vm782_vm4, %v728_v1  ;;  %1496 = vst.msk [vmem:[%s2479_s19 + $0x4] sm:$0xf] %vm1494_vm5, %v1937_v26 }
 0x106   : > { %1498 = vst.msk [vmem:[%s2479_s19 + $0x8] sm:$0x1] %vm1497_vm6, %v1937_v26 }
 0x107   : > { %1523 = vst.msk [vmem:[%s2479_s19 + $0x6c] sm:$0xf] %vm1494_vm5, %v1937_v26 }
 0x108   : > { %1524 = vst.msk [vmem:[%s2479_s19 + $0x70] sm:$0xf] %vm1494_vm5, %v1937_v26 }
 0x109   : > { %1525 = vst.msk [vmem:[%s2479_s19 + $0x74] sm:$0x1] %vm1497_vm6, %v1937_v26  ;;  %v909_v16 = vpop.f32.mrf.mxu1 }
 0x111   : > { %v911_v27 = vpop.f32.mrf.mxu1 }
 0x118   : > { %v808_v40 = vpop.f32.mrf.mxu0  ;;  %v2493_v15 = vpop.f32.mrf.mxu3 }
 0x119   : > { %v910_v8 = vadd.f32 %v909_v16, %v808_v40 }
 0x120   : > { %v1296_v17 = vpop.f32.mrf.mxu2  ;;  %v810_v52 = vpop.f32.mrf.mxu0 }
 0x121   : > { %v1336_v20 = vadd.f32 %v1296_v17, %v910_v8  ;;  %v2501_v25 = vpop.f32.mrf.mxu3  ;;  %v912_v57 = vadd.f32 %v911_v27, %v810_v52 }
 0x123   : > { %v1356_v23 = vadd.f32 %v2498_v18, %v1336_v20 }
 0x125   : > { %v1372_v4 = vmax.f32 %v1356_v23, 0.0 }
 0x127   : > { %v1405_v28 = vrot.slane %v1372_v4, 7 }
 0x128   : > { %v1298_v33 = vpop.f32.mrf.mxu2 }
 0x129   : > { %v1453_v58 = vsel %vm1404_vm7, 0.0, %v1405_v28  ;;  %v1337_v30 = vadd.f32 %v1298_v33, %v912_v57  ;;  %v2507_v35 = vpop.f32.mrf.mxu3 }
 0x12a   : > { %v1470_v51 = vpack.c.bf16 %v1453_v58, %v1453_v58  ;;  %v914_v22 = vpop.f32.mrf.mxu1 }
 0x12b   : > { %v1357_v24 = vadd.f32 %v2498_v18, %v1337_v30 }
 0x12c   : > { %1499 = vst.msk [vmem:[%s2479_s19 + $0xc] sm:$0xf] %vm1494_vm5, %v1470_v51 }
 0x12d   : > { %v1373_v2 = vmax.f32 %v1357_v24, 0.0 }
 0x12f   : > { %v1406_v38 = vrot.slane %v1373_v2, 7 }
 0x130   : > { %v1301_v11 = vpop.f32.mrf.mxu2 }
 0x131   : > { %v1407_v48 = vsel %vm1404_vm7, %v1405_v28, %v1406_v38  ;;  %v1461_v41 = vsel %vm1404_vm7, %v1406_v38, 0.0  ;;  %v813_v44 = vpop.f32.mrf.mxu0  ;;  %v2516_v46 = vpop.f32.mrf.mxu3 }
 0x132   : > { %v1471_v45 = vpack.c.bf16 %v1407_v48, %v1407_v48  ;;  %v1472_v47 = vpack.c.bf16 %v1461_v41, %v1461_v41  ;;  %v915_v42 = vadd.f32 %v914_v22, %v813_v44  ;;  %v916_v55 = vpop.f32.mrf.mxu1 }
 0x134   : > { %1500 = vst.msk [vmem:[%s2479_s19 + $0x10] sm:$0xf] %vm1494_vm5, %v1471_v45  ;;  %v1338_v49 = vadd.f32 %v1301_v11, %v915_v42 }
 0x135   : > { %1501 = vst.msk [vmem:[%s2479_s19 + $0x14] sm:$0x1] %vm1497_vm6, %v1472_v47 }
 0x136   : > { %v1358_v54 = vadd.f32 %v2498_v18, %v1338_v49 }
 0x138   : > { %v1374_v39 = vmax.f32 %v1358_v54, 0.0  ;;  %v1303_v53 = vpop.f32.mrf.mxu2 }
 0x139   : > { %v815_v32 = vpop.f32.mrf.mxu0 }
 0x13a   : > { %v1408_v61 = vrot.slane %v1374_v39, 7  ;;  %v917_v5 = vadd.f32 %v916_v55, %v815_v32 }
 0x13c   : > { %v1454_v6 = vsel %vm1404_vm7, 0.0, %v1408_v61  ;;  %v1339_v0 = vadd.f32 %v1303_v53, %v917_v5 }
 0x13d   : > { %v1473_v63 = vpack.c.bf16 %v1454_v6, %v1454_v6 }
 0x13e   : > { %v1359_v34 = vadd.f32 %v2498_v18, %v1339_v0 }
 0x13f   : > { %1502 = vst.msk [vmem:[%s2479_s19 + $0x18] sm:$0xf] %vm1494_vm5, %v1473_v63  ;;  %v939_v29 = vpop.f32.mrf.mxu3 }
 0x140   : > { %v1375_v62 = vmax.f32 %v1359_v34, 0.0  ;;  %v919_v21 = vpop.f32.mrf.mxu1  ;;  %v1306_v3 = vpop.f32.mrf.mxu2  ;;  %v940_v54 = vadd.f32 %v939_v29, %v2493_v15 }
 0x142   : > { %v1409_v50 = vrot.slane %v1375_v62, 7  ;;  %v818_v7 = vpop.f32.mrf.mxu0 }
 0x143   : > { %v920_v13 = vadd.f32 %v919_v21, %v818_v7 }
 0x144   : > { %v1410_v56 = vsel %vm1404_vm7, %v1408_v61, %v1409_v50  ;;  %v1462_v9 = vsel %vm1404_vm7, %v1409_v50, 0.0 }
 0x145   : > { %v1474_v37 = vpack.c.bf16 %v1410_v56, %v1410_v56  ;;  %v1475_v19 = vpack.c.bf16 %v1462_v9, %v1462_v9  ;;  %v1340_v59 = vadd.f32 %v1306_v3, %v920_v13 }
 0x147   : > { %1503 = vst.msk [vmem:[%s2479_s19 + $0x1c] sm:$0xf] %vm1494_vm5, %v1474_v37  ;;  %v1360_v10 = vadd.f32 %v2498_v18, %v1340_v59  ;;  %v941_v14 = vpop.f32.mrf.mxu3 }
 0x148   : > { %1504 = vst.msk [vmem:[%s2479_s19 + $0x20] sm:$0x1] %vm1497_vm6, %v1475_v19  ;;  %v921_v31 = vpop.f32.mrf.mxu1  ;;  %v1308_v1 = vpop.f32.mrf.mxu2  ;;  %v942_v15 = vadd.f32 %v941_v14, %v2501_v25 }
 0x149   : > { %v1376_v12 = vmax.f32 %v1360_v10, 0.0 }
 0x14a   : > { %v820_v36 = vpop.f32.mrf.mxu0 }
 0x14b   : > { %v1411_v60 = vrot.slane %v1376_v12, 7  ;;  %v922_v43 = vadd.f32 %v921_v31, %v820_v36 }
 0x14d   : > { %v1455_v26 = vsel %vm1404_vm7, 0.0, %v1411_v60  ;;  %v1341_v40 = vadd.f32 %v1308_v1, %v922_v43 }
 0x14e   : > { %v1476_v16 = vpack.c.bf16 %v1455_v26, %v1455_v26 }
 0x14f   : > { %v1361_v8 = vadd.f32 %v2498_v18, %v1341_v40 }
 0x150   : > { %1505 = vst.msk [vmem:[%s2479_s19 + $0x24] sm:$0xf] %vm1494_vm5, %v1476_v16  ;;  %v2535_v28 = vpop.f32.mrf.mxu3 }
 0x151   : > { %v1377_v17 = vmax.f32 %v1361_v8, 0.0 }
 0x153   : > { %v1412_v20 = vrot.slane %v1377_v17, 7 }
 0x155   : > { %v1413_v23 = vsel %vm1404_vm7, %v1411_v60, %v1412_v20  ;;  %v1463_v52 = vsel %vm1404_vm7, %v1412_v20, 0.0  ;;  %v945_v20 = vadd.f32 %v2535_v28, %v2507_v35 }
 0x156   : > { %v1477_v4 = vpack.c.bf16 %v1413_v23, %v1413_v23  ;;  %v1478_v27 = vpack.c.bf16 %v1463_v52, %v1463_v52 }
 0x157   : > { %v1311_v33 = vpop.f32.mrf.mxu2 }
 0x158   : > { %1506 = vst.msk [vmem:[%s2479_s19 + $0x28] sm:$0xf] %vm1494_vm5, %v1477_v4  ;;  %v823_v57 = vpop.f32.mrf.mxu0  ;;  %v2542_v2 = vpop.f32.mrf.mxu3 }
 0x159   : > { %1507 = vst.msk [vmem:[%s2479_s19 + $0x2c] sm:$0x1] %vm1497_vm6, %v1478_v27  ;;  %v924_v58 = vpop.f32.mrf.mxu1  ;;  %v947_v28 = vadd.f32 %v2542_v2, %v2516_v46 }
 0x15a   : > { %v925_v30 = vadd.f32 %v924_v58, %v823_v57 }
 0x15c   : > { %v1342_v51 = vadd.f32 %v1311_v33, %v925_v30 }
 0x15e   : > { %v1362_v24 = vadd.f32 %v2498_v18, %v1342_v51 }
 0x15f   : > { %v1313_v44 = vpop.f32.mrf.mxu2 }
 0x160   : > { %v1378_v22 = vmax.f32 %v1362_v24, 0.0  ;;  %v825_v38 = vpop.f32.mrf.mxu0 }
 0x161   : > { %v926_v11 = vpop.f32.mrf.mxu1 }
 0x162   : > { %v1414_v48 = vrot.slane %v1378_v22, 7  ;;  %v927_v41 = vadd.f32 %v926_v11, %v825_v38 }
 0x164   : > { %v1456_v45 = vsel %vm1404_vm7, 0.0, %v1414_v48  ;;  %v1343_v47 = vadd.f32 %v1313_v44, %v927_v41 }
 0x165   : > { %v1479_v42 = vpack.c.bf16 %v1456_v45, %v1456_v45 }
 0x166   : > { %v1363_v49 = vadd.f32 %v2498_v18, %v1343_v47 }
 0x167   : > { %1508 = vst.msk [vmem:[%s2479_s19 + $0x30] sm:$0xf] %vm1494_vm5, %v1479_v42  ;;  %v1316_v29 = vpop.f32.mrf.mxu2 }
 0x168   : > { %v1379_v39 = vmax.f32 %v1363_v49, 0.0  ;;  %v1326_v55 = vpop.f32.mrf.mxu3 }
 0x169   : > { %v1348_v53 = vadd.f32 %v1326_v55, %v940_v54 }
 0x16a   : > { %v1415_v32 = vrot.slane %v1379_v39, 7  ;;  %v929_v62 = vpop.f32.mrf.mxu1 }
 0x16b   : > { %v1368_v61 = vadd.f32 %v2498_v18, %v1348_v53 }
 0x16c   : > { %v1416_v5 = vsel %vm1404_vm7, %v1414_v48, %v1415_v32  ;;  %v1464_v6 = vsel %vm1404_vm7, %v1415_v32, 0.0 }
 0x16d   : > { %v1480_v0 = vpack.c.bf16 %v1416_v5, %v1416_v5  ;;  %v1481_v63 = vpack.c.bf16 %v1464_v6, %v1464_v6  ;;  %v1384_v34 = vmax.f32 %v1368_v61, 0.0 }
 0x16f   : > { %1509 = vst.msk [vmem:[%s2479_s19 + $0x34] sm:$0xf] %vm1494_vm5, %v1480_v0  ;;  %v1423_v21 = vrot.slane %v1384_v34, 7  ;;  %v1318_v14 = vpop.f32.mrf.mxu2 }
 0x170   : > { %1510 = vst.msk [vmem:[%s2479_s19 + $0x38] sm:$0x1] %vm1497_vm6, %v1481_v63  ;;  %v1328_v50 = vpop.f32.mrf.mxu3 }
 0x171   : > { %v1459_v3 = vsel %vm1404_vm7, 0.0, %v1423_v21  ;;  %v1349_v7 = vadd.f32 %v1328_v50, %v942_v15  ;;  %v828_v13 = vpop.f32.mrf.mxu0 }
 0x172   : > { %v1488_v56 = vpack.c.bf16 %v1459_v3, %v1459_v3  ;;  %v930_v9 = vadd.f32 %v929_v62, %v828_v13  ;;  %v931_v12 = vpop.f32.mrf.mxu1 }
 0x173   : > { %v1369_v37 = vadd.f32 %v2498_v18, %v1349_v7 }
 0x174   : > { %1517 = vst.msk [vmem:[%s2479_s19 + $0x54] sm:$0xf] %vm1494_vm5, %v1488_v56  ;;  %v1344_v19 = vadd.f32 %v1316_v29, %v930_v9 }
 0x175   : > { %v1385_v25 = vmax.f32 %v1369_v37, 0.0 }
 0x176   : > { %v1364_v59 = vadd.f32 %v2498_v18, %v1344_v19 }
 0x177   : > { %v1424_v10 = vrot.slane %v1385_v25, 7 }
 0x178   : > { %v1380_v31 = vmax.f32 %v1364_v59, 0.0 }
 0x179   : > { %v1425_v36 = vsel %vm1404_vm7, %v1423_v21, %v1424_v10  ;;  %v1467_v60 = vsel %vm1404_vm7, %v1424_v10, 0.0  ;;  %v830_v43 = vpop.f32.mrf.mxu0 }
 0x17a   : > { %v1489_v1 = vpack.c.bf16 %v1425_v36, %v1425_v36  ;;  %v1490_v26 = vpack.c.bf16 %v1467_v60, %v1467_v60  ;;  %v1417_v40 = vrot.slane %v1380_v31, 7  ;;  %v932_v16 = vadd.f32 %v931_v12, %v830_v43 }
 0x17c   : > { %1518 = vst.msk [vmem:[%s2479_s19 + $0x58] sm:$0xf] %vm1494_vm5, %v1489_v1  ;;  %v1457_v8 = vsel %vm1404_vm7, 0.0, %v1417_v40  ;;  %v1345_v17 = vadd.f32 %v1318_v14, %v932_v16 }
 0x17d   : > { %1519 = vst.msk [vmem:[%s2479_s19 + $0x5c] sm:$0x1] %vm1497_vm6, %v1490_v26  ;;  %v1482_v23 = vpack.c.bf16 %v1457_v8, %v1457_v8 }
 0x17e   : > { %v1365_v52 = vadd.f32 %v2498_v18, %v1345_v17  ;;  %v1331_v4 = vpop.f32.mrf.mxu3 }
 0x17f   : > { %1511 = vst.msk [vmem:[%s2479_s19 + $0x3c] sm:$0xf] %vm1494_vm5, %v1482_v23  ;;  %v1350_v27 = vadd.f32 %v1331_v4, %v945_v20  ;;  %v1321_v51 = vpop.f32.mrf.mxu2 }
 0x180   : > { %v1381_v57 = vmax.f32 %v1365_v52, 0.0  ;;  %v934_v33 = vpop.f32.mrf.mxu1 }
 0x181   : > { %v1370_v58 = vadd.f32 %v2498_v18, %v1350_v27 }
 0x182   : > { %v1418_v30 = vrot.slane %v1381_v57, 7  ;;  %v833_v24 = vpop.f32.mrf.mxu0 }
 0x183   : > { %v1386_v22 = vmax.f32 %v1370_v58, 0.0  ;;  %v935_v35 = vadd.f32 %v934_v33, %v833_v24 }
 0x184   : > { %v1419_v38 = vsel %vm1404_vm7, %v1417_v40, %v1418_v30  ;;  %v1465_v11 = vsel %vm1404_vm7, %v1418_v30, 0.0 }
 0x185   : > { %v1483_v48 = vpack.c.bf16 %v1419_v38, %v1419_v38  ;;  %v1484_v41 = vpack.c.bf16 %v1465_v11, %v1465_v11  ;;  %v1426_v44 = vrot.slane %v1386_v22, 7  ;;  %v1346_v45 = vadd.f32 %v1321_v51, %v935_v35 }
 0x186   : > { %v1333_v47 = vpop.f32.mrf.mxu3 }
 0x187   : > { %1512 = vst.msk [vmem:[%s2479_s19 + $0x40] sm:$0xf] %vm1494_vm5, %v1483_v48  ;;  %v1460_v42 = vsel %vm1404_vm7, 0.0, %v1426_v44  ;;  %v1366_v49 = vadd.f32 %v2498_v18, %v1346_v45  ;;  %v1351_v54 = vadd.f32 %v1333_v47, %v947_v28  ;;  %v1323_v6 = vpop.f32.mrf.mxu2 }
 0x188   : > { %1513 = vst.msk [vmem:[%s2479_s19 + $0x44] sm:$0x1] %vm1497_vm6, %v1484_v41  ;;  %v1491_v46 = vpack.c.bf16 %v1460_v42, %v1460_v42  ;;  %v936_v2 = vpop.f32.mrf.mxu1 }
 0x189   : > { %v1382_v39 = vmax.f32 %v1366_v49, 0.0  ;;  %v1371_v55 = vadd.f32 %v2498_v18, %v1351_v54 }
 0x18a   : > { %1520 = vst.msk [vmem:[%s2479_s19 + $0x60] sm:$0xf] %vm1494_vm5, %v1491_v46  ;;  %v835_v53 = vpop.f32.mrf.mxu0 }
 0x18b   : > { %v1420_v32 = vrot.slane %v1382_v39, 7  ;;  %v1387_v61 = vmax.f32 %v1371_v55, 0.0  ;;  %v937_v5 = vadd.f32 %v936_v2, %v835_v53 }
 0x18d   : > { %v1458_v0 = vsel %vm1404_vm7, 0.0, %v1420_v32  ;;  %v1427_v63 = vrot.slane %v1387_v61, 7  ;;  %v1347_v34 = vadd.f32 %v1323_v6, %v937_v5 }
 0x18e   : > { %v1485_v62 = vpack.c.bf16 %v1458_v0, %v1458_v0 }
 0x18f   : > { %v1428_v15 = vsel %vm1404_vm7, %v1426_v44, %v1427_v63  ;;  %v1468_v21 = vsel %vm1404_vm7, %v1427_v63, 0.0  ;;  %v1367_v29 = vadd.f32 %v2498_v18, %v1347_v34 }
 0x190   : > { %1514 = vst.msk [vmem:[%s2479_s19 + $0x48] sm:$0xf] %vm1494_vm5, %v1485_v62  ;;  %v1492_v50 = vpack.c.bf16 %v1428_v15, %v1428_v15  ;;  %v1493_v3 = vpack.c.bf16 %v1468_v21, %v1468_v21 }
 0x191   : > { %v1383_v7 = vmax.f32 %v1367_v29, 0.0 }
 0x192   : > { %1521 = vst.msk [vmem:[%s2479_s19 + $0x64] sm:$0xf] %vm1494_vm5, %v1492_v50 }
 0x193   : > { %1522 = vst.msk [vmem:[%s2479_s19 + $0x68] sm:$0x1] %vm1497_vm6, %v1493_v3  ;;  %v1421_v13 = vrot.slane %v1383_v7, 7 }
 0x195   : > { %v1422_v56 = vsel %vm1404_vm7, %v1420_v32, %v1421_v13  ;;  %v1466_v9 = vsel %vm1404_vm7, %v1421_v13, 0.0 }
 0x196   : > { %v1486_v37 = vpack.c.bf16 %v1422_v56, %v1422_v56  ;;  %v1487_v19 = vpack.c.bf16 %v1466_v9, %v1466_v9 }
 0x198   : > { %1515 = vst.msk [vmem:[%s2479_s19 + $0x4c] sm:$0xf] %vm1494_vm5, %v1486_v37 }
 0x199   : > { %1516 = vst.msk [vmem:[%s2479_s19 + $0x50] sm:$0x1] %vm1497_vm6, %v1487_v19 }
 0x19a PF: > { %s13_s12 = sadd.s32 1, %s1933_s12  }
 0x19b   : > { %p10_p4 = scmp.ge.s32.totalorder %s13_s12, 4  }
 0x19d   :  { %12 = sbr.rel (!%p10_p4) target bundleno = 1 (0x1), region = 66 }

// kernel: _lambda_.13
= control target key start
LH: loop header
LB: loop body
LE: loop exit
PB: predicated region body
PF: predicated region fallthrough
CT: control target
= control target key end

     0   :  { %s222_s6 = smov 0   ;;  %s239_s0 = inlined_call_operand.vmem [shape: bf16[2,1,2,8,256], index: 0, kind: input, shape index: {}]   ;;  %s240_s1 = inlined_call_operand.vmem [shape: bf16[2,1,8,128], index: 1, kind: output, shape index: {}]  }
   0x1 LB: > { %s185_s7 = sadd.s32 4294967295, %s210_s6   ;;  %p189_p0 = scmp.ge.s32.totalorder %s210_s6, 1  ;;  %s210_s6 = sphi %s222_s6, %s11_s6  }
   0x2   : > { %p87_p1 = scmp.lt.s32.totalorder %s210_s6, 3 }
   0x4   : > { %p88_p2 = pnand %p189_p0, %p87_p1 }
   0x5   : > { %p106_p3 = scmp.lt.s32.totalorder (!%p88_p2), %s185_s7, 1 }
   0x6   : > { %91 = sbr.rel (%p88_p2) target bundleno = 30 (0x1e), region = 24 }
   0xb   : > { %s242_s7 = smov (!%p106_p3, %s185_s7), 1 }
   0xc   : > { %s195_s8 = sshll.u32 %s242_s7, 4  ;;  %s192_s12 = sshll.u32 %s242_s7, 2 }
   0xd   : > { %s110_s11 = scalar_lea.vmem %s239_s0, %s195_s8  ;;  %s114_s15 = scalar_lea.vmem %s240_s1, %s192_s12 }
   0xe   : > { %v115_v0 = vld [vmem:[%s110_s11] sm:$0xff]  ;;  %v116_v1 = vld [vmem:[%s110_s11 + $0x8] sm:$0xff] }
   0xf   : > { %v117_v2 = vunpack.c.l.bf16 %v115_v0  ;;  %v118_v3 = vunpack.c.h.bf16 %v115_v0  ;;  %v119_v4 = vunpack.c.l.bf16 %v116_v1  ;;  %v120_v5 = vunpack.c.h.bf16 %v116_v1 }
  0x11   : > { %v121_v6 = vmax.f32 %v117_v2, %v119_v4  ;;  %v122_v7 = vmax.f32 %v118_v3, %v120_v5 }
  0x13   : > { %v123_v8 = vpack.c.bf16 %v122_v7, %v121_v6 }
  0x15   : > { %v126_v9 = vrot.slane %v123_v8, 4 }
  0x17   : > { %v128_v10 = vunpack.c.l.bf16 %v126_v9 }
  0x19   : > { %v129_v11 = vmax.f32 %v121_v6, %v128_v10 }
  0x1b   : > { %v130_v12 = vpack.c.bf16 %v129_v11, %v129_v11 }
  0x1d   : > { %131 = vst [vmem:[%s114_s15] sm:$0xf] %v130_v12 }
  0x1e PF: > { %s11_s6 = sadd.s32 1, %s210_s6  }
  0x1f   : > { %p8_p4 = scmp.ge.s32.totalorder %s11_s6, 4  }
  0x21   :  { %10 = sbr.rel (!%p8_p4) target bundleno = 1 (0x1), region = 54 }

</bundles_post_ra>
